<compile_context>
chip_gen: v7x
topology: tpu7x:2x2x1
jax: 0.10.0
libtpu: 0.0.40
codegen_flags: <defaults>
</compile_context>

<pallas_src>
import functools
import math

import jax
import jax.numpy as jnp
from jax.experimental import pallas as pl
from jax.experimental.pallas import tpu as pltpu

# ---- hyper-params implied by nn.Transformer(nhead=16, num_encoder_layers=12) ----
D_MODEL = 512
NHEAD = 16
HEAD_DIM = D_MODEL // NHEAD       # 32
DIM_FF = 2048
NUM_ENC = 12
NUM_DEC = 6                       # nn.Transformer default
EPS = 1e-5
N_OUT = 2001                      # out_features of layer_linear1
N_OUT_PAD = 2048                  # lane-dense padded width for the final matmul
# TODO(synk): reference Linear(2001*2, 2001) has in_features=4002, which cannot
#             follow a d_model=512 transformer output; in_features=512 used here.

_VMEM_LIMIT = 48 * 1024 * 1024    # fits v7x's 64 MiB physical VMEM with headroom


def _row_tile(m):
    for t in (512, 256, 128, 64, 32, 16, 8):
        if m % t == 0:
            return t
    return m


def _col_tile(n):
    for t in (512, 256, 128):
        if n % t == 0:
            return t
    return n


# ================================ Pallas kernels ================================

def _linear_kernel(x_ref, w_ref, b_ref, o_ref, *, relu):
    acc = jnp.dot(x_ref[...], w_ref[...], preferred_element_type=jnp.float32)
    acc = acc + b_ref[...]
    if relu:
        acc = jnp.maximum(acc, 0.0)
    o_ref[...] = acc.astype(o_ref.dtype)


def linear(x2d, w, b, *, relu=False, out_dtype=jnp.bfloat16):
    """x2d: (M, K) bf16; w: (K, N) bf16 (pre-transposed); b: (N,) f32 -> (M, N)."""
    m, k = x2d.shape
    n = w.shape[1]
    tm, tn = _row_tile(m), _col_tile(n)
    kern = functools.partial(_linear_kernel, relu=relu)
    return pl.pallas_call(
        kern,
        out_shape=jax.ShapeDtypeStruct((m, n), out_dtype),
        grid=(m // tm, n // tn),
        in_specs=[pl.BlockSpec((tm, k), lambda i, j: (i, 0)),
                  pl.BlockSpec((k, tn), lambda i, j: (0, j)),
                  pl.BlockSpec((1, tn), lambda i, j: (0, j))],
        out_specs=pl.BlockSpec((tm, tn), lambda i, j: (i, j)),
        compiler_params=pltpu.CompilerParams(
            dimension_semantics=("parallel", "parallel"),
            vmem_limit_bytes=_VMEM_LIMIT),
    )(x2d, w, b.reshape(1, n))


def _attn_kernel(q_ref, k_ref, v_ref, o_ref, *, scale):
    q = q_ref[0]                                    # (H, Sq, Dh) bf16
    k = k_ref[0]                                    # (H, Sk, Dh) bf16
    v = v_ref[0]                                    # (H, Sk, Dh) bf16
    s = jnp.einsum('hqd,hkd->hqk', q, k,
                   preferred_element_type=jnp.float32) * scale
    m = jnp.max(s, axis=-1, keepdims=True)
    p = jnp.exp(s - m)
    denom = jnp.sum(p, axis=-1, keepdims=True)
    p = p * pl.reciprocal(denom, approx=True)
    o = jnp.einsum('hqk,hkd->hqd', p.astype(v.dtype), v,
                   preferred_element_type=jnp.float32)
    o_ref[0] = o.astype(o_ref.dtype)


def attention(qh, kh, vh):
    """qh: (B, H, Sq, Dh); kh, vh: (B, H, Sk, Dh) -> (B, H, Sq, Dh).

    All heads of one batch element are processed per grid step (batched
    dot_general on the MXU; no k.T transpose, no per-head launch overhead).
    """
    b, h, sq, dh = qh.shape
    sk = kh.shape[2]
    kern = functools.partial(_attn_kernel, scale=1.0 / math.sqrt(dh))
    return pl.pallas_call(
        kern,
        out_shape=jax.ShapeDtypeStruct((b, h, sq, dh), jnp.bfloat16),
        grid=(b,),
        in_specs=[pl.BlockSpec((1, h, sq, dh), lambda i: (i, 0, 0, 0)),
                  pl.BlockSpec((1, h, sk, dh), lambda i: (i, 0, 0, 0)),
                  pl.BlockSpec((1, h, sk, dh), lambda i: (i, 0, 0, 0))],
        out_specs=pl.BlockSpec((1, h, sq, dh), lambda i: (i, 0, 0, 0)),
        compiler_params=pltpu.CompilerParams(
            dimension_semantics=("parallel",),
            vmem_limit_bytes=_VMEM_LIMIT),
    )(qh, kh, vh)


def _ln_math(z, g, b, eps):
    mu = jnp.mean(z, axis=-1, keepdims=True)
    var = jnp.mean(jnp.square(z - mu), axis=-1, keepdims=True)
    zn = (z - mu) * jax.lax.rsqrt(var + eps)
    return zn * g + b


def _add_ln_kernel(x_ref, y_ref, g_ref, b_ref, o_ref, *, eps):
    z = x_ref[...].astype(jnp.float32) + y_ref[...].astype(jnp.float32)
    o_ref[...] = _ln_math(z, g_ref[...], b_ref[...], eps).astype(o_ref.dtype)


def _ln_kernel(x_ref, g_ref, b_ref, o_ref, *, eps):
    z = x_ref[...].astype(jnp.float32)
    o_ref[...] = _ln_math(z, g_ref[...], b_ref[...], eps).astype(o_ref.dtype)


def add_layernorm(x2d, y2d, gamma, beta):
    m, e = x2d.shape
    tm = _row_tile(m)
    kern = functools.partial(_add_ln_kernel, eps=EPS)
    return pl.pallas_call(
        kern,
        out_shape=jax.ShapeDtypeStruct((m, e), jnp.bfloat16),
        grid=(m // tm,),
        in_specs=[pl.BlockSpec((tm, e), lambda i: (i, 0)),
                  pl.BlockSpec((tm, e), lambda i: (i, 0)),
                  pl.BlockSpec((1, e), lambda i: (0, 0)),
                  pl.BlockSpec((1, e), lambda i: (0, 0))],
        out_specs=pl.BlockSpec((tm, e), lambda i: (i, 0)),
        compiler_params=pltpu.CompilerParams(dimension_semantics=("parallel",)),
    )(x2d, y2d, gamma.reshape(1, e), beta.reshape(1, e))


def layernorm(x2d, gamma, beta):
    """Plain LayerNorm (no residual) -- avoids streaming a zero slab from HBM."""
    m, e = x2d.shape
    tm = _row_tile(m)
    kern = functools.partial(_ln_kernel, eps=EPS)
    return pl.pallas_call(
        kern,
        out_shape=jax.ShapeDtypeStruct((m, e), jnp.bfloat16),
        grid=(m // tm,),
        in_specs=[pl.BlockSpec((tm, e), lambda i: (i, 0)),
                  pl.BlockSpec((1, e), lambda i: (0, 0)),
                  pl.BlockSpec((1, e), lambda i: (0, 0))],
        out_specs=pl.BlockSpec((tm, e), lambda i: (i, 0)),
        compiler_params=pltpu.CompilerParams(dimension_semantics=("parallel",)),
    )(x2d, gamma.reshape(1, e), beta.reshape(1, e))


def _ffn_kernel(x_ref, w1_ref, b1_ref, w2_ref, b2_ref, g_ref, b_ref, o_ref, *, eps):
    x = x_ref[...]                                                     # (tm, E) bf16
    h = jnp.dot(x, w1_ref[...], preferred_element_type=jnp.float32) + b1_ref[...]
    h = jnp.maximum(h, 0.0).astype(jnp.bfloat16)                       # stays in VMEM
    y = jnp.dot(h, w2_ref[...], preferred_element_type=jnp.float32) + b2_ref[...]
    z = x.astype(jnp.float32) + y                                      # residual
    o_ref[...] = _ln_math(z, g_ref[...], b_ref[...], eps).astype(o_ref.dtype)


def ffn_add_layernorm(x2d, w1, b1, w2, b2, gamma, beta):
    """Fused Linear(E->F)+ReLU+Linear(F->E)+residual+LayerNorm over row tiles."""
    m, e = x2d.shape
    f = w1.shape[1]
    tm = _row_tile(m)
    kern = functools.partial(_ffn_kernel, eps=EPS)
    return pl.pallas_call(
        kern,
        out_shape=jax.ShapeDtypeStruct((m, e), jnp.bfloat16),
        grid=(m // tm,),
        in_specs=[pl.BlockSpec((tm, e), lambda i: (i, 0)),
                  pl.BlockSpec((e, f), lambda i: (0, 0)),
                  pl.BlockSpec((1, f), lambda i: (0, 0)),
                  pl.BlockSpec((f, e), lambda i: (0, 0)),
                  pl.BlockSpec((1, e), lambda i: (0, 0)),
                  pl.BlockSpec((1, e), lambda i: (0, 0)),
                  pl.BlockSpec((1, e), lambda i: (0, 0))],
        out_specs=pl.BlockSpec((tm, e), lambda i: (i, 0)),
        compiler_params=pltpu.CompilerParams(
            dimension_semantics=("parallel",),
            vmem_limit_bytes=_VMEM_LIMIT),
    )(x2d, w1, b1.reshape(1, f), w2, b2.reshape(1, e),
      gamma.reshape(1, e), beta.reshape(1, e))


# ================================ model glue (under one jit) =====================

def mha(q_in, kv_in, p, *, self_attn):
    """Multi-head attention, nn.MultiheadAttention semantics (eval). Returns 2-D."""
    sq, n, e = q_in.shape
    sk = kv_in.shape[0]
    if self_attn:
        # fused Q/K/V projection: one (M,512) x (512,1536) matmul
        qkv = linear(q_in.reshape(sq * n, e), p["in_proj_w"], p["in_proj_b"])
        q, k, v = qkv[:, :e], qkv[:, e:2 * e], qkv[:, 2 * e:]
    else:
        q = linear(q_in.reshape(sq * n, e), p["in_proj_w"][:, :e], p["in_proj_b"][:e])
        kv = linear(kv_in.reshape(sk * n, e), p["in_proj_w"][:, e:], p["in_proj_b"][e:])
        k, v = kv[:, :e], kv[:, e:]
    # TODO(synk): head split/merge is an XLA relayout; head_dim=32 < 128 lanes
    #             prevents folding it into the BlockSpec cleanly.
    qh = q.reshape(sq, n, NHEAD, HEAD_DIM).transpose(1, 2, 0, 3)   # (N, H, Sq, Dh)
    kh = k.reshape(sk, n, NHEAD, HEAD_DIM).transpose(1, 2, 0, 3)
    vh = v.reshape(sk, n, NHEAD, HEAD_DIM).transpose(1, 2, 0, 3)
    oh = attention(qh, kh, vh)                                     # (N, H, Sq, Dh)
    o = oh.transpose(2, 0, 1, 3).reshape(sq * n, e)
    return linear(o, p["out_proj_w"], p["out_proj_b"])             # (Sq*N, E)


def encoder_layer(x, p):
    s, n, e = x.shape
    x2d = x.reshape(s * n, e)
    a = mha(x, x, p["self_attn"], self_attn=True)
    x2 = add_layernorm(x2d, a, p["ln1_g"], p["ln1_b"])
    x3 = ffn_add_layernorm(x2, p["lin1_w"], p["lin1_b"], p["lin2_w"], p["lin2_b"],
                           p["ln2_g"], p["ln2_b"])
    return x3.reshape(s, n, e)


def decoder_layer(x, memory, p):
    # TODO(synk): no causal mask -- nn.Transformer does not add one automatically,
    #             matching the reference call Transformer(src=out, tgt=out).
    s, n, e = x.shape
    x2d = x.reshape(s * n, e)
    a = mha(x, x, p["self_attn"], self_attn=True)
    x2 = add_layernorm(x2d, a, p["ln1_g"], p["ln1_b"])
    a2 = mha(x2.reshape(s, n, e), memory, p["cross_attn"], self_attn=False)
    x3 = add_layernorm(x2, a2, p["ln2_g"], p["ln2_b"])
    x4 = ffn_add_layernorm(x3, p["lin1_w"], p["lin1_b"], p["lin2_w"], p["lin2_b"],
                           p["ln3_g"], p["ln3_b"])
    return x4.reshape(s, n, e)


@jax.jit
def transformer_forward(x, params):
    """x: (S, N, D_MODEL) f32 -> (S, N, N_OUT) f32."""
    s, n, e = x.shape
    # out = x.permute(0, 1, 2) -> identity
    xb = x.astype(jnp.bfloat16)

    def enc_step(h, lp):
        return encoder_layer(h, lp), None

    mem, _ = jax.lax.scan(enc_step, xb, params["enc_layers"])
    mem = layernorm(mem.reshape(s * n, e),
                    params["enc_norm_g"], params["enc_norm_b"]).reshape(s, n, e)

    # TODO(synk): reference does `out, h0 = self.rnn1(out)` (single-arg call +
    #             tuple unpack of one tensor); interpreted as src=tgt=x, no unpack.
    def dec_step(h, lp):
        return decoder_layer(h, mem, lp), None

    out, _ = jax.lax.scan(dec_step, xb, params["dec_layers"])
    out2d = layernorm(out.reshape(s * n, e),
                      params["dec_norm_g"], params["dec_norm_b"])

    # layer_linear1 (bias=False): lane-dense 2048-wide matmul, sliced to 2001.
    y = linear(out2d, params["final_w"], params["final_b"], out_dtype=jnp.float32)
    return y[:, :N_OUT].reshape(s, n, N_OUT)


# ================================ deterministic params ==========================

def init_params(key):
    keys = iter(jax.random.split(key, 256))

    def w(shape, scale=0.02):
        # stored pre-transposed as (in, out), bf16 for the MXU
        v = scale * jax.random.normal(next(keys), shape, dtype=jnp.float32)
        return v.astype(jnp.bfloat16)

    def zeros(shape):
        return jnp.zeros(shape, jnp.float32)

    def ones(shape):
        return jnp.ones(shape, jnp.float32)

    def attn_params():
        return dict(in_proj_w=w((D_MODEL, 3 * D_MODEL)),
                    in_proj_b=zeros((3 * D_MODEL,)),
                    out_proj_w=w((D_MODEL, D_MODEL)),
                    out_proj_b=zeros((D_MODEL,)))

    def enc_layer_params():
        return dict(self_attn=attn_params(),
                    lin1_w=w((D_MODEL, DIM_FF)), lin1_b=zeros((DIM_FF,)),
                    lin2_w=w((DIM_FF, D_MODEL)), lin2_b=zeros((D_MODEL,)),
                    ln1_g=ones((D_MODEL,)), ln1_b=zeros((D_MODEL,)),
                    ln2_g=ones((D_MODEL,)), ln2_b=zeros((D_MODEL,)))

    def dec_layer_params():
        d = enc_layer_params()
        d["cross_attn"] = attn_params()
        d["ln3_g"] = ones((D_MODEL,))
        d["ln3_b"] = zeros((D_MODEL,))
        return d

    enc_layers = [enc_layer_params() for _ in range(NUM_ENC)]
    dec_layers = [dec_layer_params() for _ in range(NUM_DEC)]
    # stack layers along a leading axis so the forward can lax.scan over them
    enc_stacked = jax.tree_util.tree_map(lambda *xs: jnp.stack(xs), *enc_layers)
    dec_stacked = jax.tree_util.tree_map(lambda *xs: jnp.stack(xs), *dec_layers)

    final_w = w((D_MODEL, N_OUT))
    final_w = jnp.pad(final_w, ((0, 0), (0, N_OUT_PAD - N_OUT)))   # lane-dense pad

    return dict(
        enc_layers=enc_stacked,
        dec_layers=dec_stacked,
        enc_norm_g=ones((D_MODEL,)), enc_norm_b=zeros((D_MODEL,)),
        dec_norm_g=ones((D_MODEL,)), dec_norm_b=zeros((D_MODEL,)),
        final_w=final_w,
        final_b=zeros((N_OUT_PAD,)),        # reference has bias=False; zeros
    )


if __name__ == "__main__":
    root = jax.random.PRNGKey(0)
    pkey, xkey = jax.random.split(root)
    params = init_params(pkey)

    S, N = 8, 2                              # small seq / batch for demo
    x = jax.random.normal(xkey, (S, N, D_MODEL), dtype=jnp.float32)

    out = transformer_forward(x, params)
    out = jax.block_until_ready(out)

    assert out.shape == (S, N, N_OUT), out.shape
    assert bool(jnp.all(jnp.isfinite(out)))
    print("KERNEL_OK")
</pallas_src>

<mosaic_0001>
module attributes {stable_mosaic.version = 11 : i64} {
  func.func @_linear_kernel(%arg0: i32, %arg1: i32, %arg2: memref<16x512xbf16, #tpu.memory_space<vmem>>, %arg3: memref<512x512xbf16, #tpu.memory_space<vmem>>, %arg4: memref<1x512xf32, #tpu.memory_space<vmem>>, %arg5: memref<16x512xbf16, #tpu.memory_space<vmem>>) attributes {dimension_semantics = [#tpu.dimension_semantics<parallel>, #tpu.dimension_semantics<parallel>], iteration_bounds = array<i64: 1, 3>, scalar_prefetch = 0 : i64, scratch_operands = 0 : i64, tpu.core_type = #tpu.core_type<tc>, window_params = [{transform_indices = @transform_0, window_bounds = array<i64: 16, 512>}, {transform_indices = @transform_1, window_bounds = array<i64: 512, 512>}, {transform_indices = @transform_2, window_bounds = array<i64: 1, 512>}, {transform_indices = @transform_3, window_bounds = array<i64: 16, 512>}]} {
    %c0 = arith.constant 0 : index
    %c0_0 = arith.constant 0 : index
    %0 = vector.load %arg2[%c0, %c0_0] : memref<16x512xbf16, #tpu.memory_space<vmem>>, vector<16x512xbf16>
    %c0_1 = arith.constant 0 : index
    %c0_2 = arith.constant 0 : index
    %1 = vector.load %arg3[%c0_1, %c0_2] : memref<512x512xbf16, #tpu.memory_space<vmem>>, vector<512x512xbf16>
    %cst = arith.constant dense<0.000000e+00> : vector<16x512xf32>
    %2 = tpu.matmul %0, %1, %cst {dimension_numbers = #tpu.dot_dimension_numbers<[1], [0], [0], [1], [0, 0, 1, 1], [], []>} : vector<16x512xbf16>, vector<512x512xbf16>, vector<16x512xf32> -> vector<16x512xf32>
    %c0_3 = arith.constant 0 : index
    %c0_4 = arith.constant 0 : index
    %3 = vector.load %arg4[%c0_3, %c0_4] : memref<1x512xf32, #tpu.memory_space<vmem>>, vector<1x512xf32>
    %4 = vector.broadcast %3 : vector<1x512xf32> to vector<16x512xf32>
    %5 = arith.addf %2, %4 : vector<16x512xf32>
    %6 = arith.truncf %5 : vector<16x512xf32> to vector<16x512xbf16>
    %c0_5 = arith.constant 0 : index
    %c0_6 = arith.constant 0 : index
    %7 = vector.load %arg5[%c0_5, %c0_6] : memref<16x512xbf16, #tpu.memory_space<vmem>>, vector<16x512xbf16>
    tpu.vector_store %arg5[%c0_5, %c0_6], %6 {strides = array<i32>} : memref<16x512xbf16, #tpu.memory_space<vmem>>, vector<16x512xbf16>,
    return
  }
  func.func @transform_0(%arg0: i32, %arg1: i32) -> (i32, i32) {
    %c0_i32 = arith.constant 0 : i32
    %c0_i32_0 = arith.constant 0 : i32
    return %arg0, %c0_i32 : i32, i32
  }
  func.func @transform_1(%arg0: i32, %arg1: i32) -> (i32, i32) {
    %c0_i32 = arith.constant 0 : i32
    %c0_i32_0 = arith.constant 0 : i32
    return %c0_i32, %arg1 : i32, i32
  }
  func.func @transform_2(%arg0: i32, %arg1: i32) -> (i32, i32) {
    %c0_i32 = arith.constant 0 : i32
    %c0_i32_0 = arith.constant 0 : i32
    return %c0_i32, %arg1 : i32, i32
  }
  func.func @transform_3(%arg0: i32, %arg1: i32) -> (i32, i32) {
    %c0_i32 = arith.constant 0 : i32
    return %arg0, %arg1 : i32, i32
  }
}

module attributes {stable_mosaic.version = 11 : i64} {
  func.func @_attn_kernel(%arg0: i32, %arg1: memref<1x16x8x32xbf16, #tpu.memory_space<vmem>>, %arg2: memref<1x16x8x32xbf16, #tpu.memory_space<vmem>>, %arg3: memref<1x16x8x32xbf16, #tpu.memory_space<vmem>>, %arg4: memref<1x16x8x32xbf16, #tpu.memory_space<vmem>>) attributes {dimension_semantics = [#tpu.dimension_semantics<parallel>], iteration_bounds = array<i64: 2>, scalar_prefetch = 0 : i64, scratch_operands = 0 : i64, tpu.core_type = #tpu.core_type<tc>, window_params = [{transform_indices = @transform_0, window_bounds = array<i64: 1, 16, 8, 32>}, {transform_indices = @transform_1, window_bounds = array<i64: 1, 16, 8, 32>}, {transform_indices = @transform_2, window_bounds = array<i64: 1, 16, 8, 32>}, {transform_indices = @transform_3, window_bounds = array<i64: 1, 16, 8, 32>}]} {
    %c0 = arith.constant 0 : index
    %c0_0 = arith.constant 0 : index
    %c0_1 = arith.constant 0 : index
    %c0_2 = arith.constant 0 : index
    %0 = vector.load %arg1[%c0, %c0_0, %c0_1, %c0_2] : memref<1x16x8x32xbf16, #tpu.memory_space<vmem>>, vector<1x16x8x32xbf16>
    %1 = vector.shape_cast %0 : vector<1x16x8x32xbf16> to vector<16x8x32xbf16>
    %c0_3 = arith.constant 0 : index
    %c0_4 = arith.constant 0 : index
    %c0_5 = arith.constant 0 : index
    %c0_6 = arith.constant 0 : index
    %2 = vector.load %arg2[%c0_3, %c0_4, %c0_5, %c0_6] : memref<1x16x8x32xbf16, #tpu.memory_space<vmem>>, vector<1x16x8x32xbf16>
    %3 = vector.shape_cast %2 : vector<1x16x8x32xbf16> to vector<16x8x32xbf16>
    %c0_7 = arith.constant 0 : index
    %c0_8 = arith.constant 0 : index
    %c0_9 = arith.constant 0 : index
    %c0_10 = arith.constant 0 : index
    %4 = vector.load %arg3[%c0_7, %c0_8, %c0_9, %c0_10] : memref<1x16x8x32xbf16, #tpu.memory_space<vmem>>, vector<1x16x8x32xbf16>
    %5 = vector.shape_cast %4 : vector<1x16x8x32xbf16> to vector<16x8x32xbf16>
    "tpu.trace_start"() <{level = 10 : i32, message = "hqd,hkd->hqk"}> : () -> ()
    %cst = arith.constant dense<0.000000e+00> : vector<16x8x8xf32>
    %6 = tpu.matmul %1, %3, %cst {dimension_numbers = #tpu.dot_dimension_numbers<[2], [2], [1], [1], [0, 0, 0, 1, 1, 1], [0], [0]>} : vector<16x8x32xbf16>, vector<16x8x32xbf16>, vector<16x8x8xf32> -> vector<16x8x8xf32>
    "tpu.trace_stop"() : () -> ()
    %cst_11 = arith.constant 0.176776692 : f32
    %7 = vector.broadcast %cst_11 : f32 to vector<16x8x8xf32>
    %8 = arith.mulf %6, %7 : vector<16x8x8xf32>
    %cst_12 = arith.constant dense<0xFF800000> : vector<16x8xf32>
    %9 = vector.multi_reduction <maximumf>, %8, %cst_12 [2] : vector<16x8x8xf32> to vector<16x8xf32>
    %10 = vector.shape_cast %9 : vector<16x8xf32> to vector<16x8x1xf32>
    %11 = vector.broadcast %10 : vector<16x8x1xf32> to vector<16x8x8xf32>
    %12 = arith.subf %8, %11 : vector<16x8x8xf32>
    %13 = math.exp %12 : vector<16x8x8xf32>
    %cst_13 = arith.constant dense<0.000000e+00> : vector<16x8xf32>
    %14 = vector.multi_reduction <add>, %13, %cst_13 [2] : vector<16x8x8xf32> to vector<16x8xf32>
    %15 = vector.shape_cast %14 : vector<16x8xf32> to vector<16x8x1xf32>
    %16 = tpu.reciprocal %15 {approx = true} : vector<16x8x1xf32> -> vector<16x8x1xf32>
    %17 = vector.broadcast %16 : vector<16x8x1xf32> to vector<16x8x8xf32>
    %18 = arith.mulf %13, %17 : vector<16x8x8xf32>
    %19 = arith.truncf %18 : vector<16x8x8xf32> to vector<16x8x8xbf16>
    "tpu.trace_start"() <{level = 10 : i32, message = "hqk,hkd->hqd"}> : () -> ()
    %cst_14 = arith.constant dense<0.000000e+00> : vector<16x8x32xf32>
    %20 = tpu.matmul %19, %5, %cst_14 {dimension_numbers = #tpu.dot_dimension_numbers<[2], [1], [1], [2], [0, 0, 0, 1, 1, 2], [0], [0]>} : vector<16x8x8xbf16>, vector<16x8x32xbf16>, vector<16x8x32xf32> -> vector<16x8x32xf32>
    "tpu.trace_stop"() : () -> ()
    %21 = arith.truncf %20 : vector<16x8x32xf32> to vector<16x8x32xbf16>
    %c0_15 = arith.constant 0 : index
    %c0_16 = arith.constant 0 : index
    %c0_17 = arith.constant 0 : index
    %c0_18 = arith.constant 0 : index
    %22 = vector.load %arg4[%c0_15, %c0_16, %c0_17, %c0_18] : memref<1x16x8x32xbf16, #tpu.memory_space<vmem>>, vector<1x16x8x32xbf16>
    %23 = vector.shape_cast %22 : vector<1x16x8x32xbf16> to vector<16x8x32xbf16>
    %24 = vector.shape_cast %21 : vector<16x8x32xbf16> to vector<1x16x8x32xbf16>
    tpu.vector_store %arg4[%c0_15, %c0_16, %c0_17, %c0_18], %24 {strides = array<i32>} : memref<1x16x8x32xbf16, #tpu.memory_space<vmem>>, vector<1x16x8x32xbf16>,
    return
  }
  func.func @transform_0(%arg0: i32) -> (i32, i32, i32, i32) {
    %c0_i32 = arith.constant 0 : i32
    %c0_i32_0 = arith.constant 0 : i32
    %c0_i32_1 = arith.constant 0 : i32
    %c0_i32_2 = arith.constant 0 : i32
    return %arg0, %c0_i32, %c0_i32_0, %c0_i32_1 : i32, i32, i32, i32
  }
  func.func @transform_1(%arg0: i32) -> (i32, i32, i32, i32) {
    %c0_i32 = arith.constant 0 : i32
    %c0_i32_0 = arith.constant 0 : i32
    %c0_i32_1 = arith.constant 0 : i32
    %c0_i32_2 = arith.constant 0 : i32
    return %arg0, %c0_i32, %c0_i32_0, %c0_i32_1 : i32, i32, i32, i32
  }
  func.func @transform_2(%arg0: i32) -> (i32, i32, i32, i32) {
    %c0_i32 = arith.constant 0 : i32
    %c0_i32_0 = arith.constant 0 : i32
    %c0_i32_1 = arith.constant 0 : i32
    %c0_i32_2 = arith.constant 0 : i32
    return %arg0, %c0_i32, %c0_i32_0, %c0_i32_1 : i32, i32, i32, i32
  }
  func.func @transform_3(%arg0: i32) -> (i32, i32, i32, i32) {
    %c0_i32 = arith.constant 0 : i32
    %c0_i32_0 = arith.constant 0 : i32
    %c0_i32_1 = arith.constant 0 : i32
    %c0_i32_2 = arith.constant 0 : i32
    return %arg0, %c0_i32, %c0_i32_0, %c0_i32_1 : i32, i32, i32, i32
  }
}

module attributes {stable_mosaic.version = 11 : i64} {
  func.func @_linear_kernel(%arg0: i32, %arg1: i32, %arg2: memref<16x512xbf16, #tpu.memory_space<vmem>>, %arg3: memref<512x512xbf16, #tpu.memory_space<vmem>>, %arg4: memref<1x512xf32, #tpu.memory_space<vmem>>, %arg5: memref<16x512xbf16, #tpu.memory_space<vmem>>) attributes {dimension_semantics = [#tpu.dimension_semantics<parallel>, #tpu.dimension_semantics<parallel>], iteration_bounds = array<i64: 1, 1>, scalar_prefetch = 0 : i64, scratch_operands = 0 : i64, tpu.core_type = #tpu.core_type<tc>, window_params = [{transform_indices = @transform_0, window_bounds = array<i64: 16, 512>}, {transform_indices = @transform_1, window_bounds = array<i64: 512, 512>}, {transform_indices = @transform_2, window_bounds = array<i64: 1, 512>}, {transform_indices = @transform_3, window_bounds = array<i64: 16, 512>}]} {
    %c0 = arith.constant 0 : index
    %c0_0 = arith.constant 0 : index
    %0 = vector.load %arg2[%c0, %c0_0] : memref<16x512xbf16, #tpu.memory_space<vmem>>, vector<16x512xbf16>
    %c0_1 = arith.constant 0 : index
    %c0_2 = arith.constant 0 : index
    %1 = vector.load %arg3[%c0_1, %c0_2] : memref<512x512xbf16, #tpu.memory_space<vmem>>, vector<512x512xbf16>
    %cst = arith.constant dense<0.000000e+00> : vector<16x512xf32>
    %2 = tpu.matmul %0, %1, %cst {dimension_numbers = #tpu.dot_dimension_numbers<[1], [0], [0], [1], [0, 0, 1, 1], [], []>} : vector<16x512xbf16>, vector<512x512xbf16>, vector<16x512xf32> -> vector<16x512xf32>
    %c0_3 = arith.constant 0 : index
    %c0_4 = arith.constant 0 : index
    %3 = vector.load %arg4[%c0_3, %c0_4] : memref<1x512xf32, #tpu.memory_space<vmem>>, vector<1x512xf32>
    %4 = vector.broadcast %3 : vector<1x512xf32> to vector<16x512xf32>
    %5 = arith.addf %2, %4 : vector<16x512xf32>
    %6 = arith.truncf %5 : vector<16x512xf32> to vector<16x512xbf16>
    %c0_5 = arith.constant 0 : index
    %c0_6 = arith.constant 0 : index
    %7 = vector.load %arg5[%c0_5, %c0_6] : memref<16x512xbf16, #tpu.memory_space<vmem>>, vector<16x512xbf16>
    tpu.vector_store %arg5[%c0_5, %c0_6], %6 {strides = array<i32>} : memref<16x512xbf16, #tpu.memory_space<vmem>>, vector<16x512xbf16>,
    return
  }
  func.func @transform_0(%arg0: i32, %arg1: i32) -> (i32, i32) {
    %c0_i32 = arith.constant 0 : i32
    %c0_i32_0 = arith.constant 0 : i32
    return %arg0, %c0_i32 : i32, i32
  }
  func.func @transform_1(%arg0: i32, %arg1: i32) -> (i32, i32) {
    %c0_i32 = arith.constant 0 : i32
    %c0_i32_0 = arith.constant 0 : i32
    return %c0_i32, %arg1 : i32, i32
  }
  func.func @transform_2(%arg0: i32, %arg1: i32) -> (i32, i32) {
    %c0_i32 = arith.constant 0 : i32
    %c0_i32_0 = arith.constant 0 : i32
    return %c0_i32, %arg1 : i32, i32
  }
  func.func @transform_3(%arg0: i32, %arg1: i32) -> (i32, i32) {
    %c0_i32 = arith.constant 0 : i32
    return %arg0, %arg1 : i32, i32
  }
}

module attributes {stable_mosaic.version = 11 : i64} {
  func.func @_add_ln_kernel(%arg0: i32, %arg1: memref<16x512xbf16, #tpu.memory_space<vmem>>, %arg2: memref<16x512xbf16, #tpu.memory_space<vmem>>, %arg3: memref<1x512xf32, #tpu.memory_space<vmem>>, %arg4: memref<1x512xf32, #tpu.memory_space<vmem>>, %arg5: memref<16x512xbf16, #tpu.memory_space<vmem>>) attributes {dimension_semantics = [#tpu.dimension_semantics<parallel>], iteration_bounds = array<i64: 1>, scalar_prefetch = 0 : i64, scratch_operands = 0 : i64, tpu.core_type = #tpu.core_type<tc>, window_params = [{transform_indices = @transform_0, window_bounds = array<i64: 16, 512>}, {transform_indices = @transform_1, window_bounds = array<i64: 16, 512>}, {pipeline_mode = #tpu.pipeline_mode<synchronous>, transform_indices = @transform_2, window_bounds = array<i64: 1, 512>}, {pipeline_mode = #tpu.pipeline_mode<synchronous>, transform_indices = @transform_3, window_bounds = array<i64: 1, 512>}, {transform_indices = @transform_4, window_bounds = array<i64: 16, 512>}]} {
    %c0 = arith.constant 0 : index
    %c0_0 = arith.constant 0 : index
    %0 = vector.load %arg1[%c0, %c0_0] : memref<16x512xbf16, #tpu.memory_space<vmem>>, vector<16x512xbf16>
    %1 = arith.extf %0 : vector<16x512xbf16> to vector<16x512xf32>
    %c0_1 = arith.constant 0 : index
    %c0_2 = arith.constant 0 : index
    %2 = vector.load %arg2[%c0_1, %c0_2] : memref<16x512xbf16, #tpu.memory_space<vmem>>, vector<16x512xbf16>
    %3 = arith.extf %2 : vector<16x512xbf16> to vector<16x512xf32>
    %4 = arith.addf %1, %3 : vector<16x512xf32>
    %c0_3 = arith.constant 0 : index
    %c0_4 = arith.constant 0 : index
    %5 = vector.load %arg3[%c0_3, %c0_4] : memref<1x512xf32, #tpu.memory_space<vmem>>, vector<1x512xf32>
    %c0_5 = arith.constant 0 : index
    %c0_6 = arith.constant 0 : index
    %6 = vector.load %arg4[%c0_5, %c0_6] : memref<1x512xf32, #tpu.memory_space<vmem>>, vector<1x512xf32>
    %cst = arith.constant dense<0.000000e+00> : vector<16xf32>
    %7 = vector.multi_reduction <add>, %4, %cst [1] : vector<16x512xf32> to vector<16xf32>
    %8 = vector.shape_cast %7 : vector<16xf32> to vector<16x1xf32>
    %cst_7 = arith.constant 5.120000e+02 : f32
    %9 = vector.broadcast %cst_7 : f32 to vector<16x1xf32>
    %10 = arith.divf %8, %9 : vector<16x1xf32>
    %11 = vector.broadcast %10 : vector<16x1xf32> to vector<16x512xf32>
    %12 = arith.subf %4, %11 : vector<16x512xf32>
    %13 = arith.mulf %12, %12 : vector<16x512xf32>
    %cst_8 = arith.constant dense<0.000000e+00> : vector<16xf32>
    %14 = vector.multi_reduction <add>, %13, %cst_8 [1] : vector<16x512xf32> to vector<16xf32>
    %15 = vector.shape_cast %14 : vector<16xf32> to vector<16x1xf32>
    %cst_9 = arith.constant 5.120000e+02 : f32
    %16 = vector.broadcast %cst_9 : f32 to vector<16x1xf32>
    %17 = arith.divf %15, %16 : vector<16x1xf32>
    %18 = vector.broadcast %10 : vector<16x1xf32> to vector<16x512xf32>
    %19 = arith.subf %4, %18 : vector<16x512xf32>
    %cst_10 = arith.constant 9.99999974E-6 : f32
    %20 = vector.broadcast %cst_10 : f32 to vector<16x1xf32>
    %21 = arith.addf %17, %20 : vector<16x1xf32>
    %22 = math.rsqrt %21 : vector<16x1xf32>
    %23 = vector.broadcast %22 : vector<16x1xf32> to vector<16x512xf32>
    %24 = arith.mulf %19, %23 : vector<16x512xf32>
    %25 = vector.broadcast %5 : vector<1x512xf32> to vector<16x512xf32>
    %26 = arith.mulf %24, %25 : vector<16x512xf32>
    %27 = vector.broadcast %6 : vector<1x512xf32> to vector<16x512xf32>
    %28 = arith.addf %26, %27 : vector<16x512xf32>
    %29 = arith.truncf %28 : vector<16x512xf32> to vector<16x512xbf16>
    %c0_11 = arith.constant 0 : index
    %c0_12 = arith.constant 0 : index
    %30 = vector.load %arg5[%c0_11, %c0_12] : memref<16x512xbf16, #tpu.memory_space<vmem>>, vector<16x512xbf16>
    tpu.vector_store %arg5[%c0_11, %c0_12], %29 {strides = array<i32>} : memref<16x512xbf16, #tpu.memory_space<vmem>>, vector<16x512xbf16>,
    return
  }
  func.func @transform_0(%arg0: i32) -> (i32, i32) {
    %c0_i32 = arith.constant 0 : i32
    %c0_i32_0 = arith.constant 0 : i32
    return %arg0, %c0_i32 : i32, i32
  }
  func.func @transform_1(%arg0: i32) -> (i32, i32) {
    %c0_i32 = arith.constant 0 : i32
    %c0_i32_0 = arith.constant 0 : i32
    return %arg0, %c0_i32 : i32, i32
  }
  func.func @transform_2(%arg0: i32) -> (i32, i32) {
    %c0_i32 = arith.constant 0 : i32
    %c0_i32_0 = arith.constant 0 : i32
    %c0_i32_1 = arith.constant 0 : i32
    return %c0_i32, %c0_i32_0 : i32, i32
  }
  func.func @transform_3(%arg0: i32) -> (i32, i32) {
    %c0_i32 = arith.constant 0 : i32
    %c0_i32_0 = arith.constant 0 : i32
    %c0_i32_1 = arith.constant 0 : i32
    return %c0_i32, %c0_i32_0 : i32, i32
  }
  func.func @transform_4(%arg0: i32) -> (i32, i32) {
    %c0_i32 = arith.constant 0 : i32
    %c0_i32_0 = arith.constant 0 : i32
    return %arg0, %c0_i32 : i32, i32
  }
}

module attributes {stable_mosaic.version = 11 : i64} {
  func.func @_ffn_kernel(%arg0: i32, %arg1: memref<16x512xbf16, #tpu.memory_space<vmem>>, %arg2: memref<512x2048xbf16, #tpu.memory_space<vmem>>, %arg3: memref<1x2048xf32, #tpu.memory_space<vmem>>, %arg4: memref<2048x512xbf16, #tpu.memory_space<vmem>>, %arg5: memref<1x512xf32, #tpu.memory_space<vmem>>, %arg6: memref<1x512xf32, #tpu.memory_space<vmem>>, %arg7: memref<1x512xf32, #tpu.memory_space<vmem>>, %arg8: memref<16x512xbf16, #tpu.memory_space<vmem>>) attributes {dimension_semantics = [#tpu.dimension_semantics<parallel>], iteration_bounds = array<i64: 1>, scalar_prefetch = 0 : i64, scratch_operands = 0 : i64, tpu.core_type = #tpu.core_type<tc>, window_params = [{transform_indices = @transform_0, window_bounds = array<i64: 16, 512>}, {pipeline_mode = #tpu.pipeline_mode<synchronous>, transform_indices = @transform_1, window_bounds = array<i64: 512, 2048>}, {pipeline_mode = #tpu.pipeline_mode<synchronous>, transform_indices = @transform_2, window_bounds = array<i64: 1, 2048>}, {pipeline_mode = #tpu.pipeline_mode<synchronous>, transform_indices = @transform_3, window_bounds = array<i64: 2048, 512>}, {pipeline_mode = #tpu.pipeline_mode<synchronous>, transform_indices = @transform_4, window_bounds = array<i64: 1, 512>}, {pipeline_mode = #tpu.pipeline_mode<synchronous>, transform_indices = @transform_5, window_bounds = array<i64: 1, 512>}, {pipeline_mode = #tpu.pipeline_mode<synchronous>, transform_indices = @transform_6, window_bounds = array<i64: 1, 512>}, {transform_indices = @transform_7, window_bounds = array<i64: 16, 512>}]} {
    %c0 = arith.constant 0 : index
    %c0_0 = arith.constant 0 : index
    %0 = vector.load %arg1[%c0, %c0_0] : memref<16x512xbf16, #tpu.memory_space<vmem>>, vector<16x512xbf16>
    %c0_1 = arith.constant 0 : index
    %c0_2 = arith.constant 0 : index
    %1 = vector.load %arg2[%c0_1, %c0_2] : memref<512x2048xbf16, #tpu.memory_space<vmem>>, vector<512x2048xbf16>
    %cst = arith.constant dense<0.000000e+00> : vector<16x2048xf32>
    %2 = tpu.matmul %0, %1, %cst {dimension_numbers = #tpu.dot_dimension_numbers<[1], [0], [0], [1], [0, 0, 1, 1], [], []>} : vector<16x512xbf16>, vector<512x2048xbf16>, vector<16x2048xf32> -> vector<16x2048xf32>
    %c0_3 = arith.constant 0 : index
    %c0_4 = arith.constant 0 : index
    %3 = vector.load %arg3[%c0_3, %c0_4] : memref<1x2048xf32, #tpu.memory_space<vmem>>, vector<1x2048xf32>
    %4 = vector.broadcast %3 : vector<1x2048xf32> to vector<16x2048xf32>
    %5 = arith.addf %2, %4 : vector<16x2048xf32>
    %cst_5 = arith.constant 0.000000e+00 : f32
    %6 = vector.broadcast %cst_5 : f32 to vector<16x2048xf32>
    %7 = arith.maximumf %5, %6 : vector<16x2048xf32>
    %8 = arith.truncf %7 : vector<16x2048xf32> to vector<16x2048xbf16>
    %c0_6 = arith.constant 0 : index
    %c0_7 = arith.constant 0 : index
    %9 = vector.load %arg4[%c0_6, %c0_7] : memref<2048x512xbf16, #tpu.memory_space<vmem>>, vector<2048x512xbf16>
    %cst_8 = arith.constant dense<0.000000e+00> : vector<16x512xf32>
    %10 = tpu.matmul %8, %9, %cst_8 {dimension_numbers = #tpu.dot_dimension_numbers<[1], [0], [0], [1], [0, 0, 1, 1], [], []>} : vector<16x2048xbf16>, vector<2048x512xbf16>, vector<16x512xf32> -> vector<16x512xf32>
    %c0_9 = arith.constant 0 : index
    %c0_10 = arith.constant 0 : index
    %11 = vector.load %arg5[%c0_9, %c0_10] : memref<1x512xf32, #tpu.memory_space<vmem>>, vector<1x512xf32>
    %12 = vector.broadcast %11 : vector<1x512xf32> to vector<16x512xf32>
    %13 = arith.addf %10, %12 : vector<16x512xf32>
    %14 = arith.extf %0 : vector<16x512xbf16> to vector<16x512xf32>
    %15 = arith.addf %14, %13 : vector<16x512xf32>
    %c0_11 = arith.constant 0 : index
    %c0_12 = arith.constant 0 : index
    %16 = vector.load %arg6[%c0_11, %c0_12] : memref<1x512xf32, #tpu.memory_space<vmem>>, vector<1x512xf32>
    %c0_13 = arith.constant 0 : index
    %c0_14 = arith.constant 0 : index
    %17 = vector.load %arg7[%c0_13, %c0_14] : memref<1x512xf32, #tpu.memory_space<vmem>>, vector<1x512xf32>
    %cst_15 = arith.constant dense<0.000000e+00> : vector<16xf32>
    %18 = vector.multi_reduction <add>, %15, %cst_15 [1] : vector<16x512xf32> to vector<16xf32>
    %19 = vector.shape_cast %18 : vector<16xf32> to vector<16x1xf32>
    %cst_16 = arith.constant 5.120000e+02 : f32
    %20 = vector.broadcast %cst_16 : f32 to vector<16x1xf32>
    %21 = arith.divf %19, %20 : vector<16x1xf32>
    %22 = vector.broadcast %21 : vector<16x1xf32> to vector<16x512xf32>
    %23 = arith.subf %15, %22 : vector<16x512xf32>
    %24 = arith.mulf %23, %23 : vector<16x512xf32>
    %cst_17 = arith.constant dense<0.000000e+00> : vector<16xf32>
    %25 = vector.multi_reduction <add>, %24, %cst_17 [1] : vector<16x512xf32> to vector<16xf32>
    %26 = vector.shape_cast %25 : vector<16xf32> to vector<16x1xf32>
    %cst_18 = arith.constant 5.120000e+02 : f32
    %27 = vector.broadcast %cst_18 : f32 to vector<16x1xf32>
    %28 = arith.divf %26, %27 : vector<16x1xf32>
    %29 = vector.broadcast %21 : vector<16x1xf32> to vector<16x512xf32>
    %30 = arith.subf %15, %29 : vector<16x512xf32>
    %cst_19 = arith.constant 9.99999974E-6 : f32
    %31 = vector.broadcast %cst_19 : f32 to vector<16x1xf32>
    %32 = arith.addf %28, %31 : vector<16x1xf32>
    %33 = math.rsqrt %32 : vector<16x1xf32>
    %34 = vector.broadcast %33 : vector<16x1xf32> to vector<16x512xf32>
    %35 = arith.mulf %30, %34 : vector<16x512xf32>
    %36 = vector.broadcast %16 : vector<1x512xf32> to vector<16x512xf32>
    %37 = arith.mulf %35, %36 : vector<16x512xf32>
    %38 = vector.broadcast %17 : vector<1x512xf32> to vector<16x512xf32>
    %39 = arith.addf %37, %38 : vector<16x512xf32>
    %40 = arith.truncf %39 : vector<16x512xf32> to vector<16x512xbf16>
    %c0_20 = arith.constant 0 : index
    %c0_21 = arith.constant 0 : index
    %41 = vector.load %arg8[%c0_20, %c0_21] : memref<16x512xbf16, #tpu.memory_space<vmem>>, vector<16x512xbf16>
    tpu.vector_store %arg8[%c0_20, %c0_21], %40 {strides = array<i32>} : memref<16x512xbf16, #tpu.memory_space<vmem>>, vector<16x512xbf16>,
    return
  }
  func.func @transform_0(%arg0: i32) -> (i32, i32) {
    %c0_i32 = arith.constant 0 : i32
    %c0_i32_0 = arith.constant 0 : i32
    return %arg0, %c0_i32 : i32, i32
  }
  func.func @transform_1(%arg0: i32) -> (i32, i32) {
    %c0_i32 = arith.constant 0 : i32
    %c0_i32_0 = arith.constant 0 : i32
    %c0_i32_1 = arith.constant 0 : i32
    return %c0_i32, %c0_i32_0 : i32, i32
  }
  func.func @transform_2(%arg0: i32) -> (i32, i32) {
    %c0_i32 = arith.constant 0 : i32
    %c0_i32_0 = arith.constant 0 : i32
    %c0_i32_1 = arith.constant 0 : i32
    return %c0_i32, %c0_i32_0 : i32, i32
  }
  func.func @transform_3(%arg0: i32) -> (i32, i32) {
    %c0_i32 = arith.constant 0 : i32
    %c0_i32_0 = arith.constant 0 : i32
    %c0_i32_1 = arith.constant 0 : i32
    return %c0_i32, %c0_i32_0 : i32, i32
  }
  func.func @transform_4(%arg0: i32) -> (i32, i32) {
    %c0_i32 = arith.constant 0 : i32
    %c0_i32_0 = arith.constant 0 : i32
    %c0_i32_1 = arith.constant 0 : i32
    return %c0_i32, %c0_i32_0 : i32, i32
  }
  func.func @transform_5(%arg0: i32) -> (i32, i32) {
    %c0_i32 = arith.constant 0 : i32
    %c0_i32_0 = arith.constant 0 : i32
    %c0_i32_1 = arith.constant 0 : i32
    return %c0_i32, %c0_i32_0 : i32, i32
  }
  func.func @transform_6(%arg0: i32) -> (i32, i32) {
    %c0_i32 = arith.constant 0 : i32
    %c0_i32_0 = arith.constant 0 : i32
    %c0_i32_1 = arith.constant 0 : i32
    return %c0_i32, %c0_i32_0 : i32, i32
  }
  func.func @transform_7(%arg0: i32) -> (i32, i32) {
    %c0_i32 = arith.constant 0 : i32
    %c0_i32_0 = arith.constant 0 : i32
    return %arg0, %c0_i32 : i32, i32
  }
}

module attributes {stable_mosaic.version = 11 : i64} {
  func.func @_ln_kernel(%arg0: i32, %arg1: memref<16x512xbf16, #tpu.memory_space<vmem>>, %arg2: memref<1x512xf32, #tpu.memory_space<vmem>>, %arg3: memref<1x512xf32, #tpu.memory_space<vmem>>, %arg4: memref<16x512xbf16, #tpu.memory_space<vmem>>) attributes {dimension_semantics = [#tpu.dimension_semantics<parallel>], iteration_bounds = array<i64: 1>, scalar_prefetch = 0 : i64, scratch_operands = 0 : i64, tpu.core_type = #tpu.core_type<tc>, window_params = [{transform_indices = @transform_0, window_bounds = array<i64: 16, 512>}, {pipeline_mode = #tpu.pipeline_mode<synchronous>, transform_indices = @transform_1, window_bounds = array<i64: 1, 512>}, {pipeline_mode = #tpu.pipeline_mode<synchronous>, transform_indices = @transform_2, window_bounds = array<i64: 1, 512>}, {transform_indices = @transform_3, window_bounds = array<i64: 16, 512>}]} {
    %c0 = arith.constant 0 : index
    %c0_0 = arith.constant 0 : index
    %0 = vector.load %arg1[%c0, %c0_0] : memref<16x512xbf16, #tpu.memory_space<vmem>>, vector<16x512xbf16>
    %1 = arith.extf %0 : vector<16x512xbf16> to vector<16x512xf32>
    %c0_1 = arith.constant 0 : index
    %c0_2 = arith.constant 0 : index
    %2 = vector.load %arg2[%c0_1, %c0_2] : memref<1x512xf32, #tpu.memory_space<vmem>>, vector<1x512xf32>
    %c0_3 = arith.constant 0 : index
    %c0_4 = arith.constant 0 : index
    %3 = vector.load %arg3[%c0_3, %c0_4] : memref<1x512xf32, #tpu.memory_space<vmem>>, vector<1x512xf32>
    %cst = arith.constant dense<0.000000e+00> : vector<16xf32>
    %4 = vector.multi_reduction <add>, %1, %cst [1] : vector<16x512xf32> to vector<16xf32>
    %5 = vector.shape_cast %4 : vector<16xf32> to vector<16x1xf32>
    %cst_5 = arith.constant 5.120000e+02 : f32
    %6 = vector.broadcast %cst_5 : f32 to vector<16x1xf32>
    %7 = arith.divf %5, %6 : vector<16x1xf32>
    %8 = vector.broadcast %7 : vector<16x1xf32> to vector<16x512xf32>
    %9 = arith.subf %1, %8 : vector<16x512xf32>
    %10 = arith.mulf %9, %9 : vector<16x512xf32>
    %cst_6 = arith.constant dense<0.000000e+00> : vector<16xf32>
    %11 = vector.multi_reduction <add>, %10, %cst_6 [1] : vector<16x512xf32> to vector<16xf32>
    %12 = vector.shape_cast %11 : vector<16xf32> to vector<16x1xf32>
    %cst_7 = arith.constant 5.120000e+02 : f32
    %13 = vector.broadcast %cst_7 : f32 to vector<16x1xf32>
    %14 = arith.divf %12, %13 : vector<16x1xf32>
    %15 = vector.broadcast %7 : vector<16x1xf32> to vector<16x512xf32>
    %16 = arith.subf %1, %15 : vector<16x512xf32>
    %cst_8 = arith.constant 9.99999974E-6 : f32
    %17 = vector.broadcast %cst_8 : f32 to vector<16x1xf32>
    %18 = arith.addf %14, %17 : vector<16x1xf32>
    %19 = math.rsqrt %18 : vector<16x1xf32>
    %20 = vector.broadcast %19 : vector<16x1xf32> to vector<16x512xf32>
    %21 = arith.mulf %16, %20 : vector<16x512xf32>
    %22 = vector.broadcast %2 : vector<1x512xf32> to vector<16x512xf32>
    %23 = arith.mulf %21, %22 : vector<16x512xf32>
    %24 = vector.broadcast %3 : vector<1x512xf32> to vector<16x512xf32>
    %25 = arith.addf %23, %24 : vector<16x512xf32>
    %26 = arith.truncf %25 : vector<16x512xf32> to vector<16x512xbf16>
    %c0_9 = arith.constant 0 : index
    %c0_10 = arith.constant 0 : index
    %27 = vector.load %arg4[%c0_9, %c0_10] : memref<16x512xbf16, #tpu.memory_space<vmem>>, vector<16x512xbf16>
    tpu.vector_store %arg4[%c0_9, %c0_10], %26 {strides = array<i32>} : memref<16x512xbf16, #tpu.memory_space<vmem>>, vector<16x512xbf16>,
    return
  }
  func.func @transform_0(%arg0: i32) -> (i32, i32) {
    %c0_i32 = arith.constant 0 : i32
    %c0_i32_0 = arith.constant 0 : i32
    return %arg0, %c0_i32 : i32, i32
  }
  func.func @transform_1(%arg0: i32) -> (i32, i32) {
    %c0_i32 = arith.constant 0 : i32
    %c0_i32_0 = arith.constant 0 : i32
    %c0_i32_1 = arith.constant 0 : i32
    return %c0_i32, %c0_i32_0 : i32, i32
  }
  func.func @transform_2(%arg0: i32) -> (i32, i32) {
    %c0_i32 = arith.constant 0 : i32
    %c0_i32_0 = arith.constant 0 : i32
    %c0_i32_1 = arith.constant 0 : i32
    return %c0_i32, %c0_i32_0 : i32, i32
  }
  func.func @transform_3(%arg0: i32) -> (i32, i32) {
    %c0_i32 = arith.constant 0 : i32
    %c0_i32_0 = arith.constant 0 : i32
    return %arg0, %c0_i32 : i32, i32
  }
}

module attributes {stable_mosaic.version = 11 : i64} {
  func.func @_linear_kernel(%arg0: i32, %arg1: i32, %arg2: memref<16x512xbf16, #tpu.memory_space<vmem>>, %arg3: memref<512x512xbf16, #tpu.memory_space<vmem>>, %arg4: memref<1x512xf32, #tpu.memory_space<vmem>>, %arg5: memref<16x512xbf16, #tpu.memory_space<vmem>>) attributes {dimension_semantics = [#tpu.dimension_semantics<parallel>, #tpu.dimension_semantics<parallel>], iteration_bounds = array<i64: 1, 2>, scalar_prefetch = 0 : i64, scratch_operands = 0 : i64, tpu.core_type = #tpu.core_type<tc>, window_params = [{transform_indices = @transform_0, window_bounds = array<i64: 16, 512>}, {transform_indices = @transform_1, window_bounds = array<i64: 512, 512>}, {transform_indices = @transform_2, window_bounds = array<i64: 1, 512>}, {transform_indices = @transform_3, window_bounds = array<i64: 16, 512>}]} {
    %c0 = arith.constant 0 : index
    %c0_0 = arith.constant 0 : index
    %0 = vector.load %arg2[%c0, %c0_0] : memref<16x512xbf16, #tpu.memory_space<vmem>>, vector<16x512xbf16>
    %c0_1 = arith.constant 0 : index
    %c0_2 = arith.constant 0 : index
    %1 = vector.load %arg3[%c0_1, %c0_2] : memref<512x512xbf16, #tpu.memory_space<vmem>>, vector<512x512xbf16>
    %cst = arith.constant dense<0.000000e+00> : vector<16x512xf32>
    %2 = tpu.matmul %0, %1, %cst {dimension_numbers = #tpu.dot_dimension_numbers<[1], [0], [0], [1], [0, 0, 1, 1], [], []>} : vector<16x512xbf16>, vector<512x512xbf16>, vector<16x512xf32> -> vector<16x512xf32>
    %c0_3 = arith.constant 0 : index
    %c0_4 = arith.constant 0 : index
    %3 = vector.load %arg4[%c0_3, %c0_4] : memref<1x512xf32, #tpu.memory_space<vmem>>, vector<1x512xf32>
    %4 = vector.broadcast %3 : vector<1x512xf32> to vector<16x512xf32>
    %5 = arith.addf %2, %4 : vector<16x512xf32>
    %6 = arith.truncf %5 : vector<16x512xf32> to vector<16x512xbf16>
    %c0_5 = arith.constant 0 : index
    %c0_6 = arith.constant 0 : index
    %7 = vector.load %arg5[%c0_5, %c0_6] : memref<16x512xbf16, #tpu.memory_space<vmem>>, vector<16x512xbf16>
    tpu.vector_store %arg5[%c0_5, %c0_6], %6 {strides = array<i32>} : memref<16x512xbf16, #tpu.memory_space<vmem>>, vector<16x512xbf16>,
    return
  }
  func.func @transform_0(%arg0: i32, %arg1: i32) -> (i32, i32) {
    %c0_i32 = arith.constant 0 : i32
    %c0_i32_0 = arith.constant 0 : i32
    return %arg0, %c0_i32 : i32, i32
  }
  func.func @transform_1(%arg0: i32, %arg1: i32) -> (i32, i32) {
    %c0_i32 = arith.constant 0 : i32
    %c0_i32_0 = arith.constant 0 : i32
    return %c0_i32, %arg1 : i32, i32
  }
  func.func @transform_2(%arg0: i32, %arg1: i32) -> (i32, i32) {
    %c0_i32 = arith.constant 0 : i32
    %c0_i32_0 = arith.constant 0 : i32
    return %c0_i32, %arg1 : i32, i32
  }
  func.func @transform_3(%arg0: i32, %arg1: i32) -> (i32, i32) {
    %c0_i32 = arith.constant 0 : i32
    return %arg0, %arg1 : i32, i32
  }
}

module attributes {stable_mosaic.version = 11 : i64} {
  func.func @_linear_kernel(%arg0: i32, %arg1: i32, %arg2: memref<16x512xbf16, #tpu.memory_space<vmem>>, %arg3: memref<512x512xbf16, #tpu.memory_space<vmem>>, %arg4: memref<1x512xf32, #tpu.memory_space<vmem>>, %arg5: memref<16x512xf32, #tpu.memory_space<vmem>>) attributes {dimension_semantics = [#tpu.dimension_semantics<parallel>, #tpu.dimension_semantics<parallel>], iteration_bounds = array<i64: 1, 4>, scalar_prefetch = 0 : i64, scratch_operands = 0 : i64, tpu.core_type = #tpu.core_type<tc>, window_params = [{transform_indices = @transform_0, window_bounds = array<i64: 16, 512>}, {transform_indices = @transform_1, window_bounds = array<i64: 512, 512>}, {transform_indices = @transform_2, window_bounds = array<i64: 1, 512>}, {transform_indices = @transform_3, window_bounds = array<i64: 16, 512>}]} {
    %c0 = arith.constant 0 : index
    %c0_0 = arith.constant 0 : index
    %0 = vector.load %arg2[%c0, %c0_0] : memref<16x512xbf16, #tpu.memory_space<vmem>>, vector<16x512xbf16>
    %c0_1 = arith.constant 0 : index
    %c0_2 = arith.constant 0 : index
    %1 = vector.load %arg3[%c0_1, %c0_2] : memref<512x512xbf16, #tpu.memory_space<vmem>>, vector<512x512xbf16>
    %cst = arith.constant dense<0.000000e+00> : vector<16x512xf32>
    %2 = tpu.matmul %0, %1, %cst {dimension_numbers = #tpu.dot_dimension_numbers<[1], [0], [0], [1], [0, 0, 1, 1], [], []>} : vector<16x512xbf16>, vector<512x512xbf16>, vector<16x512xf32> -> vector<16x512xf32>
    %c0_3 = arith.constant 0 : index
    %c0_4 = arith.constant 0 : index
    %3 = vector.load %arg4[%c0_3, %c0_4] : memref<1x512xf32, #tpu.memory_space<vmem>>, vector<1x512xf32>
    %4 = vector.broadcast %3 : vector<1x512xf32> to vector<16x512xf32>
    %5 = arith.addf %2, %4 : vector<16x512xf32>
    %c0_5 = arith.constant 0 : index
    %c0_6 = arith.constant 0 : index
    %6 = vector.load %arg5[%c0_5, %c0_6] : memref<16x512xf32, #tpu.memory_space<vmem>>, vector<16x512xf32>
    tpu.vector_store %arg5[%c0_5, %c0_6], %5 {strides = array<i32>} : memref<16x512xf32, #tpu.memory_space<vmem>>, vector<16x512xf32>,
    return
  }
  func.func @transform_0(%arg0: i32, %arg1: i32) -> (i32, i32) {
    %c0_i32 = arith.constant 0 : i32
    %c0_i32_0 = arith.constant 0 : i32
    return %arg0, %c0_i32 : i32, i32
  }
  func.func @transform_1(%arg0: i32, %arg1: i32) -> (i32, i32) {
    %c0_i32 = arith.constant 0 : i32
    %c0_i32_0 = arith.constant 0 : i32
    return %c0_i32, %arg1 : i32, i32
  }
  func.func @transform_2(%arg0: i32, %arg1: i32) -> (i32, i32) {
    %c0_i32 = arith.constant 0 : i32
    %c0_i32_0 = arith.constant 0 : i32
    return %c0_i32, %arg1 : i32, i32
  }
  func.func @transform_3(%arg0: i32, %arg1: i32) -> (i32, i32) {
    %c0_i32 = arith.constant 0 : i32
    return %arg0, %arg1 : i32, i32
  }
}

</mosaic_0001>

<bundles_post_ra>
// kernel: closed_call.57
= control target key start
LH: loop header
LB: loop body
LE: loop exit
PB: predicated region body
PF: predicated region fallthrough
CT: control target
= control target key end

     0   :  { %s2115_s12 = smov 0   ;;  %s2117_s13 = smov 0   ;;  %s2597_s0 = inlined_call_operand.vmem [shape: bf16[16,512], index: 0, kind: input, shape index: {}]   ;;  %s2598_s1 = inlined_call_operand.vmem [shape: bf16[512,1536], index: 1, kind: input, shape index: {}]   ;;  %s2599_s2 = inlined_call_operand.vmem [shape: f32[1,1536], index: 2, kind: input, shape index: {}]   ;;  %s2600_s3 = inlined_call_operand.vmem [shape: bf16[16,1536], index: 3, kind: output, shape index: {}]  }
   0x1   :  { %s2119_s14 = smov 0   ;;  %s2121_s15 = smov 0  }
   0x2   :  { %s2123_s16 = smov 0  }
   0x3 LB: > { %s22_s17 = sadd.s32 1, %s2089_s15  ;;  %s1642_s18 = sadd.s32 4294967295, %s2093_s16   ;;  %s2093_s16 = sphi %s2123_s16, %s13_s16   ;;  %s2089_s15 = sphi %s2121_s15, %s2605_s15   ;;  %s2085_s14 = sphi %s2119_s14, %s2604_s14   ;;  %s2081_s13 = sphi %s2117_s13, %s2603_s13   ;;  %s2077_s12 = sphi %s2115_s12, %s2602_s12  }
   0x4   : > { %p23_p0 = scmp.ge.s32.totalorder %s22_s17, 3  ;;  %p65_p1 = scmp.ne.s32.totalorder %s2081_s13, %s2077_s12 }
   0x5   : > { %p66_p2 = scmp.eq.s32.totalorder %s2093_s16, 0  ;;  %p123_p4 = scmp.eq.s32.totalorder %s1642_s18, 2 }
   0x6   : > { %s2607_s17 = smov (%p23_p0, %s22_s17), 0  ;;  %s58_s20 = sadd.s32 1, %s2081_s13 }
   0x7   : > { %p67_p3 = por %p66_p2, %p65_p1  ;;  %s55_s19 = ssub.s32 %s2089_s15, %s2607_s17 }
   0x8   : > { %p56_p5 = scmp.eq.s32.totalorder %s55_s19, 0  ;;  %p2150_p6 = por %p123_p4, %p65_p1 }
   0x9   : > { %p1646_p7 = scmp.ge.s32.totalorder %s2093_s16, 3 }
   0xa   : > { %s2155_s22 = scalar_select %p56_p5, %s2081_s13, %s58_s20  }
   0xb   : > { %155 = sbr.rel (%p1646_p7) target bundleno = 86 (0x56), region = 20 }
  0x12   : > { %158 = sbr.rel (!%p67_p3) target bundleno = 86 (0x56), region = 24  ;;  %s160_s23 = sand.u32 (%p67_p3), 1, %s2081_s13  }
  0x13   : > { %s1795_s24 = sshll.u32 (%p67_p3), %s2089_s15, 4  ;;  %s1647_s25 = sshll.u32 (%p67_p3), %s160_s23, 10 }
  0x14   : > { %s2163_s28 = scalar_lea.vmem (%p67_p3), %s2598_s1, %s1795_s24  ;;  %s2168_s29 = scalar_lea.vmem (%p67_p3), [#allocation2], %s1647_s25 }
  0x15   : > { %v178_v0 = vld [vmem:[%s2163_s28] sm:$0xff] (%p67_p3)  ;;  %v180_v1 = vld [vmem:[%s2163_s28 + $0x8] sm:$0xff] (%p67_p3)  ;;  %v182_v2 = vld [vmem:[%s2163_s28 + $0x30] sm:$0xff] (%p67_p3) }
  0x16   : > { %179 = vst [vmem:[%s2168_s29] sm:$0xff] (%p67_p3), %v178_v0  ;;  %181 = vst [vmem:[%s2168_s29 + $0x8] sm:$0xff] (%p67_p3), %v180_v1  ;;  %v184_v3 = vld [vmem:[%s2163_s28 + $0x38] sm:$0xff] (%p67_p3)  ;;  %v186_v4 = vld [vmem:[%s2163_s28 + $0x60] sm:$0xff] (%p67_p3) }
  0x17   : > { %183 = vst [vmem:[%s2168_s29 + $0x10] sm:$0xff] (%p67_p3), %v182_v2  ;;  %v188_v5 = vld [vmem:[%s2163_s28 + $0x68] sm:$0xff] (%p67_p3)  ;;  %185 = vst [vmem:[%s2168_s29 + $0x18] sm:$0xff] (%p67_p3), %v184_v3  ;;  %v190_v6 = vld [vmem:[%s2163_s28 + $0x90] sm:$0xff] (%p67_p3) }
  0x18   : > { %187 = vst [vmem:[%s2168_s29 + $0x20] sm:$0xff] (%p67_p3), %v186_v4  ;;  %189 = vst [vmem:[%s2168_s29 + $0x28] sm:$0xff] (%p67_p3), %v188_v5  ;;  %v192_v7 = vld [vmem:[%s2163_s28 + $0x98] sm:$0xff] (%p67_p3)  ;;  %v194_v8 = vld [vmem:[%s2163_s28 + $0xc0] sm:$0xff] (%p67_p3) }
  0x19   : > { %191 = vst [vmem:[%s2168_s29 + $0x30] sm:$0xff] %v190_v6  ;;  %193 = vst [vmem:[%s2168_s29 + $0x38] sm:$0xff] %v192_v7  ;;  %v196_v9 = vld [vmem:[%s2163_s28 + $0xc8] sm:$0xff]  ;;  %v198_v10 = vld [vmem:[%s2163_s28 + $0xf0] sm:$0xff] }
  0x1a   : > { %195 = vst [vmem:[%s2168_s29 + $0x40] sm:$0xff] %v194_v8  ;;  %v200_v11 = vld [vmem:[%s2163_s28 + $0xf8] sm:$0xff]  ;;  %197 = vst [vmem:[%s2168_s29 + $0x48] sm:$0xff] %v196_v9  ;;  %v202_v12 = vld [vmem:[%s2163_s28 + $0x120] sm:$0xff] }
  0x1b   : > { %199 = vst [vmem:[%s2168_s29 + $0x50] sm:$0xff] %v198_v10  ;;  %201 = vst [vmem:[%s2168_s29 + $0x58] sm:$0xff] %v200_v11  ;;  %v204_v13 = vld [vmem:[%s2163_s28 + $0x128] sm:$0xff]  ;;  %v206_v14 = vld [vmem:[%s2163_s28 + $0x150] sm:$0xff] }
  0x1c   : > { %203 = vst [vmem:[%s2168_s29 + $0x60] sm:$0xff] %v202_v12  ;;  %205 = vst [vmem:[%s2168_s29 + $0x68] sm:$0xff] %v204_v13  ;;  %v208_v15 = vld [vmem:[%s2163_s28 + $0x158] sm:$0xff]  ;;  %v210_v16 = vld [vmem:[%s2163_s28 + $0x180] sm:$0xff] }
  0x1d   : > { %207 = vst [vmem:[%s2168_s29 + $0x70] sm:$0xff] %v206_v14  ;;  %v212_v17 = vld [vmem:[%s2163_s28 + $0x188] sm:$0xff]  ;;  %209 = vst [vmem:[%s2168_s29 + $0x78] sm:$0xff] %v208_v15  ;;  %v214_v18 = vld [vmem:[%s2163_s28 + $0x1b0] sm:$0xff] }
  0x1e   : > { %211 = vst [vmem:[%s2168_s29 + $0x80] sm:$0xff] %v210_v16  ;;  %213 = vst [vmem:[%s2168_s29 + $0x88] sm:$0xff] %v212_v17  ;;  %v216_v19 = vld [vmem:[%s2163_s28 + $0x1b8] sm:$0xff]  ;;  %v218_v20 = vld [vmem:[%s2163_s28 + $0x1e0] sm:$0xff] }
  0x1f   : > { %215 = vst [vmem:[%s2168_s29 + $0x90] sm:$0xff] %v214_v18  ;;  %217 = vst [vmem:[%s2168_s29 + $0x98] sm:$0xff] %v216_v19  ;;  %v220_v21 = vld [vmem:[%s2163_s28 + $0x1e8] sm:$0xff]  ;;  %v222_v22 = vld [vmem:[%s2163_s28 + $0x210] sm:$0xff] }
  0x20   : > { %219 = vst [vmem:[%s2168_s29 + $0xa0] sm:$0xff] %v218_v20  ;;  %v224_v23 = vld [vmem:[%s2163_s28 + $0x218] sm:$0xff]  ;;  %221 = vst [vmem:[%s2168_s29 + $0xa8] sm:$0xff] %v220_v21  ;;  %v226_v24 = vld [vmem:[%s2163_s28 + $0x240] sm:$0xff] }
  0x21   : > { %223 = vst [vmem:[%s2168_s29 + $0xb0] sm:$0xff] %v222_v22  ;;  %225 = vst [vmem:[%s2168_s29 + $0xb8] sm:$0xff] %v224_v23  ;;  %v228_v25 = vld [vmem:[%s2163_s28 + $0x248] sm:$0xff]  ;;  %v230_v26 = vld [vmem:[%s2163_s28 + $0x270] sm:$0xff] }
  0x22   : > { %227 = vst [vmem:[%s2168_s29 + $0xc0] sm:$0xff] %v226_v24  ;;  %229 = vst [vmem:[%s2168_s29 + $0xc8] sm:$0xff] %v228_v25  ;;  %v232_v27 = vld [vmem:[%s2163_s28 + $0x278] sm:$0xff]  ;;  %v234_v28 = vld [vmem:[%s2163_s28 + $0x2a0] sm:$0xff] }
  0x23   : > { %231 = vst [vmem:[%s2168_s29 + $0xd0] sm:$0xff] %v230_v26  ;;  %v236_v29 = vld [vmem:[%s2163_s28 + $0x2a8] sm:$0xff]  ;;  %233 = vst [vmem:[%s2168_s29 + $0xd8] sm:$0xff] %v232_v27  ;;  %v238_v30 = vld [vmem:[%s2163_s28 + $0x2d0] sm:$0xff] }
  0x24   : > { %235 = vst [vmem:[%s2168_s29 + $0xe0] sm:$0xff] %v234_v28  ;;  %237 = vst [vmem:[%s2168_s29 + $0xe8] sm:$0xff] %v236_v29  ;;  %v240_v31 = vld [vmem:[%s2163_s28 + $0x2d8] sm:$0xff]  ;;  %v242_v32 = vld [vmem:[%s2163_s28 + $0x300] sm:$0xff] }
  0x25   : > { %239 = vst [vmem:[%s2168_s29 + $0xf0] sm:$0xff] %v238_v30  ;;  %241 = vst [vmem:[%s2168_s29 + $0xf8] sm:$0xff] %v240_v31  ;;  %v244_v33 = vld [vmem:[%s2163_s28 + $0x308] sm:$0xff]  ;;  %v246_v34 = vld [vmem:[%s2163_s28 + $0x330] sm:$0xff] }
  0x26   : > { %243 = vst [vmem:[%s2168_s29 + $0x100] sm:$0xff] %v242_v32  ;;  %v248_v35 = vld [vmem:[%s2163_s28 + $0x338] sm:$0xff]  ;;  %245 = vst [vmem:[%s2168_s29 + $0x108] sm:$0xff] %v244_v33  ;;  %v250_v36 = vld [vmem:[%s2163_s28 + $0x360] sm:$0xff] }
  0x27   : > { %247 = vst [vmem:[%s2168_s29 + $0x110] sm:$0xff] %v246_v34  ;;  %249 = vst [vmem:[%s2168_s29 + $0x118] sm:$0xff] %v248_v35  ;;  %v252_v37 = vld [vmem:[%s2163_s28 + $0x368] sm:$0xff]  ;;  %v254_v38 = vld [vmem:[%s2163_s28 + $0x390] sm:$0xff] }
  0x28   : > { %251 = vst [vmem:[%s2168_s29 + $0x120] sm:$0xff] %v250_v36  ;;  %253 = vst [vmem:[%s2168_s29 + $0x128] sm:$0xff] %v252_v37  ;;  %v256_v39 = vld [vmem:[%s2163_s28 + $0x398] sm:$0xff]  ;;  %v258_v40 = vld [vmem:[%s2163_s28 + $0x3c0] sm:$0xff] }
  0x29   : > { %255 = vst [vmem:[%s2168_s29 + $0x130] sm:$0xff] %v254_v38  ;;  %v260_v41 = vld [vmem:[%s2163_s28 + $0x3c8] sm:$0xff]  ;;  %257 = vst [vmem:[%s2168_s29 + $0x138] sm:$0xff] %v256_v39  ;;  %v262_v42 = vld [vmem:[%s2163_s28 + $0x3f0] sm:$0xff] }
  0x2a   : > { %259 = vst [vmem:[%s2168_s29 + $0x140] sm:$0xff] %v258_v40  ;;  %261 = vst [vmem:[%s2168_s29 + $0x148] sm:$0xff] %v260_v41  ;;  %v264_v43 = vld [vmem:[%s2163_s28 + $0x3f8] sm:$0xff]  ;;  %v266_v44 = vld [vmem:[%s2163_s28 + $0x420] sm:$0xff] }
  0x2b   : > { %263 = vst [vmem:[%s2168_s29 + $0x150] sm:$0xff] %v262_v42  ;;  %265 = vst [vmem:[%s2168_s29 + $0x158] sm:$0xff] %v264_v43  ;;  %v268_v45 = vld [vmem:[%s2163_s28 + $0x428] sm:$0xff]  ;;  %v270_v46 = vld [vmem:[%s2163_s28 + $0x450] sm:$0xff] }
  0x2c   : > { %267 = vst [vmem:[%s2168_s29 + $0x160] sm:$0xff] %v266_v44  ;;  %v272_v47 = vld [vmem:[%s2163_s28 + $0x458] sm:$0xff]  ;;  %269 = vst [vmem:[%s2168_s29 + $0x168] sm:$0xff] %v268_v45  ;;  %v274_v48 = vld [vmem:[%s2163_s28 + $0x480] sm:$0xff] }
  0x2d   : > { %271 = vst [vmem:[%s2168_s29 + $0x170] sm:$0xff] %v270_v46  ;;  %273 = vst [vmem:[%s2168_s29 + $0x178] sm:$0xff] %v272_v47  ;;  %v276_v49 = vld [vmem:[%s2163_s28 + $0x488] sm:$0xff]  ;;  %v278_v50 = vld [vmem:[%s2163_s28 + $0x4b0] sm:$0xff] }
  0x2e   : > { %275 = vst [vmem:[%s2168_s29 + $0x180] sm:$0xff] %v274_v48  ;;  %277 = vst [vmem:[%s2168_s29 + $0x188] sm:$0xff] %v276_v49  ;;  %v280_v51 = vld [vmem:[%s2163_s28 + $0x4b8] sm:$0xff]  ;;  %v282_v52 = vld [vmem:[%s2163_s28 + $0x4e0] sm:$0xff] }
  0x2f   : > { %279 = vst [vmem:[%s2168_s29 + $0x190] sm:$0xff] %v278_v50  ;;  %v284_v53 = vld [vmem:[%s2163_s28 + $0x4e8] sm:$0xff]  ;;  %281 = vst [vmem:[%s2168_s29 + $0x198] sm:$0xff] %v280_v51  ;;  %v286_v54 = vld [vmem:[%s2163_s28 + $0x510] sm:$0xff] }
  0x30   : > { %283 = vst [vmem:[%s2168_s29 + $0x1a0] sm:$0xff] %v282_v52  ;;  %285 = vst [vmem:[%s2168_s29 + $0x1a8] sm:$0xff] %v284_v53  ;;  %v288_v55 = vld [vmem:[%s2163_s28 + $0x518] sm:$0xff]  ;;  %v290_v56 = vld [vmem:[%s2163_s28 + $0x540] sm:$0xff] }
  0x31   : > { %287 = vst [vmem:[%s2168_s29 + $0x1b0] sm:$0xff] %v286_v54  ;;  %289 = vst [vmem:[%s2168_s29 + $0x1b8] sm:$0xff] %v288_v55  ;;  %v292_v57 = vld [vmem:[%s2163_s28 + $0x548] sm:$0xff]  ;;  %v294_v58 = vld [vmem:[%s2163_s28 + $0x570] sm:$0xff] }
  0x32   : > { %291 = vst [vmem:[%s2168_s29 + $0x1c0] sm:$0xff] %v290_v56  ;;  %v296_v59 = vld [vmem:[%s2163_s28 + $0x578] sm:$0xff]  ;;  %293 = vst [vmem:[%s2168_s29 + $0x1c8] sm:$0xff] %v292_v57  ;;  %v298_v60 = vld [vmem:[%s2163_s28 + $0x5a0] sm:$0xff] }
  0x33   : > { %295 = vst [vmem:[%s2168_s29 + $0x1d0] sm:$0xff] %v294_v58  ;;  %297 = vst [vmem:[%s2168_s29 + $0x1d8] sm:$0xff] %v296_v59  ;;  %v300_v61 = vld [vmem:[%s2163_s28 + $0x5a8] sm:$0xff]  ;;  %v302_v62 = vld [vmem:[%s2163_s28 + $0x5d0] sm:$0xff] }
  0x34   : > { %299 = vst [vmem:[%s2168_s29 + $0x1e0] sm:$0xff] %v298_v60  ;;  %301 = vst [vmem:[%s2168_s29 + $0x1e8] sm:$0xff] %v300_v61  ;;  %v304_v63 = vld [vmem:[%s2163_s28 + $0x5d8] sm:$0xff]  ;;  %v306_v0 = vld [vmem:[%s2163_s28 + $0x600] sm:$0xff] }
  0x35   : > { %303 = vst [vmem:[%s2168_s29 + $0x1f0] sm:$0xff] %v302_v62  ;;  %v308_v1 = vld [vmem:[%s2163_s28 + $0x608] sm:$0xff]  ;;  %305 = vst [vmem:[%s2168_s29 + $0x1f8] sm:$0xff] %v304_v63  ;;  %v310_v2 = vld [vmem:[%s2163_s28 + $0x630] sm:$0xff] }
  0x36   : > { %307 = vst [vmem:[%s2168_s29 + $0x200] sm:$0xff] %v306_v0  ;;  %309 = vst [vmem:[%s2168_s29 + $0x208] sm:$0xff] %v308_v1  ;;  %v312_v3 = vld [vmem:[%s2163_s28 + $0x638] sm:$0xff]  ;;  %v314_v4 = vld [vmem:[%s2163_s28 + $0x660] sm:$0xff] }
  0x37   : > { %311 = vst [vmem:[%s2168_s29 + $0x210] sm:$0xff] %v310_v2  ;;  %313 = vst [vmem:[%s2168_s29 + $0x218] sm:$0xff] %v312_v3  ;;  %v316_v5 = vld [vmem:[%s2163_s28 + $0x668] sm:$0xff]  ;;  %v318_v6 = vld [vmem:[%s2163_s28 + $0x690] sm:$0xff] }
  0x38   : > { %315 = vst [vmem:[%s2168_s29 + $0x220] sm:$0xff] %v314_v4  ;;  %v320_v7 = vld [vmem:[%s2163_s28 + $0x698] sm:$0xff]  ;;  %317 = vst [vmem:[%s2168_s29 + $0x228] sm:$0xff] %v316_v5  ;;  %v322_v8 = vld [vmem:[%s2163_s28 + $0x6c0] sm:$0xff] }
  0x39   : > { %319 = vst [vmem:[%s2168_s29 + $0x230] sm:$0xff] %v318_v6  ;;  %321 = vst [vmem:[%s2168_s29 + $0x238] sm:$0xff] %v320_v7  ;;  %v324_v9 = vld [vmem:[%s2163_s28 + $0x6c8] sm:$0xff]  ;;  %v326_v10 = vld [vmem:[%s2163_s28 + $0x6f0] sm:$0xff] }
  0x3a   : > { %323 = vst [vmem:[%s2168_s29 + $0x240] sm:$0xff] %v322_v8  ;;  %325 = vst [vmem:[%s2168_s29 + $0x248] sm:$0xff] %v324_v9  ;;  %v328_v11 = vld [vmem:[%s2163_s28 + $0x6f8] sm:$0xff]  ;;  %v330_v12 = vld [vmem:[%s2163_s28 + $0x720] sm:$0xff] }
  0x3b   : > { %327 = vst [vmem:[%s2168_s29 + $0x250] sm:$0xff] %v326_v10  ;;  %v332_v13 = vld [vmem:[%s2163_s28 + $0x728] sm:$0xff]  ;;  %329 = vst [vmem:[%s2168_s29 + $0x258] sm:$0xff] %v328_v11  ;;  %v334_v14 = vld [vmem:[%s2163_s28 + $0x750] sm:$0xff] }
  0x3c   : > { %331 = vst [vmem:[%s2168_s29 + $0x260] sm:$0xff] %v330_v12  ;;  %333 = vst [vmem:[%s2168_s29 + $0x268] sm:$0xff] %v332_v13  ;;  %v336_v15 = vld [vmem:[%s2163_s28 + $0x758] sm:$0xff]  ;;  %v338_v16 = vld [vmem:[%s2163_s28 + $0x780] sm:$0xff] }
  0x3d   : > { %335 = vst [vmem:[%s2168_s29 + $0x270] sm:$0xff] %v334_v14  ;;  %337 = vst [vmem:[%s2168_s29 + $0x278] sm:$0xff] %v336_v15  ;;  %v340_v17 = vld [vmem:[%s2163_s28 + $0x788] sm:$0xff]  ;;  %v342_v18 = vld [vmem:[%s2163_s28 + $0x7b0] sm:$0xff] }
  0x3e   : > { %339 = vst [vmem:[%s2168_s29 + $0x280] sm:$0xff] %v338_v16  ;;  %v344_v19 = vld [vmem:[%s2163_s28 + $0x7b8] sm:$0xff]  ;;  %341 = vst [vmem:[%s2168_s29 + $0x288] sm:$0xff] %v340_v17  ;;  %v346_v20 = vld [vmem:[%s2163_s28 + $0x7e0] sm:$0xff] }
  0x3f   : > { %343 = vst [vmem:[%s2168_s29 + $0x290] sm:$0xff] %v342_v18  ;;  %345 = vst [vmem:[%s2168_s29 + $0x298] sm:$0xff] %v344_v19  ;;  %v348_v21 = vld [vmem:[%s2163_s28 + $0x7e8] sm:$0xff]  ;;  %v350_v22 = vld [vmem:[%s2163_s28 + $0x810] sm:$0xff] }
  0x40   : > { %347 = vst [vmem:[%s2168_s29 + $0x2a0] sm:$0xff] %v346_v20  ;;  %349 = vst [vmem:[%s2168_s29 + $0x2a8] sm:$0xff] %v348_v21  ;;  %v352_v23 = vld [vmem:[%s2163_s28 + $0x818] sm:$0xff]  ;;  %v354_v24 = vld [vmem:[%s2163_s28 + $0x840] sm:$0xff] }
  0x41   : > { %351 = vst [vmem:[%s2168_s29 + $0x2b0] sm:$0xff] %v350_v22  ;;  %v356_v25 = vld [vmem:[%s2163_s28 + $0x848] sm:$0xff]  ;;  %353 = vst [vmem:[%s2168_s29 + $0x2b8] sm:$0xff] %v352_v23  ;;  %v358_v26 = vld [vmem:[%s2163_s28 + $0x870] sm:$0xff] }
  0x42   : > { %355 = vst [vmem:[%s2168_s29 + $0x2c0] sm:$0xff] %v354_v24  ;;  %357 = vst [vmem:[%s2168_s29 + $0x2c8] sm:$0xff] %v356_v25  ;;  %v360_v27 = vld [vmem:[%s2163_s28 + $0x878] sm:$0xff]  ;;  %v362_v28 = vld [vmem:[%s2163_s28 + $0x8a0] sm:$0xff] }
  0x43   : > { %359 = vst [vmem:[%s2168_s29 + $0x2d0] sm:$0xff] %v358_v26  ;;  %361 = vst [vmem:[%s2168_s29 + $0x2d8] sm:$0xff] %v360_v27  ;;  %v364_v29 = vld [vmem:[%s2163_s28 + $0x8a8] sm:$0xff]  ;;  %v366_v30 = vld [vmem:[%s2163_s28 + $0x8d0] sm:$0xff] }
  0x44   : > { %363 = vst [vmem:[%s2168_s29 + $0x2e0] sm:$0xff] %v362_v28  ;;  %v368_v31 = vld [vmem:[%s2163_s28 + $0x8d8] sm:$0xff]  ;;  %365 = vst [vmem:[%s2168_s29 + $0x2e8] sm:$0xff] %v364_v29  ;;  %v370_v32 = vld [vmem:[%s2163_s28 + $0x900] sm:$0xff] }
  0x45   : > { %367 = vst [vmem:[%s2168_s29 + $0x2f0] sm:$0xff] %v366_v30  ;;  %369 = vst [vmem:[%s2168_s29 + $0x2f8] sm:$0xff] %v368_v31  ;;  %v372_v33 = vld [vmem:[%s2163_s28 + $0x908] sm:$0xff]  ;;  %v374_v34 = vld [vmem:[%s2163_s28 + $0x930] sm:$0xff] }
  0x46   : > { %371 = vst [vmem:[%s2168_s29 + $0x300] sm:$0xff] %v370_v32  ;;  %373 = vst [vmem:[%s2168_s29 + $0x308] sm:$0xff] %v372_v33  ;;  %v376_v35 = vld [vmem:[%s2163_s28 + $0x938] sm:$0xff]  ;;  %v378_v36 = vld [vmem:[%s2163_s28 + $0x960] sm:$0xff] }
  0x47   : > { %375 = vst [vmem:[%s2168_s29 + $0x310] sm:$0xff] %v374_v34  ;;  %v380_v37 = vld [vmem:[%s2163_s28 + $0x968] sm:$0xff]  ;;  %377 = vst [vmem:[%s2168_s29 + $0x318] sm:$0xff] %v376_v35  ;;  %v382_v38 = vld [vmem:[%s2163_s28 + $0x990] sm:$0xff] }
  0x48   : > { %379 = vst [vmem:[%s2168_s29 + $0x320] sm:$0xff] %v378_v36  ;;  %381 = vst [vmem:[%s2168_s29 + $0x328] sm:$0xff] %v380_v37  ;;  %v384_v39 = vld [vmem:[%s2163_s28 + $0x998] sm:$0xff]  ;;  %v386_v40 = vld [vmem:[%s2163_s28 + $0x9c0] sm:$0xff] }
  0x49   : > { %383 = vst [vmem:[%s2168_s29 + $0x330] sm:$0xff] %v382_v38  ;;  %385 = vst [vmem:[%s2168_s29 + $0x338] sm:$0xff] %v384_v39  ;;  %v388_v41 = vld [vmem:[%s2163_s28 + $0x9c8] sm:$0xff]  ;;  %v390_v42 = vld [vmem:[%s2163_s28 + $0x9f0] sm:$0xff] }
  0x4a   : > { %387 = vst [vmem:[%s2168_s29 + $0x340] sm:$0xff] %v386_v40  ;;  %v392_v43 = vld [vmem:[%s2163_s28 + $0x9f8] sm:$0xff]  ;;  %389 = vst [vmem:[%s2168_s29 + $0x348] sm:$0xff] %v388_v41  ;;  %v394_v44 = vld [vmem:[%s2163_s28 + $0xa20] sm:$0xff] }
  0x4b   : > { %391 = vst [vmem:[%s2168_s29 + $0x350] sm:$0xff] %v390_v42  ;;  %393 = vst [vmem:[%s2168_s29 + $0x358] sm:$0xff] %v392_v43  ;;  %v396_v45 = vld [vmem:[%s2163_s28 + $0xa28] sm:$0xff]  ;;  %v398_v46 = vld [vmem:[%s2163_s28 + $0xa50] sm:$0xff] }
  0x4c   : > { %395 = vst [vmem:[%s2168_s29 + $0x360] sm:$0xff] %v394_v44  ;;  %397 = vst [vmem:[%s2168_s29 + $0x368] sm:$0xff] %v396_v45  ;;  %v400_v47 = vld [vmem:[%s2163_s28 + $0xa58] sm:$0xff]  ;;  %v402_v48 = vld [vmem:[%s2163_s28 + $0xa80] sm:$0xff] }
  0x4d   : > { %399 = vst [vmem:[%s2168_s29 + $0x370] sm:$0xff] %v398_v46  ;;  %v404_v49 = vld [vmem:[%s2163_s28 + $0xa88] sm:$0xff]  ;;  %401 = vst [vmem:[%s2168_s29 + $0x378] sm:$0xff] %v400_v47  ;;  %v406_v50 = vld [vmem:[%s2163_s28 + $0xab0] sm:$0xff] }
  0x4e   : > { %403 = vst [vmem:[%s2168_s29 + $0x380] sm:$0xff] %v402_v48  ;;  %405 = vst [vmem:[%s2168_s29 + $0x388] sm:$0xff] %v404_v49  ;;  %v408_v51 = vld [vmem:[%s2163_s28 + $0xab8] sm:$0xff]  ;;  %v410_v52 = vld [vmem:[%s2163_s28 + $0xae0] sm:$0xff] }
  0x4f   : > { %407 = vst [vmem:[%s2168_s29 + $0x390] sm:$0xff] %v406_v50  ;;  %409 = vst [vmem:[%s2168_s29 + $0x398] sm:$0xff] %v408_v51  ;;  %v412_v53 = vld [vmem:[%s2163_s28 + $0xae8] sm:$0xff]  ;;  %v414_v54 = vld [vmem:[%s2163_s28 + $0xb10] sm:$0xff] }
  0x50   : > { %411 = vst [vmem:[%s2168_s29 + $0x3a0] sm:$0xff] %v410_v52  ;;  %v416_v55 = vld [vmem:[%s2163_s28 + $0xb18] sm:$0xff]  ;;  %413 = vst [vmem:[%s2168_s29 + $0x3a8] sm:$0xff] %v412_v53  ;;  %v418_v56 = vld [vmem:[%s2163_s28 + $0xb40] sm:$0xff] }
  0x51   : > { %415 = vst [vmem:[%s2168_s29 + $0x3b0] sm:$0xff] %v414_v54  ;;  %417 = vst [vmem:[%s2168_s29 + $0x3b8] sm:$0xff] %v416_v55  ;;  %v420_v57 = vld [vmem:[%s2163_s28 + $0xb48] sm:$0xff]  ;;  %v422_v58 = vld [vmem:[%s2163_s28 + $0xb70] sm:$0xff] }
  0x52   : > { %419 = vst [vmem:[%s2168_s29 + $0x3c0] sm:$0xff] %v418_v56  ;;  %421 = vst [vmem:[%s2168_s29 + $0x3c8] sm:$0xff] %v420_v57  ;;  %v424_v59 = vld [vmem:[%s2163_s28 + $0xb78] sm:$0xff]  ;;  %v426_v60 = vld [vmem:[%s2163_s28 + $0xba0] sm:$0xff] }
  0x53   : > { %423 = vst [vmem:[%s2168_s29 + $0x3d0] sm:$0xff] %v422_v58  ;;  %v428_v61 = vld [vmem:[%s2163_s28 + $0xba8] sm:$0xff]  ;;  %425 = vst [vmem:[%s2168_s29 + $0x3d8] sm:$0xff] %v424_v59  ;;  %v430_v62 = vld [vmem:[%s2163_s28 + $0xbd0] sm:$0xff] }
  0x54   : > { %427 = vst [vmem:[%s2168_s29 + $0x3e0] sm:$0xff] %v426_v60  ;;  %429 = vst [vmem:[%s2168_s29 + $0x3e8] sm:$0xff] %v428_v61  ;;  %v432_v63 = vld [vmem:[%s2163_s28 + $0xbd8] sm:$0xff] }
  0x55   : > { %431 = vst [vmem:[%s2168_s29 + $0x3f0] sm:$0xff] %v430_v62  ;;  %433 = vst [vmem:[%s2168_s29 + $0x3f8] sm:$0xff] %v432_v63 }
  0x56 PF: > { %p1650_p8 = scmp.ge.s32.totalorder %s2093_s16, 1  ;;  %p446_p9 = scmp.lt.s32.totalorder %s2093_s16, 4 }
  0x58   : > { %p447_p10 = pnand %p1650_p8, %p446_p9 }
  0x59   : > { %s453_s30 = sand.u32 (!%p447_p10), 1, %s2077_s12   ;;  %v1955_v0 = vld [vmem:[%s2597_s0 + $0x4] ss:$16 sps:$4 sm:$0xff] (!%p447_p10)   ;;  %s1653_s20 = sshll.u32 (!%p447_p10), %s2085_s14, 2 }
  0x5a   : > { %450 = sbr.rel (%p447_p10) target bundleno = 449 (0x1c1), region = 51  ;;  %s1651_s4 = sshll.u32 (!%p447_p10), %s453_s30, 10  ;;  %1346 = vmatprep.mubr.bf16.mxu0 (!%p447_p10), %v1955_v0  ;;  %1432 = vmatprep.mubr.bf16.mxu1 (!%p447_p10), %v1955_v0 }
  0x5b   : > { %s2431_s7 = scalar_lea.vmem (!%p447_p10), [#allocation2], %s1651_s4  ;;  %p494_p11 = scmp.lt.s32.totalorder (!%p447_p10), %s1653_s20, 11 }
  0x5c   : > { %v1857_v1 = vld [vmem:[%s2431_s7 + $0x4] ss:$16 sps:$4 sm:$0xff] (!%p447_p10)   ;;  %v1859_v2 = vld [vmem:[%s2431_s7 + $0xc] ss:$16 sps:$4 sm:$0xff] (!%p447_p10)   ;;  %v1861_v3 = vld [vmem:[%s2431_s7] ss:$16 sps:$4 sm:$0xff] (!%p447_p10)  }
  0x5d   : > { %1314 = vmatprep.subr.bf16.mxu0 (!%p447_p10), %v1857_v1  ;;  %v1862_v4 = vld [vmem:[%s2431_s7 + $0x8] ss:$16 sps:$4 sm:$0xff] (!%p447_p10)   ;;  %1400 = vmatprep.subr.bf16.mxu1 (!%p447_p10), %v1859_v2  ;;  %v1863_v5 = vld [vmem:[%s2431_s7 + $0x24] ss:$16 sps:$4 sm:$0xff] (!%p447_p10)   ;;  %v1865_v6 = vld [vmem:[%s2431_s7 + $0x2c] ss:$16 sps:$4 sm:$0xff] (!%p447_p10)  }
  0x5e   : > { %1315 = vmatpush1.bf16.msra.mxu0 (!%p447_p10), %v1861_v3  ;;  %1401 = vmatpush1.bf16.msra.mxu1 (!%p447_p10), %v1862_v4  ;;  %v1867_v7 = vld [vmem:[%s2431_s7 + $0x20] ss:$16 sps:$4 sm:$0xff] (!%p447_p10)   ;;  %v1868_v8 = vld [vmem:[%s2431_s7 + $0x28] ss:$16 sps:$4 sm:$0xff] (!%p447_p10)   ;;  %v1869_v9 = vld [vmem:[%s2431_s7 + $0x44] ss:$16 sps:$4 sm:$0xff] (!%p447_p10)  }
  0x5f   : > { %1316 = vmatprep.subr.bf16.mxu0 (!%p447_p10), %v1863_v5  ;;  %1402 = vmatprep.subr.bf16.mxu1 (!%p447_p10), %v1865_v6  ;;  %v1871_v10 = vld [vmem:[%s2431_s7 + $0x4c] ss:$16 sps:$4 sm:$0xff] (!%p447_p10)   ;;  %v1873_v11 = vld [vmem:[%s2431_s7 + $0x40] ss:$16 sps:$4 sm:$0xff] (!%p447_p10)   ;;  %v1874_v12 = vld [vmem:[%s2431_s7 + $0x48] ss:$16 sps:$4 sm:$0xff] (!%p447_p10)  }
  0x60   : > { %v1875_v13 = vld [vmem:[%s2431_s7 + $0x64] ss:$16 sps:$4 sm:$0xff] (!%p447_p10)   ;;  %v1877_v14 = vld [vmem:[%s2431_s7 + $0x6c] ss:$16 sps:$4 sm:$0xff] (!%p447_p10)   ;;  %v1879_v15 = vld [vmem:[%s2431_s7 + $0x60] ss:$16 sps:$4 sm:$0xff] (!%p447_p10)  }
  0x61   : > { %v1880_v16 = vld [vmem:[%s2431_s7 + $0x68] ss:$16 sps:$4 sm:$0xff]   ;;  %v1881_v17 = vld [vmem:[%s2431_s7 + $0x84] ss:$16 sps:$4 sm:$0xff]   ;;  %v1883_v18 = vld [vmem:[%s2431_s7 + $0x8c] ss:$16 sps:$4 sm:$0xff]  }
  0x62   : > { %1317 = vmatpush1.bf16.msra.mxu0 %v1867_v7  ;;  %1403 = vmatpush1.bf16.msra.mxu1 %v1868_v8  ;;  %v1885_v19 = vld [vmem:[%s2431_s7 + $0x80] ss:$16 sps:$4 sm:$0xff]   ;;  %v1886_v20 = vld [vmem:[%s2431_s7 + $0x88] ss:$16 sps:$4 sm:$0xff]   ;;  %v1887_v21 = vld [vmem:[%s2431_s7 + $0xa4] ss:$16 sps:$4 sm:$0xff]  }
  0x63   : > { %1318 = vmatprep.subr.bf16.mxu0 %v1869_v9  ;;  %1404 = vmatprep.subr.bf16.mxu1 %v1871_v10  ;;  %v1889_v22 = vld [vmem:[%s2431_s7 + $0xac] ss:$16 sps:$4 sm:$0xff]   ;;  %v1891_v23 = vld [vmem:[%s2431_s7 + $0xa0] ss:$16 sps:$4 sm:$0xff]   ;;  %v1892_v24 = vld [vmem:[%s2431_s7 + $0xa8] ss:$16 sps:$4 sm:$0xff]  }
  0x64   : > { %v1893_v25 = vld [vmem:[%s2431_s7 + $0xc4] ss:$16 sps:$4 sm:$0xff]   ;;  %v1895_v26 = vld [vmem:[%s2431_s7 + $0xcc] ss:$16 sps:$4 sm:$0xff]   ;;  %v1897_v27 = vld [vmem:[%s2431_s7 + $0xc0] ss:$16 sps:$4 sm:$0xff]  }
  0x65   : > { %v1898_v28 = vld [vmem:[%s2431_s7 + $0xc8] ss:$16 sps:$4 sm:$0xff]   ;;  %v1899_v29 = vld [vmem:[%s2431_s7 + $0xe4] ss:$16 sps:$4 sm:$0xff]   ;;  %v1901_v30 = vld [vmem:[%s2431_s7 + $0xec] ss:$16 sps:$4 sm:$0xff]  }
  0x66   : > { %1319 = vmatpush1.bf16.msra.mxu0 %v1873_v11  ;;  %1405 = vmatpush1.bf16.msra.mxu1 %v1874_v12  ;;  %v1903_v31 = vld [vmem:[%s2431_s7 + $0xe0] ss:$16 sps:$4 sm:$0xff]   ;;  %v1904_v32 = vld [vmem:[%s2431_s7 + $0xe8] ss:$16 sps:$4 sm:$0xff]   ;;  %v1905_v33 = vld [vmem:[%s2431_s7 + $0x104] ss:$16 sps:$4 sm:$0xff]  }
  0x67   : > { %1320 = vmatprep.subr.bf16.mxu0 %v1875_v13  ;;  %1406 = vmatprep.subr.bf16.mxu1 %v1877_v14  ;;  %v1907_v34 = vld [vmem:[%s2431_s7 + $0x10c] ss:$16 sps:$4 sm:$0xff]   ;;  %v1909_v35 = vld [vmem:[%s2431_s7 + $0x100] ss:$16 sps:$4 sm:$0xff]   ;;  %v1910_v36 = vld [vmem:[%s2431_s7 + $0x108] ss:$16 sps:$4 sm:$0xff]  }
  0x68   : > { %v1911_v37 = vld [vmem:[%s2431_s7 + $0x124] ss:$16 sps:$4 sm:$0xff]   ;;  %v1913_v38 = vld [vmem:[%s2431_s7 + $0x12c] ss:$16 sps:$4 sm:$0xff]   ;;  %v1915_v39 = vld [vmem:[%s2431_s7 + $0x120] ss:$16 sps:$4 sm:$0xff]  }
  0x69   : > { %v1916_v40 = vld [vmem:[%s2431_s7 + $0x128] ss:$16 sps:$4 sm:$0xff]   ;;  %v1917_v41 = vld [vmem:[%s2431_s7 + $0x144] ss:$16 sps:$4 sm:$0xff]   ;;  %v1919_v42 = vld [vmem:[%s2431_s7 + $0x14c] ss:$16 sps:$4 sm:$0xff]  }
  0x6a   : > { %1321 = vmatpush1.bf16.msra.mxu0 %v1879_v15  ;;  %1407 = vmatpush1.bf16.msra.mxu1 %v1880_v16  ;;  %v1921_v43 = vld [vmem:[%s2431_s7 + $0x140] ss:$16 sps:$4 sm:$0xff]   ;;  %v1922_v44 = vld [vmem:[%s2431_s7 + $0x148] ss:$16 sps:$4 sm:$0xff]   ;;  %v1923_v45 = vld [vmem:[%s2431_s7 + $0x164] ss:$16 sps:$4 sm:$0xff]  }
  0x6b   : > { %1322 = vmatprep.subr.bf16.mxu0 %v1881_v17  ;;  %1408 = vmatprep.subr.bf16.mxu1 %v1883_v18  ;;  %v1925_v46 = vld [vmem:[%s2431_s7 + $0x16c] ss:$16 sps:$4 sm:$0xff]   ;;  %v1927_v47 = vld [vmem:[%s2431_s7 + $0x160] ss:$16 sps:$4 sm:$0xff]   ;;  %v1928_v48 = vld [vmem:[%s2431_s7 + $0x168] ss:$16 sps:$4 sm:$0xff]  }
  0x6c   : > { %v1929_v49 = vld [vmem:[%s2431_s7 + $0x184] ss:$16 sps:$4 sm:$0xff]   ;;  %v1931_v50 = vld [vmem:[%s2431_s7 + $0x18c] ss:$16 sps:$4 sm:$0xff]   ;;  %v1933_v51 = vld [vmem:[%s2431_s7 + $0x180] ss:$16 sps:$4 sm:$0xff]  }
  0x6d   : > { %v1934_v52 = vld [vmem:[%s2431_s7 + $0x188] ss:$16 sps:$4 sm:$0xff]   ;;  %v1935_v53 = vld [vmem:[%s2431_s7 + $0x1a4] ss:$16 sps:$4 sm:$0xff]   ;;  %v1937_v54 = vld [vmem:[%s2431_s7 + $0x1ac] ss:$16 sps:$4 sm:$0xff]  }
  0x6e   : > { %1323 = vmatpush1.bf16.msra.mxu0 %v1885_v19  ;;  %1409 = vmatpush1.bf16.msra.mxu1 %v1886_v20  ;;  %v1939_v55 = vld [vmem:[%s2431_s7 + $0x1a0] ss:$16 sps:$4 sm:$0xff]   ;;  %v1940_v56 = vld [vmem:[%s2431_s7 + $0x1a8] ss:$16 sps:$4 sm:$0xff]   ;;  %v1941_v57 = vld [vmem:[%s2431_s7 + $0x1c4] ss:$16 sps:$4 sm:$0xff]  }
  0x6f   : > { %1324 = vmatprep.subr.bf16.mxu0 %v1887_v21  ;;  %1410 = vmatprep.subr.bf16.mxu1 %v1889_v22  ;;  %v1943_v58 = vld [vmem:[%s2431_s7 + $0x1cc] ss:$16 sps:$4 sm:$0xff]   ;;  %v1945_v59 = vld [vmem:[%s2431_s7 + $0x1c0] ss:$16 sps:$4 sm:$0xff]   ;;  %v1946_v60 = vld [vmem:[%s2431_s7 + $0x1c8] ss:$16 sps:$4 sm:$0xff]  }
  0x70   : > { %v1947_v61 = vld [vmem:[%s2431_s7 + $0x1e4] ss:$16 sps:$4 sm:$0xff]   ;;  %v1949_v62 = vld [vmem:[%s2431_s7 + $0x1ec] ss:$16 sps:$4 sm:$0xff]   ;;  %v1951_v63 = vld [vmem:[%s2431_s7 + $0x1e0] ss:$16 sps:$4 sm:$0xff]  }
  0x71   : > { %v1952_v0 = vld [vmem:[%s2431_s7 + $0x1e8] ss:$16 sps:$4 sm:$0xff]   ;;  %v1958_v1 = vld [vmem:[%s2431_s7 + $0x204] ss:$16 sps:$4 sm:$0xff]   ;;  %v1961_v2 = vld [vmem:[%s2431_s7 + $0x20c] ss:$16 sps:$4 sm:$0xff]  }
  0x72   : > { %1325 = vmatpush1.bf16.msra.mxu0 %v1891_v23  ;;  %1411 = vmatpush1.bf16.msra.mxu1 %v1892_v24  ;;  %v1953_v3 = vld [vmem:[%s2597_s0] ss:$16 sps:$4 sm:$0xff]   ;;  %v1959_v5 = vld [vmem:[%s2431_s7 + $0x208] ss:$16 sps:$4 sm:$0xff]   ;;  %v1964_v6 = vld [vmem:[%s2431_s7 + $0x224] ss:$16 sps:$4 sm:$0xff]  }
  0x73   : > { %1326 = vmatprep.subr.bf16.mxu0 %v1893_v25  ;;  %1412 = vmatprep.subr.bf16.mxu1 %v1895_v26  ;;  %v1956_v4 = vld [vmem:[%s2431_s7 + $0x200] ss:$16 sps:$4 sm:$0xff]   ;;  %v1967_v7 = vld [vmem:[%s2431_s7 + $0x22c] ss:$16 sps:$4 sm:$0xff]   ;;  %v1965_v9 = vld [vmem:[%s2431_s7 + $0x228] ss:$16 sps:$4 sm:$0xff]  }
  0x74   : > { %v1962_v8 = vld [vmem:[%s2431_s7 + $0x220] ss:$16 sps:$4 sm:$0xff]   ;;  %v1970_v10 = vld [vmem:[%s2431_s7 + $0x244] ss:$16 sps:$4 sm:$0xff]   ;;  %v1973_v11 = vld [vmem:[%s2431_s7 + $0x24c] ss:$16 sps:$4 sm:$0xff]  }
  0x75   : > { %v1968_v12 = vld [vmem:[%s2431_s7 + $0x240] ss:$16 sps:$4 sm:$0xff]   ;;  %v1971_v13 = vld [vmem:[%s2431_s7 + $0x248] ss:$16 sps:$4 sm:$0xff]   ;;  %v1976_v14 = vld [vmem:[%s2431_s7 + $0x264] ss:$16 sps:$4 sm:$0xff]  }
  0x76   : > { %1327 = vmatpush1.bf16.msra.mxu0 %v1897_v27  ;;  %1413 = vmatpush1.bf16.msra.mxu1 %v1898_v28  ;;  %v1979_v15 = vld [vmem:[%s2431_s7 + $0x26c] ss:$16 sps:$4 sm:$0xff]   ;;  %v1974_v16 = vld [vmem:[%s2431_s7 + $0x260] ss:$16 sps:$4 sm:$0xff]   ;;  %v1977_v17 = vld [vmem:[%s2431_s7 + $0x268] ss:$16 sps:$4 sm:$0xff]  }
  0x77   : > { %1328 = vmatprep.subr.bf16.mxu0 %v1899_v29  ;;  %1414 = vmatprep.subr.bf16.mxu1 %v1901_v30  ;;  %v1982_v18 = vld [vmem:[%s2431_s7 + $0x284] ss:$16 sps:$4 sm:$0xff]   ;;  %v1985_v19 = vld [vmem:[%s2431_s7 + $0x28c] ss:$16 sps:$4 sm:$0xff]   ;;  %v1980_v20 = vld [vmem:[%s2431_s7 + $0x280] ss:$16 sps:$4 sm:$0xff]  }
  0x78   : > { %v1983_v21 = vld [vmem:[%s2431_s7 + $0x288] ss:$16 sps:$4 sm:$0xff]   ;;  %v1988_v22 = vld [vmem:[%s2431_s7 + $0x2a4] ss:$16 sps:$4 sm:$0xff]   ;;  %v1991_v23 = vld [vmem:[%s2431_s7 + $0x2ac] ss:$16 sps:$4 sm:$0xff]  }
  0x79   : > { %v1986_v24 = vld [vmem:[%s2431_s7 + $0x2a0] ss:$16 sps:$4 sm:$0xff]   ;;  %v1989_v25 = vld [vmem:[%s2431_s7 + $0x2a8] ss:$16 sps:$4 sm:$0xff]   ;;  %v1994_v26 = vld [vmem:[%s2431_s7 + $0x2c4] ss:$16 sps:$4 sm:$0xff]  }
  0x7a   : > { %1329 = vmatpush1.bf16.msra.mxu0 %v1903_v31  ;;  %1415 = vmatpush1.bf16.msra.mxu1 %v1904_v32  ;;  %v1997_v27 = vld [vmem:[%s2431_s7 + $0x2cc] ss:$16 sps:$4 sm:$0xff]   ;;  %v1992_v29 = vld [vmem:[%s2431_s7 + $0x2c0] ss:$16 sps:$4 sm:$0xff]   ;;  %v1995_v30 = vld [vmem:[%s2431_s7 + $0x2c8] ss:$16 sps:$4 sm:$0xff]  }
  0x7b   : > { %1330 = vmatprep.subr.bf16.mxu0 %v1905_v33  ;;  %1416 = vmatprep.subr.bf16.mxu1 %v1907_v34  ;;  %v2054_v28 = vld [vmem:[%s2597_s0 + $0xc] ss:$16 sps:$4 sm:$0xff]   ;;  %v2000_v31 = vld [vmem:[%s2431_s7 + $0x2e4] ss:$16 sps:$4 sm:$0xff]   ;;  %v1998_v33 = vld [vmem:[%s2431_s7 + $0x2e0] ss:$16 sps:$4 sm:$0xff]  }
  0x7c   : > { %v2003_v32 = vld [vmem:[%s2431_s7 + $0x2ec] ss:$16 sps:$4 sm:$0xff]   ;;  %v2001_v34 = vld [vmem:[%s2431_s7 + $0x2e8] ss:$16 sps:$4 sm:$0xff]   ;;  %s2609_s20 = smov (!%p494_p11, %s1653_s20), 11  ;;  %s1652_s26 = sshll.u32 %s453_s30, 5 }
  0x7d   : > { %s496_s25 = scalar_lea.vmem %s2599_s2, %s2609_s20  ;;  %s484_s27 = scalar_lea.vmem [#allocation3], %s1652_s26 }
  0x7e   : > { %1331 = vmatpush1.bf16.msra.mxu0 %v1909_v35  ;;  %1417 = vmatpush1.bf16.msra.mxu1 %v1910_v36  ;;  %v2006_v35 = vld [vmem:[%s2431_s7 + $0x304] ss:$16 sps:$4 sm:$0xff]   ;;  %v2009_v36 = vld [vmem:[%s2431_s7 + $0x30c] ss:$16 sps:$4 sm:$0xff]   ;;  %s1800_s12 = sshll.u32 (%p2150_p6), %s2085_s14, 4 }
  0x7f   : > { %1332 = vmatprep.subr.bf16.mxu0 %v1911_v37  ;;  %1418 = vmatprep.subr.bf16.mxu1 %v1913_v38  ;;  %v2004_v37 = vld [vmem:[%s2431_s7 + $0x300] ss:$16 sps:$4 sm:$0xff]   ;;  %v2007_v38 = vld [vmem:[%s2431_s7 + $0x308] ss:$16 sps:$4 sm:$0xff]   ;;  %s1526_s30 = scalar_lea.vmem (%p2150_p6), %s2600_s3, %s1800_s12 }
  0x82   : > { %1333 = vmatpush1.bf16.msra.mxu0 %v1915_v39  ;;  %1419 = vmatpush1.bf16.msra.mxu1 %v1916_v40  ;;  %v2012_v39 = vld [vmem:[%s2431_s7 + $0x324] ss:$16 sps:$4 sm:$0xff]   ;;  %v2015_v40 = vld [vmem:[%s2431_s7 + $0x32c] ss:$16 sps:$4 sm:$0xff]  }
  0x83   : > { %1334 = vmatprep.subr.bf16.mxu0 %v1917_v41  ;;  %1420 = vmatprep.subr.bf16.mxu1 %v1919_v42  ;;  %v2010_v41 = vld [vmem:[%s2431_s7 + $0x320] ss:$16 sps:$4 sm:$0xff]   ;;  %v2013_v42 = vld [vmem:[%s2431_s7 + $0x328] ss:$16 sps:$4 sm:$0xff]  }
  0x86   : > { %1335 = vmatpush1.bf16.msra.mxu0 %v1921_v43  ;;  %1421 = vmatpush1.bf16.msra.mxu1 %v1922_v44  ;;  %v2018_v43 = vld [vmem:[%s2431_s7 + $0x344] ss:$16 sps:$4 sm:$0xff]   ;;  %v2021_v44 = vld [vmem:[%s2431_s7 + $0x34c] ss:$16 sps:$4 sm:$0xff]  }
  0x87   : > { %1336 = vmatprep.subr.bf16.mxu0 %v1923_v45  ;;  %1422 = vmatprep.subr.bf16.mxu1 %v1925_v46  ;;  %v2016_v45 = vld [vmem:[%s2431_s7 + $0x340] ss:$16 sps:$4 sm:$0xff]   ;;  %v2019_v46 = vld [vmem:[%s2431_s7 + $0x348] ss:$16 sps:$4 sm:$0xff]  }
  0x8a   : > { %1337 = vmatpush1.bf16.msra.mxu0 %v1927_v47  ;;  %1423 = vmatpush1.bf16.msra.mxu1 %v1928_v48  ;;  %v2024_v47 = vld [vmem:[%s2431_s7 + $0x364] ss:$16 sps:$4 sm:$0xff]   ;;  %v2027_v48 = vld [vmem:[%s2431_s7 + $0x36c] ss:$16 sps:$4 sm:$0xff]  }
  0x8b   : > { %1338 = vmatprep.subr.bf16.mxu0 %v1929_v49  ;;  %1424 = vmatprep.subr.bf16.mxu1 %v1931_v50  ;;  %v2022_v49 = vld [vmem:[%s2431_s7 + $0x360] ss:$16 sps:$4 sm:$0xff]   ;;  %v2025_v50 = vld [vmem:[%s2431_s7 + $0x368] ss:$16 sps:$4 sm:$0xff]  }
  0x8e   : > { %1339 = vmatpush1.bf16.msra.mxu0 %v1933_v51  ;;  %1425 = vmatpush1.bf16.msra.mxu1 %v1934_v52  ;;  %v2030_v51 = vld [vmem:[%s2431_s7 + $0x384] ss:$16 sps:$4 sm:$0xff]   ;;  %v2033_v52 = vld [vmem:[%s2431_s7 + $0x38c] ss:$16 sps:$4 sm:$0xff]  }
  0x8f   : > { %1340 = vmatprep.subr.bf16.mxu0 %v1935_v53  ;;  %1426 = vmatprep.subr.bf16.mxu1 %v1937_v54  ;;  %v2028_v53 = vld [vmem:[%s2431_s7 + $0x380] ss:$16 sps:$4 sm:$0xff]   ;;  %v2031_v54 = vld [vmem:[%s2431_s7 + $0x388] ss:$16 sps:$4 sm:$0xff]  }
  0x92   : > { %1341 = vmatpush1.bf16.msra.mxu0 %v1939_v55  ;;  %1427 = vmatpush1.bf16.msra.mxu1 %v1940_v56  ;;  %v2036_v55 = vld [vmem:[%s2431_s7 + $0x3a4] ss:$16 sps:$4 sm:$0xff]   ;;  %v2039_v56 = vld [vmem:[%s2431_s7 + $0x3ac] ss:$16 sps:$4 sm:$0xff]  }
  0x93   : > { %1342 = vmatprep.subr.bf16.mxu0 %v1941_v57  ;;  %1428 = vmatprep.subr.bf16.mxu1 %v1943_v58  ;;  %v2034_v57 = vld [vmem:[%s2431_s7 + $0x3a0] ss:$16 sps:$4 sm:$0xff]   ;;  %v2037_v58 = vld [vmem:[%s2431_s7 + $0x3a8] ss:$16 sps:$4 sm:$0xff]  }
  0x96   : > { %1343 = vmatpush1.bf16.msra.mxu0 %v1945_v59  ;;  %1429 = vmatpush1.bf16.msra.mxu1 %v1946_v60  ;;  %v2042_v59 = vld [vmem:[%s2431_s7 + $0x3c4] ss:$16 sps:$4 sm:$0xff]   ;;  %v2045_v60 = vld [vmem:[%s2431_s7 + $0x3cc] ss:$16 sps:$4 sm:$0xff]  }
  0x97   : > { %1344 = vmatprep.subr.bf16.mxu0 %v1947_v61  ;;  %1430 = vmatprep.subr.bf16.mxu1 %v1949_v62  ;;  %v2040_v61 = vld [vmem:[%s2431_s7 + $0x3c0] ss:$16 sps:$4 sm:$0xff]   ;;  %v2043_v62 = vld [vmem:[%s2431_s7 + $0x3c8] ss:$16 sps:$4 sm:$0xff]  }
  0x9a   : > { %1345 = vmatpush1.bf16.msra.mxu0 %v1951_v63  ;;  %1431 = vmatpush1.bf16.msra.mxu1 %v1952_v0  ;;  %v2048_v63 = vld [vmem:[%s2431_s7 + $0x3e4] ss:$16 sps:$4 sm:$0xff]   ;;  %v2051_v0 = vld [vmem:[%s2431_s7 + $0x3ec] ss:$16 sps:$4 sm:$0xff]  }
  0x9b   : > { %1357 = vmatprep.subr.bf16.mxu0 %v1958_v1  ;;  %1443 = vmatprep.subr.bf16.mxu1 %v1961_v2  ;;  %v2046_v1 = vld [vmem:[%s2431_s7 + $0x3e0] ss:$16 sps:$4 sm:$0xff]   ;;  %v2049_v2 = vld [vmem:[%s2431_s7 + $0x3e8] ss:$16 sps:$4 sm:$0xff]  }
  0x9d   : > { %1347 = vmatmul.mubr.bf16.vlgmr.msra.gmra.mrb[0].mxu0 %v1953_v3  ;;  %1433 = vmatmul.mubr.bf16.vlgmr.msra.gmra.mrb[0].mxu1 %v1953_v3  ;;  %v2052_v3 = vld [vmem:[%s2597_s0 + $0x8] ss:$16 sps:$4 sm:$0xff]  }
  0x9e   : > { %1358 = vmatpush1.bf16.msra.mxu0 %v1956_v4  ;;  %1444 = vmatpush1.bf16.msra.mxu1 %v1959_v5  ;;  %v634_v4 = vlaneseq }
  0x9f   : > { %1359 = vmatprep.subr.bf16.mxu0 %v1964_v6  ;;  %1445 = vmatprep.subr.bf16.mxu1 %v1967_v7 }
  0xa0   : > { %1389 = vmatprep.mubr.bf16.mxu0 %v2054_v28  ;;  %1475 = vmatprep.mubr.bf16.mxu1 %v2054_v28  ;;  %v635_v5 = vshrl.u32 %v634_v4, 7 }
  0xa2   : > { %1360 = vmatpush1.bf16.msra.mxu0 %v1962_v8  ;;  %1446 = vmatpush1.bf16.msra.mxu1 %v1965_v9  ;;  %v636_v6 = vsub.s32 0, %v635_v5  ;;  %v644_v7 = vsub.s32 2, %v635_v5  ;;  %v632_v8 = vld [vmem:[%s496_s25] sm:$0xf]  ;;  %v640_v9 = vsub.s32 1, %v635_v5 }
  0xa3   : > { %1361 = vmatprep.subr.bf16.mxu0 %v1970_v10  ;;  %1447 = vmatprep.subr.bf16.mxu1 %v1973_v11  ;;  %v648_v10 = vsub.s32 3, %v635_v5 }
  0xa4   : > { %v637_v11 = vrot.slane %v632_v8, %v636_v6 }
  0xa6   : > { %1362 = vmatpush1.bf16.msra.mxu0 %v1968_v12  ;;  %1448 = vmatpush1.bf16.msra.mxu1 %v1971_v13  ;;  %v645_v12 = vrot.slane %v632_v8, %v644_v7  ;;  %v641_v13 = vrot.slane %v632_v8, %v640_v9 }
  0xa7   : > { %1363 = vmatprep.subr.bf16.mxu0 %v1976_v14  ;;  %1449 = vmatprep.subr.bf16.mxu1 %v1979_v15  ;;  %v649_v14 = vrot.slane %v632_v8, %v648_v10 }
  0xaa   : > { %1364 = vmatpush1.bf16.msra.mxu0 %v1974_v16  ;;  %1450 = vmatpush1.bf16.msra.mxu1 %v1977_v17 }
  0xab   : > { %1365 = vmatprep.subr.bf16.mxu0 %v1982_v18  ;;  %1451 = vmatprep.subr.bf16.mxu1 %v1985_v19 }
  0xae   : > { %1366 = vmatpush1.bf16.msra.mxu0 %v1980_v20  ;;  %1452 = vmatpush1.bf16.msra.mxu1 %v1983_v21 }
  0xaf   : > { %1367 = vmatprep.subr.bf16.mxu0 %v1988_v22  ;;  %1453 = vmatprep.subr.bf16.mxu1 %v1991_v23 }
  0xb2   : > { %1368 = vmatpush1.bf16.msra.mxu0 %v1986_v24  ;;  %1454 = vmatpush1.bf16.msra.mxu1 %v1989_v25 }
  0xb3   : > { %1369 = vmatprep.subr.bf16.mxu0 %v1994_v26  ;;  %1455 = vmatprep.subr.bf16.mxu1 %v1997_v27 }
  0xb6   : > { %1370 = vmatpush1.bf16.msra.mxu0 %v1992_v29  ;;  %1456 = vmatpush1.bf16.msra.mxu1 %v1995_v30 }
  0xb7   : > { %1371 = vmatprep.subr.bf16.mxu0 %v2000_v31  ;;  %1457 = vmatprep.subr.bf16.mxu1 %v2003_v32 }
  0xba   : > { %1372 = vmatpush1.bf16.msra.mxu0 %v1998_v33  ;;  %1458 = vmatpush1.bf16.msra.mxu1 %v2001_v34 }
  0xbb   : > { %1373 = vmatprep.subr.bf16.mxu0 %v2006_v35  ;;  %1459 = vmatprep.subr.bf16.mxu1 %v2009_v36 }
  0xbe   : > { %1374 = vmatpush1.bf16.msra.mxu0 %v2004_v37  ;;  %1460 = vmatpush1.bf16.msra.mxu1 %v2007_v38 }
  0xbf   : > { %1375 = vmatprep.subr.bf16.mxu0 %v2012_v39  ;;  %1461 = vmatprep.subr.bf16.mxu1 %v2015_v40 }
  0xc2   : > { %1376 = vmatpush1.bf16.msra.mxu0 %v2010_v41  ;;  %1462 = vmatpush1.bf16.msra.mxu1 %v2013_v42 }
  0xc3   : > { %1377 = vmatprep.subr.bf16.mxu0 %v2018_v43  ;;  %1463 = vmatprep.subr.bf16.mxu1 %v2021_v44 }
  0xc6   : > { %1378 = vmatpush1.bf16.msra.mxu0 %v2016_v45  ;;  %1464 = vmatpush1.bf16.msra.mxu1 %v2019_v46 }
  0xc7   : > { %1379 = vmatprep.subr.bf16.mxu0 %v2024_v47  ;;  %1465 = vmatprep.subr.bf16.mxu1 %v2027_v48 }
  0xca   : > { %1380 = vmatpush1.bf16.msra.mxu0 %v2022_v49  ;;  %1466 = vmatpush1.bf16.msra.mxu1 %v2025_v50 }
  0xcb   : > { %1381 = vmatprep.subr.bf16.mxu0 %v2030_v51  ;;  %1467 = vmatprep.subr.bf16.mxu1 %v2033_v52 }
  0xce   : > { %1382 = vmatpush1.bf16.msra.mxu0 %v2028_v53  ;;  %1468 = vmatpush1.bf16.msra.mxu1 %v2031_v54 }
  0xcf   : > { %1383 = vmatprep.subr.bf16.mxu0 %v2036_v55  ;;  %1469 = vmatprep.subr.bf16.mxu1 %v2039_v56 }
  0xd2   : > { %1384 = vmatpush1.bf16.msra.mxu0 %v2034_v57  ;;  %1470 = vmatpush1.bf16.msra.mxu1 %v2037_v58 }
  0xd3   : > { %1385 = vmatprep.subr.bf16.mxu0 %v2042_v59  ;;  %1471 = vmatprep.subr.bf16.mxu1 %v2045_v60 }
  0xd6   : > { %1386 = vmatpush1.bf16.msra.mxu0 %v2040_v61  ;;  %1472 = vmatpush1.bf16.msra.mxu1 %v2043_v62 }
  0xd7   : > { %1387 = vmatprep.subr.bf16.mxu0 %v2048_v63  ;;  %1473 = vmatprep.subr.bf16.mxu1 %v2051_v0 }
  0xda   : > { %1388 = vmatpush1.bf16.msra.mxu0 %v2046_v1  ;;  %1474 = vmatpush1.bf16.msra.mxu1 %v2049_v2 }
  0xdd   : > { %1390 = vmatmul.mubr.bf16.vlgmr.msra.gmra.mrb[0].mxu0 %v2052_v3  ;;  %1476 = vmatmul.mubr.bf16.vlgmr.msra.gmra.mrb[0].mxu1 %v2052_v3 }
 0x1b0   : > { %v1391_v15 = vpop.f32.mrb[0].mxu0  ;;  %v1477_v16 = vpop.f32.mrb[0].mxu1 }
 0x1b1   : > { %v1801_v17 = vadd.f32 %v1391_v15, %v637_v11  ;;  %v1805_v18 = vadd.f32 %v1477_v16, %v645_v12  ;;  %v1393_v19 = vpop.f32.mrb[1].mxu0  ;;  %v1479_v20 = vpop.f32.mrb[1].mxu1 }
 0x1b2   : > { %v1802_v21 = vadd.f32 %v1393_v19, %v641_v13  ;;  %v1806_v22 = vadd.f32 %v1479_v20, %v649_v14  ;;  %v1395_v23 = vpop.f32.mrb[2].mxu0  ;;  %v1481_v24 = vpop.f32.mrb[2].mxu1  ;;  %1520 = sbr.rel (!%p2150_p6) target bundleno = 449 (0x1c1), region = 59 }
 0x1b3   : > { %v1803_v25 = vadd.f32 %v1395_v23, %v637_v11  ;;  %v1807_v26 = vadd.f32 %v1481_v24, %v645_v12  ;;  %v1397_v27 = vpop.f32.mrb[3].mxu0  ;;  %v1483_v28 = vpop.f32.mrb[3].mxu1 }
 0x1b4   : > { %v1796_v29 = vpack.c.bf16 %v1802_v21, %v1801_v17  ;;  %v1797_v30 = vpack.c.bf16 %v1806_v22, %v1805_v18  ;;  %v1804_v31 = vadd.f32 %v1397_v27, %v641_v13  ;;  %v1808_v32 = vadd.f32 %v1483_v28, %v649_v14 }
 0x1b6   : > { %1510 = vst [vmem:[%s484_s27] sm:$0xff] %v1796_v29  ;;  %1511 = vst [vmem:[%s484_s27 + $0x8] sm:$0xff] %v1797_v30  ;;  %v1798_v33 = vpack.c.bf16 %v1804_v31, %v1803_v25  ;;  %v1799_v34 = vpack.c.bf16 %v1808_v32, %v1807_v26 }
 0x1b8   : > { %1512 = vst [vmem:[%s484_s27 + $0x10] sm:$0xff] %v1798_v33  ;;  %1513 = vst [vmem:[%s484_s27 + $0x18] sm:$0xff] %v1799_v34 }
 0x1bd   : > { %v1539_v35 = vld [vmem:[%s484_s27] sm:$0xff]  ;;  %v1541_v36 = vld [vmem:[%s484_s27 + $0x8] sm:$0xff] }
 0x1be   : > { %1540 = vst [vmem:[%s1526_s30] sm:$0xff] %v1539_v35  ;;  %1542 = vst [vmem:[%s1526_s30 + $0x8] sm:$0xff] %v1541_v36 }
 0x1bf   : > { %v1543_v37 = vld [vmem:[%s484_s27 + $0x10] sm:$0xff]  ;;  %v1545_v38 = vld [vmem:[%s484_s27 + $0x18] sm:$0xff] }
 0x1c0   : > { %1544 = vst [vmem:[%s1526_s30 + $0x30] sm:$0xff] %v1543_v37  ;;  %1546 = vst [vmem:[%s1526_s30 + $0x38] sm:$0xff] %v1545_v38 }
 0x1c1 PF: > { %s13_s16 = sadd.s32 1, %s2093_s16   ;;  %s2602_s12 = smov %s2081_s13 }
 0x1c2   : > { %p10_p12 = scmp.ge.s32.totalorder %s13_s16, 5   ;;  %s2603_s13 = smov %s2155_s22 }
 0x1c3   : > { %s2604_s14 = smov %s2089_s15  ;;  %s2605_s15 = smov %s2607_s17 }
 0x1c4   :  { %12 = sbr.rel (!%p10_p12) target bundleno = 3 (0x3), region = 119 }

// kernel: closed_call.58
= control target key start
LH: loop header
LB: loop body
LE: loop exit
PB: predicated region body
PF: predicated region fallthrough
CT: control target
= control target key end

     0   :  { %s2466_s12 = smov 0   ;;  %s2945_s0 = inlined_call_operand.vmem [shape: bf16[2,16,8,32], index: 0, kind: input, shape index: {}]   ;;  %s2946_s1 = inlined_call_operand.vmem [shape: bf16[2,16,8,32], index: 1, kind: input, shape index: {}]   ;;  %s2947_s2 = inlined_call_operand.vmem [shape: bf16[2,16,8,32], index: 2, kind: input, shape index: {}]   ;;  %s2948_s3 = inlined_call_operand.vmem [shape: bf16[2,16,8,32], index: 3, kind: output, shape index: {}]  }
   0x1 LB: > { %s2055_s13 = sadd.s32 4294967295, %s2442_s12   ;;  %p2059_p0 = scmp.ge.s32.totalorder %s2442_s12, 1  ;;  %s2442_s12 = sphi %s2466_s12, %s13_s12  }
   0x2   : > { %p157_p1 = scmp.lt.s32.totalorder %s2442_s12, 3 }
   0x4   : > { %p158_p2 = pnand %p2059_p0, %p157_p1 }
   0x5   : > { %p191_p3 = scmp.lt.s32.totalorder (!%p158_p2), %s2055_s13, 1  ;;  %v2444_v0 = vmov (!%p158_p2), 0.0   ;;  %vm2445_vm0 = vmmov (!%p158_p2), 0   ;;  %vm260_vm1 = vcmask (!%p158_p2), 261120   ;;  %vm1013_vm2 = vcmask (!%p158_p2), 64512  }
   0x6   : > { %161 = sbr.rel (%p158_p2) target bundleno = 830 (0x33e), region = 32  ;;  %2170 = vmatprep.subr.bf16.mxu0 (!%p158_p2), %v2444_v0  ;;  %2176 = vmatprep.subr.bf16.mxu1 (!%p158_p2), %v2444_v0  ;;  %vm1209_vm3 = vcmask (!%p158_p2), 1043456   ;;  %vm1959_vm4 = vcmask (!%p158_p2), 257024  }
   0x7   : > { %2172 = vmatprep.mubr.msk.bf16.mxu0 (!%p158_p2), %vm2445_vm0, %v2444_v0  ;;  %2178 = vmatprep.mubr.msk.bf16.mxu1 (!%p158_p2), %vm2445_vm0, %v2444_v0 }
   0xd   : > { %s2950_s13 = smov (!%p191_p3, %s2055_s13), 1 }
   0xe   : > { %s2480_s14 = sshll.u32 %s2950_s13, 6 }
   0xf   : > { %s2486_s17 = scalar_lea.vmem %s2946_s1, %s2480_s14  ;;  %s2496_s20 = scalar_lea.vmem %s2945_s0, %s2480_s14 }
  0x10   : > { %v228_v1 = vld [vmem:[%s2486_s17] sm:$0xf]  ;;  %v229_v2 = vld [vmem:[%s2486_s17 + $0x4] sm:$0xf]  ;;  %v230_v5 = vld [vmem:[%s2486_s17 + $0x8] sm:$0xf]  ;;  %s2718_s23 = scalar_lea.vmem %s2947_s2, %s2480_s14  ;;  %s2908_s26 = scalar_lea.vmem %s2948_s3, %s2480_s14 }
  0x11   : > { %v265_v3 = vsel %vm260_vm1, %v228_v1, 0  ;;  %v311_v4 = vsel %vm260_vm1, %v229_v2, 0  ;;  %v231_v6 = vld [vmem:[%s2486_s17 + $0xc] sm:$0xf]  ;;  %v212_v7 = vld [vmem:[%s2496_s20] sm:$0xf] }
  0x12   : > { %2171 = vmatpush3.bf16.xpose.msra.mxu0 %v265_v3  ;;  %2177 = vmatpush3.bf16.xpose.msra.mxu1 %v311_v4  ;;  %v213_v8 = vld [vmem:[%s2496_s20 + $0x4] sm:$0xf]  ;;  %v357_v9 = vsel %vm260_vm1, %v230_v5, 0  ;;  %v403_v10 = vsel %vm260_vm1, %v231_v6, 0  ;;  %v232_v11 = vld [vmem:[%s2486_s17 + $0x10] sm:$0xf] }
  0x13   : > { %2182 = vmatprep.subr.bf16.mxu0 %v2444_v0  ;;  %2188 = vmatprep.subr.bf16.mxu1 %v2444_v0  ;;  %v233_v12 = vld [vmem:[%s2486_s17 + $0x14] sm:$0xf]  ;;  %v214_v13 = vld [vmem:[%s2496_s20 + $0x8] sm:$0xf]  ;;  %v215_v14 = vld [vmem:[%s2496_s20 + $0xc] sm:$0xf] }
  0x14   : > { %v449_v15 = vsel %vm260_vm1, %v232_v11, 0  ;;  %v495_v16 = vsel %vm260_vm1, %v233_v12, 0  ;;  %v234_v17 = vld [vmem:[%s2486_s17 + $0x18] sm:$0xf]  ;;  %v235_v18 = vld [vmem:[%s2486_s17 + $0x1c] sm:$0xf] }
  0x15   : > { %v216_v19 = vld [vmem:[%s2496_s20 + $0x10] sm:$0xf]  ;;  %v217_v20 = vld [vmem:[%s2496_s20 + $0x14] sm:$0xf]  ;;  %v541_v21 = vsel %vm260_vm1, %v234_v17, 0  ;;  %v587_v22 = vsel %vm260_vm1, %v235_v18, 0 }
  0x16   : > { %v236_v23 = vld [vmem:[%s2486_s17 + $0x20] sm:$0xf]  ;;  %v237_v24 = vld [vmem:[%s2486_s17 + $0x24] sm:$0xf]  ;;  %v218_v25 = vld [vmem:[%s2496_s20 + $0x18] sm:$0xf] }
  0x17   : > { %v219_v26 = vld [vmem:[%s2496_s20 + $0x1c] sm:$0xf]  ;;  %v633_v27 = vsel %vm260_vm1, %v236_v23, 0  ;;  %v679_v28 = vsel %vm260_vm1, %v237_v24, 0  ;;  %v238_v29 = vld [vmem:[%s2486_s17 + $0x28] sm:$0xf] }
  0x18   : > { %v239_v30 = vld [vmem:[%s2486_s17 + $0x2c] sm:$0xf]  ;;  %v220_v31 = vld [vmem:[%s2496_s20 + $0x20] sm:$0xf]  ;;  %v221_v32 = vld [vmem:[%s2496_s20 + $0x24] sm:$0xf] }
  0x19   : > { %2173 = vmatmul.mubr.msk.bf16.vlgmr.msra.gmra.mrb[0].mxu0 %vm260_vm1, %v212_v7  ;;  %2179 = vmatmul.mubr.msk.bf16.vlgmr.msra.gmra.mrb[0].mxu1 %vm260_vm1, %v213_v8  ;;  %v725_v33 = vsel %vm260_vm1, %v238_v29, 0  ;;  %v771_v34 = vsel %vm260_vm1, %v239_v30, 0  ;;  %v240_v35 = vld [vmem:[%s2486_s17 + $0x30] sm:$0xf]  ;;  %v241_v36 = vld [vmem:[%s2486_s17 + $0x34] sm:$0xf] }
  0x1a   : > { %2183 = vmatpush3.bf16.xpose.msra.mxu0 %v357_v9  ;;  %2189 = vmatpush3.bf16.xpose.msra.mxu1 %v403_v10  ;;  %v222_v37 = vld [vmem:[%s2496_s20 + $0x28] sm:$0xf]  ;;  %v223_v38 = vld [vmem:[%s2496_s20 + $0x2c] sm:$0xf]  ;;  %v817_v39 = vsel %vm260_vm1, %v240_v35, 0  ;;  %v863_v40 = vsel %vm260_vm1, %v241_v36, 0 }
  0x1b   : > { %2184 = vmatprep.mubr.msk.bf16.mxu0 %vm2445_vm0, %v2444_v0  ;;  %2190 = vmatprep.mubr.msk.bf16.mxu1 %vm2445_vm0, %v2444_v0  ;;  %v242_v41 = vld [vmem:[%s2486_s17 + $0x38] sm:$0xf]  ;;  %v243_v42 = vld [vmem:[%s2486_s17 + $0x3c] sm:$0xf]  ;;  %v224_v43 = vld [vmem:[%s2496_s20 + $0x30] sm:$0xf] }
  0x1c   : > { %2194 = vmatprep.subr.bf16.mxu0 %v2444_v0  ;;  %2200 = vmatprep.subr.bf16.mxu1 %v2444_v0  ;;  %v225_v44 = vld [vmem:[%s2496_s20 + $0x34] sm:$0xf]  ;;  %v909_v45 = vsel %vm260_vm1, %v242_v41, 0  ;;  %v955_v46 = vsel %vm260_vm1, %v243_v42, 0  ;;  %v226_v47 = vld [vmem:[%s2496_s20 + $0x38] sm:$0xf] }
  0x1d   : > { %v227_v48 = vld [vmem:[%s2496_s20 + $0x3c] sm:$0xf] }
  0x21   : > { %2185 = vmatmul.mubr.msk.bf16.vlgmr.msra.gmra.mrb[4].mxu0 %vm260_vm1, %v214_v13  ;;  %2191 = vmatmul.mubr.msk.bf16.vlgmr.msra.gmra.mrb[4].mxu1 %vm260_vm1, %v215_v14 }
  0x22   : > { %2195 = vmatpush3.bf16.xpose.msra.mxu0 %v449_v15  ;;  %2201 = vmatpush3.bf16.xpose.msra.mxu1 %v495_v16 }
  0x23   : > { %2196 = vmatprep.mubr.msk.bf16.mxu0 %vm2445_vm0, %v2444_v0  ;;  %2202 = vmatprep.mubr.msk.bf16.mxu1 %vm2445_vm0, %v2444_v0 }
  0x24   : > { %2206 = vmatprep.subr.bf16.mxu0 %v2444_v0  ;;  %2212 = vmatprep.subr.bf16.mxu1 %v2444_v0 }
  0x29   : > { %2197 = vmatmul.mubr.msk.bf16.vlgmr.msra.gmra.mrb[8].mxu0 %vm260_vm1, %v216_v19  ;;  %2203 = vmatmul.mubr.msk.bf16.vlgmr.msra.gmra.mrb[8].mxu1 %vm260_vm1, %v217_v20 }
  0x2a   : > { %2207 = vmatpush3.bf16.xpose.msra.mxu0 %v541_v21  ;;  %2213 = vmatpush3.bf16.xpose.msra.mxu1 %v587_v22 }
  0x2b   : > { %2208 = vmatprep.mubr.msk.bf16.mxu0 %vm2445_vm0, %v2444_v0  ;;  %2214 = vmatprep.mubr.msk.bf16.mxu1 %vm2445_vm0, %v2444_v0 }
  0x2c   : > { %2218 = vmatprep.subr.bf16.mxu0 %v2444_v0  ;;  %2224 = vmatprep.subr.bf16.mxu1 %v2444_v0 }
  0x31   : > { %2209 = vmatmul.mubr.msk.bf16.vlgmr.msra.gmra.mrb[12].mxu0 %vm260_vm1, %v218_v25  ;;  %2215 = vmatmul.mubr.msk.bf16.vlgmr.msra.gmra.mrb[12].mxu1 %vm260_vm1, %v219_v26 }
  0x32   : > { %2219 = vmatpush3.bf16.xpose.msra.mxu0 %v633_v27  ;;  %2225 = vmatpush3.bf16.xpose.msra.mxu1 %v679_v28 }
  0x33   : > { %2220 = vmatprep.mubr.msk.bf16.mxu0 %vm2445_vm0, %v2444_v0  ;;  %2226 = vmatprep.mubr.msk.bf16.mxu1 %vm2445_vm0, %v2444_v0 }
  0x34   : > { %2230 = vmatprep.subr.bf16.mxu0 %v2444_v0  ;;  %2236 = vmatprep.subr.bf16.mxu1 %v2444_v0 }
  0x39   : > { %2221 = vmatmul.mubr.msk.bf16.vlgmr.msra.gmra.mrb[16].mxu0 %vm260_vm1, %v220_v31  ;;  %2227 = vmatmul.mubr.msk.bf16.vlgmr.msra.gmra.mrb[16].mxu1 %vm260_vm1, %v221_v32 }
  0x3a   : > { %2231 = vmatpush3.bf16.xpose.msra.mxu0 %v725_v33  ;;  %2237 = vmatpush3.bf16.xpose.msra.mxu1 %v771_v34 }
  0x3b   : > { %2232 = vmatprep.mubr.msk.bf16.mxu0 %vm2445_vm0, %v2444_v0  ;;  %2238 = vmatprep.mubr.msk.bf16.mxu1 %vm2445_vm0, %v2444_v0 }
  0x3c   : > { %2242 = vmatprep.subr.bf16.mxu0 %v2444_v0  ;;  %2248 = vmatprep.subr.bf16.mxu1 %v2444_v0 }
  0x41   : > { %2233 = vmatmul.mubr.msk.bf16.vlgmr.msra.gmra.mrb[20].mxu0 %vm260_vm1, %v222_v37  ;;  %2239 = vmatmul.mubr.msk.bf16.vlgmr.msra.gmra.mrb[20].mxu1 %vm260_vm1, %v223_v38 }
  0x42   : > { %2243 = vmatpush3.bf16.xpose.msra.mxu0 %v817_v39  ;;  %2249 = vmatpush3.bf16.xpose.msra.mxu1 %v863_v40 }
  0x43   : > { %2244 = vmatprep.mubr.msk.bf16.mxu0 %vm2445_vm0, %v2444_v0  ;;  %2250 = vmatprep.mubr.msk.bf16.mxu1 %vm2445_vm0, %v2444_v0 }
  0x44   : > { %2254 = vmatprep.subr.bf16.mxu0 %v2444_v0  ;;  %2260 = vmatprep.subr.bf16.mxu1 %v2444_v0 }
  0x49   : > { %2245 = vmatmul.mubr.msk.bf16.vlgmr.msra.gmra.mrb[24].mxu0 %vm260_vm1, %v224_v43  ;;  %2251 = vmatmul.mubr.msk.bf16.vlgmr.msra.gmra.mrb[24].mxu1 %vm260_vm1, %v225_v44 }
  0x4a   : > { %2255 = vmatpush3.bf16.xpose.msra.mxu0 %v909_v45  ;;  %2261 = vmatpush3.bf16.xpose.msra.mxu1 %v955_v46 }
  0x4b   : > { %2256 = vmatprep.mubr.msk.bf16.mxu0 %vm2445_vm0, %v2444_v0  ;;  %2262 = vmatprep.mubr.msk.bf16.mxu1 %vm2445_vm0, %v2444_v0 }
  0x4c   : > { %2266 = vmatprep.subr.bf16.mxu0 %v2444_v0  ;;  %2272 = vmatprep.subr.bf16.mxu1 %v2444_v0 }
  0x51   : > { %2257 = vmatmul.mubr.msk.bf16.vlgmr.msra.gmra.mrb[28].mxu0 %vm260_vm1, %v226_v47  ;;  %2263 = vmatmul.mubr.msk.bf16.vlgmr.msra.gmra.mrb[28].mxu1 %vm260_vm1, %v227_v48 }
  0x52   : > { %2268 = vmatprep.mubr.msk.bf16.mxu0 %vm2445_vm0, %v2444_v0  ;;  %2274 = vmatprep.mubr.msk.bf16.mxu1 %vm2445_vm0, %v2444_v0 }
  0xec   : > { %v301_v49 = vpop.f32.mrb[0].mxu0  ;;  %v347_v50 = vpop.f32.mrb[0].mxu1 }
  0xed   : > { %v2606_v51 = vmul.f32 0.17677669, %v301_v49  ;;  %v2174_v52 = vpop.f32.mrb[1].mxu0  ;;  %v2608_v53 = vmul.f32 0.17677669, %v347_v50  ;;  %v2180_v54 = vpop.f32.mrb[1].mxu1 }
  0xee   : > { %v304_v55 = vpop.f32.mrb[2].mxu0  ;;  %v350_v56 = vpop.f32.mrb[2].mxu1 }
  0xef   : > { %v2175_v57 = vpop.f32.mrb[3].mxu0  ;;  %v1014_v58 = vsel %vm1013_vm2, %v2606_v51, -inf  ;;  %v2181_v59 = vpop.f32.mrb[3].mxu1  ;;  %v1017_v60 = vsel %vm1013_vm2, %v2608_v53, -inf }
  0xf0   : > { %1015 = vmax.xlane.f32.xlu0 %v1014_v58 }
  0xf4   : > { %1018 = vmax.xlane.f32.xlu0 %v1017_v60  ;;  %v393_v61 = vpop.f32.mrb[4].mxu0  ;;  %v439_v62 = vpop.f32.mrb[4].mxu1 }
  0xf5   : > { %v2614_v63 = vmul.f32 0.17677669, %v393_v61  ;;  %v2186_v1 = vpop.f32.mrb[5].mxu0  ;;  %v2616_v2 = vmul.f32 0.17677669, %v439_v62  ;;  %v2192_v3 = vpop.f32.mrb[5].mxu1 }
  0xf6   : > { %v396_v4 = vpop.f32.mrb[6].mxu0  ;;  %v442_v5 = vpop.f32.mrb[6].mxu1 }
  0xf7   : > { %v2187_v6 = vpop.f32.mrb[7].mxu0  ;;  %v1020_v7 = vsel %vm1013_vm2, %v2614_v63, -inf  ;;  %v2193_v8 = vpop.f32.mrb[7].mxu1  ;;  %v1023_v9 = vsel %vm1013_vm2, %v2616_v2, -inf }
  0xf8   : > { %1021 = vmax.xlane.f32.xlu1 %v1020_v7 }
  0xfc   : > { %v531_v10 = vpop.f32.mrb[8].mxu1  ;;  %1024 = vmax.xlane.f32.xlu1 %v1023_v9  ;;  %v485_v11 = vpop.f32.mrb[8].mxu0 }
  0xfd   : > { %v2622_v12 = vmul.f32 0.17677669, %v531_v10  ;;  %v2624_v13 = vmul.f32 0.17677669, %v485_v11  ;;  %v2198_v14 = vpop.f32.mrb[9].mxu0  ;;  %v2204_v15 = vpop.f32.mrb[9].mxu1 }
  0xfe   : > { %v534_v16 = vpop.f32.mrb[10].mxu1  ;;  %v488_v17 = vpop.f32.mrb[10].mxu0 }
  0xff   : > { %v1029_v18 = vsel %vm1013_vm2, %v2622_v12, -inf  ;;  %v1026_v19 = vsel %vm1013_vm2, %v2624_v13, -inf  ;;  %v2199_v20 = vpop.f32.mrb[11].mxu0  ;;  %v2205_v21 = vpop.f32.mrb[11].mxu1 }
 0x100   : > { %1030 = vmax.xlane.f32.xlu1 %v1029_v18  ;;  %1027 = vmax.xlane.f32.xlu0 %v1026_v19 }
 0x104   : > { %v577_v22 = vpop.f32.mrb[12].mxu0  ;;  %v623_v23 = vpop.f32.mrb[12].mxu1 }
 0x105   : > { %v2630_v24 = vmul.f32 0.17677669, %v577_v22  ;;  %v2632_v25 = vmul.f32 0.17677669, %v623_v23  ;;  %v2210_v26 = vpop.f32.mrb[13].mxu0  ;;  %v2216_v27 = vpop.f32.mrb[13].mxu1 }
 0x106   : > { %v626_v28 = vpop.f32.mrb[14].mxu1  ;;  %v580_v29 = vpop.f32.mrb[14].mxu0 }
 0x107   : > { %v1035_v30 = vsel %vm1013_vm2, %v2632_v25, -inf  ;;  %v1032_v31 = vsel %vm1013_vm2, %v2630_v24, -inf  ;;  %v2211_v32 = vpop.f32.mrb[15].mxu0  ;;  %v2217_v33 = vpop.f32.mrb[15].mxu1 }
 0x108   : > { %1036 = vmax.xlane.f32.xlu1 %v1035_v30  ;;  %1033 = vmax.xlane.f32.xlu0 %v1032_v31 }
 0x10c   : > { %v669_v34 = vpop.f32.mrb[16].mxu0  ;;  %v715_v35 = vpop.f32.mrb[16].mxu1 }
 0x10d   : > { %v2638_v36 = vmul.f32 0.17677669, %v669_v34  ;;  %v2640_v37 = vmul.f32 0.17677669, %v715_v35  ;;  %v2222_v38 = vpop.f32.mrb[17].mxu0  ;;  %v2228_v39 = vpop.f32.mrb[17].mxu1 }
 0x10e   : > { %v718_v40 = vpop.f32.mrb[18].mxu1  ;;  %v672_v41 = vpop.f32.mrb[18].mxu0 }
 0x10f   : > { %v1041_v42 = vsel %vm1013_vm2, %v2640_v37, -inf  ;;  %v1038_v43 = vsel %vm1013_vm2, %v2638_v36, -inf  ;;  %v2223_v44 = vpop.f32.mrb[19].mxu0  ;;  %v2229_v45 = vpop.f32.mrb[19].mxu1 }
 0x110   : > { %1042 = vmax.xlane.f32.xlu1 %v1041_v42  ;;  %1039 = vmax.xlane.f32.xlu0 %v1038_v43 }
 0x114   : > { %v761_v46 = vpop.f32.mrb[20].mxu0  ;;  %v807_v47 = vpop.f32.mrb[20].mxu1 }
 0x115   : > { %v2646_v48 = vmul.f32 0.17677669, %v761_v46  ;;  %v2648_v49 = vmul.f32 0.17677669, %v807_v47  ;;  %v2234_v50 = vpop.f32.mrb[21].mxu0  ;;  %v2240_v52 = vpop.f32.mrb[21].mxu1 }
 0x116   : > { %v810_v54 = vpop.f32.mrb[22].mxu1  ;;  %v764_v55 = vpop.f32.mrb[22].mxu0 }
 0x117   : > { %v1047_v56 = vsel %vm1013_vm2, %v2648_v49, -inf  ;;  %v1044_v57 = vsel %vm1013_vm2, %v2646_v48, -inf  ;;  %v2235_v58 = vpop.f32.mrb[23].mxu0  ;;  %v2241_v59 = vpop.f32.mrb[23].mxu1 }
 0x118   : > { %1048 = vmax.xlane.f32.xlu1 %v1047_v56  ;;  %1045 = vmax.xlane.f32.xlu0 %v1044_v57 }
 0x11c   : > { %v853_v60 = vpop.f32.mrb[24].mxu0  ;;  %v899_v61 = vpop.f32.mrb[24].mxu1 }
 0x11d   : > { %v2654_v62 = vmul.f32 0.17677669, %v853_v60  ;;  %v2656_v1 = vmul.f32 0.17677669, %v899_v61  ;;  %v2246_v3 = vpop.f32.mrb[25].mxu0  ;;  %v2252_v4 = vpop.f32.mrb[25].mxu1 }
 0x11e   : > { %v902_v5 = vpop.f32.mrb[26].mxu1  ;;  %v856_v6 = vpop.f32.mrb[26].mxu0 }
 0x11f   : > { %v1053_v7 = vsel %vm1013_vm2, %v2656_v1, -inf  ;;  %v1050_v8 = vsel %vm1013_vm2, %v2654_v62, -inf  ;;  %v2247_v9 = vpop.f32.mrb[27].mxu0  ;;  %v2253_v10 = vpop.f32.mrb[27].mxu1 }
 0x120   : > { %1054 = vmax.xlane.f32.xlu1 %v1053_v7  ;;  %1051 = vmax.xlane.f32.xlu0 %v1050_v8 }
 0x124   : > { %v945_v11 = vpop.f32.mrb[28].mxu0  ;;  %v991_v14 = vpop.f32.mrb[28].mxu1 }
 0x125   : > { %v2662_v15 = vmul.f32 0.17677669, %v945_v11  ;;  %v2664_v16 = vmul.f32 0.17677669, %v991_v14  ;;  %v2258_v17 = vpop.f32.mrb[29].mxu0  ;;  %v2264_v18 = vpop.f32.mrb[29].mxu1 }
 0x126   : > { %v994_v19 = vpop.f32.mrb[30].mxu1  ;;  %v948_v20 = vpop.f32.mrb[30].mxu0  ;;  %v244_v18 = vld [vmem:[%s2718_s23] sm:$0xf] }
 0x127   : > { %v1059_v21 = vsel %vm1013_vm2, %v2664_v16, -inf  ;;  %v1056_v22 = vsel %vm1013_vm2, %v2662_v15, -inf  ;;  %v2259_v23 = vpop.f32.mrb[31].mxu0  ;;  %v2265_v26 = vpop.f32.mrb[31].mxu1 }
 0x128   : > { %1060 = vmax.xlane.f32.xlu1 %v1059_v21  ;;  %1057 = vmax.xlane.f32.xlu0 %v1056_v22 }
 0x17d   : > { %v1016_v27 = vpop.xlane.xlu0 %1015 }
 0x17e   : > { %v1062_v28 = vsub.f32 %v2606_v51, %v1016_v27 }
 0x180   : > { %v1078_v29 = vmul.f32 1.442695, %v1062_v28 }
 0x181   : > { %v1019_v30 = vpop.xlane.xlu0 %1018 }
 0x182   : > { %2372 = vpow2.f32 %v1078_v29  ;;  %v1063_v31 = vsub.f32 %v2608_v53, %v1019_v30 }
 0x184   : > { %v1080_v32 = vmul.f32 1.442695, %v1063_v31 }
 0x185   : > { %v1022_v33 = vpop.xlane.xlu1 %1021 }
 0x186   : > { %2374 = vpow2.f32 %v1080_v32  ;;  %v1064_v34 = vsub.f32 %v2614_v63, %v1022_v33  ;;  %v246_v32 = vld [vmem:[%s2718_s23 + $0x8] sm:$0xf] }
 0x188   : > { %v1082_v35 = vmul.f32 1.442695, %v1064_v34 }
 0x189   : > { %v1025_v38 = vpop.xlane.xlu1 %1024 }
 0x18a   : > { %2376 = vpow2.f32 %v1082_v35  ;;  %v1065_v39 = vsub.f32 %v2616_v2, %v1025_v38  ;;  %v2738_v35 = vsel %vm1209_vm3, %v246_v32, 0  ;;  %v247_v38 = vld [vmem:[%s2718_s23 + $0xc] sm:$0xf] }
 0x18c   : > { %v2674_v40 = vpop.eup %2372  ;;  %v1084_v41 = vmul.f32 1.442695, %v1065_v39 }
 0x18d   : > { %v1031_v42 = vpop.xlane.xlu1 %1030  ;;  %v1028_v51 = vpop.xlane.xlu0 %1027  ;;  %v1110_v43 = vsel %vm1013_vm2, %v2674_v40, 0.0 }
 0x18e   : > { %2378 = vpow2.f32 %v1084_v41  ;;  %v1067_v53 = vsub.f32 %v2622_v12, %v1031_v42  ;;  %v1066_v44 = vsub.f32 %v2624_v13, %v1028_v51  ;;  %1111 = vadd.xlane.f32.xlu0 %v1110_v43 }
 0x190   : > { %v2680_v63 = vpop.eup %2374  ;;  %v1088_v45 = vmul.f32 1.442695, %v1067_v53  ;;  %v1086_v46 = vmul.f32 1.442695, %v1066_v44 }
 0x191   : > { %v1113_v2 = vsel %vm1013_vm2, %v2680_v63, 0.0 }
 0x192   : > { %2380 = vpow2.f32 %v1088_v45  ;;  %1114 = vadd.xlane.f32.xlu1 %v1113_v2  ;;  %v248_v45 = vld [vmem:[%s2718_s23 + $0x10] sm:$0xf] }
 0x193   : > { %2382 = vpow2.f32 %v1086_v46 }
 0x194   : > { %v2684_v47 = vpop.eup %2376 }
 0x195   : > { %v1037_v50 = vpop.xlane.xlu1 %1036  ;;  %v1034_v52 = vpop.xlane.xlu0 %1033  ;;  %v1116_v12 = vsel %vm1013_vm2, %v2684_v47, 0.0 }
 0x196   : > { %v1069_v13 = vsub.f32 %v2632_v25, %v1037_v50  ;;  %v1068_v54 = vsub.f32 %v2630_v24, %v1034_v52  ;;  %1117 = vadd.xlane.f32.xlu0 %v1116_v12  ;;  %v2756_v50 = vsel %vm1209_vm3, %v248_v45, 0  ;;  %v249_v52 = vld [vmem:[%s2718_s23 + $0x14] sm:$0xf] }
 0x198   : > { %v2690_v55 = vpop.eup %2378  ;;  %v1092_v56 = vmul.f32 1.442695, %v1069_v13  ;;  %v1090_v57 = vmul.f32 1.442695, %v1068_v54 }
 0x199   : > { %v1119_v58 = vsel %vm1013_vm2, %v2690_v55, 0.0 }
 0x19a   : > { %2384 = vpow2.f32 %v1092_v56  ;;  %1120 = vadd.xlane.f32.xlu1 %v1119_v58  ;;  %v250_v56 = vld [vmem:[%s2718_s23 + $0x18] sm:$0xf]  ;;  %v251_v58 = vld [vmem:[%s2718_s23 + $0x1c] sm:$0xf] }
 0x19b   : > { %2386 = vpow2.f32 %v1090_v57  ;;  %v2772_v57 = vsel %vm1209_vm3, %v250_v56, 0 }
 0x19c   : > { %v2694_v59 = vpop.eup %2380 }
 0x19d   : > { %v2696_v60 = vpop.eup %2382  ;;  %v1043_v61 = vpop.xlane.xlu1 %1042  ;;  %v1125_v24 = vsel %vm1013_vm2, %v2694_v59, 0.0 }
 0x19e   : > { %v1040_v3 = vpop.xlane.xlu0 %1039  ;;  %v1071_v25 = vsub.f32 %v2640_v37, %v1043_v61  ;;  %1126 = vadd.xlane.f32.xlu1 %v1125_v24  ;;  %v1122_v5 = vsel %vm1013_vm2, %v2696_v60, 0.0 }
 0x19f   : > { %v1070_v4 = vsub.f32 %v2638_v36, %v1040_v3  ;;  %1123 = vadd.xlane.f32.xlu0 %v1122_v5  ;;  %v2778_v3 = vsel %vm1209_vm3, %v251_v58, 0  ;;  %v252_v5 = vld [vmem:[%s2718_s23 + $0x20] sm:$0xf] }
 0x1a0   : > { %v1096_v6 = vmul.f32 1.442695, %v1071_v25 }
 0x1a1   : > { %v1094_v7 = vmul.f32 1.442695, %v1070_v4 }
 0x1a2   : > { %2388 = vpow2.f32 %v1096_v6  ;;  %v2788_v6 = vsel %vm1209_vm3, %v252_v5, 0 }
 0x1a3   : > { %2390 = vpow2.f32 %v1094_v7  ;;  %v253_v7 = vld [vmem:[%s2718_s23 + $0x24] sm:$0xf] }
 0x1a4   : > { %v2704_v8 = vpop.eup %2384 }
 0x1a5   : > { %v2706_v9 = vpop.eup %2386  ;;  %v1049_v10 = vpop.xlane.xlu1 %1048  ;;  %v1131_v37 = vsel %vm1013_vm2, %v2704_v8, 0.0 }
 0x1a6   : > { %v1046_v11 = vpop.xlane.xlu0 %1045  ;;  %v1073_v36 = vsub.f32 %v2648_v49, %v1049_v10  ;;  %1132 = vadd.xlane.f32.xlu1 %v1131_v37  ;;  %v1128_v17 = vsel %vm1013_vm2, %v2706_v9, 0.0  ;;  %v1211_v49 = vsel %vm1209_vm3, %v244_v18, 0  ;;  %v2792_v10 = vsel %vm1209_vm3, %v253_v7, 0 }
 0x1a7   : > { %v1072_v14 = vsub.f32 %v2646_v48, %v1046_v11  ;;  %1129 = vadd.xlane.f32.xlu0 %v1128_v17  ;;  %2267 = vmatpush3.bf16.msra.mxu0 %v1211_v49  ;;  %v245_v48 = vld [vmem:[%s2718_s23 + $0x4] sm:$0xf]  ;;  %v254_v11 = vld [vmem:[%s2718_s23 + $0x28] sm:$0xf]  ;;  %v256_v17 = vld [vmem:[%s2718_s23 + $0x30] sm:$0xf] }
 0x1a8   : > { %v1100_v19 = vmul.f32 1.442695, %v1073_v36  ;;  %2278 = vmatprep.subr.bf16.mxu0 %v2444_v0  ;;  %v1257_v22 = vsel %vm1209_vm3, %v245_v48, 0  ;;  %v2796_v37 = vsel %vm1209_vm3, %v254_v11, 0  ;;  %v255_v36 = vld [vmem:[%s2718_s23 + $0x2c] sm:$0xf] }
 0x1a9   : > { %v1098_v20 = vmul.f32 1.442695, %v1072_v14  ;;  %2273 = vmatpush3.bf16.msra.mxu1 %v1257_v22  ;;  %v2800_v14 = vsel %vm1209_vm3, %v255_v36, 0  ;;  %v2804_v18 = vsel %vm1209_vm3, %v256_v17, 0  ;;  %v258_v49 = vld [vmem:[%s2718_s23 + $0x38] sm:$0xf] }
 0x1aa   : > { %2392 = vpow2.f32 %v1100_v19  ;;  %2284 = vmatprep.subr.bf16.mxu1 %v2444_v0  ;;  %v257_v19 = vld [vmem:[%s2718_s23 + $0x34] sm:$0xf]  ;;  %v2812_v48 = vsel %vm1209_vm3, %v258_v49, 0  ;;  %v259_v22 = vld [vmem:[%s2718_s23 + $0x3c] sm:$0xf] }
 0x1ab   : > { %2394 = vpow2.f32 %v1098_v20  ;;  %v2808_v20 = vsel %vm1209_vm3, %v257_v19, 0 }
 0x1ac   : > { %v2724_v21 = vpop.eup %2388 }
 0x1ad   : > { %v2727_v23 = vpop.eup %2390  ;;  %v1055_v26 = vpop.xlane.xlu1 %1054  ;;  %v1137_v28 = vsel %vm1013_vm2, %v2724_v21, 0.0 }
 0x1ae   : > { %v1052_v27 = vpop.xlane.xlu0 %1051  ;;  %v1075_v29 = vsub.f32 %v2656_v1, %v1055_v26  ;;  %1138 = vadd.xlane.f32.xlu1 %v1137_v28  ;;  %v1134_v31 = vsel %vm1013_vm2, %v2727_v23, 0.0  ;;  %v2816_v26 = vsel %vm1209_vm3, %v259_v22, 0 }
 0x1af   : > { %v1074_v30 = vsub.f32 %v2654_v62, %v1052_v27  ;;  %1135 = vadd.xlane.f32.xlu0 %v1134_v31  ;;  %v2744_v62 = vsel %vm1209_vm3, %v247_v38, 0 }
 0x1b0   : > { %v1104_v33 = vmul.f32 1.442695, %v1075_v29 }
 0x1b1   : > { %v1102_v34 = vmul.f32 1.442695, %v1074_v30 }
 0x1b2   : > { %2396 = vpow2.f32 %v1104_v33 }
 0x1b3   : > { %2398 = vpow2.f32 %v1102_v34 }
 0x1b4   : > { %v2741_v1 = vpop.eup %2392 }
 0x1b5   : > { %v2746_v39 = vpop.eup %2394  ;;  %v1061_v41 = vpop.xlane.xlu1 %1060  ;;  %v1143_v51 = vsel %vm1013_vm2, %v2741_v1, 0.0 }
 0x1b6   : > { %v1058_v42 = vpop.xlane.xlu0 %1057  ;;  %v1077_v43 = vsub.f32 %v2664_v16, %v1061_v41  ;;  %1144 = vadd.xlane.f32.xlu1 %v1143_v51  ;;  %v1140_v44 = vsel %vm1013_vm2, %v2746_v39, 0.0 }
 0x1b7   : > { %v1076_v53 = vsub.f32 %v2662_v15, %v1058_v42  ;;  %1141 = vadd.xlane.f32.xlu0 %v1140_v44  ;;  %v2762_v15 = vsel %vm1209_vm3, %v249_v52, 0 }
 0x1b8   : > { %v1108_v46 = vmul.f32 1.442695, %v1077_v43 }
 0x1b9   : > { %v1106_v2 = vmul.f32 1.442695, %v1076_v53 }
 0x1ba   : > { %2400 = vpow2.f32 %v1108_v46 }
 0x1bb   : > { %2402 = vpow2.f32 %v1106_v2 }
 0x1bc   : > { %v2759_v12 = vpop.eup %2396 }
 0x1bd   : > { %v2764_v16 = vpop.eup %2398  ;;  %v1149_v13 = vsel %vm1013_vm2, %v2759_v12, 0.0 }
 0x1be   : > { %1150 = vadd.xlane.f32.xlu1 %v1149_v13  ;;  %v1146_v54 = vsel %vm1013_vm2, %v2764_v16, 0.0 }
 0x1bf   : > { %1147 = vadd.xlane.f32.xlu0 %v1146_v54 }
 0x1c4   : > { %v2775_v61 = vpop.eup %2400 }
 0x1c5   : > { %v2780_v24 = vpop.eup %2402  ;;  %v1155_v25 = vsel %vm1013_vm2, %v2775_v61, 0.0 }
 0x1c6   : > { %1156 = vadd.xlane.f32.xlu1 %v1155_v25  ;;  %v1152_v4 = vsel %vm1013_vm2, %v2780_v24, 0.0 }
 0x1c7   : > { %1153 = vadd.xlane.f32.xlu0 %v1152_v4 }
 0x21b   : > { %v1112_v27 = vpop.xlane.xlu0 %1111 }
 0x21c   : > { %2404 = vrcp.f32 %v1112_v27 }
 0x21f   : > { %v1115_v28 = vpop.xlane.xlu1 %1114 }
 0x220   : > { %2406 = vrcp.f32 %v1115_v28 }
 0x223   : > { %v1118_v29 = vpop.xlane.xlu0 %1117 }
 0x224   : > { %2408 = vrcp.f32 %v1118_v29 }
 0x226   : > { %v2405_v30 = vpop.eup %2404 }
 0x227   : > { %v1174_v31 = vmul.f32 %v2405_v30, %v2674_v40  ;;  %v1121_v32 = vpop.xlane.xlu1 %1120 }
 0x228   : > { %2410 = vrcp.f32 %v1121_v32 }
 0x229   : > { %v1190_v33 = vpack.c.bf16 %v1174_v31, %v1174_v31 }
 0x22a   : > { %v2407_v34 = vpop.eup %2406 }
 0x22b   : > { %v1175_v38 = vmul.f32 %v2407_v34, %v2680_v63  ;;  %v1127_v41 = vpop.xlane.xlu1 %1126  ;;  %2269 = vmatmul.mubr.msk.bf16.vlgmr.msra.gmra.mrb[32].mxu0 %vm1013_vm2, %v1190_v33 }
 0x22c   : > { %2412 = vrcp.f32 %v1127_v41  ;;  %v1124_v42 = vpop.xlane.xlu0 %1123  ;;  %2279 = vmatpush3.bf16.msra.mxu0 %v2738_v35  ;;  %2280 = vmatprep.mubr.msk.bf16.mxu0 %vm2445_vm0, %v2444_v0 }
 0x22d   : > { %2414 = vrcp.f32 %v1124_v42  ;;  %v1191_v51 = vpack.c.bf16 %v1175_v38, %v1175_v38  ;;  %2290 = vmatprep.subr.bf16.mxu0 %v2444_v0 }
 0x22e   : > { %v2409_v40 = vpop.eup %2408 }
 0x22f   : > { %v1176_v43 = vmul.f32 %v2409_v40, %v2684_v47  ;;  %2275 = vmatmul.mubr.msk.bf16.vlgmr.msra.gmra.mrb[32].mxu1 %vm1013_vm2, %v1191_v51 }
 0x230   : > { %2285 = vmatpush3.bf16.msra.mxu1 %v2744_v62  ;;  %2286 = vmatprep.mubr.msk.bf16.mxu1 %vm2445_vm0, %v2444_v0 }
 0x231   : > { %v1192_v63 = vpack.c.bf16 %v1176_v43, %v1176_v43  ;;  %2296 = vmatprep.subr.bf16.mxu1 %v2444_v0 }
 0x232   : > { %v2411_v35 = vpop.eup %2410 }
 0x233   : > { %v1177_v53 = vmul.f32 %v2411_v35, %v2690_v55  ;;  %v1133_v44 = vpop.xlane.xlu1 %1132  ;;  %2281 = vmatmul.mubr.msk.bf16.vlgmr.msra.gmra.mrb[36].mxu0 %vm1013_vm2, %v1192_v63 }
 0x234   : > { %2416 = vrcp.f32 %v1133_v44  ;;  %v1130_v45 = vpop.xlane.xlu0 %1129  ;;  %2291 = vmatpush3.bf16.msra.mxu0 %v2756_v50  ;;  %2292 = vmatprep.mubr.msk.bf16.mxu0 %vm2445_vm0, %v2444_v0 }
 0x235   : > { %2418 = vrcp.f32 %v1130_v45  ;;  %v1193_v47 = vpack.c.bf16 %v1177_v53, %v1177_v53  ;;  %2302 = vmatprep.subr.bf16.mxu0 %v2444_v0 }
 0x236   : > { %v2413_v62 = vpop.eup %2412 }
 0x237   : > { %v2415_v46 = vpop.eup %2414  ;;  %2287 = vmatmul.mubr.msk.bf16.vlgmr.msra.gmra.mrb[36].mxu1 %vm1013_vm2, %v1193_v47  ;;  %v1179_v2 = vmul.f32 %v2413_v62, %v2694_v59 }
 0x238   : > { %v1178_v55 = vmul.f32 %v2415_v46, %v2696_v60  ;;  %2297 = vmatpush3.bf16.msra.mxu1 %v2762_v15  ;;  %2298 = vmatprep.mubr.msk.bf16.mxu1 %vm2445_vm0, %v2444_v0 }
 0x239   : > { %2308 = vmatprep.subr.bf16.mxu1 %v2444_v0  ;;  %v1195_v54 = vpack.c.bf16 %v1179_v2, %v1179_v2 }
 0x23a   : > { %v1194_v50 = vpack.c.bf16 %v1178_v55, %v1178_v55 }
 0x23b   : > { %v1139_v52 = vpop.xlane.xlu1 %1138 }
 0x23c   : > { %2420 = vrcp.f32 %v1139_v52  ;;  %2293 = vmatmul.mubr.msk.bf16.vlgmr.msra.gmra.mrb[40].mxu0 %vm1013_vm2, %v1194_v50  ;;  %v1136_v13 = vpop.xlane.xlu0 %1135 }
 0x23d   : > { %2422 = vrcp.f32 %v1136_v13  ;;  %2303 = vmatpush3.bf16.msra.mxu0 %v2772_v57  ;;  %2304 = vmatprep.mubr.msk.bf16.mxu0 %vm2445_vm0, %v2444_v0 }
 0x23e   : > { %v2417_v60 = vpop.eup %2416  ;;  %2314 = vmatprep.subr.bf16.mxu0 %v2444_v0 }
 0x23f   : > { %v2419_v15 = vpop.eup %2418  ;;  %2299 = vmatmul.mubr.msk.bf16.vlgmr.msra.gmra.mrb[40].mxu1 %vm1013_vm2, %v1195_v54  ;;  %v1181_v56 = vmul.f32 %v2417_v60, %v2704_v8 }
 0x240   : > { %v1180_v59 = vmul.f32 %v2419_v15, %v2706_v9  ;;  %2309 = vmatpush3.bf16.msra.mxu1 %v2778_v3  ;;  %2310 = vmatprep.mubr.msk.bf16.mxu1 %vm2445_vm0, %v2444_v0 }
 0x241   : > { %2320 = vmatprep.subr.bf16.mxu1 %v2444_v0  ;;  %v1197_v4 = vpack.c.bf16 %v1181_v56, %v1181_v56 }
 0x242   : > { %v1196_v57 = vpack.c.bf16 %v1180_v59, %v1180_v59 }
 0x243   : > { %v1145_v58 = vpop.xlane.xlu1 %1144 }
 0x244   : > { %2424 = vrcp.f32 %v1145_v58  ;;  %2305 = vmatmul.mubr.msk.bf16.vlgmr.msra.gmra.mrb[44].mxu0 %vm1013_vm2, %v1196_v57  ;;  %v1142_v25 = vpop.xlane.xlu0 %1141 }
 0x245   : > { %2426 = vrcp.f32 %v1142_v25  ;;  %2315 = vmatpush3.bf16.msra.mxu0 %v2788_v6  ;;  %2316 = vmatprep.mubr.msk.bf16.mxu0 %vm2445_vm0, %v2444_v0 }
 0x246   : > { %v2421_v9 = vpop.eup %2420  ;;  %2326 = vmatprep.subr.bf16.mxu0 %v2444_v0 }
 0x247   : > { %v2423_v3 = vpop.eup %2422  ;;  %2311 = vmatmul.mubr.msk.bf16.vlgmr.msra.gmra.mrb[44].mxu1 %vm1013_vm2, %v1197_v4  ;;  %v1183_v5 = vmul.f32 %v2421_v9, %v2724_v21 }
 0x248   : > { %v1182_v8 = vmul.f32 %v2423_v3, %v2727_v23  ;;  %2321 = vmatpush3.bf16.msra.mxu1 %v2792_v10  ;;  %2322 = vmatprep.mubr.msk.bf16.mxu1 %vm2445_vm0, %v2444_v0 }
 0x249   : > { %2332 = vmatprep.subr.bf16.mxu1 %v2444_v0  ;;  %v1199_v36 = vpack.c.bf16 %v1183_v5, %v1183_v5 }
 0x24a   : > { %v1198_v6 = vpack.c.bf16 %v1182_v8, %v1182_v8 }
 0x24b   : > { %v1151_v7 = vpop.xlane.xlu1 %1150 }
 0x24c   : > { %2428 = vrcp.f32 %v1151_v7  ;;  %2317 = vmatmul.mubr.msk.bf16.vlgmr.msra.gmra.mrb[48].mxu0 %vm1013_vm2, %v1198_v6  ;;  %v1148_v11 = vpop.xlane.xlu0 %1147 }
 0x24d   : > { %2430 = vrcp.f32 %v1148_v11  ;;  %2327 = vmatpush3.bf16.msra.mxu0 %v2796_v37  ;;  %2328 = vmatprep.mubr.msk.bf16.mxu0 %vm2445_vm0, %v2444_v0 }
 0x24e   : > { %v2425_v23 = vpop.eup %2424  ;;  %2338 = vmatprep.subr.bf16.mxu0 %v2444_v0 }
 0x24f   : > { %v2427_v10 = vpop.eup %2426  ;;  %2323 = vmatmul.mubr.msk.bf16.vlgmr.msra.gmra.mrb[48].mxu1 %vm1013_vm2, %v1199_v36  ;;  %v1185_v17 = vmul.f32 %v2425_v23, %v2741_v1 }
 0x250   : > { %v1184_v21 = vmul.f32 %v2427_v10, %v2746_v39  ;;  %2333 = vmatpush3.bf16.msra.mxu1 %v2800_v14  ;;  %2334 = vmatprep.mubr.msk.bf16.mxu1 %vm2445_vm0, %v2444_v0 }
 0x251   : > { %2344 = vmatprep.subr.bf16.mxu1 %v2444_v0  ;;  %v1201_v22 = vpack.c.bf16 %v1185_v17, %v1185_v17 }
 0x252   : > { %v1200_v37 = vpack.c.bf16 %v1184_v21, %v1184_v21 }
 0x253   : > { %v1157_v19 = vpop.xlane.xlu1 %1156 }
 0x254   : > { %2432 = vrcp.f32 %v1157_v19  ;;  %2329 = vmatmul.mubr.msk.bf16.vlgmr.msra.gmra.mrb[52].mxu0 %vm1013_vm2, %v1200_v37  ;;  %v1154_v49 = vpop.xlane.xlu0 %1153 }
 0x255   : > { %2434 = vrcp.f32 %v1154_v49  ;;  %2339 = vmatpush3.bf16.msra.mxu0 %v2804_v18  ;;  %2340 = vmatprep.mubr.msk.bf16.mxu0 %vm2445_vm0, %v2444_v0 }
 0x256   : > { %v2429_v39 = vpop.eup %2428  ;;  %2350 = vmatprep.subr.bf16.mxu0 %v2444_v0 }
 0x257   : > { %v2431_v14 = vpop.eup %2430  ;;  %2335 = vmatmul.mubr.msk.bf16.vlgmr.msra.gmra.mrb[52].mxu1 %vm1013_vm2, %v1201_v22  ;;  %v1187_v27 = vmul.f32 %v2429_v39, %v2759_v12 }
 0x258   : > { %v1186_v1 = vmul.f32 %v2431_v14, %v2764_v16  ;;  %2345 = vmatpush3.bf16.msra.mxu1 %v2808_v20  ;;  %2346 = vmatprep.mubr.msk.bf16.mxu1 %vm2445_vm0, %v2444_v0 }
 0x259   : > { %2356 = vmatprep.subr.bf16.mxu1 %v2444_v0  ;;  %v1203_v28 = vpack.c.bf16 %v1187_v27, %v1187_v27 }
 0x25a   : > { %v1202_v18 = vpack.c.bf16 %v1186_v1, %v1186_v1 }
 0x25c   : > { %2341 = vmatmul.mubr.msk.bf16.vlgmr.msra.gmra.mrb[56].mxu0 %vm1013_vm2, %v1202_v18 }
 0x25d   : > { %2351 = vmatpush3.bf16.msra.mxu0 %v2812_v48  ;;  %2352 = vmatprep.mubr.msk.bf16.mxu0 %vm2445_vm0, %v2444_v0 }
 0x25e   : > { %v2433_v16 = vpop.eup %2432 }
 0x25f   : > { %v2435_v29 = vpop.eup %2434  ;;  %2347 = vmatmul.mubr.msk.bf16.vlgmr.msra.gmra.mrb[56].mxu1 %vm1013_vm2, %v1203_v28  ;;  %v1189_v12 = vmul.f32 %v2433_v16, %v2775_v61 }
 0x260   : > { %v1188_v20 = vmul.f32 %v2435_v29, %v2780_v24  ;;  %2357 = vmatpush3.bf16.msra.mxu1 %v2816_v26  ;;  %2358 = vmatprep.mubr.msk.bf16.mxu1 %vm2445_vm0, %v2444_v0 }
 0x261   : > { %v1205_v48 = vpack.c.bf16 %v1189_v12, %v1189_v12 }
 0x262   : > { %v1204_v30 = vpack.c.bf16 %v1188_v20, %v1188_v20 }
 0x264   : > { %2353 = vmatmul.mubr.msk.bf16.vlgmr.msra.gmra.mrb[60].mxu0 %vm1013_vm2, %v1204_v30 }
 0x267   : > { %2359 = vmatmul.mubr.msk.bf16.vlgmr.msra.gmra.mrb[60].mxu1 %vm1013_vm2, %v1205_v48 }
 0x2fe   : > { %v1247_v24 = vpop.f32.mrb[32].mxu0 }
 0x2ff   : > { %v1943_v26 = vpack.c.bf16 %v1247_v24, %v1247_v24  ;;  %v2270_v0 = vpop.f32.mrb[33].mxu0 }
 0x300   : > { %v1250_v31 = vpop.f32.mrb[34].mxu0 }
 0x301   : > { %1960 = vst.msk [vmem:[%s2908_s26] sm:$0xf] %vm1959_vm4, %v1943_v26  ;;  %v2271_v61 = vpop.f32.mrb[35].mxu0 }
 0x302   : > { %v1293_v32 = vpop.f32.mrb[32].mxu1 }
 0x303   : > { %v1944_v33 = vpack.c.bf16 %v1293_v32, %v1293_v32  ;;  %v2276_v34 = vpop.f32.mrb[33].mxu1 }
 0x304   : > { %v1296_v38 = vpop.f32.mrb[34].mxu1 }
 0x305   : > { %1961 = vst.msk [vmem:[%s2908_s26 + $0x4] sm:$0xf] %vm1959_vm4, %v1944_v33  ;;  %v2277_v41 = vpop.f32.mrb[35].mxu1 }
 0x306   : > { %v1339_v42 = vpop.f32.mrb[36].mxu0 }
 0x307   : > { %v1945_v51 = vpack.c.bf16 %v1339_v42, %v1339_v42  ;;  %v2282_v40 = vpop.f32.mrb[37].mxu0 }
 0x308   : > { %v1342_v43 = vpop.f32.mrb[38].mxu0 }
 0x309   : > { %1962 = vst.msk [vmem:[%s2908_s26 + $0x8] sm:$0xf] %vm1959_vm4, %v1945_v51  ;;  %v2283_v63 = vpop.f32.mrb[39].mxu0 }
 0x30a   : > { %v1385_v35 = vpop.f32.mrb[36].mxu1 }
 0x30b   : > { %v1946_v53 = vpack.c.bf16 %v1385_v35, %v1385_v35  ;;  %v2288_v44 = vpop.f32.mrb[37].mxu1 }
 0x30c   : > { %v1388_v45 = vpop.f32.mrb[38].mxu1 }
 0x30d   : > { %1963 = vst.msk [vmem:[%s2908_s26 + $0xc] sm:$0xf] %vm1959_vm4, %v1946_v53  ;;  %v2289_v47 = vpop.f32.mrb[39].mxu1 }
 0x30f   : > { %v1431_v62 = vpop.f32.mrb[40].mxu0 }
 0x310   : > { %v1947_v46 = vpack.c.bf16 %v1431_v62, %v1431_v62  ;;  %v2294_v55 = vpop.f32.mrb[41].mxu0 }
 0x311   : > { %v1434_v2 = vpop.f32.mrb[42].mxu0 }
 0x312   : > { %1964 = vst.msk [vmem:[%s2908_s26 + $0x10] sm:$0xf] %vm1959_vm4, %v1947_v46  ;;  %v2295_v50 = vpop.f32.mrb[43].mxu0  ;;  %v1477_v52 = vpop.f32.mrb[40].mxu1 }
 0x313   : > { %v1948_v13 = vpack.c.bf16 %v1477_v52, %v1477_v52  ;;  %v2300_v54 = vpop.f32.mrb[41].mxu1 }
 0x314   : > { %v1480_v60 = vpop.f32.mrb[42].mxu1 }
 0x315   : > { %1965 = vst.msk [vmem:[%s2908_s26 + $0x14] sm:$0xf] %vm1959_vm4, %v1948_v13  ;;  %v2301_v15 = vpop.f32.mrb[43].mxu1 }
 0x317   : > { %v1523_v59 = vpop.f32.mrb[44].mxu0 }
 0x318   : > { %v1949_v56 = vpack.c.bf16 %v1523_v59, %v1523_v59  ;;  %v2306_v57 = vpop.f32.mrb[45].mxu0 }
 0x319   : > { %v1526_v58 = vpop.f32.mrb[46].mxu0 }
 0x31a   : > { %1966 = vst.msk [vmem:[%s2908_s26 + $0x18] sm:$0xf] %vm1959_vm4, %v1949_v56  ;;  %v2307_v25 = vpop.f32.mrb[47].mxu0  ;;  %v1569_v4 = vpop.f32.mrb[44].mxu1 }
 0x31b   : > { %v1950_v9 = vpack.c.bf16 %v1569_v4, %v1569_v4  ;;  %v2312_v3 = vpop.f32.mrb[45].mxu1 }
 0x31c   : > { %v1572_v8 = vpop.f32.mrb[46].mxu1 }
 0x31d   : > { %1967 = vst.msk [vmem:[%s2908_s26 + $0x1c] sm:$0xf] %vm1959_vm4, %v1950_v9  ;;  %v2313_v5 = vpop.f32.mrb[47].mxu1 }
 0x31f   : > { %v1615_v6 = vpop.f32.mrb[48].mxu0 }
 0x320   : > { %v1951_v7 = vpack.c.bf16 %v1615_v6, %v1615_v6  ;;  %v2318_v11 = vpop.f32.mrb[49].mxu0 }
 0x321   : > { %v1618_v36 = vpop.f32.mrb[50].mxu0 }
 0x322   : > { %1968 = vst.msk [vmem:[%s2908_s26 + $0x20] sm:$0xf] %vm1959_vm4, %v1951_v7  ;;  %v2319_v23 = vpop.f32.mrb[51].mxu0  ;;  %v1661_v10 = vpop.f32.mrb[48].mxu1 }
 0x323   : > { %v1952_v21 = vpack.c.bf16 %v1661_v10, %v1661_v10  ;;  %v2324_v17 = vpop.f32.mrb[49].mxu1 }
 0x324   : > { %v1664_v37 = vpop.f32.mrb[50].mxu1 }
 0x325   : > { %1969 = vst.msk [vmem:[%s2908_s26 + $0x24] sm:$0xf] %vm1959_vm4, %v1952_v21  ;;  %v2325_v19 = vpop.f32.mrb[51].mxu1 }
 0x327   : > { %v1707_v49 = vpop.f32.mrb[52].mxu0 }
 0x328   : > { %v1953_v22 = vpack.c.bf16 %v1707_v49, %v1707_v49  ;;  %v2330_v39 = vpop.f32.mrb[53].mxu0 }
 0x329   : > { %v1710_v14 = vpop.f32.mrb[54].mxu0 }
 0x32a   : > { %1970 = vst.msk [vmem:[%s2908_s26 + $0x28] sm:$0xf] %vm1959_vm4, %v1953_v22  ;;  %v2331_v1 = vpop.f32.mrb[55].mxu0  ;;  %v1753_v27 = vpop.f32.mrb[52].mxu1 }
 0x32b   : > { %v1954_v18 = vpack.c.bf16 %v1753_v27, %v1753_v27  ;;  %v2336_v28 = vpop.f32.mrb[53].mxu1 }
 0x32c   : > { %v1756_v16 = vpop.f32.mrb[54].mxu1 }
 0x32d   : > { %1971 = vst.msk [vmem:[%s2908_s26 + $0x2c] sm:$0xf] %vm1959_vm4, %v1954_v18  ;;  %v2337_v29 = vpop.f32.mrb[55].mxu1 }
 0x32f   : > { %v1799_v20 = vpop.f32.mrb[56].mxu0 }
 0x330   : > { %v1955_v12 = vpack.c.bf16 %v1799_v20, %v1799_v20  ;;  %v2342_v30 = vpop.f32.mrb[57].mxu0 }
 0x331   : > { %v1802_v48 = vpop.f32.mrb[58].mxu0 }
 0x332   : > { %1972 = vst.msk [vmem:[%s2908_s26 + $0x30] sm:$0xf] %vm1959_vm4, %v1955_v12  ;;  %v2343_v24 = vpop.f32.mrb[59].mxu0  ;;  %v1845_v26 = vpop.f32.mrb[56].mxu1 }
 0x333   : > { %v1956_v0 = vpack.c.bf16 %v1845_v26, %v1845_v26  ;;  %v2348_v31 = vpop.f32.mrb[57].mxu1 }
 0x334   : > { %v1848_v61 = vpop.f32.mrb[58].mxu1 }
 0x335   : > { %1973 = vst.msk [vmem:[%s2908_s26 + $0x34] sm:$0xf] %vm1959_vm4, %v1956_v0  ;;  %v2349_v32 = vpop.f32.mrb[59].mxu1 }
 0x337   : > { %v1891_v33 = vpop.f32.mrb[60].mxu0 }
 0x338   : > { %v1957_v34 = vpack.c.bf16 %v1891_v33, %v1891_v33  ;;  %v2354_v38 = vpop.f32.mrb[61].mxu0 }
 0x339   : > { %v1894_v41 = vpop.f32.mrb[62].mxu0 }
 0x33a   : > { %1974 = vst.msk [vmem:[%s2908_s26 + $0x38] sm:$0xf] %vm1959_vm4, %v1957_v34  ;;  %v2355_v42 = vpop.f32.mrb[63].mxu0  ;;  %v1937_v51 = vpop.f32.mrb[60].mxu1 }
 0x33b   : > { %v1958_v40 = vpack.c.bf16 %v1937_v51, %v1937_v51  ;;  %v2360_v43 = vpop.f32.mrb[61].mxu1 }
 0x33c   : > { %v1940_v63 = vpop.f32.mrb[62].mxu1 }
 0x33d   : > { %1975 = vst.msk [vmem:[%s2908_s26 + $0x3c] sm:$0xf] %vm1959_vm4, %v1958_v40  ;;  %v2361_v35 = vpop.f32.mrb[63].mxu1 }
 0x33e PF: > { %s13_s12 = sadd.s32 1, %s2442_s12  }
 0x33f   : > { %p10_p4 = scmp.ge.s32.totalorder %s13_s12, 4  }
 0x341   :  { %12 = sbr.rel (!%p10_p4) target bundleno = 1 (0x1), region = 68 }

// kernel: closed_call.60
= control target key start
LH: loop header
LB: loop body
LE: loop exit
PB: predicated region body
PF: predicated region fallthrough
CT: control target
= control target key end

     0   :  { %s273_s0 = inlined_call_operand.vmem [shape: bf16[16,512], index: 0, kind: input, shape index: {}]   ;;  %s274_s1 = inlined_call_operand.vmem [shape: bf16[16,512], index: 1, kind: input, shape index: {}]   ;;  %s275_s2 = inlined_call_operand.vmem [shape: f32[1,512], index: 2, kind: input, shape index: {}]   ;;  %s276_s3 = inlined_call_operand.vmem [shape: f32[1,512], index: 3, kind: input, shape index: {}]   ;;  %s277_s4 = inlined_call_operand.vmem [shape: bf16[16,512], index: 4, kind: output, shape index: {}]  }
   0x1   :  { %v17_v0 = vld [vmem:[%s273_s0] sm:$0xff]  ;;  %v18_v1 = vld [vmem:[%s273_s0 + $0x8] sm:$0xff]  ;;  %v19_v8 = vld [vmem:[%s273_s0 + $0x10] sm:$0xff] }
   0x2   :  { %v29_v2 = vld [vmem:[%s274_s1] sm:$0xff]  ;;  %v21_v3 = vunpack.c.l.bf16 %v17_v0  ;;  %v22_v4 = vunpack.c.h.bf16 %v17_v0  ;;  %v23_v5 = vunpack.c.l.bf16 %v18_v1  ;;  %v24_v6 = vunpack.c.h.bf16 %v18_v1  ;;  %v30_v7 = vld [vmem:[%s274_s1 + $0x8] sm:$0xff]  ;;  %v20_v9 = vld [vmem:[%s273_s0 + $0x18] sm:$0xff] }
   0x3   :  { %v33_v10 = vunpack.c.l.bf16 %v29_v2  ;;  %v34_v11 = vunpack.c.h.bf16 %v29_v2  ;;  %v35_v12 = vunpack.c.l.bf16 %v30_v7  ;;  %v36_v13 = vunpack.c.h.bf16 %v30_v7  ;;  %v31_v14 = vld [vmem:[%s274_s1 + $0x10] sm:$0xff]  ;;  %v32_v15 = vld [vmem:[%s274_s1 + $0x18] sm:$0xff] }
   0x4   :  { %v25_v16 = vunpack.c.l.bf16 %v19_v8  ;;  %v26_v17 = vunpack.c.h.bf16 %v19_v8  ;;  %v27_v18 = vunpack.c.l.bf16 %v20_v9  ;;  %v28_v22 = vunpack.c.h.bf16 %v20_v9 }
   0x5   :  { %v41_v19 = vadd.f32 %v33_v10, %v21_v3  ;;  %v42_v20 = vadd.f32 %v34_v11, %v22_v4  ;;  %v43_v21 = vadd.f32 %v35_v12, %v23_v5  ;;  %v37_v23 = vunpack.c.l.bf16 %v31_v14  ;;  %v49_v12 = vld [vmem:[%s275_s2] sm:$0xf] }
   0x6   :  { %v38_v24 = vunpack.c.h.bf16 %v31_v14  ;;  %v39_v25 = vunpack.c.l.bf16 %v32_v15  ;;  %v40_v26 = vunpack.c.h.bf16 %v32_v15  ;;  %v44_v27 = vadd.f32 %v36_v13, %v24_v6  ;;  %v50_v13 = vld [vmem:[%s276_s3] sm:$0xf] }
   0x7   :  { %v51_v28 = vadd.f32 %v42_v20, %v41_v19  ;;  %v45_v29 = vadd.f32 %v37_v23, %v25_v16  ;;  %v105_v2 = vlaneseq }
   0x8   :  { %v46_v30 = vadd.f32 %v38_v24, %v26_v17  ;;  %v47_v31 = vadd.f32 %v39_v25, %v27_v18  ;;  %v48_v33 = vadd.f32 %v40_v26, %v28_v22 }
   0x9   :  { %v52_v32 = vadd.f32 %v51_v28, %v43_v21  ;;  %v106_v6 = vshrl.u32 %v105_v2, 7 }
   0xa   :  { %v56_v34 = vadd.f32 %v46_v30, %v45_v29 }
   0xb   :  { %v53_v35 = vadd.f32 %v52_v32, %v44_v27  ;;  %v107_v8 = vsub.s32 0, %v106_v6  ;;  %v111_v9 = vsub.s32 1, %v106_v6  ;;  %v115_v10 = vsub.s32 2, %v106_v6 }
   0xc   :  { %v57_v36 = vadd.f32 %v56_v34, %v47_v31  ;;  %v119_v11 = vsub.s32 3, %v106_v6 }
   0xd   :  { %54 = vadd.xlane.f32.xlu0 %v53_v35  ;;  %v108_v14 = vrot.slane %v49_v12, %v107_v8  ;;  %v112_v15 = vrot.slane %v49_v12, %v111_v9  ;;  %v116_v16 = vrot.slane %v49_v12, %v115_v10 }
   0xe   :  { %v58_v37 = vadd.f32 %v57_v36, %v48_v33  ;;  %v120_v17 = vrot.slane %v49_v12, %v119_v11  ;;  %v149_v22 = vrot.slane %v50_v13, %v119_v11 }
  0x11   :  { %59 = vadd.xlane.f32.xlu0 %v58_v37 }
  0x9a   :  { %v55_v38 = vpop.xlane.xlu0 %54 }
  0x9b   :  { %v62_v39 = vmul.f32 0.001953125, %v55_v38 }
  0x9d   :  { %v64_v40 = vsub.f32 %v41_v19, %v62_v39  ;;  %v65_v41 = vsub.f32 %v42_v20, %v62_v39  ;;  %v66_v42 = vsub.f32 %v43_v21, %v62_v39  ;;  %v67_v44 = vsub.f32 %v44_v27, %v62_v39 }
  0x9e   :  { %v60_v43 = vpop.xlane.xlu0 %59  ;;  %v137_v19 = vrot.slane %v50_v13, %v107_v8  ;;  %v141_v20 = vrot.slane %v50_v13, %v111_v9  ;;  %v145_v21 = vrot.slane %v50_v13, %v115_v10 }
  0x9f   :  { %v63_v45 = vmul.f32 0.001953125, %v60_v43  ;;  %v72_v46 = vmul.f32 %v64_v40, %v64_v40  ;;  %v73_v47 = vmul.f32 %v65_v41, %v65_v41  ;;  %v74_v48 = vmul.f32 %v66_v42, %v66_v42 }
  0xa0   :  { %v75_v53 = vmul.f32 %v67_v44, %v67_v44 }
  0xa1   :  { %v68_v49 = vsub.f32 %v45_v29, %v63_v45  ;;  %v69_v50 = vsub.f32 %v46_v30, %v63_v45  ;;  %v80_v51 = vadd.f32 %v73_v47, %v72_v46  ;;  %v70_v52 = vsub.f32 %v47_v31, %v63_v45 }
  0xa2   :  { %v71_v55 = vsub.f32 %v48_v33, %v63_v45 }
  0xa3   :  { %v81_v54 = vadd.f32 %v80_v51, %v74_v48  ;;  %v76_v56 = vmul.f32 %v68_v49, %v68_v49  ;;  %v77_v57 = vmul.f32 %v69_v50, %v69_v50  ;;  %v78_v59 = vmul.f32 %v70_v52, %v70_v52 }
  0xa4   :  { %v79_v61 = vmul.f32 %v71_v55, %v71_v55 }
  0xa5   :  { %v82_v58 = vadd.f32 %v81_v54, %v75_v53  ;;  %v85_v60 = vadd.f32 %v77_v57, %v76_v56 }
  0xa7   :  { %83 = vadd.xlane.f32.xlu1 %v82_v58  ;;  %v86_v62 = vadd.f32 %v85_v60, %v78_v59 }
  0xa9   :  { %v87_v63 = vadd.f32 %v86_v62, %v79_v61 }
  0xab   :  { %88 = vadd.xlane.f32.xlu1 %v87_v63 }
 0x134   :  { %v84_v0 = vpop.xlane.xlu1 %83 }
 0x135   :  { %v90_v1 = vmul.f32 0.001953125, %v84_v0 }
 0x137   :  { %v92_v3 = vadd.f32 1e-05, %v90_v1 }
 0x138   :  { %v89_v4 = vpop.xlane.xlu1 %88 }
 0x139   :  { %202 = vrsqrt.f32 %v92_v3  ;;  %v91_v5 = vmul.f32 0.001953125, %v89_v4 }
 0x13b   :  { %v93_v7 = vadd.f32 1e-05, %v91_v5 }
 0x13d   :  { %204 = vrsqrt.f32 %v93_v7 }
 0x143   :  { %v203_v18 = vpop.eup %202 }
 0x144   :  { %v96_v23 = vmul.f32 %v203_v18, %v64_v40  ;;  %v97_v24 = vmul.f32 %v203_v18, %v65_v41  ;;  %v98_v25 = vmul.f32 %v203_v18, %v66_v42  ;;  %v99_v26 = vmul.f32 %v203_v18, %v67_v44 }
 0x146   :  { %v125_v27 = vmul.f32 %v108_v14, %v96_v23  ;;  %v126_v28 = vmul.f32 %v112_v15, %v97_v24  ;;  %v127_v29 = vmul.f32 %v116_v16, %v98_v25  ;;  %v128_v30 = vmul.f32 %v120_v17, %v99_v26 }
 0x147   :  { %v205_v31 = vpop.eup %204 }
 0x148   :  { %v154_v32 = vadd.f32 %v137_v19, %v125_v27  ;;  %v155_v33 = vadd.f32 %v141_v20, %v126_v28  ;;  %v156_v34 = vadd.f32 %v145_v21, %v127_v29  ;;  %v157_v35 = vadd.f32 %v149_v22, %v128_v30 }
 0x149   :  { %v100_v36 = vmul.f32 %v205_v31, %v68_v49  ;;  %v101_v37 = vmul.f32 %v205_v31, %v69_v50  ;;  %v102_v38 = vmul.f32 %v205_v31, %v70_v52  ;;  %v103_v39 = vmul.f32 %v205_v31, %v71_v55 }
 0x14a   :  { %v198_v43 = vpack.c.bf16 %v155_v33, %v154_v32  ;;  %v199_v45 = vpack.c.bf16 %v157_v35, %v156_v34 }
 0x14b   :  { %v129_v46 = vmul.f32 %v108_v14, %v100_v36  ;;  %v130_v40 = vmul.f32 %v112_v15, %v101_v37  ;;  %v131_v41 = vmul.f32 %v116_v16, %v102_v38  ;;  %v132_v42 = vmul.f32 %v120_v17, %v103_v39 }
 0x14c   :  { %186 = vst [vmem:[%s277_s4] sm:$0xff] %v198_v43  ;;  %187 = vst [vmem:[%s277_s4 + $0x8] sm:$0xff] %v199_v45 }
 0x14d   :  { %v158_v44 = vadd.f32 %v137_v19, %v129_v46  ;;  %v159_v47 = vadd.f32 %v141_v20, %v130_v40  ;;  %v160_v48 = vadd.f32 %v145_v21, %v131_v41  ;;  %v161_v49 = vadd.f32 %v149_v22, %v132_v42 }
 0x14f   :  { %v200_v50 = vpack.c.bf16 %v159_v47, %v158_v44  ;;  %v201_v51 = vpack.c.bf16 %v161_v49, %v160_v48 }
 0x151   :  { %188 = vst [vmem:[%s277_s4 + $0x10] sm:$0xff] %v200_v50  ;;  %189 = vst [vmem:[%s277_s4 + $0x18] sm:$0xff] %v201_v51 }

// kernel: closed_call.59
= control target key start
LH: loop header
LB: loop body
LE: loop exit
PB: predicated region body
PF: predicated region fallthrough
CT: control target
= control target key end

     0   :  { %s1817_s1 = inlined_call_operand.vmem [shape: bf16[512,512], index: 1, kind: input, shape index: {}]   ;;  %s1818_s0 = inlined_call_operand.vmem [shape: bf16[16,512], index: 0, kind: input, shape index: {}]   ;;  %s1819_s2 = inlined_call_operand.vmem [shape: f32[1,512], index: 2, kind: input, shape index: {}]   ;;  %s1820_s3 = inlined_call_operand.vmem [shape: bf16[16,512], index: 3, kind: output, shape index: {}]  }
   0x1   :  { %v1188_v0 = vld [vmem:[%s1817_s1 + $0x4] ss:$16 sps:$4 sm:$0xff]   ;;  %v1190_v1 = vld [vmem:[%s1817_s1 + $0xc] ss:$16 sps:$4 sm:$0xff]   ;;  %v1192_v2 = vld [vmem:[%s1817_s1] ss:$16 sps:$4 sm:$0xff]  }
   0x2   :  { %828 = vmatprep.subr.bf16.mxu0 %v1188_v0  ;;  %v1193_v3 = vld [vmem:[%s1817_s1 + $0x8] ss:$16 sps:$4 sm:$0xff]   ;;  %914 = vmatprep.subr.bf16.mxu1 %v1190_v1  ;;  %v1194_v4 = vld [vmem:[%s1817_s1 + $0x24] ss:$16 sps:$4 sm:$0xff]   ;;  %v1196_v5 = vld [vmem:[%s1817_s1 + $0x2c] ss:$16 sps:$4 sm:$0xff]  }
   0x3   :  { %829 = vmatpush1.bf16.msra.mxu0 %v1192_v2  ;;  %915 = vmatpush1.bf16.msra.mxu1 %v1193_v3  ;;  %v1198_v6 = vld [vmem:[%s1817_s1 + $0x20] ss:$16 sps:$4 sm:$0xff]   ;;  %v1199_v7 = vld [vmem:[%s1817_s1 + $0x28] ss:$16 sps:$4 sm:$0xff]   ;;  %v1200_v8 = vld [vmem:[%s1817_s1 + $0x44] ss:$16 sps:$4 sm:$0xff]  }
   0x4   :  { %830 = vmatprep.subr.bf16.mxu0 %v1194_v4  ;;  %916 = vmatprep.subr.bf16.mxu1 %v1196_v5  ;;  %v1202_v9 = vld [vmem:[%s1817_s1 + $0x4c] ss:$16 sps:$4 sm:$0xff]   ;;  %v1204_v10 = vld [vmem:[%s1817_s1 + $0x40] ss:$16 sps:$4 sm:$0xff]   ;;  %v1205_v11 = vld [vmem:[%s1817_s1 + $0x48] ss:$16 sps:$4 sm:$0xff]  }
   0x5   :  { %v1206_v12 = vld [vmem:[%s1817_s1 + $0x64] ss:$16 sps:$4 sm:$0xff]   ;;  %v1208_v13 = vld [vmem:[%s1817_s1 + $0x6c] ss:$16 sps:$4 sm:$0xff]   ;;  %v1210_v14 = vld [vmem:[%s1817_s1 + $0x60] ss:$16 sps:$4 sm:$0xff]  }
   0x6   :  { %v1211_v15 = vld [vmem:[%s1817_s1 + $0x68] ss:$16 sps:$4 sm:$0xff]   ;;  %v1212_v16 = vld [vmem:[%s1817_s1 + $0x84] ss:$16 sps:$4 sm:$0xff]   ;;  %v1214_v17 = vld [vmem:[%s1817_s1 + $0x8c] ss:$16 sps:$4 sm:$0xff]  }
   0x7   :  { %831 = vmatpush1.bf16.msra.mxu0 %v1198_v6  ;;  %917 = vmatpush1.bf16.msra.mxu1 %v1199_v7  ;;  %v1216_v18 = vld [vmem:[%s1817_s1 + $0x80] ss:$16 sps:$4 sm:$0xff]   ;;  %v1217_v19 = vld [vmem:[%s1817_s1 + $0x88] ss:$16 sps:$4 sm:$0xff]   ;;  %v1218_v20 = vld [vmem:[%s1817_s1 + $0xa4] ss:$16 sps:$4 sm:$0xff]  }
   0x8   :  { %832 = vmatprep.subr.bf16.mxu0 %v1200_v8  ;;  %918 = vmatprep.subr.bf16.mxu1 %v1202_v9  ;;  %v1220_v21 = vld [vmem:[%s1817_s1 + $0xac] ss:$16 sps:$4 sm:$0xff]   ;;  %v1222_v22 = vld [vmem:[%s1817_s1 + $0xa0] ss:$16 sps:$4 sm:$0xff]   ;;  %v1223_v23 = vld [vmem:[%s1817_s1 + $0xa8] ss:$16 sps:$4 sm:$0xff]  }
   0x9   :  { %v1224_v24 = vld [vmem:[%s1817_s1 + $0xc4] ss:$16 sps:$4 sm:$0xff]   ;;  %v1226_v25 = vld [vmem:[%s1817_s1 + $0xcc] ss:$16 sps:$4 sm:$0xff]   ;;  %v1228_v26 = vld [vmem:[%s1817_s1 + $0xc0] ss:$16 sps:$4 sm:$0xff]  }
   0xa   :  { %v1229_v27 = vld [vmem:[%s1817_s1 + $0xc8] ss:$16 sps:$4 sm:$0xff]   ;;  %v1230_v28 = vld [vmem:[%s1817_s1 + $0xe4] ss:$16 sps:$4 sm:$0xff]   ;;  %v1232_v29 = vld [vmem:[%s1817_s1 + $0xec] ss:$16 sps:$4 sm:$0xff]  }
   0xb   :  { %833 = vmatpush1.bf16.msra.mxu0 %v1204_v10  ;;  %919 = vmatpush1.bf16.msra.mxu1 %v1205_v11  ;;  %v1234_v30 = vld [vmem:[%s1817_s1 + $0xe0] ss:$16 sps:$4 sm:$0xff]   ;;  %v1235_v31 = vld [vmem:[%s1817_s1 + $0xe8] ss:$16 sps:$4 sm:$0xff]   ;;  %v1236_v32 = vld [vmem:[%s1817_s1 + $0x104] ss:$16 sps:$4 sm:$0xff]  }
   0xc   :  { %834 = vmatprep.subr.bf16.mxu0 %v1206_v12  ;;  %920 = vmatprep.subr.bf16.mxu1 %v1208_v13  ;;  %v1238_v33 = vld [vmem:[%s1817_s1 + $0x10c] ss:$16 sps:$4 sm:$0xff]   ;;  %v1240_v34 = vld [vmem:[%s1817_s1 + $0x100] ss:$16 sps:$4 sm:$0xff]   ;;  %v1241_v35 = vld [vmem:[%s1817_s1 + $0x108] ss:$16 sps:$4 sm:$0xff]  }
   0xd   :  { %v1242_v36 = vld [vmem:[%s1817_s1 + $0x124] ss:$16 sps:$4 sm:$0xff]   ;;  %v1244_v37 = vld [vmem:[%s1817_s1 + $0x12c] ss:$16 sps:$4 sm:$0xff]   ;;  %v1246_v38 = vld [vmem:[%s1817_s1 + $0x120] ss:$16 sps:$4 sm:$0xff]  }
   0xe   :  { %v1247_v39 = vld [vmem:[%s1817_s1 + $0x128] ss:$16 sps:$4 sm:$0xff]   ;;  %v1248_v40 = vld [vmem:[%s1817_s1 + $0x144] ss:$16 sps:$4 sm:$0xff]   ;;  %v1250_v41 = vld [vmem:[%s1817_s1 + $0x14c] ss:$16 sps:$4 sm:$0xff]  }
   0xf   :  { %835 = vmatpush1.bf16.msra.mxu0 %v1210_v14  ;;  %921 = vmatpush1.bf16.msra.mxu1 %v1211_v15  ;;  %v1252_v42 = vld [vmem:[%s1817_s1 + $0x140] ss:$16 sps:$4 sm:$0xff]   ;;  %v1253_v43 = vld [vmem:[%s1817_s1 + $0x148] ss:$16 sps:$4 sm:$0xff]   ;;  %v1254_v44 = vld [vmem:[%s1817_s1 + $0x164] ss:$16 sps:$4 sm:$0xff]  }
  0x10   :  { %836 = vmatprep.subr.bf16.mxu0 %v1212_v16  ;;  %922 = vmatprep.subr.bf16.mxu1 %v1214_v17  ;;  %v1256_v45 = vld [vmem:[%s1817_s1 + $0x16c] ss:$16 sps:$4 sm:$0xff]   ;;  %v1258_v46 = vld [vmem:[%s1817_s1 + $0x160] ss:$16 sps:$4 sm:$0xff]   ;;  %v1259_v47 = vld [vmem:[%s1817_s1 + $0x168] ss:$16 sps:$4 sm:$0xff]  }
  0x11   :  { %v1286_v48 = vld [vmem:[%s1818_s0 + $0x4] ss:$16 sps:$4 sm:$0xff]   ;;  %v1262_v50 = vld [vmem:[%s1817_s1 + $0x18c] ss:$16 sps:$4 sm:$0xff]   ;;  %v1264_v51 = vld [vmem:[%s1817_s1 + $0x180] ss:$16 sps:$4 sm:$0xff]  }
  0x12   :  { %v1260_v49 = vld [vmem:[%s1817_s1 + $0x184] ss:$16 sps:$4 sm:$0xff]   ;;  %860 = vmatprep.mubr.bf16.mxu0 %v1286_v48  ;;  %946 = vmatprep.mubr.bf16.mxu1 %v1286_v48  ;;  %v1265_v52 = vld [vmem:[%s1817_s1 + $0x188] ss:$16 sps:$4 sm:$0xff]   ;;  %v1268_v54 = vld [vmem:[%s1817_s1 + $0x1ac] ss:$16 sps:$4 sm:$0xff]  }
  0x13   :  { %837 = vmatpush1.bf16.msra.mxu0 %v1216_v18  ;;  %923 = vmatpush1.bf16.msra.mxu1 %v1217_v19  ;;  %v1266_v53 = vld [vmem:[%s1817_s1 + $0x1a4] ss:$16 sps:$4 sm:$0xff]   ;;  %v1270_v55 = vld [vmem:[%s1817_s1 + $0x1a0] ss:$16 sps:$4 sm:$0xff]   ;;  %v1271_v56 = vld [vmem:[%s1817_s1 + $0x1a8] ss:$16 sps:$4 sm:$0xff]  }
  0x14   :  { %838 = vmatprep.subr.bf16.mxu0 %v1218_v20  ;;  %924 = vmatprep.subr.bf16.mxu1 %v1220_v21  ;;  %v1272_v57 = vld [vmem:[%s1817_s1 + $0x1c4] ss:$16 sps:$4 sm:$0xff]   ;;  %v1274_v58 = vld [vmem:[%s1817_s1 + $0x1cc] ss:$16 sps:$4 sm:$0xff]   ;;  %v1276_v59 = vld [vmem:[%s1817_s1 + $0x1c0] ss:$16 sps:$4 sm:$0xff]  }
  0x15   :  { %v1277_v60 = vld [vmem:[%s1817_s1 + $0x1c8] ss:$16 sps:$4 sm:$0xff]   ;;  %v1278_v61 = vld [vmem:[%s1817_s1 + $0x1e4] ss:$16 sps:$4 sm:$0xff]   ;;  %v1280_v62 = vld [vmem:[%s1817_s1 + $0x1ec] ss:$16 sps:$4 sm:$0xff]  }
  0x16   :  { %v1282_v63 = vld [vmem:[%s1817_s1 + $0x1e0] ss:$16 sps:$4 sm:$0xff]   ;;  %v1283_v0 = vld [vmem:[%s1817_s1 + $0x1e8] ss:$16 sps:$4 sm:$0xff]   ;;  %v1289_v1 = vld [vmem:[%s1817_s1 + $0x204] ss:$16 sps:$4 sm:$0xff]  }
  0x17   :  { %839 = vmatpush1.bf16.msra.mxu0 %v1222_v22  ;;  %925 = vmatpush1.bf16.msra.mxu1 %v1223_v23  ;;  %v1292_v2 = vld [vmem:[%s1817_s1 + $0x20c] ss:$16 sps:$4 sm:$0xff]   ;;  %v1284_v3 = vld [vmem:[%s1818_s0] ss:$16 sps:$4 sm:$0xff]   ;;  %v1290_v5 = vld [vmem:[%s1817_s1 + $0x208] ss:$16 sps:$4 sm:$0xff]  }
  0x18   :  { %840 = vmatprep.subr.bf16.mxu0 %v1224_v24  ;;  %926 = vmatprep.subr.bf16.mxu1 %v1226_v25  ;;  %v1287_v4 = vld [vmem:[%s1817_s1 + $0x200] ss:$16 sps:$4 sm:$0xff]   ;;  %v1295_v6 = vld [vmem:[%s1817_s1 + $0x224] ss:$16 sps:$4 sm:$0xff]   ;;  %v1298_v7 = vld [vmem:[%s1817_s1 + $0x22c] ss:$16 sps:$4 sm:$0xff]  }
  0x19   :  { %v1293_v8 = vld [vmem:[%s1817_s1 + $0x220] ss:$16 sps:$4 sm:$0xff]   ;;  %v1296_v9 = vld [vmem:[%s1817_s1 + $0x228] ss:$16 sps:$4 sm:$0xff]   ;;  %v1301_v10 = vld [vmem:[%s1817_s1 + $0x244] ss:$16 sps:$4 sm:$0xff]  }
  0x1a   :  { %v1304_v11 = vld [vmem:[%s1817_s1 + $0x24c] ss:$16 sps:$4 sm:$0xff]   ;;  %v1299_v12 = vld [vmem:[%s1817_s1 + $0x240] ss:$16 sps:$4 sm:$0xff]   ;;  %v1302_v13 = vld [vmem:[%s1817_s1 + $0x248] ss:$16 sps:$4 sm:$0xff]  }
  0x1b   :  { %841 = vmatpush1.bf16.msra.mxu0 %v1228_v26  ;;  %927 = vmatpush1.bf16.msra.mxu1 %v1229_v27  ;;  %v1307_v14 = vld [vmem:[%s1817_s1 + $0x264] ss:$16 sps:$4 sm:$0xff]   ;;  %v1310_v15 = vld [vmem:[%s1817_s1 + $0x26c] ss:$16 sps:$4 sm:$0xff]   ;;  %v1305_v16 = vld [vmem:[%s1817_s1 + $0x260] ss:$16 sps:$4 sm:$0xff]  }
  0x1c   :  { %842 = vmatprep.subr.bf16.mxu0 %v1230_v28  ;;  %928 = vmatprep.subr.bf16.mxu1 %v1232_v29  ;;  %v1308_v17 = vld [vmem:[%s1817_s1 + $0x268] ss:$16 sps:$4 sm:$0xff]   ;;  %v1313_v18 = vld [vmem:[%s1817_s1 + $0x284] ss:$16 sps:$4 sm:$0xff]   ;;  %v1316_v19 = vld [vmem:[%s1817_s1 + $0x28c] ss:$16 sps:$4 sm:$0xff]  }
  0x1d   :  { %v1311_v20 = vld [vmem:[%s1817_s1 + $0x280] ss:$16 sps:$4 sm:$0xff]   ;;  %v1314_v21 = vld [vmem:[%s1817_s1 + $0x288] ss:$16 sps:$4 sm:$0xff]   ;;  %v1319_v22 = vld [vmem:[%s1817_s1 + $0x2a4] ss:$16 sps:$4 sm:$0xff]  }
  0x1e   :  { %v1322_v23 = vld [vmem:[%s1817_s1 + $0x2ac] ss:$16 sps:$4 sm:$0xff]   ;;  %v1317_v24 = vld [vmem:[%s1817_s1 + $0x2a0] ss:$16 sps:$4 sm:$0xff]   ;;  %v1320_v25 = vld [vmem:[%s1817_s1 + $0x2a8] ss:$16 sps:$4 sm:$0xff]  }
  0x1f   :  { %843 = vmatpush1.bf16.msra.mxu0 %v1234_v30  ;;  %929 = vmatpush1.bf16.msra.mxu1 %v1235_v31  ;;  %v1325_v26 = vld [vmem:[%s1817_s1 + $0x2c4] ss:$16 sps:$4 sm:$0xff]   ;;  %v1328_v27 = vld [vmem:[%s1817_s1 + $0x2cc] ss:$16 sps:$4 sm:$0xff]   ;;  %v1323_v29 = vld [vmem:[%s1817_s1 + $0x2c0] ss:$16 sps:$4 sm:$0xff]  }
  0x20   :  { %844 = vmatprep.subr.bf16.mxu0 %v1236_v32  ;;  %930 = vmatprep.subr.bf16.mxu1 %v1238_v33  ;;  %v1385_v28 = vld [vmem:[%s1818_s0 + $0xc] ss:$16 sps:$4 sm:$0xff]   ;;  %v1326_v30 = vld [vmem:[%s1817_s1 + $0x2c8] ss:$16 sps:$4 sm:$0xff]   ;;  %v1331_v31 = vld [vmem:[%s1817_s1 + $0x2e4] ss:$16 sps:$4 sm:$0xff]  }
  0x21   :  { %v1334_v32 = vld [vmem:[%s1817_s1 + $0x2ec] ss:$16 sps:$4 sm:$0xff]   ;;  %v1329_v33 = vld [vmem:[%s1817_s1 + $0x2e0] ss:$16 sps:$4 sm:$0xff]  }
  0x22   :  { %v1358_v48 = vld [vmem:[%s1817_s1 + $0x36c] ss:$16 sps:$4 sm:$0xff]  }
  0x23   :  { %845 = vmatpush1.bf16.msra.mxu0 %v1240_v34  ;;  %931 = vmatpush1.bf16.msra.mxu1 %v1241_v35  ;;  %v1332_v34 = vld [vmem:[%s1817_s1 + $0x2e8] ss:$16 sps:$4 sm:$0xff]   ;;  %v1337_v35 = vld [vmem:[%s1817_s1 + $0x304] ss:$16 sps:$4 sm:$0xff]  }
  0x24   :  { %846 = vmatprep.subr.bf16.mxu0 %v1242_v36  ;;  %932 = vmatprep.subr.bf16.mxu1 %v1244_v37  ;;  %v1340_v36 = vld [vmem:[%s1817_s1 + $0x30c] ss:$16 sps:$4 sm:$0xff]   ;;  %v1335_v37 = vld [vmem:[%s1817_s1 + $0x300] ss:$16 sps:$4 sm:$0xff]  }
  0x27   :  { %847 = vmatpush1.bf16.msra.mxu0 %v1246_v38  ;;  %933 = vmatpush1.bf16.msra.mxu1 %v1247_v39  ;;  %v1338_v38 = vld [vmem:[%s1817_s1 + $0x308] ss:$16 sps:$4 sm:$0xff]   ;;  %v1343_v39 = vld [vmem:[%s1817_s1 + $0x324] ss:$16 sps:$4 sm:$0xff]  }
  0x28   :  { %848 = vmatprep.subr.bf16.mxu0 %v1248_v40  ;;  %934 = vmatprep.subr.bf16.mxu1 %v1250_v41  ;;  %v1346_v40 = vld [vmem:[%s1817_s1 + $0x32c] ss:$16 sps:$4 sm:$0xff]   ;;  %v1341_v41 = vld [vmem:[%s1817_s1 + $0x320] ss:$16 sps:$4 sm:$0xff]  }
  0x2b   :  { %849 = vmatpush1.bf16.msra.mxu0 %v1252_v42  ;;  %935 = vmatpush1.bf16.msra.mxu1 %v1253_v43  ;;  %v1344_v42 = vld [vmem:[%s1817_s1 + $0x328] ss:$16 sps:$4 sm:$0xff]   ;;  %v1349_v43 = vld [vmem:[%s1817_s1 + $0x344] ss:$16 sps:$4 sm:$0xff]  }
  0x2c   :  { %850 = vmatprep.subr.bf16.mxu0 %v1254_v44  ;;  %936 = vmatprep.subr.bf16.mxu1 %v1256_v45  ;;  %v1352_v44 = vld [vmem:[%s1817_s1 + $0x34c] ss:$16 sps:$4 sm:$0xff]   ;;  %v1347_v45 = vld [vmem:[%s1817_s1 + $0x340] ss:$16 sps:$4 sm:$0xff]  }
  0x2f   :  { %851 = vmatpush1.bf16.msra.mxu0 %v1258_v46  ;;  %937 = vmatpush1.bf16.msra.mxu1 %v1259_v47  ;;  %v1350_v46 = vld [vmem:[%s1817_s1 + $0x348] ss:$16 sps:$4 sm:$0xff]   ;;  %v1355_v47 = vld [vmem:[%s1817_s1 + $0x364] ss:$16 sps:$4 sm:$0xff]  }
  0x30   :  { %852 = vmatprep.subr.bf16.mxu0 %v1260_v49  ;;  %938 = vmatprep.subr.bf16.mxu1 %v1262_v50  ;;  %v1353_v49 = vld [vmem:[%s1817_s1 + $0x360] ss:$16 sps:$4 sm:$0xff]   ;;  %v1356_v50 = vld [vmem:[%s1817_s1 + $0x368] ss:$16 sps:$4 sm:$0xff]  }
  0x33   :  { %853 = vmatpush1.bf16.msra.mxu0 %v1264_v51  ;;  %939 = vmatpush1.bf16.msra.mxu1 %v1265_v52  ;;  %v1361_v51 = vld [vmem:[%s1817_s1 + $0x384] ss:$16 sps:$4 sm:$0xff]   ;;  %v1364_v52 = vld [vmem:[%s1817_s1 + $0x38c] ss:$16 sps:$4 sm:$0xff]  }
  0x34   :  { %854 = vmatprep.subr.bf16.mxu0 %v1266_v53  ;;  %940 = vmatprep.subr.bf16.mxu1 %v1268_v54  ;;  %v1359_v53 = vld [vmem:[%s1817_s1 + $0x380] ss:$16 sps:$4 sm:$0xff]   ;;  %v1362_v54 = vld [vmem:[%s1817_s1 + $0x388] ss:$16 sps:$4 sm:$0xff]  }
  0x37   :  { %855 = vmatpush1.bf16.msra.mxu0 %v1270_v55  ;;  %941 = vmatpush1.bf16.msra.mxu1 %v1271_v56  ;;  %v1367_v55 = vld [vmem:[%s1817_s1 + $0x3a4] ss:$16 sps:$4 sm:$0xff]   ;;  %v1370_v56 = vld [vmem:[%s1817_s1 + $0x3ac] ss:$16 sps:$4 sm:$0xff]  }
  0x38   :  { %856 = vmatprep.subr.bf16.mxu0 %v1272_v57  ;;  %942 = vmatprep.subr.bf16.mxu1 %v1274_v58  ;;  %v1365_v57 = vld [vmem:[%s1817_s1 + $0x3a0] ss:$16 sps:$4 sm:$0xff]   ;;  %v1368_v58 = vld [vmem:[%s1817_s1 + $0x3a8] ss:$16 sps:$4 sm:$0xff]  }
  0x3b   :  { %857 = vmatpush1.bf16.msra.mxu0 %v1276_v59  ;;  %943 = vmatpush1.bf16.msra.mxu1 %v1277_v60  ;;  %v1373_v59 = vld [vmem:[%s1817_s1 + $0x3c4] ss:$16 sps:$4 sm:$0xff]   ;;  %v1376_v60 = vld [vmem:[%s1817_s1 + $0x3cc] ss:$16 sps:$4 sm:$0xff]  }
  0x3c   :  { %858 = vmatprep.subr.bf16.mxu0 %v1278_v61  ;;  %944 = vmatprep.subr.bf16.mxu1 %v1280_v62  ;;  %v1371_v61 = vld [vmem:[%s1817_s1 + $0x3c0] ss:$16 sps:$4 sm:$0xff]   ;;  %v1374_v62 = vld [vmem:[%s1817_s1 + $0x3c8] ss:$16 sps:$4 sm:$0xff]  }
  0x3f   :  { %859 = vmatpush1.bf16.msra.mxu0 %v1282_v63  ;;  %945 = vmatpush1.bf16.msra.mxu1 %v1283_v0  ;;  %v1379_v63 = vld [vmem:[%s1817_s1 + $0x3e4] ss:$16 sps:$4 sm:$0xff]   ;;  %v1382_v0 = vld [vmem:[%s1817_s1 + $0x3ec] ss:$16 sps:$4 sm:$0xff]  }
  0x40   :  { %871 = vmatprep.subr.bf16.mxu0 %v1289_v1  ;;  %957 = vmatprep.subr.bf16.mxu1 %v1292_v2  ;;  %v1377_v1 = vld [vmem:[%s1817_s1 + $0x3e0] ss:$16 sps:$4 sm:$0xff]   ;;  %v1380_v2 = vld [vmem:[%s1817_s1 + $0x3e8] ss:$16 sps:$4 sm:$0xff]  }
  0x42   :  { %861 = vmatmul.mubr.bf16.vlgmr.msra.gmra.mrb[0].mxu0 %v1284_v3  ;;  %947 = vmatmul.mubr.bf16.vlgmr.msra.gmra.mrb[0].mxu1 %v1284_v3  ;;  %v1383_v3 = vld [vmem:[%s1818_s0 + $0x8] ss:$16 sps:$4 sm:$0xff]  }
  0x43   :  { %872 = vmatpush1.bf16.msra.mxu0 %v1287_v4  ;;  %958 = vmatpush1.bf16.msra.mxu1 %v1290_v5  ;;  %v148_v4 = vlaneseq }
  0x44   :  { %873 = vmatprep.subr.bf16.mxu0 %v1295_v6  ;;  %959 = vmatprep.subr.bf16.mxu1 %v1298_v7 }
  0x45   :  { %903 = vmatprep.mubr.bf16.mxu0 %v1385_v28  ;;  %989 = vmatprep.mubr.bf16.mxu1 %v1385_v28  ;;  %v149_v5 = vshrl.u32 %v148_v4, 7 }
  0x47   :  { %874 = vmatpush1.bf16.msra.mxu0 %v1293_v8  ;;  %960 = vmatpush1.bf16.msra.mxu1 %v1296_v9  ;;  %v150_v6 = vsub.s32 0, %v149_v5  ;;  %v158_v7 = vsub.s32 2, %v149_v5  ;;  %v146_v8 = vld [vmem:[%s1819_s2] sm:$0xf]  ;;  %v154_v9 = vsub.s32 1, %v149_v5 }
  0x48   :  { %875 = vmatprep.subr.bf16.mxu0 %v1301_v10  ;;  %961 = vmatprep.subr.bf16.mxu1 %v1304_v11  ;;  %v162_v10 = vsub.s32 3, %v149_v5 }
  0x49   :  { %v151_v11 = vrot.slane %v146_v8, %v150_v6 }
  0x4b   :  { %876 = vmatpush1.bf16.msra.mxu0 %v1299_v12  ;;  %962 = vmatpush1.bf16.msra.mxu1 %v1302_v13  ;;  %v159_v12 = vrot.slane %v146_v8, %v158_v7  ;;  %v155_v13 = vrot.slane %v146_v8, %v154_v9 }
  0x4c   :  { %877 = vmatprep.subr.bf16.mxu0 %v1307_v14  ;;  %963 = vmatprep.subr.bf16.mxu1 %v1310_v15  ;;  %v163_v14 = vrot.slane %v146_v8, %v162_v10 }
  0x4f   :  { %878 = vmatpush1.bf16.msra.mxu0 %v1305_v16  ;;  %964 = vmatpush1.bf16.msra.mxu1 %v1308_v17 }
  0x50   :  { %879 = vmatprep.subr.bf16.mxu0 %v1313_v18  ;;  %965 = vmatprep.subr.bf16.mxu1 %v1316_v19 }
  0x53   :  { %880 = vmatpush1.bf16.msra.mxu0 %v1311_v20  ;;  %966 = vmatpush1.bf16.msra.mxu1 %v1314_v21 }
  0x54   :  { %881 = vmatprep.subr.bf16.mxu0 %v1319_v22  ;;  %967 = vmatprep.subr.bf16.mxu1 %v1322_v23 }
  0x57   :  { %882 = vmatpush1.bf16.msra.mxu0 %v1317_v24  ;;  %968 = vmatpush1.bf16.msra.mxu1 %v1320_v25 }
  0x58   :  { %883 = vmatprep.subr.bf16.mxu0 %v1325_v26  ;;  %969 = vmatprep.subr.bf16.mxu1 %v1328_v27 }
  0x5b   :  { %884 = vmatpush1.bf16.msra.mxu0 %v1323_v29  ;;  %970 = vmatpush1.bf16.msra.mxu1 %v1326_v30 }
  0x5c   :  { %885 = vmatprep.subr.bf16.mxu0 %v1331_v31  ;;  %971 = vmatprep.subr.bf16.mxu1 %v1334_v32 }
  0x5f   :  { %886 = vmatpush1.bf16.msra.mxu0 %v1329_v33  ;;  %972 = vmatpush1.bf16.msra.mxu1 %v1332_v34 }
  0x60   :  { %887 = vmatprep.subr.bf16.mxu0 %v1337_v35  ;;  %973 = vmatprep.subr.bf16.mxu1 %v1340_v36 }
  0x63   :  { %888 = vmatpush1.bf16.msra.mxu0 %v1335_v37  ;;  %974 = vmatpush1.bf16.msra.mxu1 %v1338_v38 }
  0x64   :  { %889 = vmatprep.subr.bf16.mxu0 %v1343_v39  ;;  %975 = vmatprep.subr.bf16.mxu1 %v1346_v40 }
  0x67   :  { %890 = vmatpush1.bf16.msra.mxu0 %v1341_v41  ;;  %976 = vmatpush1.bf16.msra.mxu1 %v1344_v42 }
  0x68   :  { %891 = vmatprep.subr.bf16.mxu0 %v1349_v43  ;;  %977 = vmatprep.subr.bf16.mxu1 %v1352_v44 }
  0x6b   :  { %892 = vmatpush1.bf16.msra.mxu0 %v1347_v45  ;;  %978 = vmatpush1.bf16.msra.mxu1 %v1350_v46 }
  0x6c   :  { %893 = vmatprep.subr.bf16.mxu0 %v1355_v47  ;;  %979 = vmatprep.subr.bf16.mxu1 %v1358_v48 }
  0x6f   :  { %894 = vmatpush1.bf16.msra.mxu0 %v1353_v49  ;;  %980 = vmatpush1.bf16.msra.mxu1 %v1356_v50 }
  0x70   :  { %895 = vmatprep.subr.bf16.mxu0 %v1361_v51  ;;  %981 = vmatprep.subr.bf16.mxu1 %v1364_v52 }
  0x73   :  { %896 = vmatpush1.bf16.msra.mxu0 %v1359_v53  ;;  %982 = vmatpush1.bf16.msra.mxu1 %v1362_v54 }
  0x74   :  { %897 = vmatprep.subr.bf16.mxu0 %v1367_v55  ;;  %983 = vmatprep.subr.bf16.mxu1 %v1370_v56 }
  0x77   :  { %898 = vmatpush1.bf16.msra.mxu0 %v1365_v57  ;;  %984 = vmatpush1.bf16.msra.mxu1 %v1368_v58 }
  0x78   :  { %899 = vmatprep.subr.bf16.mxu0 %v1373_v59  ;;  %985 = vmatprep.subr.bf16.mxu1 %v1376_v60 }
  0x7b   :  { %900 = vmatpush1.bf16.msra.mxu0 %v1371_v61  ;;  %986 = vmatpush1.bf16.msra.mxu1 %v1374_v62 }
  0x7c   :  { %901 = vmatprep.subr.bf16.mxu0 %v1379_v63  ;;  %987 = vmatprep.subr.bf16.mxu1 %v1382_v0 }
  0x7f   :  { %902 = vmatpush1.bf16.msra.mxu0 %v1377_v1  ;;  %988 = vmatpush1.bf16.msra.mxu1 %v1380_v2 }
  0x82   :  { %904 = vmatmul.mubr.bf16.vlgmr.msra.gmra.mrb[0].mxu0 %v1383_v3  ;;  %990 = vmatmul.mubr.bf16.vlgmr.msra.gmra.mrb[0].mxu1 %v1383_v3 }
 0x155   :  { %v905_v15 = vpop.f32.mrb[0].mxu0  ;;  %v991_v16 = vpop.f32.mrb[0].mxu1 }
 0x156   :  { %v1172_v17 = vadd.f32 %v905_v15, %v151_v11  ;;  %v1176_v18 = vadd.f32 %v991_v16, %v159_v12  ;;  %v907_v19 = vpop.f32.mrb[1].mxu0  ;;  %v993_v20 = vpop.f32.mrb[1].mxu1 }
 0x157   :  { %v1173_v21 = vadd.f32 %v907_v19, %v155_v13  ;;  %v1177_v22 = vadd.f32 %v993_v20, %v163_v14  ;;  %v909_v23 = vpop.f32.mrb[2].mxu0  ;;  %v995_v24 = vpop.f32.mrb[2].mxu1 }
 0x158   :  { %v1174_v25 = vadd.f32 %v909_v23, %v151_v11  ;;  %v1178_v26 = vadd.f32 %v995_v24, %v159_v12  ;;  %v911_v27 = vpop.f32.mrb[3].mxu0  ;;  %v997_v28 = vpop.f32.mrb[3].mxu1 }
 0x159   :  { %v1168_v29 = vpack.c.bf16 %v1173_v21, %v1172_v17  ;;  %v1169_v30 = vpack.c.bf16 %v1177_v22, %v1176_v18  ;;  %v1175_v31 = vadd.f32 %v911_v27, %v155_v13  ;;  %v1179_v32 = vadd.f32 %v997_v28, %v163_v14 }
 0x15b   :  { %1024 = vst [vmem:[%s1820_s3] sm:$0xff] %v1168_v29  ;;  %1025 = vst [vmem:[%s1820_s3 + $0x8] sm:$0xff] %v1169_v30  ;;  %v1170_v33 = vpack.c.bf16 %v1175_v31, %v1174_v25  ;;  %v1171_v34 = vpack.c.bf16 %v1179_v32, %v1178_v26 }
 0x15d   :  { %1026 = vst [vmem:[%s1820_s3 + $0x10] sm:$0xff] %v1170_v33  ;;  %1027 = vst [vmem:[%s1820_s3 + $0x18] sm:$0xff] %v1171_v34 }

// kernel: transformer_forward.3
= control target key start
LH: loop header
LB: loop body
LE: loop exit
PB: predicated region body
PF: predicated region fallthrough
CT: control target
= control target key end

     0   :  { %v82_v46 = vlaneseq  ;;  %s233_s0 = inlined_call_operand.vmem [shape: bf16[16,512], index: 0, kind: input, shape index: {}]   ;;  %s234_s1 = inlined_call_operand.vmem [shape: f32[1,512], index: 1, kind: input, shape index: {}]   ;;  %s235_s2 = inlined_call_operand.vmem [shape: f32[1,512], index: 2, kind: input, shape index: {}]   ;;  %s236_s3 = inlined_call_operand.vmem [shape: bf16[16,512], index: 3, kind: output, shape index: {}]  }
   0x1   :  { %v14_v0 = vld [vmem:[%s233_s0] sm:$0xff]  ;;  %v15_v1 = vld [vmem:[%s233_s0 + $0x8] sm:$0xff]  ;;  %v16_v2 = vld [vmem:[%s233_s0 + $0x10] sm:$0xff] }
   0x2   :  { %v18_v3 = vunpack.c.l.bf16 %v14_v0  ;;  %v19_v4 = vunpack.c.h.bf16 %v14_v0  ;;  %v20_v5 = vunpack.c.l.bf16 %v15_v1  ;;  %v17_v6 = vld [vmem:[%s233_s0 + $0x18] sm:$0xff]  ;;  %v22_v7 = vunpack.c.l.bf16 %v16_v2  ;;  %v26_v56 = vld [vmem:[%s234_s1] sm:$0xf] }
   0x3   :  { %v23_v8 = vunpack.c.h.bf16 %v16_v2  ;;  %v24_v9 = vunpack.c.l.bf16 %v17_v6  ;;  %v21_v10 = vunpack.c.h.bf16 %v15_v1  ;;  %v25_v14 = vunpack.c.h.bf16 %v17_v6  ;;  %v27_v57 = vld [vmem:[%s235_s2] sm:$0xf] }
   0x4   :  { %v28_v11 = vadd.f32 %v19_v4, %v18_v3  ;;  %v83_v50 = vshrl.u32 %v82_v46, 7 }
   0x5   :  { %v33_v12 = vadd.f32 %v23_v8, %v22_v7 }
   0x6   :  { %v29_v13 = vadd.f32 %v28_v11, %v20_v5  ;;  %v84_v52 = vsub.s32 0, %v83_v50  ;;  %v88_v53 = vsub.s32 1, %v83_v50  ;;  %v92_v54 = vsub.s32 2, %v83_v50 }
   0x7   :  { %v34_v15 = vadd.f32 %v33_v12, %v24_v9  ;;  %v96_v55 = vsub.s32 3, %v83_v50 }
   0x8   :  { %v30_v16 = vadd.f32 %v29_v13, %v21_v10  ;;  %v85_v58 = vrot.slane %v26_v56, %v84_v52  ;;  %v89_v59 = vrot.slane %v26_v56, %v88_v53  ;;  %v93_v60 = vrot.slane %v26_v56, %v92_v54 }
   0x9   :  { %v35_v17 = vadd.f32 %v34_v15, %v25_v14  ;;  %v97_v61 = vrot.slane %v26_v56, %v96_v55  ;;  %v114_v63 = vrot.slane %v27_v57, %v84_v52  ;;  %v118_v0 = vrot.slane %v27_v57, %v88_v53 }
   0xa   :  { %31 = vadd.xlane.f32.xlu0 %v30_v16  ;;  %v122_v1 = vrot.slane %v27_v57, %v92_v54  ;;  %v126_v2 = vrot.slane %v27_v57, %v96_v55 }
   0xe   :  { %36 = vadd.xlane.f32.xlu0 %v35_v17 }
  0x97   :  { %v32_v18 = vpop.xlane.xlu0 %31 }
  0x98   :  { %v39_v19 = vmul.f32 0.001953125, %v32_v18 }
  0x9a   :  { %v41_v20 = vsub.f32 %v18_v3, %v39_v19  ;;  %v42_v21 = vsub.f32 %v19_v4, %v39_v19  ;;  %v43_v22 = vsub.f32 %v20_v5, %v39_v19  ;;  %v44_v24 = vsub.f32 %v21_v10, %v39_v19 }
  0x9b   :  { %v37_v23 = vpop.xlane.xlu0 %36 }
  0x9c   :  { %v40_v25 = vmul.f32 0.001953125, %v37_v23  ;;  %v49_v26 = vmul.f32 %v41_v20, %v41_v20  ;;  %v50_v27 = vmul.f32 %v42_v21, %v42_v21  ;;  %v51_v28 = vmul.f32 %v43_v22, %v43_v22 }
  0x9d   :  { %v52_v33 = vmul.f32 %v44_v24, %v44_v24 }
  0x9e   :  { %v45_v29 = vsub.f32 %v22_v7, %v40_v25  ;;  %v46_v30 = vsub.f32 %v23_v8, %v40_v25  ;;  %v57_v31 = vadd.f32 %v50_v27, %v49_v26  ;;  %v47_v32 = vsub.f32 %v24_v9, %v40_v25 }
  0x9f   :  { %v48_v35 = vsub.f32 %v25_v14, %v40_v25 }
  0xa0   :  { %v58_v34 = vadd.f32 %v57_v31, %v51_v28  ;;  %v53_v36 = vmul.f32 %v45_v29, %v45_v29  ;;  %v54_v37 = vmul.f32 %v46_v30, %v46_v30  ;;  %v55_v39 = vmul.f32 %v47_v32, %v47_v32 }
  0xa1   :  { %v56_v41 = vmul.f32 %v48_v35, %v48_v35 }
  0xa2   :  { %v59_v38 = vadd.f32 %v58_v34, %v52_v33  ;;  %v62_v40 = vadd.f32 %v54_v37, %v53_v36 }
  0xa4   :  { %60 = vadd.xlane.f32.xlu1 %v59_v38  ;;  %v63_v42 = vadd.f32 %v62_v40, %v55_v39 }
  0xa6   :  { %v64_v43 = vadd.f32 %v63_v42, %v56_v41 }
  0xa8   :  { %65 = vadd.xlane.f32.xlu1 %v64_v43 }
 0x131   :  { %v61_v44 = vpop.xlane.xlu1 %60 }
 0x132   :  { %v67_v45 = vmul.f32 0.001953125, %v61_v44 }
 0x134   :  { %v69_v47 = vadd.f32 1e-05, %v67_v45 }
 0x135   :  { %v66_v48 = vpop.xlane.xlu1 %65 }
 0x136   :  { %179 = vrsqrt.f32 %v69_v47  ;;  %v68_v49 = vmul.f32 0.001953125, %v66_v48 }
 0x138   :  { %v70_v51 = vadd.f32 1e-05, %v68_v49 }
 0x13a   :  { %181 = vrsqrt.f32 %v70_v51 }
 0x140   :  { %v180_v62 = vpop.eup %179 }
 0x141   :  { %v73_v3 = vmul.f32 %v180_v62, %v41_v20  ;;  %v74_v4 = vmul.f32 %v180_v62, %v42_v21  ;;  %v75_v5 = vmul.f32 %v180_v62, %v43_v22  ;;  %v76_v6 = vmul.f32 %v180_v62, %v44_v24 }
 0x143   :  { %v102_v7 = vmul.f32 %v85_v58, %v73_v3  ;;  %v103_v8 = vmul.f32 %v89_v59, %v74_v4  ;;  %v104_v9 = vmul.f32 %v93_v60, %v75_v5  ;;  %v105_v10 = vmul.f32 %v97_v61, %v76_v6 }
 0x144   :  { %v182_v11 = vpop.eup %181 }
 0x145   :  { %v131_v12 = vadd.f32 %v114_v63, %v102_v7  ;;  %v132_v13 = vadd.f32 %v118_v0, %v103_v8  ;;  %v133_v14 = vadd.f32 %v122_v1, %v104_v9  ;;  %v134_v15 = vadd.f32 %v126_v2, %v105_v10 }
 0x146   :  { %v77_v16 = vmul.f32 %v182_v11, %v45_v29  ;;  %v78_v17 = vmul.f32 %v182_v11, %v46_v30  ;;  %v79_v18 = vmul.f32 %v182_v11, %v47_v32  ;;  %v80_v19 = vmul.f32 %v182_v11, %v48_v35 }
 0x147   :  { %v175_v23 = vpack.c.bf16 %v132_v13, %v131_v12  ;;  %v176_v25 = vpack.c.bf16 %v134_v15, %v133_v14 }
 0x148   :  { %v106_v26 = vmul.f32 %v85_v58, %v77_v16  ;;  %v107_v20 = vmul.f32 %v89_v59, %v78_v17  ;;  %v108_v21 = vmul.f32 %v93_v60, %v79_v18  ;;  %v109_v22 = vmul.f32 %v97_v61, %v80_v19 }
 0x149   :  { %163 = vst [vmem:[%s236_s3] sm:$0xff] %v175_v23  ;;  %164 = vst [vmem:[%s236_s3 + $0x8] sm:$0xff] %v176_v25 }
 0x14a   :  { %v135_v24 = vadd.f32 %v114_v63, %v106_v26  ;;  %v136_v27 = vadd.f32 %v118_v0, %v107_v20  ;;  %v137_v28 = vadd.f32 %v122_v1, %v108_v21  ;;  %v138_v29 = vadd.f32 %v126_v2, %v109_v22 }
 0x14c   :  { %v177_v30 = vpack.c.bf16 %v136_v27, %v135_v24  ;;  %v178_v31 = vpack.c.bf16 %v138_v29, %v137_v28 }
 0x14e   :  { %165 = vst [vmem:[%s236_s3 + $0x10] sm:$0xff] %v177_v30  ;;  %166 = vst [vmem:[%s236_s3 + $0x18] sm:$0xff] %v178_v31 }

// kernel: closed_call.67
= control target key start
LH: loop header
LB: loop body
LE: loop exit
PB: predicated region body
PF: predicated region fallthrough
CT: control target
= control target key end

     0   :  { %s2115_s12 = smov 0   ;;  %s2117_s13 = smov 0   ;;  %s2597_s0 = inlined_call_operand.vmem [shape: bf16[16,512], index: 0, kind: input, shape index: {}]   ;;  %s2598_s1 = inlined_call_operand.vmem [shape: bf16[512,1024], index: 1, kind: input, shape index: {}]   ;;  %s2599_s2 = inlined_call_operand.vmem [shape: f32[1,1024], index: 2, kind: input, shape index: {}]   ;;  %s2600_s3 = inlined_call_operand.vmem [shape: bf16[16,1024], index: 3, kind: output, shape index: {}]  }
   0x1   :  { %s2119_s14 = smov 0   ;;  %s2121_s15 = smov 0  }
   0x2   :  { %s2123_s16 = smov 0  }
   0x3 LB: > { %s22_s17 = sadd.s32 1, %s2089_s15  ;;  %s1642_s18 = sadd.s32 4294967295, %s2093_s16   ;;  %s2093_s16 = sphi %s2123_s16, %s13_s16   ;;  %s2089_s15 = sphi %s2121_s15, %s2605_s15   ;;  %s2085_s14 = sphi %s2119_s14, %s2604_s14   ;;  %s2081_s13 = sphi %s2117_s13, %s2603_s13   ;;  %s2077_s12 = sphi %s2115_s12, %s2602_s12  }
   0x4   : > { %p23_p0 = scmp.ge.s32.totalorder %s22_s17, 2  ;;  %p65_p1 = scmp.ne.s32.totalorder %s2081_s13, %s2077_s12 }
   0x5   : > { %p66_p2 = scmp.eq.s32.totalorder %s2093_s16, 0  ;;  %p123_p4 = scmp.eq.s32.totalorder %s1642_s18, 1 }
   0x6   : > { %s2607_s17 = smov (%p23_p0, %s22_s17), 0  ;;  %s58_s20 = sadd.s32 1, %s2081_s13 }
   0x7   : > { %p67_p3 = por %p66_p2, %p65_p1  ;;  %s55_s19 = ssub.s32 %s2089_s15, %s2607_s17 }
   0x8   : > { %p56_p5 = scmp.eq.s32.totalorder %s55_s19, 0  ;;  %p2150_p6 = por %p123_p4, %p65_p1 }
   0x9   : > { %p1646_p7 = scmp.ge.s32.totalorder %s2093_s16, 2 }
   0xa   : > { %s2155_s22 = scalar_select %p56_p5, %s2081_s13, %s58_s20  }
   0xb   : > { %155 = sbr.rel (%p1646_p7) target bundleno = 86 (0x56), region = 20 }
  0x12   : > { %158 = sbr.rel (!%p67_p3) target bundleno = 86 (0x56), region = 24  ;;  %s160_s23 = sand.u32 (%p67_p3), 1, %s2081_s13  }
  0x13   : > { %s1795_s24 = sshll.u32 (%p67_p3), %s2089_s15, 4  ;;  %s1647_s25 = sshll.u32 (%p67_p3), %s160_s23, 10 }
  0x14   : > { %s2163_s28 = scalar_lea.vmem (%p67_p3), %s2598_s1, %s1795_s24  ;;  %s2168_s29 = scalar_lea.vmem (%p67_p3), [#allocation2], %s1647_s25 }
  0x15   : > { %v178_v0 = vld [vmem:[%s2163_s28] sm:$0xff] (%p67_p3)  ;;  %v180_v1 = vld [vmem:[%s2163_s28 + $0x8] sm:$0xff] (%p67_p3) }
  0x16   : > { %v182_v2 = vld [vmem:[%s2163_s28 + $0x20] sm:$0xff] (%p67_p3)  ;;  %179 = vst [vmem:[%s2168_s29] sm:$0xff] (%p67_p3), %v178_v0  ;;  %181 = vst [vmem:[%s2168_s29 + $0x8] sm:$0xff] (%p67_p3), %v180_v1  ;;  %v184_v3 = vld [vmem:[%s2163_s28 + $0x28] sm:$0xff] (%p67_p3) }
  0x17   : > { %183 = vst [vmem:[%s2168_s29 + $0x10] sm:$0xff] (%p67_p3), %v182_v2  ;;  %v186_v4 = vld [vmem:[%s2163_s28 + $0x40] sm:$0xff] (%p67_p3)  ;;  %v188_v5 = vld [vmem:[%s2163_s28 + $0x48] sm:$0xff] (%p67_p3)  ;;  %185 = vst [vmem:[%s2168_s29 + $0x18] sm:$0xff] (%p67_p3), %v184_v3 }
  0x18   : > { %187 = vst [vmem:[%s2168_s29 + $0x20] sm:$0xff] (%p67_p3), %v186_v4  ;;  %189 = vst [vmem:[%s2168_s29 + $0x28] sm:$0xff] (%p67_p3), %v188_v5  ;;  %v190_v6 = vld [vmem:[%s2163_s28 + $0x60] sm:$0xff] (%p67_p3)  ;;  %v192_v7 = vld [vmem:[%s2163_s28 + $0x68] sm:$0xff] (%p67_p3) }
  0x19   : > { %v194_v8 = vld [vmem:[%s2163_s28 + $0x80] sm:$0xff]  ;;  %191 = vst [vmem:[%s2168_s29 + $0x30] sm:$0xff] %v190_v6  ;;  %193 = vst [vmem:[%s2168_s29 + $0x38] sm:$0xff] %v192_v7  ;;  %v196_v9 = vld [vmem:[%s2163_s28 + $0x88] sm:$0xff] }
  0x1a   : > { %195 = vst [vmem:[%s2168_s29 + $0x40] sm:$0xff] %v194_v8  ;;  %v198_v10 = vld [vmem:[%s2163_s28 + $0xa0] sm:$0xff]  ;;  %v200_v11 = vld [vmem:[%s2163_s28 + $0xa8] sm:$0xff]  ;;  %197 = vst [vmem:[%s2168_s29 + $0x48] sm:$0xff] %v196_v9 }
  0x1b   : > { %199 = vst [vmem:[%s2168_s29 + $0x50] sm:$0xff] %v198_v10  ;;  %201 = vst [vmem:[%s2168_s29 + $0x58] sm:$0xff] %v200_v11  ;;  %v202_v12 = vld [vmem:[%s2163_s28 + $0xc0] sm:$0xff]  ;;  %v204_v13 = vld [vmem:[%s2163_s28 + $0xc8] sm:$0xff] }
  0x1c   : > { %v206_v14 = vld [vmem:[%s2163_s28 + $0xe0] sm:$0xff]  ;;  %203 = vst [vmem:[%s2168_s29 + $0x60] sm:$0xff] %v202_v12  ;;  %205 = vst [vmem:[%s2168_s29 + $0x68] sm:$0xff] %v204_v13  ;;  %v208_v15 = vld [vmem:[%s2163_s28 + $0xe8] sm:$0xff] }
  0x1d   : > { %207 = vst [vmem:[%s2168_s29 + $0x70] sm:$0xff] %v206_v14  ;;  %v210_v16 = vld [vmem:[%s2163_s28 + $0x100] sm:$0xff]  ;;  %v212_v17 = vld [vmem:[%s2163_s28 + $0x108] sm:$0xff]  ;;  %209 = vst [vmem:[%s2168_s29 + $0x78] sm:$0xff] %v208_v15 }
  0x1e   : > { %211 = vst [vmem:[%s2168_s29 + $0x80] sm:$0xff] %v210_v16  ;;  %213 = vst [vmem:[%s2168_s29 + $0x88] sm:$0xff] %v212_v17  ;;  %v214_v18 = vld [vmem:[%s2163_s28 + $0x120] sm:$0xff]  ;;  %v216_v19 = vld [vmem:[%s2163_s28 + $0x128] sm:$0xff] }
  0x1f   : > { %v218_v20 = vld [vmem:[%s2163_s28 + $0x140] sm:$0xff]  ;;  %215 = vst [vmem:[%s2168_s29 + $0x90] sm:$0xff] %v214_v18  ;;  %217 = vst [vmem:[%s2168_s29 + $0x98] sm:$0xff] %v216_v19  ;;  %v220_v21 = vld [vmem:[%s2163_s28 + $0x148] sm:$0xff] }
  0x20   : > { %219 = vst [vmem:[%s2168_s29 + $0xa0] sm:$0xff] %v218_v20  ;;  %v222_v22 = vld [vmem:[%s2163_s28 + $0x160] sm:$0xff]  ;;  %v224_v23 = vld [vmem:[%s2163_s28 + $0x168] sm:$0xff]  ;;  %221 = vst [vmem:[%s2168_s29 + $0xa8] sm:$0xff] %v220_v21 }
  0x21   : > { %223 = vst [vmem:[%s2168_s29 + $0xb0] sm:$0xff] %v222_v22  ;;  %225 = vst [vmem:[%s2168_s29 + $0xb8] sm:$0xff] %v224_v23  ;;  %v226_v24 = vld [vmem:[%s2163_s28 + $0x180] sm:$0xff]  ;;  %v228_v25 = vld [vmem:[%s2163_s28 + $0x188] sm:$0xff] }
  0x22   : > { %v230_v26 = vld [vmem:[%s2163_s28 + $0x1a0] sm:$0xff]  ;;  %227 = vst [vmem:[%s2168_s29 + $0xc0] sm:$0xff] %v226_v24  ;;  %229 = vst [vmem:[%s2168_s29 + $0xc8] sm:$0xff] %v228_v25  ;;  %v232_v27 = vld [vmem:[%s2163_s28 + $0x1a8] sm:$0xff] }
  0x23   : > { %231 = vst [vmem:[%s2168_s29 + $0xd0] sm:$0xff] %v230_v26  ;;  %v234_v28 = vld [vmem:[%s2163_s28 + $0x1c0] sm:$0xff]  ;;  %v236_v29 = vld [vmem:[%s2163_s28 + $0x1c8] sm:$0xff]  ;;  %233 = vst [vmem:[%s2168_s29 + $0xd8] sm:$0xff] %v232_v27 }
  0x24   : > { %235 = vst [vmem:[%s2168_s29 + $0xe0] sm:$0xff] %v234_v28  ;;  %237 = vst [vmem:[%s2168_s29 + $0xe8] sm:$0xff] %v236_v29  ;;  %v238_v30 = vld [vmem:[%s2163_s28 + $0x1e0] sm:$0xff]  ;;  %v240_v31 = vld [vmem:[%s2163_s28 + $0x1e8] sm:$0xff] }
  0x25   : > { %v242_v32 = vld [vmem:[%s2163_s28 + $0x200] sm:$0xff]  ;;  %239 = vst [vmem:[%s2168_s29 + $0xf0] sm:$0xff] %v238_v30  ;;  %241 = vst [vmem:[%s2168_s29 + $0xf8] sm:$0xff] %v240_v31  ;;  %v244_v33 = vld [vmem:[%s2163_s28 + $0x208] sm:$0xff] }
  0x26   : > { %243 = vst [vmem:[%s2168_s29 + $0x100] sm:$0xff] %v242_v32  ;;  %v246_v34 = vld [vmem:[%s2163_s28 + $0x220] sm:$0xff]  ;;  %v248_v35 = vld [vmem:[%s2163_s28 + $0x228] sm:$0xff]  ;;  %245 = vst [vmem:[%s2168_s29 + $0x108] sm:$0xff] %v244_v33 }
  0x27   : > { %247 = vst [vmem:[%s2168_s29 + $0x110] sm:$0xff] %v246_v34  ;;  %249 = vst [vmem:[%s2168_s29 + $0x118] sm:$0xff] %v248_v35  ;;  %v250_v36 = vld [vmem:[%s2163_s28 + $0x240] sm:$0xff]  ;;  %v252_v37 = vld [vmem:[%s2163_s28 + $0x248] sm:$0xff] }
  0x28   : > { %v254_v38 = vld [vmem:[%s2163_s28 + $0x260] sm:$0xff]  ;;  %251 = vst [vmem:[%s2168_s29 + $0x120] sm:$0xff] %v250_v36  ;;  %253 = vst [vmem:[%s2168_s29 + $0x128] sm:$0xff] %v252_v37  ;;  %v256_v39 = vld [vmem:[%s2163_s28 + $0x268] sm:$0xff] }
  0x29   : > { %255 = vst [vmem:[%s2168_s29 + $0x130] sm:$0xff] %v254_v38  ;;  %v258_v40 = vld [vmem:[%s2163_s28 + $0x280] sm:$0xff]  ;;  %v260_v41 = vld [vmem:[%s2163_s28 + $0x288] sm:$0xff]  ;;  %257 = vst [vmem:[%s2168_s29 + $0x138] sm:$0xff] %v256_v39 }
  0x2a   : > { %259 = vst [vmem:[%s2168_s29 + $0x140] sm:$0xff] %v258_v40  ;;  %261 = vst [vmem:[%s2168_s29 + $0x148] sm:$0xff] %v260_v41  ;;  %v262_v42 = vld [vmem:[%s2163_s28 + $0x2a0] sm:$0xff]  ;;  %v264_v43 = vld [vmem:[%s2163_s28 + $0x2a8] sm:$0xff] }
  0x2b   : > { %v266_v44 = vld [vmem:[%s2163_s28 + $0x2c0] sm:$0xff]  ;;  %263 = vst [vmem:[%s2168_s29 + $0x150] sm:$0xff] %v262_v42  ;;  %265 = vst [vmem:[%s2168_s29 + $0x158] sm:$0xff] %v264_v43  ;;  %v268_v45 = vld [vmem:[%s2163_s28 + $0x2c8] sm:$0xff] }
  0x2c   : > { %267 = vst [vmem:[%s2168_s29 + $0x160] sm:$0xff] %v266_v44  ;;  %v270_v46 = vld [vmem:[%s2163_s28 + $0x2e0] sm:$0xff]  ;;  %v272_v47 = vld [vmem:[%s2163_s28 + $0x2e8] sm:$0xff]  ;;  %269 = vst [vmem:[%s2168_s29 + $0x168] sm:$0xff] %v268_v45 }
  0x2d   : > { %271 = vst [vmem:[%s2168_s29 + $0x170] sm:$0xff] %v270_v46  ;;  %273 = vst [vmem:[%s2168_s29 + $0x178] sm:$0xff] %v272_v47  ;;  %v274_v48 = vld [vmem:[%s2163_s28 + $0x300] sm:$0xff]  ;;  %v276_v49 = vld [vmem:[%s2163_s28 + $0x308] sm:$0xff] }
  0x2e   : > { %v278_v50 = vld [vmem:[%s2163_s28 + $0x320] sm:$0xff]  ;;  %275 = vst [vmem:[%s2168_s29 + $0x180] sm:$0xff] %v274_v48  ;;  %277 = vst [vmem:[%s2168_s29 + $0x188] sm:$0xff] %v276_v49  ;;  %v280_v51 = vld [vmem:[%s2163_s28 + $0x328] sm:$0xff] }
  0x2f   : > { %279 = vst [vmem:[%s2168_s29 + $0x190] sm:$0xff] %v278_v50  ;;  %v282_v52 = vld [vmem:[%s2163_s28 + $0x340] sm:$0xff]  ;;  %v284_v53 = vld [vmem:[%s2163_s28 + $0x348] sm:$0xff]  ;;  %281 = vst [vmem:[%s2168_s29 + $0x198] sm:$0xff] %v280_v51 }
  0x30   : > { %283 = vst [vmem:[%s2168_s29 + $0x1a0] sm:$0xff] %v282_v52  ;;  %285 = vst [vmem:[%s2168_s29 + $0x1a8] sm:$0xff] %v284_v53  ;;  %v286_v54 = vld [vmem:[%s2163_s28 + $0x360] sm:$0xff]  ;;  %v288_v55 = vld [vmem:[%s2163_s28 + $0x368] sm:$0xff] }
  0x31   : > { %v290_v56 = vld [vmem:[%s2163_s28 + $0x380] sm:$0xff]  ;;  %287 = vst [vmem:[%s2168_s29 + $0x1b0] sm:$0xff] %v286_v54  ;;  %289 = vst [vmem:[%s2168_s29 + $0x1b8] sm:$0xff] %v288_v55  ;;  %v292_v57 = vld [vmem:[%s2163_s28 + $0x388] sm:$0xff] }
  0x32   : > { %291 = vst [vmem:[%s2168_s29 + $0x1c0] sm:$0xff] %v290_v56  ;;  %v294_v58 = vld [vmem:[%s2163_s28 + $0x3a0] sm:$0xff]  ;;  %v296_v59 = vld [vmem:[%s2163_s28 + $0x3a8] sm:$0xff]  ;;  %293 = vst [vmem:[%s2168_s29 + $0x1c8] sm:$0xff] %v292_v57 }
  0x33   : > { %295 = vst [vmem:[%s2168_s29 + $0x1d0] sm:$0xff] %v294_v58  ;;  %297 = vst [vmem:[%s2168_s29 + $0x1d8] sm:$0xff] %v296_v59  ;;  %v298_v60 = vld [vmem:[%s2163_s28 + $0x3c0] sm:$0xff]  ;;  %v300_v61 = vld [vmem:[%s2163_s28 + $0x3c8] sm:$0xff] }
  0x34   : > { %v302_v62 = vld [vmem:[%s2163_s28 + $0x3e0] sm:$0xff]  ;;  %299 = vst [vmem:[%s2168_s29 + $0x1e0] sm:$0xff] %v298_v60  ;;  %301 = vst [vmem:[%s2168_s29 + $0x1e8] sm:$0xff] %v300_v61  ;;  %v304_v63 = vld [vmem:[%s2163_s28 + $0x3e8] sm:$0xff] }
  0x35   : > { %303 = vst [vmem:[%s2168_s29 + $0x1f0] sm:$0xff] %v302_v62  ;;  %v306_v0 = vld [vmem:[%s2163_s28 + $0x400] sm:$0xff]  ;;  %v308_v1 = vld [vmem:[%s2163_s28 + $0x408] sm:$0xff]  ;;  %305 = vst [vmem:[%s2168_s29 + $0x1f8] sm:$0xff] %v304_v63 }
  0x36   : > { %307 = vst [vmem:[%s2168_s29 + $0x200] sm:$0xff] %v306_v0  ;;  %309 = vst [vmem:[%s2168_s29 + $0x208] sm:$0xff] %v308_v1  ;;  %v310_v2 = vld [vmem:[%s2163_s28 + $0x420] sm:$0xff]  ;;  %v312_v3 = vld [vmem:[%s2163_s28 + $0x428] sm:$0xff] }
  0x37   : > { %v314_v4 = vld [vmem:[%s2163_s28 + $0x440] sm:$0xff]  ;;  %311 = vst [vmem:[%s2168_s29 + $0x210] sm:$0xff] %v310_v2  ;;  %313 = vst [vmem:[%s2168_s29 + $0x218] sm:$0xff] %v312_v3  ;;  %v316_v5 = vld [vmem:[%s2163_s28 + $0x448] sm:$0xff] }
  0x38   : > { %315 = vst [vmem:[%s2168_s29 + $0x220] sm:$0xff] %v314_v4  ;;  %v318_v6 = vld [vmem:[%s2163_s28 + $0x460] sm:$0xff]  ;;  %v320_v7 = vld [vmem:[%s2163_s28 + $0x468] sm:$0xff]  ;;  %317 = vst [vmem:[%s2168_s29 + $0x228] sm:$0xff] %v316_v5 }
  0x39   : > { %319 = vst [vmem:[%s2168_s29 + $0x230] sm:$0xff] %v318_v6  ;;  %321 = vst [vmem:[%s2168_s29 + $0x238] sm:$0xff] %v320_v7  ;;  %v322_v8 = vld [vmem:[%s2163_s28 + $0x480] sm:$0xff]  ;;  %v324_v9 = vld [vmem:[%s2163_s28 + $0x488] sm:$0xff] }
  0x3a   : > { %v326_v10 = vld [vmem:[%s2163_s28 + $0x4a0] sm:$0xff]  ;;  %323 = vst [vmem:[%s2168_s29 + $0x240] sm:$0xff] %v322_v8  ;;  %325 = vst [vmem:[%s2168_s29 + $0x248] sm:$0xff] %v324_v9  ;;  %v328_v11 = vld [vmem:[%s2163_s28 + $0x4a8] sm:$0xff] }
  0x3b   : > { %327 = vst [vmem:[%s2168_s29 + $0x250] sm:$0xff] %v326_v10  ;;  %v330_v12 = vld [vmem:[%s2163_s28 + $0x4c0] sm:$0xff]  ;;  %v332_v13 = vld [vmem:[%s2163_s28 + $0x4c8] sm:$0xff]  ;;  %329 = vst [vmem:[%s2168_s29 + $0x258] sm:$0xff] %v328_v11 }
  0x3c   : > { %331 = vst [vmem:[%s2168_s29 + $0x260] sm:$0xff] %v330_v12  ;;  %333 = vst [vmem:[%s2168_s29 + $0x268] sm:$0xff] %v332_v13  ;;  %v334_v14 = vld [vmem:[%s2163_s28 + $0x4e0] sm:$0xff]  ;;  %v336_v15 = vld [vmem:[%s2163_s28 + $0x4e8] sm:$0xff] }
  0x3d   : > { %v338_v16 = vld [vmem:[%s2163_s28 + $0x500] sm:$0xff]  ;;  %335 = vst [vmem:[%s2168_s29 + $0x270] sm:$0xff] %v334_v14  ;;  %337 = vst [vmem:[%s2168_s29 + $0x278] sm:$0xff] %v336_v15  ;;  %v340_v17 = vld [vmem:[%s2163_s28 + $0x508] sm:$0xff] }
  0x3e   : > { %339 = vst [vmem:[%s2168_s29 + $0x280] sm:$0xff] %v338_v16  ;;  %v342_v18 = vld [vmem:[%s2163_s28 + $0x520] sm:$0xff]  ;;  %v344_v19 = vld [vmem:[%s2163_s28 + $0x528] sm:$0xff]  ;;  %341 = vst [vmem:[%s2168_s29 + $0x288] sm:$0xff] %v340_v17 }
  0x3f   : > { %343 = vst [vmem:[%s2168_s29 + $0x290] sm:$0xff] %v342_v18  ;;  %345 = vst [vmem:[%s2168_s29 + $0x298] sm:$0xff] %v344_v19  ;;  %v346_v20 = vld [vmem:[%s2163_s28 + $0x540] sm:$0xff]  ;;  %v348_v21 = vld [vmem:[%s2163_s28 + $0x548] sm:$0xff] }
  0x40   : > { %v350_v22 = vld [vmem:[%s2163_s28 + $0x560] sm:$0xff]  ;;  %347 = vst [vmem:[%s2168_s29 + $0x2a0] sm:$0xff] %v346_v20  ;;  %349 = vst [vmem:[%s2168_s29 + $0x2a8] sm:$0xff] %v348_v21  ;;  %v352_v23 = vld [vmem:[%s2163_s28 + $0x568] sm:$0xff] }
  0x41   : > { %351 = vst [vmem:[%s2168_s29 + $0x2b0] sm:$0xff] %v350_v22  ;;  %v354_v24 = vld [vmem:[%s2163_s28 + $0x580] sm:$0xff]  ;;  %v356_v25 = vld [vmem:[%s2163_s28 + $0x588] sm:$0xff]  ;;  %353 = vst [vmem:[%s2168_s29 + $0x2b8] sm:$0xff] %v352_v23 }
  0x42   : > { %355 = vst [vmem:[%s2168_s29 + $0x2c0] sm:$0xff] %v354_v24  ;;  %357 = vst [vmem:[%s2168_s29 + $0x2c8] sm:$0xff] %v356_v25  ;;  %v358_v26 = vld [vmem:[%s2163_s28 + $0x5a0] sm:$0xff]  ;;  %v360_v27 = vld [vmem:[%s2163_s28 + $0x5a8] sm:$0xff] }
  0x43   : > { %v362_v28 = vld [vmem:[%s2163_s28 + $0x5c0] sm:$0xff]  ;;  %359 = vst [vmem:[%s2168_s29 + $0x2d0] sm:$0xff] %v358_v26  ;;  %361 = vst [vmem:[%s2168_s29 + $0x2d8] sm:$0xff] %v360_v27  ;;  %v364_v29 = vld [vmem:[%s2163_s28 + $0x5c8] sm:$0xff] }
  0x44   : > { %363 = vst [vmem:[%s2168_s29 + $0x2e0] sm:$0xff] %v362_v28  ;;  %v366_v30 = vld [vmem:[%s2163_s28 + $0x5e0] sm:$0xff]  ;;  %v368_v31 = vld [vmem:[%s2163_s28 + $0x5e8] sm:$0xff]  ;;  %365 = vst [vmem:[%s2168_s29 + $0x2e8] sm:$0xff] %v364_v29 }
  0x45   : > { %367 = vst [vmem:[%s2168_s29 + $0x2f0] sm:$0xff] %v366_v30  ;;  %369 = vst [vmem:[%s2168_s29 + $0x2f8] sm:$0xff] %v368_v31  ;;  %v370_v32 = vld [vmem:[%s2163_s28 + $0x600] sm:$0xff]  ;;  %v372_v33 = vld [vmem:[%s2163_s28 + $0x608] sm:$0xff] }
  0x46   : > { %v374_v34 = vld [vmem:[%s2163_s28 + $0x620] sm:$0xff]  ;;  %371 = vst [vmem:[%s2168_s29 + $0x300] sm:$0xff] %v370_v32  ;;  %373 = vst [vmem:[%s2168_s29 + $0x308] sm:$0xff] %v372_v33  ;;  %v376_v35 = vld [vmem:[%s2163_s28 + $0x628] sm:$0xff] }
  0x47   : > { %375 = vst [vmem:[%s2168_s29 + $0x310] sm:$0xff] %v374_v34  ;;  %v378_v36 = vld [vmem:[%s2163_s28 + $0x640] sm:$0xff]  ;;  %v380_v37 = vld [vmem:[%s2163_s28 + $0x648] sm:$0xff]  ;;  %377 = vst [vmem:[%s2168_s29 + $0x318] sm:$0xff] %v376_v35 }
  0x48   : > { %379 = vst [vmem:[%s2168_s29 + $0x320] sm:$0xff] %v378_v36  ;;  %381 = vst [vmem:[%s2168_s29 + $0x328] sm:$0xff] %v380_v37  ;;  %v382_v38 = vld [vmem:[%s2163_s28 + $0x660] sm:$0xff]  ;;  %v384_v39 = vld [vmem:[%s2163_s28 + $0x668] sm:$0xff] }
  0x49   : > { %v386_v40 = vld [vmem:[%s2163_s28 + $0x680] sm:$0xff]  ;;  %383 = vst [vmem:[%s2168_s29 + $0x330] sm:$0xff] %v382_v38  ;;  %385 = vst [vmem:[%s2168_s29 + $0x338] sm:$0xff] %v384_v39  ;;  %v388_v41 = vld [vmem:[%s2163_s28 + $0x688] sm:$0xff] }
  0x4a   : > { %387 = vst [vmem:[%s2168_s29 + $0x340] sm:$0xff] %v386_v40  ;;  %v390_v42 = vld [vmem:[%s2163_s28 + $0x6a0] sm:$0xff]  ;;  %v392_v43 = vld [vmem:[%s2163_s28 + $0x6a8] sm:$0xff]  ;;  %389 = vst [vmem:[%s2168_s29 + $0x348] sm:$0xff] %v388_v41 }
  0x4b   : > { %391 = vst [vmem:[%s2168_s29 + $0x350] sm:$0xff] %v390_v42  ;;  %393 = vst [vmem:[%s2168_s29 + $0x358] sm:$0xff] %v392_v43  ;;  %v394_v44 = vld [vmem:[%s2163_s28 + $0x6c0] sm:$0xff]  ;;  %v396_v45 = vld [vmem:[%s2163_s28 + $0x6c8] sm:$0xff] }
  0x4c   : > { %v398_v46 = vld [vmem:[%s2163_s28 + $0x6e0] sm:$0xff]  ;;  %395 = vst [vmem:[%s2168_s29 + $0x360] sm:$0xff] %v394_v44  ;;  %397 = vst [vmem:[%s2168_s29 + $0x368] sm:$0xff] %v396_v45  ;;  %v400_v47 = vld [vmem:[%s2163_s28 + $0x6e8] sm:$0xff] }
  0x4d   : > { %399 = vst [vmem:[%s2168_s29 + $0x370] sm:$0xff] %v398_v46  ;;  %v402_v48 = vld [vmem:[%s2163_s28 + $0x700] sm:$0xff]  ;;  %v404_v49 = vld [vmem:[%s2163_s28 + $0x708] sm:$0xff]  ;;  %401 = vst [vmem:[%s2168_s29 + $0x378] sm:$0xff] %v400_v47 }
  0x4e   : > { %403 = vst [vmem:[%s2168_s29 + $0x380] sm:$0xff] %v402_v48  ;;  %405 = vst [vmem:[%s2168_s29 + $0x388] sm:$0xff] %v404_v49  ;;  %v406_v50 = vld [vmem:[%s2163_s28 + $0x720] sm:$0xff]  ;;  %v408_v51 = vld [vmem:[%s2163_s28 + $0x728] sm:$0xff] }
  0x4f   : > { %v410_v52 = vld [vmem:[%s2163_s28 + $0x740] sm:$0xff]  ;;  %407 = vst [vmem:[%s2168_s29 + $0x390] sm:$0xff] %v406_v50  ;;  %409 = vst [vmem:[%s2168_s29 + $0x398] sm:$0xff] %v408_v51  ;;  %v412_v53 = vld [vmem:[%s2163_s28 + $0x748] sm:$0xff] }
  0x50   : > { %411 = vst [vmem:[%s2168_s29 + $0x3a0] sm:$0xff] %v410_v52  ;;  %v414_v54 = vld [vmem:[%s2163_s28 + $0x760] sm:$0xff]  ;;  %v416_v55 = vld [vmem:[%s2163_s28 + $0x768] sm:$0xff]  ;;  %413 = vst [vmem:[%s2168_s29 + $0x3a8] sm:$0xff] %v412_v53 }
  0x51   : > { %415 = vst [vmem:[%s2168_s29 + $0x3b0] sm:$0xff] %v414_v54  ;;  %417 = vst [vmem:[%s2168_s29 + $0x3b8] sm:$0xff] %v416_v55  ;;  %v418_v56 = vld [vmem:[%s2163_s28 + $0x780] sm:$0xff]  ;;  %v420_v57 = vld [vmem:[%s2163_s28 + $0x788] sm:$0xff] }
  0x52   : > { %v422_v58 = vld [vmem:[%s2163_s28 + $0x7a0] sm:$0xff]  ;;  %419 = vst [vmem:[%s2168_s29 + $0x3c0] sm:$0xff] %v418_v56  ;;  %421 = vst [vmem:[%s2168_s29 + $0x3c8] sm:$0xff] %v420_v57  ;;  %v424_v59 = vld [vmem:[%s2163_s28 + $0x7a8] sm:$0xff] }
  0x53   : > { %423 = vst [vmem:[%s2168_s29 + $0x3d0] sm:$0xff] %v422_v58  ;;  %v426_v60 = vld [vmem:[%s2163_s28 + $0x7c0] sm:$0xff]  ;;  %v428_v61 = vld [vmem:[%s2163_s28 + $0x7c8] sm:$0xff]  ;;  %425 = vst [vmem:[%s2168_s29 + $0x3d8] sm:$0xff] %v424_v59 }
  0x54   : > { %427 = vst [vmem:[%s2168_s29 + $0x3e0] sm:$0xff] %v426_v60  ;;  %429 = vst [vmem:[%s2168_s29 + $0x3e8] sm:$0xff] %v428_v61  ;;  %v430_v62 = vld [vmem:[%s2163_s28 + $0x7e0] sm:$0xff]  ;;  %v432_v63 = vld [vmem:[%s2163_s28 + $0x7e8] sm:$0xff] }
  0x55   : > { %431 = vst [vmem:[%s2168_s29 + $0x3f0] sm:$0xff] %v430_v62  ;;  %433 = vst [vmem:[%s2168_s29 + $0x3f8] sm:$0xff] %v432_v63 }
  0x56 PF: > { %p1650_p8 = scmp.ge.s32.totalorder %s2093_s16, 1  ;;  %p446_p9 = scmp.lt.s32.totalorder %s2093_s16, 3 }
  0x58   : > { %p447_p10 = pnand %p1650_p8, %p446_p9 }
  0x59   : > { %s453_s30 = sand.u32 (!%p447_p10), 1, %s2077_s12   ;;  %v1955_v0 = vld [vmem:[%s2597_s0 + $0x4] ss:$16 sps:$4 sm:$0xff] (!%p447_p10)   ;;  %s1653_s20 = sshll.u32 (!%p447_p10), %s2085_s14, 2 }
  0x5a   : > { %450 = sbr.rel (%p447_p10) target bundleno = 449 (0x1c1), region = 51  ;;  %s1651_s4 = sshll.u32 (!%p447_p10), %s453_s30, 10  ;;  %1346 = vmatprep.mubr.bf16.mxu0 (!%p447_p10), %v1955_v0  ;;  %1432 = vmatprep.mubr.bf16.mxu1 (!%p447_p10), %v1955_v0 }
  0x5b   : > { %s2431_s7 = scalar_lea.vmem (!%p447_p10), [#allocation2], %s1651_s4  ;;  %p494_p11 = scmp.lt.s32.totalorder (!%p447_p10), %s1653_s20, 7 }
  0x5c   : > { %v1857_v1 = vld [vmem:[%s2431_s7 + $0x4] ss:$16 sps:$4 sm:$0xff] (!%p447_p10)   ;;  %v1859_v2 = vld [vmem:[%s2431_s7 + $0xc] ss:$16 sps:$4 sm:$0xff] (!%p447_p10)   ;;  %v1861_v3 = vld [vmem:[%s2431_s7] ss:$16 sps:$4 sm:$0xff] (!%p447_p10)  }
  0x5d   : > { %1314 = vmatprep.subr.bf16.mxu0 (!%p447_p10), %v1857_v1  ;;  %v1862_v4 = vld [vmem:[%s2431_s7 + $0x8] ss:$16 sps:$4 sm:$0xff] (!%p447_p10)   ;;  %1400 = vmatprep.subr.bf16.mxu1 (!%p447_p10), %v1859_v2  ;;  %v1863_v5 = vld [vmem:[%s2431_s7 + $0x24] ss:$16 sps:$4 sm:$0xff] (!%p447_p10)   ;;  %v1865_v6 = vld [vmem:[%s2431_s7 + $0x2c] ss:$16 sps:$4 sm:$0xff] (!%p447_p10)  }
  0x5e   : > { %1315 = vmatpush1.bf16.msra.mxu0 (!%p447_p10), %v1861_v3  ;;  %1401 = vmatpush1.bf16.msra.mxu1 (!%p447_p10), %v1862_v4  ;;  %v1867_v7 = vld [vmem:[%s2431_s7 + $0x20] ss:$16 sps:$4 sm:$0xff] (!%p447_p10)   ;;  %v1868_v8 = vld [vmem:[%s2431_s7 + $0x28] ss:$16 sps:$4 sm:$0xff] (!%p447_p10)   ;;  %v1869_v9 = vld [vmem:[%s2431_s7 + $0x44] ss:$16 sps:$4 sm:$0xff] (!%p447_p10)  }
  0x5f   : > { %1316 = vmatprep.subr.bf16.mxu0 (!%p447_p10), %v1863_v5  ;;  %1402 = vmatprep.subr.bf16.mxu1 (!%p447_p10), %v1865_v6  ;;  %v1871_v10 = vld [vmem:[%s2431_s7 + $0x4c] ss:$16 sps:$4 sm:$0xff] (!%p447_p10)   ;;  %v1873_v11 = vld [vmem:[%s2431_s7 + $0x40] ss:$16 sps:$4 sm:$0xff] (!%p447_p10)   ;;  %v1874_v12 = vld [vmem:[%s2431_s7 + $0x48] ss:$16 sps:$4 sm:$0xff] (!%p447_p10)  }
  0x60   : > { %v1875_v13 = vld [vmem:[%s2431_s7 + $0x64] ss:$16 sps:$4 sm:$0xff] (!%p447_p10)   ;;  %v1877_v14 = vld [vmem:[%s2431_s7 + $0x6c] ss:$16 sps:$4 sm:$0xff] (!%p447_p10)   ;;  %v1879_v15 = vld [vmem:[%s2431_s7 + $0x60] ss:$16 sps:$4 sm:$0xff] (!%p447_p10)  }
  0x61   : > { %v1880_v16 = vld [vmem:[%s2431_s7 + $0x68] ss:$16 sps:$4 sm:$0xff]   ;;  %v1881_v17 = vld [vmem:[%s2431_s7 + $0x84] ss:$16 sps:$4 sm:$0xff]   ;;  %v1883_v18 = vld [vmem:[%s2431_s7 + $0x8c] ss:$16 sps:$4 sm:$0xff]  }
  0x62   : > { %1317 = vmatpush1.bf16.msra.mxu0 %v1867_v7  ;;  %1403 = vmatpush1.bf16.msra.mxu1 %v1868_v8  ;;  %v1885_v19 = vld [vmem:[%s2431_s7 + $0x80] ss:$16 sps:$4 sm:$0xff]   ;;  %v1886_v20 = vld [vmem:[%s2431_s7 + $0x88] ss:$16 sps:$4 sm:$0xff]   ;;  %v1887_v21 = vld [vmem:[%s2431_s7 + $0xa4] ss:$16 sps:$4 sm:$0xff]  }
  0x63   : > { %1318 = vmatprep.subr.bf16.mxu0 %v1869_v9  ;;  %1404 = vmatprep.subr.bf16.mxu1 %v1871_v10  ;;  %v1889_v22 = vld [vmem:[%s2431_s7 + $0xac] ss:$16 sps:$4 sm:$0xff]   ;;  %v1891_v23 = vld [vmem:[%s2431_s7 + $0xa0] ss:$16 sps:$4 sm:$0xff]   ;;  %v1892_v24 = vld [vmem:[%s2431_s7 + $0xa8] ss:$16 sps:$4 sm:$0xff]  }
  0x64   : > { %v1893_v25 = vld [vmem:[%s2431_s7 + $0xc4] ss:$16 sps:$4 sm:$0xff]   ;;  %v1895_v26 = vld [vmem:[%s2431_s7 + $0xcc] ss:$16 sps:$4 sm:$0xff]   ;;  %v1897_v27 = vld [vmem:[%s2431_s7 + $0xc0] ss:$16 sps:$4 sm:$0xff]  }
  0x65   : > { %v1898_v28 = vld [vmem:[%s2431_s7 + $0xc8] ss:$16 sps:$4 sm:$0xff]   ;;  %v1899_v29 = vld [vmem:[%s2431_s7 + $0xe4] ss:$16 sps:$4 sm:$0xff]   ;;  %v1901_v30 = vld [vmem:[%s2431_s7 + $0xec] ss:$16 sps:$4 sm:$0xff]  }
  0x66   : > { %1319 = vmatpush1.bf16.msra.mxu0 %v1873_v11  ;;  %1405 = vmatpush1.bf16.msra.mxu1 %v1874_v12  ;;  %v1903_v31 = vld [vmem:[%s2431_s7 + $0xe0] ss:$16 sps:$4 sm:$0xff]   ;;  %v1904_v32 = vld [vmem:[%s2431_s7 + $0xe8] ss:$16 sps:$4 sm:$0xff]   ;;  %v1905_v33 = vld [vmem:[%s2431_s7 + $0x104] ss:$16 sps:$4 sm:$0xff]  }
  0x67   : > { %1320 = vmatprep.subr.bf16.mxu0 %v1875_v13  ;;  %1406 = vmatprep.subr.bf16.mxu1 %v1877_v14  ;;  %v1907_v34 = vld [vmem:[%s2431_s7 + $0x10c] ss:$16 sps:$4 sm:$0xff]   ;;  %v1909_v35 = vld [vmem:[%s2431_s7 + $0x100] ss:$16 sps:$4 sm:$0xff]   ;;  %v1910_v36 = vld [vmem:[%s2431_s7 + $0x108] ss:$16 sps:$4 sm:$0xff]  }
  0x68   : > { %v1911_v37 = vld [vmem:[%s2431_s7 + $0x124] ss:$16 sps:$4 sm:$0xff]   ;;  %v1913_v38 = vld [vmem:[%s2431_s7 + $0x12c] ss:$16 sps:$4 sm:$0xff]   ;;  %v1915_v39 = vld [vmem:[%s2431_s7 + $0x120] ss:$16 sps:$4 sm:$0xff]  }
  0x69   : > { %v1916_v40 = vld [vmem:[%s2431_s7 + $0x128] ss:$16 sps:$4 sm:$0xff]   ;;  %v1917_v41 = vld [vmem:[%s2431_s7 + $0x144] ss:$16 sps:$4 sm:$0xff]   ;;  %v1919_v42 = vld [vmem:[%s2431_s7 + $0x14c] ss:$16 sps:$4 sm:$0xff]  }
  0x6a   : > { %1321 = vmatpush1.bf16.msra.mxu0 %v1879_v15  ;;  %1407 = vmatpush1.bf16.msra.mxu1 %v1880_v16  ;;  %v1921_v43 = vld [vmem:[%s2431_s7 + $0x140] ss:$16 sps:$4 sm:$0xff]   ;;  %v1922_v44 = vld [vmem:[%s2431_s7 + $0x148] ss:$16 sps:$4 sm:$0xff]   ;;  %v1923_v45 = vld [vmem:[%s2431_s7 + $0x164] ss:$16 sps:$4 sm:$0xff]  }
  0x6b   : > { %1322 = vmatprep.subr.bf16.mxu0 %v1881_v17  ;;  %1408 = vmatprep.subr.bf16.mxu1 %v1883_v18  ;;  %v1925_v46 = vld [vmem:[%s2431_s7 + $0x16c] ss:$16 sps:$4 sm:$0xff]   ;;  %v1927_v47 = vld [vmem:[%s2431_s7 + $0x160] ss:$16 sps:$4 sm:$0xff]   ;;  %v1928_v48 = vld [vmem:[%s2431_s7 + $0x168] ss:$16 sps:$4 sm:$0xff]  }
  0x6c   : > { %v1929_v49 = vld [vmem:[%s2431_s7 + $0x184] ss:$16 sps:$4 sm:$0xff]   ;;  %v1931_v50 = vld [vmem:[%s2431_s7 + $0x18c] ss:$16 sps:$4 sm:$0xff]   ;;  %v1933_v51 = vld [vmem:[%s2431_s7 + $0x180] ss:$16 sps:$4 sm:$0xff]  }
  0x6d   : > { %v1934_v52 = vld [vmem:[%s2431_s7 + $0x188] ss:$16 sps:$4 sm:$0xff]   ;;  %v1935_v53 = vld [vmem:[%s2431_s7 + $0x1a4] ss:$16 sps:$4 sm:$0xff]   ;;  %v1937_v54 = vld [vmem:[%s2431_s7 + $0x1ac] ss:$16 sps:$4 sm:$0xff]  }
  0x6e   : > { %1323 = vmatpush1.bf16.msra.mxu0 %v1885_v19  ;;  %1409 = vmatpush1.bf16.msra.mxu1 %v1886_v20  ;;  %v1939_v55 = vld [vmem:[%s2431_s7 + $0x1a0] ss:$16 sps:$4 sm:$0xff]   ;;  %v1940_v56 = vld [vmem:[%s2431_s7 + $0x1a8] ss:$16 sps:$4 sm:$0xff]   ;;  %v1941_v57 = vld [vmem:[%s2431_s7 + $0x1c4] ss:$16 sps:$4 sm:$0xff]  }
  0x6f   : > { %1324 = vmatprep.subr.bf16.mxu0 %v1887_v21  ;;  %1410 = vmatprep.subr.bf16.mxu1 %v1889_v22  ;;  %v1943_v58 = vld [vmem:[%s2431_s7 + $0x1cc] ss:$16 sps:$4 sm:$0xff]   ;;  %v1945_v59 = vld [vmem:[%s2431_s7 + $0x1c0] ss:$16 sps:$4 sm:$0xff]   ;;  %v1946_v60 = vld [vmem:[%s2431_s7 + $0x1c8] ss:$16 sps:$4 sm:$0xff]  }
  0x70   : > { %v1947_v61 = vld [vmem:[%s2431_s7 + $0x1e4] ss:$16 sps:$4 sm:$0xff]   ;;  %v1949_v62 = vld [vmem:[%s2431_s7 + $0x1ec] ss:$16 sps:$4 sm:$0xff]   ;;  %v1951_v63 = vld [vmem:[%s2431_s7 + $0x1e0] ss:$16 sps:$4 sm:$0xff]  }
  0x71   : > { %v1952_v0 = vld [vmem:[%s2431_s7 + $0x1e8] ss:$16 sps:$4 sm:$0xff]   ;;  %v1958_v1 = vld [vmem:[%s2431_s7 + $0x204] ss:$16 sps:$4 sm:$0xff]   ;;  %v1961_v2 = vld [vmem:[%s2431_s7 + $0x20c] ss:$16 sps:$4 sm:$0xff]  }
  0x72   : > { %1325 = vmatpush1.bf16.msra.mxu0 %v1891_v23  ;;  %1411 = vmatpush1.bf16.msra.mxu1 %v1892_v24  ;;  %v1953_v3 = vld [vmem:[%s2597_s0] ss:$16 sps:$4 sm:$0xff]   ;;  %v1959_v5 = vld [vmem:[%s2431_s7 + $0x208] ss:$16 sps:$4 sm:$0xff]   ;;  %v1964_v6 = vld [vmem:[%s2431_s7 + $0x224] ss:$16 sps:$4 sm:$0xff]  }
  0x73   : > { %1326 = vmatprep.subr.bf16.mxu0 %v1893_v25  ;;  %1412 = vmatprep.subr.bf16.mxu1 %v1895_v26  ;;  %v1956_v4 = vld [vmem:[%s2431_s7 + $0x200] ss:$16 sps:$4 sm:$0xff]   ;;  %v1967_v7 = vld [vmem:[%s2431_s7 + $0x22c] ss:$16 sps:$4 sm:$0xff]   ;;  %v1965_v9 = vld [vmem:[%s2431_s7 + $0x228] ss:$16 sps:$4 sm:$0xff]  }
  0x74   : > { %v1962_v8 = vld [vmem:[%s2431_s7 + $0x220] ss:$16 sps:$4 sm:$0xff]   ;;  %v1970_v10 = vld [vmem:[%s2431_s7 + $0x244] ss:$16 sps:$4 sm:$0xff]   ;;  %v1973_v11 = vld [vmem:[%s2431_s7 + $0x24c] ss:$16 sps:$4 sm:$0xff]  }
  0x75   : > { %v1968_v12 = vld [vmem:[%s2431_s7 + $0x240] ss:$16 sps:$4 sm:$0xff]   ;;  %v1971_v13 = vld [vmem:[%s2431_s7 + $0x248] ss:$16 sps:$4 sm:$0xff]   ;;  %v1976_v14 = vld [vmem:[%s2431_s7 + $0x264] ss:$16 sps:$4 sm:$0xff]  }
  0x76   : > { %1327 = vmatpush1.bf16.msra.mxu0 %v1897_v27  ;;  %1413 = vmatpush1.bf16.msra.mxu1 %v1898_v28  ;;  %v1979_v15 = vld [vmem:[%s2431_s7 + $0x26c] ss:$16 sps:$4 sm:$0xff]   ;;  %v1974_v16 = vld [vmem:[%s2431_s7 + $0x260] ss:$16 sps:$4 sm:$0xff]   ;;  %v1977_v17 = vld [vmem:[%s2431_s7 + $0x268] ss:$16 sps:$4 sm:$0xff]  }
  0x77   : > { %1328 = vmatprep.subr.bf16.mxu0 %v1899_v29  ;;  %1414 = vmatprep.subr.bf16.mxu1 %v1901_v30  ;;  %v1982_v18 = vld [vmem:[%s2431_s7 + $0x284] ss:$16 sps:$4 sm:$0xff]   ;;  %v1985_v19 = vld [vmem:[%s2431_s7 + $0x28c] ss:$16 sps:$4 sm:$0xff]   ;;  %v1980_v20 = vld [vmem:[%s2431_s7 + $0x280] ss:$16 sps:$4 sm:$0xff]  }
  0x78   : > { %v1983_v21 = vld [vmem:[%s2431_s7 + $0x288] ss:$16 sps:$4 sm:$0xff]   ;;  %v1988_v22 = vld [vmem:[%s2431_s7 + $0x2a4] ss:$16 sps:$4 sm:$0xff]   ;;  %v1991_v23 = vld [vmem:[%s2431_s7 + $0x2ac] ss:$16 sps:$4 sm:$0xff]  }
  0x79   : > { %v1986_v24 = vld [vmem:[%s2431_s7 + $0x2a0] ss:$16 sps:$4 sm:$0xff]   ;;  %v1989_v25 = vld [vmem:[%s2431_s7 + $0x2a8] ss:$16 sps:$4 sm:$0xff]   ;;  %v1994_v26 = vld [vmem:[%s2431_s7 + $0x2c4] ss:$16 sps:$4 sm:$0xff]  }
  0x7a   : > { %1329 = vmatpush1.bf16.msra.mxu0 %v1903_v31  ;;  %1415 = vmatpush1.bf16.msra.mxu1 %v1904_v32  ;;  %v1997_v27 = vld [vmem:[%s2431_s7 + $0x2cc] ss:$16 sps:$4 sm:$0xff]   ;;  %v1992_v29 = vld [vmem:[%s2431_s7 + $0x2c0] ss:$16 sps:$4 sm:$0xff]   ;;  %v1995_v30 = vld [vmem:[%s2431_s7 + $0x2c8] ss:$16 sps:$4 sm:$0xff]  }
  0x7b   : > { %1330 = vmatprep.subr.bf16.mxu0 %v1905_v33  ;;  %1416 = vmatprep.subr.bf16.mxu1 %v1907_v34  ;;  %v2054_v28 = vld [vmem:[%s2597_s0 + $0xc] ss:$16 sps:$4 sm:$0xff]   ;;  %v2000_v31 = vld [vmem:[%s2431_s7 + $0x2e4] ss:$16 sps:$4 sm:$0xff]   ;;  %v1998_v33 = vld [vmem:[%s2431_s7 + $0x2e0] ss:$16 sps:$4 sm:$0xff]  }
  0x7c   : > { %v2003_v32 = vld [vmem:[%s2431_s7 + $0x2ec] ss:$16 sps:$4 sm:$0xff]   ;;  %v2001_v34 = vld [vmem:[%s2431_s7 + $0x2e8] ss:$16 sps:$4 sm:$0xff]   ;;  %s2609_s20 = smov (!%p494_p11, %s1653_s20), 7  ;;  %s1652_s26 = sshll.u32 %s453_s30, 5 }
  0x7d   : > { %s496_s25 = scalar_lea.vmem %s2599_s2, %s2609_s20  ;;  %s484_s27 = scalar_lea.vmem [#allocation3], %s1652_s26 }
  0x7e   : > { %1331 = vmatpush1.bf16.msra.mxu0 %v1909_v35  ;;  %1417 = vmatpush1.bf16.msra.mxu1 %v1910_v36  ;;  %v2006_v35 = vld [vmem:[%s2431_s7 + $0x304] ss:$16 sps:$4 sm:$0xff]   ;;  %v2009_v36 = vld [vmem:[%s2431_s7 + $0x30c] ss:$16 sps:$4 sm:$0xff]   ;;  %s1800_s12 = sshll.u32 (%p2150_p6), %s2085_s14, 4 }
  0x7f   : > { %1332 = vmatprep.subr.bf16.mxu0 %v1911_v37  ;;  %1418 = vmatprep.subr.bf16.mxu1 %v1913_v38  ;;  %v2004_v37 = vld [vmem:[%s2431_s7 + $0x300] ss:$16 sps:$4 sm:$0xff]   ;;  %v2007_v38 = vld [vmem:[%s2431_s7 + $0x308] ss:$16 sps:$4 sm:$0xff]   ;;  %s1526_s30 = scalar_lea.vmem (%p2150_p6), %s2600_s3, %s1800_s12 }
  0x82   : > { %1333 = vmatpush1.bf16.msra.mxu0 %v1915_v39  ;;  %1419 = vmatpush1.bf16.msra.mxu1 %v1916_v40  ;;  %v2012_v39 = vld [vmem:[%s2431_s7 + $0x324] ss:$16 sps:$4 sm:$0xff]   ;;  %v2015_v40 = vld [vmem:[%s2431_s7 + $0x32c] ss:$16 sps:$4 sm:$0xff]  }
  0x83   : > { %1334 = vmatprep.subr.bf16.mxu0 %v1917_v41  ;;  %1420 = vmatprep.subr.bf16.mxu1 %v1919_v42  ;;  %v2010_v41 = vld [vmem:[%s2431_s7 + $0x320] ss:$16 sps:$4 sm:$0xff]   ;;  %v2013_v42 = vld [vmem:[%s2431_s7 + $0x328] ss:$16 sps:$4 sm:$0xff]  }
  0x86   : > { %1335 = vmatpush1.bf16.msra.mxu0 %v1921_v43  ;;  %1421 = vmatpush1.bf16.msra.mxu1 %v1922_v44  ;;  %v2018_v43 = vld [vmem:[%s2431_s7 + $0x344] ss:$16 sps:$4 sm:$0xff]   ;;  %v2021_v44 = vld [vmem:[%s2431_s7 + $0x34c] ss:$16 sps:$4 sm:$0xff]  }
  0x87   : > { %1336 = vmatprep.subr.bf16.mxu0 %v1923_v45  ;;  %1422 = vmatprep.subr.bf16.mxu1 %v1925_v46  ;;  %v2016_v45 = vld [vmem:[%s2431_s7 + $0x340] ss:$16 sps:$4 sm:$0xff]   ;;  %v2019_v46 = vld [vmem:[%s2431_s7 + $0x348] ss:$16 sps:$4 sm:$0xff]  }
  0x8a   : > { %1337 = vmatpush1.bf16.msra.mxu0 %v1927_v47  ;;  %1423 = vmatpush1.bf16.msra.mxu1 %v1928_v48  ;;  %v2024_v47 = vld [vmem:[%s2431_s7 + $0x364] ss:$16 sps:$4 sm:$0xff]   ;;  %v2027_v48 = vld [vmem:[%s2431_s7 + $0x36c] ss:$16 sps:$4 sm:$0xff]  }
  0x8b   : > { %1338 = vmatprep.subr.bf16.mxu0 %v1929_v49  ;;  %1424 = vmatprep.subr.bf16.mxu1 %v1931_v50  ;;  %v2022_v49 = vld [vmem:[%s2431_s7 + $0x360] ss:$16 sps:$4 sm:$0xff]   ;;  %v2025_v50 = vld [vmem:[%s2431_s7 + $0x368] ss:$16 sps:$4 sm:$0xff]  }
  0x8e   : > { %1339 = vmatpush1.bf16.msra.mxu0 %v1933_v51  ;;  %1425 = vmatpush1.bf16.msra.mxu1 %v1934_v52  ;;  %v2030_v51 = vld [vmem:[%s2431_s7 + $0x384] ss:$16 sps:$4 sm:$0xff]   ;;  %v2033_v52 = vld [vmem:[%s2431_s7 + $0x38c] ss:$16 sps:$4 sm:$0xff]  }
  0x8f   : > { %1340 = vmatprep.subr.bf16.mxu0 %v1935_v53  ;;  %1426 = vmatprep.subr.bf16.mxu1 %v1937_v54  ;;  %v2028_v53 = vld [vmem:[%s2431_s7 + $0x380] ss:$16 sps:$4 sm:$0xff]   ;;  %v2031_v54 = vld [vmem:[%s2431_s7 + $0x388] ss:$16 sps:$4 sm:$0xff]  }
  0x92   : > { %1341 = vmatpush1.bf16.msra.mxu0 %v1939_v55  ;;  %1427 = vmatpush1.bf16.msra.mxu1 %v1940_v56  ;;  %v2036_v55 = vld [vmem:[%s2431_s7 + $0x3a4] ss:$16 sps:$4 sm:$0xff]   ;;  %v2039_v56 = vld [vmem:[%s2431_s7 + $0x3ac] ss:$16 sps:$4 sm:$0xff]  }
  0x93   : > { %1342 = vmatprep.subr.bf16.mxu0 %v1941_v57  ;;  %1428 = vmatprep.subr.bf16.mxu1 %v1943_v58  ;;  %v2034_v57 = vld [vmem:[%s2431_s7 + $0x3a0] ss:$16 sps:$4 sm:$0xff]   ;;  %v2037_v58 = vld [vmem:[%s2431_s7 + $0x3a8] ss:$16 sps:$4 sm:$0xff]  }
  0x96   : > { %1343 = vmatpush1.bf16.msra.mxu0 %v1945_v59  ;;  %1429 = vmatpush1.bf16.msra.mxu1 %v1946_v60  ;;  %v2042_v59 = vld [vmem:[%s2431_s7 + $0x3c4] ss:$16 sps:$4 sm:$0xff]   ;;  %v2045_v60 = vld [vmem:[%s2431_s7 + $0x3cc] ss:$16 sps:$4 sm:$0xff]  }
  0x97   : > { %1344 = vmatprep.subr.bf16.mxu0 %v1947_v61  ;;  %1430 = vmatprep.subr.bf16.mxu1 %v1949_v62  ;;  %v2040_v61 = vld [vmem:[%s2431_s7 + $0x3c0] ss:$16 sps:$4 sm:$0xff]   ;;  %v2043_v62 = vld [vmem:[%s2431_s7 + $0x3c8] ss:$16 sps:$4 sm:$0xff]  }
  0x9a   : > { %1345 = vmatpush1.bf16.msra.mxu0 %v1951_v63  ;;  %1431 = vmatpush1.bf16.msra.mxu1 %v1952_v0  ;;  %v2048_v63 = vld [vmem:[%s2431_s7 + $0x3e4] ss:$16 sps:$4 sm:$0xff]   ;;  %v2051_v0 = vld [vmem:[%s2431_s7 + $0x3ec] ss:$16 sps:$4 sm:$0xff]  }
  0x9b   : > { %1357 = vmatprep.subr.bf16.mxu0 %v1958_v1  ;;  %1443 = vmatprep.subr.bf16.mxu1 %v1961_v2  ;;  %v2046_v1 = vld [vmem:[%s2431_s7 + $0x3e0] ss:$16 sps:$4 sm:$0xff]   ;;  %v2049_v2 = vld [vmem:[%s2431_s7 + $0x3e8] ss:$16 sps:$4 sm:$0xff]  }
  0x9d   : > { %1347 = vmatmul.mubr.bf16.vlgmr.msra.gmra.mrb[0].mxu0 %v1953_v3  ;;  %1433 = vmatmul.mubr.bf16.vlgmr.msra.gmra.mrb[0].mxu1 %v1953_v3  ;;  %v2052_v3 = vld [vmem:[%s2597_s0 + $0x8] ss:$16 sps:$4 sm:$0xff]  }
  0x9e   : > { %1358 = vmatpush1.bf16.msra.mxu0 %v1956_v4  ;;  %1444 = vmatpush1.bf16.msra.mxu1 %v1959_v5  ;;  %v634_v4 = vlaneseq }
  0x9f   : > { %1359 = vmatprep.subr.bf16.mxu0 %v1964_v6  ;;  %1445 = vmatprep.subr.bf16.mxu1 %v1967_v7 }
  0xa0   : > { %1389 = vmatprep.mubr.bf16.mxu0 %v2054_v28  ;;  %1475 = vmatprep.mubr.bf16.mxu1 %v2054_v28  ;;  %v635_v5 = vshrl.u32 %v634_v4, 7 }
  0xa2   : > { %1360 = vmatpush1.bf16.msra.mxu0 %v1962_v8  ;;  %1446 = vmatpush1.bf16.msra.mxu1 %v1965_v9  ;;  %v636_v6 = vsub.s32 0, %v635_v5  ;;  %v644_v7 = vsub.s32 2, %v635_v5  ;;  %v632_v8 = vld [vmem:[%s496_s25] sm:$0xf]  ;;  %v640_v9 = vsub.s32 1, %v635_v5 }
  0xa3   : > { %1361 = vmatprep.subr.bf16.mxu0 %v1970_v10  ;;  %1447 = vmatprep.subr.bf16.mxu1 %v1973_v11  ;;  %v648_v10 = vsub.s32 3, %v635_v5 }
  0xa4   : > { %v637_v11 = vrot.slane %v632_v8, %v636_v6 }
  0xa6   : > { %1362 = vmatpush1.bf16.msra.mxu0 %v1968_v12  ;;  %1448 = vmatpush1.bf16.msra.mxu1 %v1971_v13  ;;  %v645_v12 = vrot.slane %v632_v8, %v644_v7  ;;  %v641_v13 = vrot.slane %v632_v8, %v640_v9 }
  0xa7   : > { %1363 = vmatprep.subr.bf16.mxu0 %v1976_v14  ;;  %1449 = vmatprep.subr.bf16.mxu1 %v1979_v15  ;;  %v649_v14 = vrot.slane %v632_v8, %v648_v10 }
  0xaa   : > { %1364 = vmatpush1.bf16.msra.mxu0 %v1974_v16  ;;  %1450 = vmatpush1.bf16.msra.mxu1 %v1977_v17 }
  0xab   : > { %1365 = vmatprep.subr.bf16.mxu0 %v1982_v18  ;;  %1451 = vmatprep.subr.bf16.mxu1 %v1985_v19 }
  0xae   : > { %1366 = vmatpush1.bf16.msra.mxu0 %v1980_v20  ;;  %1452 = vmatpush1.bf16.msra.mxu1 %v1983_v21 }
  0xaf   : > { %1367 = vmatprep.subr.bf16.mxu0 %v1988_v22  ;;  %1453 = vmatprep.subr.bf16.mxu1 %v1991_v23 }
  0xb2   : > { %1368 = vmatpush1.bf16.msra.mxu0 %v1986_v24  ;;  %1454 = vmatpush1.bf16.msra.mxu1 %v1989_v25 }
  0xb3   : > { %1369 = vmatprep.subr.bf16.mxu0 %v1994_v26  ;;  %1455 = vmatprep.subr.bf16.mxu1 %v1997_v27 }
  0xb6   : > { %1370 = vmatpush1.bf16.msra.mxu0 %v1992_v29  ;;  %1456 = vmatpush1.bf16.msra.mxu1 %v1995_v30 }
  0xb7   : > { %1371 = vmatprep.subr.bf16.mxu0 %v2000_v31  ;;  %1457 = vmatprep.subr.bf16.mxu1 %v2003_v32 }
  0xba   : > { %1372 = vmatpush1.bf16.msra.mxu0 %v1998_v33  ;;  %1458 = vmatpush1.bf16.msra.mxu1 %v2001_v34 }
  0xbb   : > { %1373 = vmatprep.subr.bf16.mxu0 %v2006_v35  ;;  %1459 = vmatprep.subr.bf16.mxu1 %v2009_v36 }
  0xbe   : > { %1374 = vmatpush1.bf16.msra.mxu0 %v2004_v37  ;;  %1460 = vmatpush1.bf16.msra.mxu1 %v2007_v38 }
  0xbf   : > { %1375 = vmatprep.subr.bf16.mxu0 %v2012_v39  ;;  %1461 = vmatprep.subr.bf16.mxu1 %v2015_v40 }
  0xc2   : > { %1376 = vmatpush1.bf16.msra.mxu0 %v2010_v41  ;;  %1462 = vmatpush1.bf16.msra.mxu1 %v2013_v42 }
  0xc3   : > { %1377 = vmatprep.subr.bf16.mxu0 %v2018_v43  ;;  %1463 = vmatprep.subr.bf16.mxu1 %v2021_v44 }
  0xc6   : > { %1378 = vmatpush1.bf16.msra.mxu0 %v2016_v45  ;;  %1464 = vmatpush1.bf16.msra.mxu1 %v2019_v46 }
  0xc7   : > { %1379 = vmatprep.subr.bf16.mxu0 %v2024_v47  ;;  %1465 = vmatprep.subr.bf16.mxu1 %v2027_v48 }
  0xca   : > { %1380 = vmatpush1.bf16.msra.mxu0 %v2022_v49  ;;  %1466 = vmatpush1.bf16.msra.mxu1 %v2025_v50 }
  0xcb   : > { %1381 = vmatprep.subr.bf16.mxu0 %v2030_v51  ;;  %1467 = vmatprep.subr.bf16.mxu1 %v2033_v52 }
  0xce   : > { %1382 = vmatpush1.bf16.msra.mxu0 %v2028_v53  ;;  %1468 = vmatpush1.bf16.msra.mxu1 %v2031_v54 }
  0xcf   : > { %1383 = vmatprep.subr.bf16.mxu0 %v2036_v55  ;;  %1469 = vmatprep.subr.bf16.mxu1 %v2039_v56 }
  0xd2   : > { %1384 = vmatpush1.bf16.msra.mxu0 %v2034_v57  ;;  %1470 = vmatpush1.bf16.msra.mxu1 %v2037_v58 }
  0xd3   : > { %1385 = vmatprep.subr.bf16.mxu0 %v2042_v59  ;;  %1471 = vmatprep.subr.bf16.mxu1 %v2045_v60 }
  0xd6   : > { %1386 = vmatpush1.bf16.msra.mxu0 %v2040_v61  ;;  %1472 = vmatpush1.bf16.msra.mxu1 %v2043_v62 }
  0xd7   : > { %1387 = vmatprep.subr.bf16.mxu0 %v2048_v63  ;;  %1473 = vmatprep.subr.bf16.mxu1 %v2051_v0 }
  0xda   : > { %1388 = vmatpush1.bf16.msra.mxu0 %v2046_v1  ;;  %1474 = vmatpush1.bf16.msra.mxu1 %v2049_v2 }
  0xdd   : > { %1390 = vmatmul.mubr.bf16.vlgmr.msra.gmra.mrb[0].mxu0 %v2052_v3  ;;  %1476 = vmatmul.mubr.bf16.vlgmr.msra.gmra.mrb[0].mxu1 %v2052_v3 }
 0x1b0   : > { %v1391_v15 = vpop.f32.mrb[0].mxu0  ;;  %v1477_v16 = vpop.f32.mrb[0].mxu1 }
 0x1b1   : > { %v1801_v17 = vadd.f32 %v1391_v15, %v637_v11  ;;  %v1805_v18 = vadd.f32 %v1477_v16, %v645_v12  ;;  %v1393_v19 = vpop.f32.mrb[1].mxu0  ;;  %v1479_v20 = vpop.f32.mrb[1].mxu1 }
 0x1b2   : > { %v1802_v21 = vadd.f32 %v1393_v19, %v641_v13  ;;  %v1806_v22 = vadd.f32 %v1479_v20, %v649_v14  ;;  %v1395_v23 = vpop.f32.mrb[2].mxu0  ;;  %v1481_v24 = vpop.f32.mrb[2].mxu1  ;;  %1520 = sbr.rel (!%p2150_p6) target bundleno = 449 (0x1c1), region = 59 }
 0x1b3   : > { %v1803_v25 = vadd.f32 %v1395_v23, %v637_v11  ;;  %v1807_v26 = vadd.f32 %v1481_v24, %v645_v12  ;;  %v1397_v27 = vpop.f32.mrb[3].mxu0  ;;  %v1483_v28 = vpop.f32.mrb[3].mxu1 }
 0x1b4   : > { %v1796_v29 = vpack.c.bf16 %v1802_v21, %v1801_v17  ;;  %v1797_v30 = vpack.c.bf16 %v1806_v22, %v1805_v18  ;;  %v1804_v31 = vadd.f32 %v1397_v27, %v641_v13  ;;  %v1808_v32 = vadd.f32 %v1483_v28, %v649_v14 }
 0x1b6   : > { %1510 = vst [vmem:[%s484_s27] sm:$0xff] %v1796_v29  ;;  %1511 = vst [vmem:[%s484_s27 + $0x8] sm:$0xff] %v1797_v30  ;;  %v1798_v33 = vpack.c.bf16 %v1804_v31, %v1803_v25  ;;  %v1799_v34 = vpack.c.bf16 %v1808_v32, %v1807_v26 }
 0x1b8   : > { %1512 = vst [vmem:[%s484_s27 + $0x10] sm:$0xff] %v1798_v33  ;;  %1513 = vst [vmem:[%s484_s27 + $0x18] sm:$0xff] %v1799_v34 }
 0x1bd   : > { %v1539_v35 = vld [vmem:[%s484_s27] sm:$0xff]  ;;  %v1541_v36 = vld [vmem:[%s484_s27 + $0x8] sm:$0xff] }
 0x1be   : > { %1540 = vst [vmem:[%s1526_s30] sm:$0xff] %v1539_v35  ;;  %1542 = vst [vmem:[%s1526_s30 + $0x8] sm:$0xff] %v1541_v36 }
 0x1bf   : > { %v1543_v37 = vld [vmem:[%s484_s27 + $0x10] sm:$0xff]  ;;  %v1545_v38 = vld [vmem:[%s484_s27 + $0x18] sm:$0xff] }
 0x1c0   : > { %1544 = vst [vmem:[%s1526_s30 + $0x20] sm:$0xff] %v1543_v37  ;;  %1546 = vst [vmem:[%s1526_s30 + $0x28] sm:$0xff] %v1545_v38 }
 0x1c1 PF: > { %s13_s16 = sadd.s32 1, %s2093_s16   ;;  %s2602_s12 = smov %s2081_s13 }
 0x1c2   : > { %p10_p12 = scmp.ge.s32.totalorder %s13_s16, 4   ;;  %s2603_s13 = smov %s2155_s22 }
 0x1c3   : > { %s2604_s14 = smov %s2089_s15  ;;  %s2605_s15 = smov %s2607_s17 }
 0x1c4   :  { %12 = sbr.rel (!%p10_p12) target bundleno = 3 (0x3), region = 119 }

// kernel: closed_call.61
= control target key start
LH: loop header
LB: loop body
LE: loop exit
PB: predicated region body
PF: predicated region fallthrough
CT: control target
= control target key end

     0   :  { %s13188_s1 = inlined_call_operand.vmem [shape: bf16[512,2048], index: 1, kind: input, shape index: {}]   ;;  %s13189_s0 = inlined_call_operand.vmem [shape: bf16[16,512], index: 0, kind: input, shape index: {}]   ;;  %s13190_s2 = inlined_call_operand.vmem [shape: f32[1,2048], index: 2, kind: input, shape index: {}]   ;;  %s13191_s3 = inlined_call_operand.vmem [shape: bf16[2048,512], index: 3, kind: input, shape index: {}]   ;;  %s13192_s4 = inlined_call_operand.vmem [shape: f32[1,512], index: 4, kind: input, shape index: {}]   ;;  %s13193_s5 = inlined_call_operand.vmem [shape: f32[1,512], index: 5, kind: input, shape index: {}]   ;;  %s13194_s6 = inlined_call_operand.vmem [shape: f32[1,512], index: 6, kind: input, shape index: {}]   ;;  %s13195_s7 = inlined_call_operand.vmem [shape: bf16[16,512], index: 7, kind: output, shape index: {}]  }
   0x1   :  { %v30_v0 = vld [vmem:[%s13188_s1] sm:$0xff]  ;;  %v31_v2 = vld [vmem:[%s13188_s1 + $0x8] sm:$0xff]  ;;  %v9962_v54 = vld [vmem:[%s13189_s0 + $0x10] sm:$0xff] }
   0x2   :  { %v38_v1 = vld [vmem:[%s13188_s1 + $0x40] sm:$0xff]  ;;  %v39_v4 = vld [vmem:[%s13188_s1 + $0x48] sm:$0xff] }
   0x3   :  { %v7890_v3 = vcombine.high %v30_v0, %v38_v1  ;;  %v7889_v5 = vcombine.low %v30_v0, %v38_v1  ;;  %v46_v6 = vld [vmem:[%s13188_s1 + $0x80] sm:$0xff]  ;;  %v7892_v8 = vcombine.high %v31_v2, %v39_v4  ;;  %v7891_v9 = vcombine.low %v31_v2, %v39_v4  ;;  %v47_v11 = vld [vmem:[%s13188_s1 + $0x88] sm:$0xff] }
   0x4   :  { %v54_v7 = vld [vmem:[%s13188_s1 + $0xc0] sm:$0xff]  ;;  %v55_v12 = vld [vmem:[%s13188_s1 + $0xc8] sm:$0xff] }
   0x5   :  { %v7906_v10 = vcombine.high %v46_v6, %v54_v7  ;;  %v62_v13 = vld [vmem:[%s13188_s1 + $0x100] sm:$0xff]  ;;  %3206 = vmatprep.subr.bf16.mxu0 %v7890_v3  ;;  %v7908_v14 = vcombine.high %v47_v11, %v55_v12  ;;  %v63_v16 = vld [vmem:[%s13188_s1 + $0x108] sm:$0xff]  ;;  %3292 = vmatprep.subr.bf16.mxu1 %v7892_v8  ;;  %v7905_v18 = vcombine.low %v46_v6, %v54_v7 }
   0x6   :  { %v70_v15 = vld [vmem:[%s13188_s1 + $0x140] sm:$0xff]  ;;  %v71_v17 = vld [vmem:[%s13188_s1 + $0x148] sm:$0xff]  ;;  %3207 = vmatpush1.bf16.msra.mxu0 %v7889_v5  ;;  %3293 = vmatpush1.bf16.msra.mxu1 %v7891_v9  ;;  %v7907_v19 = vcombine.low %v47_v11, %v55_v12 }
   0x7   :  { %3208 = vmatprep.subr.bf16.mxu0 %v7906_v10  ;;  %v7922_v20 = vcombine.high %v62_v13, %v70_v15  ;;  %3294 = vmatprep.subr.bf16.mxu1 %v7908_v14  ;;  %v7924_v21 = vcombine.high %v63_v16, %v71_v17  ;;  %v78_v22 = vld [vmem:[%s13188_s1 + $0x180] sm:$0xff]  ;;  %v79_v24 = vld [vmem:[%s13188_s1 + $0x188] sm:$0xff]  ;;  %v7921_v26 = vcombine.low %v62_v13, %v70_v15 }
   0x8   :  { %v86_v23 = vld [vmem:[%s13188_s1 + $0x1c0] sm:$0xff]  ;;  %v87_v25 = vld [vmem:[%s13188_s1 + $0x1c8] sm:$0xff]  ;;  %v7923_v27 = vcombine.low %v63_v16, %v71_v17 }
   0x9   :  { %v7938_v28 = vcombine.high %v78_v22, %v86_v23  ;;  %v7940_v29 = vcombine.high %v79_v24, %v87_v25  ;;  %v94_v30 = vld [vmem:[%s13188_s1 + $0x200] sm:$0xff]  ;;  %v95_v32 = vld [vmem:[%s13188_s1 + $0x208] sm:$0xff]  ;;  %v7937_v34 = vcombine.low %v78_v22, %v86_v23  ;;  %v7939_v35 = vcombine.low %v79_v24, %v87_v25 }
   0xa   :  { %3209 = vmatpush1.bf16.msra.mxu0 %v7905_v18  ;;  %3295 = vmatpush1.bf16.msra.mxu1 %v7907_v19  ;;  %v102_v31 = vld [vmem:[%s13188_s1 + $0x240] sm:$0xff]  ;;  %v103_v33 = vld [vmem:[%s13188_s1 + $0x248] sm:$0xff] }
   0xb   :  { %3210 = vmatprep.subr.bf16.mxu0 %v7922_v20  ;;  %3296 = vmatprep.subr.bf16.mxu1 %v7924_v21  ;;  %v7954_v36 = vcombine.high %v94_v30, %v102_v31  ;;  %v7956_v37 = vcombine.high %v95_v32, %v103_v33  ;;  %v110_v38 = vld [vmem:[%s13188_s1 + $0x280] sm:$0xff]  ;;  %v111_v40 = vld [vmem:[%s13188_s1 + $0x288] sm:$0xff]  ;;  %v7953_v42 = vcombine.low %v94_v30, %v102_v31 }
   0xc   :  { %v118_v39 = vld [vmem:[%s13188_s1 + $0x2c0] sm:$0xff]  ;;  %v119_v41 = vld [vmem:[%s13188_s1 + $0x2c8] sm:$0xff]  ;;  %v7955_v43 = vcombine.low %v95_v32, %v103_v33 }
   0xd   :  { %v7970_v44 = vcombine.high %v110_v38, %v118_v39  ;;  %v7972_v45 = vcombine.high %v111_v40, %v119_v41  ;;  %v126_v46 = vld [vmem:[%s13188_s1 + $0x300] sm:$0xff]  ;;  %v127_v48 = vld [vmem:[%s13188_s1 + $0x308] sm:$0xff]  ;;  %v7969_v50 = vcombine.low %v110_v38, %v118_v39  ;;  %v7971_v51 = vcombine.low %v111_v40, %v119_v41 }
   0xe   :  { %3211 = vmatpush1.bf16.msra.mxu0 %v7921_v26  ;;  %3297 = vmatpush1.bf16.msra.mxu1 %v7923_v27  ;;  %v134_v47 = vld [vmem:[%s13188_s1 + $0x340] sm:$0xff]  ;;  %v135_v49 = vld [vmem:[%s13188_s1 + $0x348] sm:$0xff] }
   0xf   :  { %3212 = vmatprep.subr.bf16.mxu0 %v7938_v28  ;;  %3298 = vmatprep.subr.bf16.mxu1 %v7940_v29  ;;  %v7986_v52 = vcombine.high %v126_v46, %v134_v47  ;;  %v9957_v53 = vld [vmem:[%s13189_s0] sm:$0xff]  ;;  %v7988_v55 = vcombine.high %v127_v48, %v135_v49  ;;  %v143_v59 = vld [vmem:[%s13188_s1 + $0x388] sm:$0xff]  ;;  %v7985_v61 = vcombine.low %v126_v46, %v134_v47 }
  0x10   :  { %v142_v56 = vld [vmem:[%s13188_s1 + $0x380] sm:$0xff]  ;;  %v9972_v58 = vcombine.high %v9957_v53, %v9962_v54  ;;  %v151_v60 = vld [vmem:[%s13188_s1 + $0x3c8] sm:$0xff]  ;;  %v7987_v62 = vcombine.low %v127_v48, %v135_v49 }
  0x11   :  { %v150_v57 = vld [vmem:[%s13188_s1 + $0x3c0] sm:$0xff]  ;;  %v8004_v0 = vcombine.high %v143_v59, %v151_v60  ;;  %v159_v3 = vld [vmem:[%s13188_s1 + $0x408] sm:$0xff]  ;;  %v8003_v6 = vcombine.low %v143_v59, %v151_v60 }
  0x12   :  { %3213 = vmatpush1.bf16.msra.mxu0 %v7937_v34  ;;  %3299 = vmatpush1.bf16.msra.mxu1 %v7939_v35  ;;  %v8002_v63 = vcombine.high %v142_v56, %v150_v57  ;;  %v158_v1 = vld [vmem:[%s13188_s1 + $0x400] sm:$0xff]  ;;  %v167_v4 = vld [vmem:[%s13188_s1 + $0x448] sm:$0xff]  ;;  %v8001_v5 = vcombine.low %v142_v56, %v150_v57 }
  0x13   :  { %3214 = vmatprep.subr.bf16.mxu0 %v7954_v36  ;;  %3300 = vmatprep.subr.bf16.mxu1 %v7956_v37  ;;  %v166_v2 = vld [vmem:[%s13188_s1 + $0x440] sm:$0xff]  ;;  %v8020_v8 = vcombine.high %v159_v3, %v167_v4  ;;  %v175_v11 = vld [vmem:[%s13188_s1 + $0x488] sm:$0xff]  ;;  %v8019_v14 = vcombine.low %v159_v3, %v167_v4 }
  0x14   :  { %3238 = vmatprep.mubr.bf16.mxu0 %v9972_v58  ;;  %3324 = vmatprep.mubr.bf16.mxu1 %v9972_v58  ;;  %v8018_v7 = vcombine.high %v158_v1, %v166_v2  ;;  %v174_v9 = vld [vmem:[%s13188_s1 + $0x480] sm:$0xff]  ;;  %v183_v12 = vld [vmem:[%s13188_s1 + $0x4c8] sm:$0xff]  ;;  %v8017_v13 = vcombine.low %v158_v1, %v166_v2 }
  0x15   :  { %v182_v10 = vld [vmem:[%s13188_s1 + $0x4c0] sm:$0xff]  ;;  %v8036_v16 = vcombine.high %v175_v11, %v183_v12  ;;  %v191_v19 = vld [vmem:[%s13188_s1 + $0x508] sm:$0xff]  ;;  %v8035_v22 = vcombine.low %v175_v11, %v183_v12 }
  0x16   :  { %3215 = vmatpush1.bf16.msra.mxu0 %v7953_v42  ;;  %3301 = vmatpush1.bf16.msra.mxu1 %v7955_v43  ;;  %v8034_v15 = vcombine.high %v174_v9, %v182_v10  ;;  %v190_v17 = vld [vmem:[%s13188_s1 + $0x500] sm:$0xff]  ;;  %v199_v20 = vld [vmem:[%s13188_s1 + $0x548] sm:$0xff]  ;;  %v8033_v21 = vcombine.low %v174_v9, %v182_v10 }
  0x17   :  { %3216 = vmatprep.subr.bf16.mxu0 %v7970_v44  ;;  %3302 = vmatprep.subr.bf16.mxu1 %v7972_v45  ;;  %v198_v18 = vld [vmem:[%s13188_s1 + $0x540] sm:$0xff]  ;;  %v8052_v24 = vcombine.high %v191_v19, %v199_v20  ;;  %v207_v27 = vld [vmem:[%s13188_s1 + $0x588] sm:$0xff]  ;;  %v8051_v30 = vcombine.low %v191_v19, %v199_v20 }
  0x18   :  { %v8050_v23 = vcombine.high %v190_v17, %v198_v18  ;;  %v206_v25 = vld [vmem:[%s13188_s1 + $0x580] sm:$0xff]  ;;  %v215_v28 = vld [vmem:[%s13188_s1 + $0x5c8] sm:$0xff]  ;;  %v8049_v29 = vcombine.low %v190_v17, %v198_v18  ;;  %v10114_v18 = vld [vmem:[%s13189_s0 + $0x18] sm:$0xff] }
  0x19   :  { %v214_v26 = vld [vmem:[%s13188_s1 + $0x5c0] sm:$0xff]  ;;  %v8068_v32 = vcombine.high %v207_v27, %v215_v28  ;;  %v223_v35 = vld [vmem:[%s13188_s1 + $0x608] sm:$0xff]  ;;  %v8067_v38 = vcombine.low %v207_v27, %v215_v28 }
  0x1a   :  { %3217 = vmatpush1.bf16.msra.mxu0 %v7969_v50  ;;  %3303 = vmatpush1.bf16.msra.mxu1 %v7971_v51  ;;  %v8066_v31 = vcombine.high %v206_v25, %v214_v26  ;;  %v222_v33 = vld [vmem:[%s13188_s1 + $0x600] sm:$0xff]  ;;  %v231_v36 = vld [vmem:[%s13188_s1 + $0x648] sm:$0xff]  ;;  %v8065_v37 = vcombine.low %v206_v25, %v214_v26 }
  0x1b   :  { %3218 = vmatprep.subr.bf16.mxu0 %v7986_v52  ;;  %3304 = vmatprep.subr.bf16.mxu1 %v7988_v55  ;;  %v230_v34 = vld [vmem:[%s13188_s1 + $0x640] sm:$0xff]  ;;  %v8084_v40 = vcombine.high %v223_v35, %v231_v36  ;;  %v239_v43 = vld [vmem:[%s13188_s1 + $0x688] sm:$0xff]  ;;  %v8083_v46 = vcombine.low %v223_v35, %v231_v36 }
  0x1c   :  { %v8082_v39 = vcombine.high %v222_v33, %v230_v34  ;;  %v238_v41 = vld [vmem:[%s13188_s1 + $0x680] sm:$0xff]  ;;  %v247_v44 = vld [vmem:[%s13188_s1 + $0x6c8] sm:$0xff]  ;;  %v8081_v45 = vcombine.low %v222_v33, %v230_v34 }
  0x1d   :  { %v246_v42 = vld [vmem:[%s13188_s1 + $0x6c0] sm:$0xff]  ;;  %v8100_v48 = vcombine.high %v239_v43, %v247_v44  ;;  %v255_v51 = vld [vmem:[%s13188_s1 + $0x708] sm:$0xff]  ;;  %v8099_v56 = vcombine.low %v239_v43, %v247_v44 }
  0x1e   :  { %3219 = vmatpush1.bf16.msra.mxu0 %v7985_v61  ;;  %3305 = vmatpush1.bf16.msra.mxu1 %v7987_v62  ;;  %v8098_v47 = vcombine.high %v238_v41, %v246_v42  ;;  %v254_v49 = vld [vmem:[%s13188_s1 + $0x700] sm:$0xff]  ;;  %v263_v52 = vld [vmem:[%s13188_s1 + $0x748] sm:$0xff]  ;;  %v8097_v55 = vcombine.low %v238_v41, %v246_v42 }
  0x1f   :  { %3220 = vmatprep.subr.bf16.mxu0 %v8002_v63  ;;  %3306 = vmatprep.subr.bf16.mxu1 %v8004_v0  ;;  %v262_v50 = vld [vmem:[%s13188_s1 + $0x740] sm:$0xff]  ;;  %v8116_v59 = vcombine.high %v255_v51, %v263_v52  ;;  %v271_v62 = vld [vmem:[%s13188_s1 + $0x788] sm:$0xff]  ;;  %v8115_v1 = vcombine.low %v255_v51, %v263_v52 }
  0x20   :  { %v8114_v57 = vcombine.high %v254_v49, %v262_v50  ;;  %v270_v60 = vld [vmem:[%s13188_s1 + $0x780] sm:$0xff]  ;;  %v279_v63 = vld [vmem:[%s13188_s1 + $0x7c8] sm:$0xff]  ;;  %v8113_v0 = vcombine.low %v254_v49, %v262_v50 }
  0x21   :  { %v278_v61 = vld [vmem:[%s13188_s1 + $0x7c0] sm:$0xff]  ;;  %v8132_v3 = vcombine.high %v271_v62, %v279_v63  ;;  %v8131_v9 = vcombine.low %v271_v62, %v279_v63  ;;  %v10109_v17 = vld [vmem:[%s13189_s0 + $0x8] sm:$0xff] }
  0x22   :  { %3221 = vmatpush1.bf16.msra.mxu0 %v8001_v5  ;;  %3307 = vmatpush1.bf16.msra.mxu1 %v8003_v6  ;;  %v8130_v2 = vcombine.high %v270_v60, %v278_v61  ;;  %v286_v4 = vld [vmem:[%s13188_s1 + $0x800] sm:$0xff]  ;;  %v287_v6 = vld [vmem:[%s13188_s1 + $0x808] sm:$0xff] }
  0x23   :  { %3222 = vmatprep.subr.bf16.mxu0 %v8018_v7  ;;  %3308 = vmatprep.subr.bf16.mxu1 %v8020_v8  ;;  %v294_v5 = vld [vmem:[%s13188_s1 + $0x840] sm:$0xff]  ;;  %v295_v7 = vld [vmem:[%s13188_s1 + $0x848] sm:$0xff]  ;;  %v8129_v8 = vcombine.low %v270_v60, %v278_v61 }
  0x24   :  { %v8146_v10 = vcombine.high %v286_v4, %v294_v5  ;;  %v8148_v11 = vcombine.high %v287_v6, %v295_v7  ;;  %v302_v12 = vld [vmem:[%s13188_s1 + $0x880] sm:$0xff]  ;;  %v8145_v19 = vcombine.low %v286_v4, %v294_v5  ;;  %v327_v25 = vld [vmem:[%s13188_s1 + $0x948] sm:$0xff] }
  0x25   :  { %v343_v33 = vld [vmem:[%s13188_s1 + $0x9c8] sm:$0xff] }
  0x26   :  { %3223 = vmatpush1.bf16.msra.mxu0 %v8017_v13  ;;  %3309 = vmatpush1.bf16.msra.mxu1 %v8019_v14  ;;  %v310_v13 = vld [vmem:[%s13188_s1 + $0x8c0] sm:$0xff]  ;;  %v303_v14 = vld [vmem:[%s13188_s1 + $0x888] sm:$0xff] }
  0x27   :  { %3224 = vmatprep.subr.bf16.mxu0 %v8034_v15  ;;  %3310 = vmatprep.subr.bf16.mxu1 %v8036_v16  ;;  %v10101_v15 = vcombine.low %v9957_v53, %v9962_v54  ;;  %v311_v16 = vld [vmem:[%s13188_s1 + $0x8c8] sm:$0xff]  ;;  %v8147_v53 = vcombine.low %v287_v6, %v295_v7  ;;  %v8162_v54 = vcombine.high %v302_v12, %v310_v13 }
  0x28   :  { %v8164_v20 = vcombine.high %v303_v14, %v311_v16  ;;  %v8161_v26 = vcombine.low %v302_v12, %v310_v13  ;;  %v8163_v27 = vcombine.low %v303_v14, %v311_v16  ;;  %v359_v41 = vld [vmem:[%s13188_s1 + $0xa48] sm:$0xff] }
  0x29   :  { %v375_v49 = vld [vmem:[%s13188_s1 + $0xac8] sm:$0xff] }
  0x2a   :  { %3225 = vmatpush1.bf16.msra.mxu0 %v8033_v21  ;;  %3311 = vmatpush1.bf16.msra.mxu1 %v8035_v22  ;;  %v318_v21 = vld [vmem:[%s13188_s1 + $0x900] sm:$0xff]  ;;  %v391_v60 = vld [vmem:[%s13188_s1 + $0xb48] sm:$0xff] }
  0x2b   :  { %3226 = vmatprep.subr.bf16.mxu0 %v8050_v23  ;;  %3312 = vmatprep.subr.bf16.mxu1 %v8052_v24  ;;  %v326_v22 = vld [vmem:[%s13188_s1 + $0x940] sm:$0xff]  ;;  %v10124_v23 = vcombine.high %v10109_v17, %v10114_v18  ;;  %v319_v24 = vld [vmem:[%s13188_s1 + $0x908] sm:$0xff] }
  0x2c   :  { %v8178_v28 = vcombine.high %v318_v21, %v326_v22  ;;  %v8177_v34 = vcombine.low %v318_v21, %v326_v22  ;;  %v8179_v35 = vcombine.low %v319_v24, %v327_v25  ;;  %v407_v4 = vld [vmem:[%s13188_s1 + $0xbc8] sm:$0xff] }
  0x2d   :  { %v423_v12 = vld [vmem:[%s13188_s1 + $0xc48] sm:$0xff] }
  0x2e   :  { %3227 = vmatpush1.bf16.msra.mxu0 %v8049_v29  ;;  %3313 = vmatpush1.bf16.msra.mxu1 %v8051_v30  ;;  %v8180_v29 = vcombine.high %v319_v24, %v327_v25  ;;  %v334_v30 = vld [vmem:[%s13188_s1 + $0x980] sm:$0xff]  ;;  %v439_v21 = vld [vmem:[%s13188_s1 + $0xcc8] sm:$0xff] }
  0x2f   :  { %3228 = vmatprep.subr.bf16.mxu0 %v8066_v31  ;;  %3314 = vmatprep.subr.bf16.mxu1 %v8068_v32  ;;  %v342_v31 = vld [vmem:[%s13188_s1 + $0x9c0] sm:$0xff]  ;;  %v335_v32 = vld [vmem:[%s13188_s1 + $0x988] sm:$0xff] }
  0x30   :  { %v8194_v36 = vcombine.high %v334_v30, %v342_v31  ;;  %v8193_v42 = vcombine.low %v334_v30, %v342_v31  ;;  %v8195_v43 = vcombine.low %v335_v32, %v343_v33  ;;  %v455_v30 = vld [vmem:[%s13188_s1 + $0xd48] sm:$0xff] }
  0x32   :  { %3229 = vmatpush1.bf16.msra.mxu0 %v8065_v37  ;;  %3315 = vmatpush1.bf16.msra.mxu1 %v8067_v38  ;;  %v8196_v37 = vcombine.high %v335_v32, %v343_v33  ;;  %v350_v38 = vld [vmem:[%s13188_s1 + $0xa00] sm:$0xff] }
  0x33   :  { %3230 = vmatprep.subr.bf16.mxu0 %v8082_v39  ;;  %3316 = vmatprep.subr.bf16.mxu1 %v8084_v40  ;;  %v358_v39 = vld [vmem:[%s13188_s1 + $0xa40] sm:$0xff]  ;;  %v351_v40 = vld [vmem:[%s13188_s1 + $0xa08] sm:$0xff] }
  0x34   :  { %v8210_v44 = vcombine.high %v350_v38, %v358_v39  ;;  %v8209_v50 = vcombine.low %v350_v38, %v358_v39  ;;  %v8211_v51 = vcombine.low %v351_v40, %v359_v41  ;;  %v471_v38 = vld [vmem:[%s13188_s1 + $0xdc8] sm:$0xff] }
  0x36   :  { %3231 = vmatpush1.bf16.msra.mxu0 %v8081_v45  ;;  %3317 = vmatpush1.bf16.msra.mxu1 %v8083_v46  ;;  %v8212_v45 = vcombine.high %v351_v40, %v359_v41  ;;  %v366_v46 = vld [vmem:[%s13188_s1 + $0xa80] sm:$0xff] }
  0x37   :  { %3232 = vmatprep.subr.bf16.mxu0 %v8098_v47  ;;  %3318 = vmatprep.subr.bf16.mxu1 %v8100_v48  ;;  %v374_v47 = vld [vmem:[%s13188_s1 + $0xac0] sm:$0xff]  ;;  %v367_v48 = vld [vmem:[%s13188_s1 + $0xa88] sm:$0xff] }
  0x38   :  { %v8226_v52 = vcombine.high %v366_v46, %v374_v47  ;;  %v8225_v61 = vcombine.low %v366_v46, %v374_v47  ;;  %v8227_v62 = vcombine.low %v367_v48, %v375_v49  ;;  %v487_v46 = vld [vmem:[%s13188_s1 + $0xe48] sm:$0xff] }
  0x3a   :  { %3233 = vmatpush1.bf16.msra.mxu0 %v8097_v55  ;;  %3319 = vmatpush1.bf16.msra.mxu1 %v8099_v56  ;;  %v8228_v55 = vcombine.high %v367_v48, %v375_v49  ;;  %v382_v56 = vld [vmem:[%s13188_s1 + $0xb00] sm:$0xff] }
  0x3b   :  { %3234 = vmatprep.subr.bf16.mxu0 %v8114_v57  ;;  %3320 = vmatprep.subr.bf16.mxu1 %v8116_v59  ;;  %v390_v57 = vld [vmem:[%s13188_s1 + $0xb40] sm:$0xff]  ;;  %v383_v59 = vld [vmem:[%s13188_s1 + $0xb08] sm:$0xff] }
  0x3c   :  { %v8242_v63 = vcombine.high %v382_v56, %v390_v57  ;;  %v8241_v5 = vcombine.low %v382_v56, %v390_v57  ;;  %v8243_v6 = vcombine.low %v383_v59, %v391_v60  ;;  %v503_v56 = vld [vmem:[%s13188_s1 + $0xec8] sm:$0xff] }
  0x3e   :  { %3235 = vmatpush1.bf16.msra.mxu0 %v8113_v0  ;;  %3321 = vmatpush1.bf16.msra.mxu1 %v8115_v1  ;;  %v8244_v0 = vcombine.high %v383_v59, %v391_v60  ;;  %v398_v1 = vld [vmem:[%s13188_s1 + $0xb80] sm:$0xff] }
  0x3f   :  { %3236 = vmatprep.subr.bf16.mxu0 %v8130_v2  ;;  %3322 = vmatprep.subr.bf16.mxu1 %v8132_v3  ;;  %v406_v2 = vld [vmem:[%s13188_s1 + $0xbc0] sm:$0xff]  ;;  %v399_v3 = vld [vmem:[%s13188_s1 + $0xb88] sm:$0xff] }
  0x40   :  { %v8258_v7 = vcombine.high %v398_v1, %v406_v2  ;;  %v8257_v13 = vcombine.low %v398_v1, %v406_v2  ;;  %v8259_v14 = vcombine.low %v399_v3, %v407_v4  ;;  %v519_v1 = vld [vmem:[%s13188_s1 + $0xf48] sm:$0xff] }
  0x42   :  { %3237 = vmatpush1.bf16.msra.mxu0 %v8129_v8  ;;  %3323 = vmatpush1.bf16.msra.mxu1 %v8131_v9  ;;  %v8260_v8 = vcombine.high %v399_v3, %v407_v4  ;;  %v414_v9 = vld [vmem:[%s13188_s1 + $0xc00] sm:$0xff] }
  0x43   :  { %3249 = vmatprep.subr.bf16.mxu0 %v8146_v10  ;;  %3335 = vmatprep.subr.bf16.mxu1 %v8148_v11  ;;  %v422_v10 = vld [vmem:[%s13188_s1 + $0xc40] sm:$0xff]  ;;  %v415_v11 = vld [vmem:[%s13188_s1 + $0xc08] sm:$0xff] }
  0x44   :  { %v8274_v16 = vcombine.high %v414_v9, %v422_v10  ;;  %v8273_v22 = vcombine.low %v414_v9, %v422_v10  ;;  %v8275_v24 = vcombine.low %v415_v11, %v423_v12  ;;  %v535_v9 = vld [vmem:[%s13188_s1 + $0xfc8] sm:$0xff] }
  0x45   :  { %3239 = vmatmul.mubr.bf16.vlgmr.msra.gmra.mrb[0].mxu0 %v10101_v15  ;;  %3325 = vmatmul.mubr.bf16.vlgmr.msra.gmra.mrb[0].mxu1 %v10101_v15 }
  0x46   :  { %3250 = vmatpush1.bf16.msra.mxu0 %v8145_v19  ;;  %3336 = vmatpush1.bf16.msra.mxu1 %v8147_v53  ;;  %v8276_v19 = vcombine.high %v415_v11, %v423_v12  ;;  %v430_v53 = vld [vmem:[%s13188_s1 + $0xc80] sm:$0xff] }
  0x47   :  { %3251 = vmatprep.subr.bf16.mxu0 %v8162_v54  ;;  %3337 = vmatprep.subr.bf16.mxu1 %v8164_v20  ;;  %v438_v54 = vld [vmem:[%s13188_s1 + $0xcc0] sm:$0xff]  ;;  %v431_v20 = vld [vmem:[%s13188_s1 + $0xc88] sm:$0xff] }
  0x48   :  { %3281 = vmatprep.mubr.bf16.mxu0 %v10124_v23  ;;  %3367 = vmatprep.mubr.bf16.mxu1 %v10124_v23  ;;  %v8290_v25 = vcombine.high %v430_v53, %v438_v54  ;;  %v8289_v31 = vcombine.low %v430_v53, %v438_v54  ;;  %v8291_v32 = vcombine.low %v431_v20, %v439_v21  ;;  %v41_v53 = vld [vmem:[%s13188_s1 + $0x58] sm:$0xff] }
  0x4a   :  { %3252 = vmatpush1.bf16.msra.mxu0 %v8161_v26  ;;  %3338 = vmatpush1.bf16.msra.mxu1 %v8163_v27  ;;  %v8292_v26 = vcombine.high %v431_v20, %v439_v21  ;;  %v446_v27 = vld [vmem:[%s13188_s1 + $0xd00] sm:$0xff] }
  0x4b   :  { %3253 = vmatprep.subr.bf16.mxu0 %v8178_v28  ;;  %3339 = vmatprep.subr.bf16.mxu1 %v8180_v29  ;;  %v454_v28 = vld [vmem:[%s13188_s1 + $0xd40] sm:$0xff]  ;;  %v447_v29 = vld [vmem:[%s13188_s1 + $0xd08] sm:$0xff] }
  0x4c   :  { %v8306_v33 = vcombine.high %v446_v27, %v454_v28  ;;  %v8305_v39 = vcombine.low %v446_v27, %v454_v28  ;;  %v8307_v40 = vcombine.low %v447_v29, %v455_v30  ;;  %v49_v27 = vld [vmem:[%s13188_s1 + $0x98] sm:$0xff] }
  0x4d   :  { %v57_v28 = vld [vmem:[%s13188_s1 + $0xd8] sm:$0xff] }
  0x4e   :  { %3254 = vmatpush1.bf16.msra.mxu0 %v8177_v34  ;;  %3340 = vmatpush1.bf16.msra.mxu1 %v8179_v35  ;;  %v8308_v34 = vcombine.high %v447_v29, %v455_v30  ;;  %v462_v35 = vld [vmem:[%s13188_s1 + $0xd80] sm:$0xff] }
  0x4f   :  { %3255 = vmatprep.subr.bf16.mxu0 %v8194_v36  ;;  %3341 = vmatprep.subr.bf16.mxu1 %v8196_v37  ;;  %v470_v36 = vld [vmem:[%s13188_s1 + $0xdc0] sm:$0xff]  ;;  %v463_v37 = vld [vmem:[%s13188_s1 + $0xd88] sm:$0xff] }
  0x50   :  { %v8322_v41 = vcombine.high %v462_v35, %v470_v36  ;;  %v8321_v47 = vcombine.low %v462_v35, %v470_v36  ;;  %v8323_v48 = vcombine.low %v463_v37, %v471_v38  ;;  %v7911_v36 = vcombine.low %v49_v27, %v57_v28 }
  0x52   :  { %3256 = vmatpush1.bf16.msra.mxu0 %v8193_v42  ;;  %3342 = vmatpush1.bf16.msra.mxu1 %v8195_v43  ;;  %v8324_v42 = vcombine.high %v463_v37, %v471_v38  ;;  %v478_v43 = vld [vmem:[%s13188_s1 + $0xe00] sm:$0xff] }
  0x53   :  { %3257 = vmatprep.subr.bf16.mxu0 %v8210_v44  ;;  %3343 = vmatprep.subr.bf16.mxu1 %v8212_v45  ;;  %v486_v44 = vld [vmem:[%s13188_s1 + $0xe40] sm:$0xff]  ;;  %v479_v45 = vld [vmem:[%s13188_s1 + $0xe08] sm:$0xff] }
  0x54   :  { %v8338_v49 = vcombine.high %v478_v43, %v486_v44  ;;  %v8337_v57 = vcombine.low %v478_v43, %v486_v44  ;;  %v8339_v59 = vcombine.low %v479_v45, %v487_v46 }
  0x56   :  { %3258 = vmatpush1.bf16.msra.mxu0 %v8209_v50  ;;  %3344 = vmatpush1.bf16.msra.mxu1 %v8211_v51  ;;  %v8340_v50 = vcombine.high %v479_v45, %v487_v46  ;;  %v494_v51 = vld [vmem:[%s13188_s1 + $0xe80] sm:$0xff] }
  0x57   :  { %3259 = vmatprep.subr.bf16.mxu0 %v8226_v52  ;;  %3345 = vmatprep.subr.bf16.mxu1 %v8228_v55  ;;  %v502_v52 = vld [vmem:[%s13188_s1 + $0xec0] sm:$0xff]  ;;  %v495_v55 = vld [vmem:[%s13188_s1 + $0xe88] sm:$0xff] }
  0x58   :  { %v8354_v60 = vcombine.high %v494_v51, %v502_v52  ;;  %v8353_v2 = vcombine.low %v494_v51, %v502_v52  ;;  %v8355_v3 = vcombine.low %v495_v55, %v503_v56 }
  0x5a   :  { %3260 = vmatpush1.bf16.msra.mxu0 %v8225_v61  ;;  %3346 = vmatpush1.bf16.msra.mxu1 %v8227_v62  ;;  %v8356_v61 = vcombine.high %v495_v55, %v503_v56  ;;  %v510_v62 = vld [vmem:[%s13188_s1 + $0xf00] sm:$0xff] }
  0x5b   :  { %3261 = vmatprep.subr.bf16.mxu0 %v8242_v63  ;;  %3347 = vmatprep.subr.bf16.mxu1 %v8244_v0  ;;  %v518_v63 = vld [vmem:[%s13188_s1 + $0xf40] sm:$0xff]  ;;  %v511_v0 = vld [vmem:[%s13188_s1 + $0xf08] sm:$0xff] }
  0x5c   :  { %v8370_v4 = vcombine.high %v510_v62, %v518_v63  ;;  %v8369_v10 = vcombine.low %v510_v62, %v518_v63  ;;  %v8371_v11 = vcombine.low %v511_v0, %v519_v1 }
  0x5e   :  { %3262 = vmatpush1.bf16.msra.mxu0 %v8241_v5  ;;  %3348 = vmatpush1.bf16.msra.mxu1 %v8243_v6  ;;  %v8372_v5 = vcombine.high %v511_v0, %v519_v1  ;;  %v526_v6 = vld [vmem:[%s13188_s1 + $0xf80] sm:$0xff] }
  0x5f   :  { %3263 = vmatprep.subr.bf16.mxu0 %v8258_v7  ;;  %3349 = vmatprep.subr.bf16.mxu1 %v8260_v8  ;;  %v534_v7 = vld [vmem:[%s13188_s1 + $0xfc0] sm:$0xff]  ;;  %v527_v8 = vld [vmem:[%s13188_s1 + $0xf88] sm:$0xff] }
  0x60   :  { %v8386_v12 = vcombine.high %v526_v6, %v534_v7  ;;  %v8385_v54 = vcombine.low %v526_v6, %v534_v7  ;;  %v8387_v20 = vcombine.low %v527_v8, %v535_v9 }
  0x62   :  { %3264 = vmatpush1.bf16.msra.mxu0 %v8257_v13  ;;  %3350 = vmatpush1.bf16.msra.mxu1 %v8259_v14  ;;  %v8388_v13 = vcombine.high %v527_v8, %v535_v9  ;;  %v32_v14 = vld [vmem:[%s13188_s1 + $0x10] sm:$0xff] }
  0x63   :  { %3265 = vmatprep.subr.bf16.mxu0 %v8274_v16  ;;  %3351 = vmatprep.subr.bf16.mxu1 %v8276_v19  ;;  %v40_v16 = vld [vmem:[%s13188_s1 + $0x50] sm:$0xff]  ;;  %v33_v19 = vld [vmem:[%s13188_s1 + $0x18] sm:$0xff] }
  0x64   :  { %v7894_v21 = vcombine.high %v32_v14, %v40_v16  ;;  %v7893_v29 = vcombine.low %v32_v14, %v40_v16  ;;  %v7895_v30 = vcombine.low %v33_v19, %v41_v53 }
  0x66   :  { %3266 = vmatpush1.bf16.msra.mxu0 %v8273_v22  ;;  %3352 = vmatpush1.bf16.msra.mxu1 %v8275_v24  ;;  %v7896_v22 = vcombine.high %v33_v19, %v41_v53  ;;  %v48_v24 = vld [vmem:[%s13188_s1 + $0x90] sm:$0xff] }
  0x67   :  { %3267 = vmatprep.subr.bf16.mxu0 %v8290_v25  ;;  %3353 = vmatprep.subr.bf16.mxu1 %v8292_v26  ;;  %v56_v25 = vld [vmem:[%s13188_s1 + $0xd0] sm:$0xff]  ;;  %v10312_v26 = vcombine.low %v10109_v17, %v10114_v18 }
  0x68   :  { %v64_v17 = vld [vmem:[%s13188_s1 + $0x110] sm:$0xff]  ;;  %v7909_v35 = vcombine.low %v48_v24, %v56_v25 }
  0x69   :  { %v72_v18 = vld [vmem:[%s13188_s1 + $0x150] sm:$0xff] }
  0x6a   :  { %3268 = vmatpush1.bf16.msra.mxu0 %v8289_v31  ;;  %3354 = vmatpush1.bf16.msra.mxu1 %v8291_v32  ;;  %v7910_v31 = vcombine.high %v48_v24, %v56_v25  ;;  %v7912_v32 = vcombine.high %v49_v27, %v57_v28  ;;  %v7926_v37 = vcombine.high %v64_v17, %v72_v18 }
  0x6b   :  { %3269 = vmatprep.subr.bf16.mxu0 %v8306_v33  ;;  %3355 = vmatprep.subr.bf16.mxu1 %v8308_v34  ;;  %v65_v33 = vld [vmem:[%s13188_s1 + $0x118] sm:$0xff]  ;;  %v7925_v43 = vcombine.low %v64_v17, %v72_v18 }
  0x6c   :  { %v73_v34 = vld [vmem:[%s13188_s1 + $0x158] sm:$0xff] }
  0x6d   :  { %v7928_v38 = vcombine.high %v65_v33, %v73_v34  ;;  %v7927_v44 = vcombine.low %v65_v33, %v73_v34 }
  0x6e   :  { %3270 = vmatpush1.bf16.msra.mxu0 %v8305_v39  ;;  %3356 = vmatpush1.bf16.msra.mxu1 %v8307_v40  ;;  %v80_v39 = vld [vmem:[%s13188_s1 + $0x190] sm:$0xff] }
  0x6f   :  { %3271 = vmatprep.subr.bf16.mxu0 %v8322_v41  ;;  %3357 = vmatprep.subr.bf16.mxu1 %v8324_v42  ;;  %v88_v40 = vld [vmem:[%s13188_s1 + $0x1d0] sm:$0xff]  ;;  %v81_v41 = vld [vmem:[%s13188_s1 + $0x198] sm:$0xff] }
  0x70   :  { %v89_v42 = vld [vmem:[%s13188_s1 + $0x1d8] sm:$0xff]  ;;  %v7942_v45 = vcombine.high %v80_v39, %v88_v40  ;;  %v7941_v51 = vcombine.low %v80_v39, %v88_v40 }
  0x71   :  { %v7944_v46 = vcombine.high %v81_v41, %v89_v42  ;;  %v7943_v52 = vcombine.low %v81_v41, %v89_v42 }
  0x72   :  { %3272 = vmatpush1.bf16.msra.mxu0 %v8321_v47  ;;  %3358 = vmatpush1.bf16.msra.mxu1 %v8323_v48  ;;  %v96_v47 = vld [vmem:[%s13188_s1 + $0x210] sm:$0xff] }
  0x73   :  { %3273 = vmatprep.subr.bf16.mxu0 %v8338_v49  ;;  %3359 = vmatprep.subr.bf16.mxu1 %v8340_v50  ;;  %v104_v48 = vld [vmem:[%s13188_s1 + $0x250] sm:$0xff]  ;;  %v97_v49 = vld [vmem:[%s13188_s1 + $0x218] sm:$0xff] }
  0x74   :  { %v105_v50 = vld [vmem:[%s13188_s1 + $0x258] sm:$0xff]  ;;  %v7958_v55 = vcombine.high %v96_v47, %v104_v48  ;;  %v7957_v62 = vcombine.low %v96_v47, %v104_v48 }
  0x75   :  { %v7960_v56 = vcombine.high %v97_v49, %v105_v50  ;;  %v7959_v63 = vcombine.low %v97_v49, %v105_v50 }
  0x76   :  { %3274 = vmatpush1.bf16.msra.mxu0 %v8337_v57  ;;  %3360 = vmatpush1.bf16.msra.mxu1 %v8339_v59  ;;  %v112_v57 = vld [vmem:[%s13188_s1 + $0x290] sm:$0xff] }
  0x77   :  { %3275 = vmatprep.subr.bf16.mxu0 %v8354_v60  ;;  %3361 = vmatprep.subr.bf16.mxu1 %v8356_v61  ;;  %v120_v59 = vld [vmem:[%s13188_s1 + $0x2d0] sm:$0xff]  ;;  %v113_v60 = vld [vmem:[%s13188_s1 + $0x298] sm:$0xff] }
  0x78   :  { %v121_v61 = vld [vmem:[%s13188_s1 + $0x2d8] sm:$0xff]  ;;  %v7974_v0 = vcombine.high %v112_v57, %v120_v59  ;;  %v7973_v6 = vcombine.low %v112_v57, %v120_v59 }
  0x79   :  { %v7976_v1 = vcombine.high %v113_v60, %v121_v61  ;;  %v7975_v7 = vcombine.low %v113_v60, %v121_v61 }
  0x7a   :  { %3276 = vmatpush1.bf16.msra.mxu0 %v8353_v2  ;;  %3362 = vmatpush1.bf16.msra.mxu1 %v8355_v3  ;;  %v128_v2 = vld [vmem:[%s13188_s1 + $0x310] sm:$0xff] }
  0x7b   :  { %3277 = vmatprep.subr.bf16.mxu0 %v8370_v4  ;;  %3363 = vmatprep.subr.bf16.mxu1 %v8372_v5  ;;  %v136_v3 = vld [vmem:[%s13188_s1 + $0x350] sm:$0xff]  ;;  %v129_v4 = vld [vmem:[%s13188_s1 + $0x318] sm:$0xff] }
  0x7c   :  { %v137_v5 = vld [vmem:[%s13188_s1 + $0x358] sm:$0xff]  ;;  %v7990_v8 = vcombine.high %v128_v2, %v136_v3  ;;  %v7989_v14 = vcombine.low %v128_v2, %v136_v3 }
  0x7d   :  { %v7992_v9 = vcombine.high %v129_v4, %v137_v5  ;;  %v7991_v16 = vcombine.low %v129_v4, %v137_v5 }
  0x7e   :  { %3278 = vmatpush1.bf16.msra.mxu0 %v8369_v10  ;;  %3364 = vmatpush1.bf16.msra.mxu1 %v8371_v11  ;;  %v144_v10 = vld [vmem:[%s13188_s1 + $0x390] sm:$0xff] }
  0x7f   :  { %3279 = vmatprep.subr.bf16.mxu0 %v8386_v12  ;;  %3365 = vmatprep.subr.bf16.mxu1 %v8388_v13  ;;  %v152_v11 = vld [vmem:[%s13188_s1 + $0x3d0] sm:$0xff]  ;;  %v145_v12 = vld [vmem:[%s13188_s1 + $0x398] sm:$0xff] }
  0x80   :  { %v153_v13 = vld [vmem:[%s13188_s1 + $0x3d8] sm:$0xff]  ;;  %v8006_v19 = vcombine.high %v144_v10, %v152_v11  ;;  %v8005_v24 = vcombine.low %v144_v10, %v152_v11 }
  0x81   :  { %v8008_v53 = vcombine.high %v145_v12, %v153_v13  ;;  %v8007_v25 = vcombine.low %v145_v12, %v153_v13 }
  0x82   :  { %3280 = vmatpush1.bf16.msra.mxu0 %v8385_v54  ;;  %3366 = vmatpush1.bf16.msra.mxu1 %v8387_v20  ;;  %v160_v54 = vld [vmem:[%s13188_s1 + $0x410] sm:$0xff] }
  0x83   :  { %3378 = vmatprep.subr.bf16.mxu0 %v7894_v21  ;;  %3464 = vmatprep.subr.bf16.mxu1 %v7896_v22  ;;  %v168_v20 = vld [vmem:[%s13188_s1 + $0x450] sm:$0xff]  ;;  %v161_v21 = vld [vmem:[%s13188_s1 + $0x418] sm:$0xff] }
  0x84   :  { %v169_v22 = vld [vmem:[%s13188_s1 + $0x458] sm:$0xff]  ;;  %v8022_v27 = vcombine.high %v160_v54, %v168_v20  ;;  %v8021_v17 = vcombine.low %v160_v54, %v168_v20 }
  0x85   :  { %3282 = vmatmul.mubr.bf16.vlgmr.msra.gmra.mrb[0].mxu0 %v10312_v26  ;;  %3368 = vmatmul.mubr.bf16.vlgmr.msra.gmra.mrb[0].mxu1 %v10312_v26  ;;  %v8024_v28 = vcombine.high %v161_v21, %v169_v22  ;;  %v8023_v18 = vcombine.low %v161_v21, %v169_v22 }
  0x86   :  { %3379 = vmatpush1.bf16.msra.mxu0 %v7893_v29  ;;  %3465 = vmatpush1.bf16.msra.mxu1 %v7895_v30  ;;  %v176_v29 = vld [vmem:[%s13188_s1 + $0x490] sm:$0xff] }
  0x87   :  { %3380 = vmatprep.subr.bf16.mxu0 %v7910_v31  ;;  %3466 = vmatprep.subr.bf16.mxu1 %v7912_v32  ;;  %v184_v30 = vld [vmem:[%s13188_s1 + $0x4d0] sm:$0xff]  ;;  %v177_v31 = vld [vmem:[%s13188_s1 + $0x498] sm:$0xff] }
  0x88   :  { %3410 = vmatprep.mubr.bf16.mxu0 %v9972_v58  ;;  %3496 = vmatprep.mubr.bf16.mxu1 %v9972_v58  ;;  %v185_v32 = vld [vmem:[%s13188_s1 + $0x4d8] sm:$0xff]  ;;  %v8038_v33 = vcombine.high %v176_v29, %v184_v30  ;;  %v8037_v39 = vcombine.low %v176_v29, %v184_v30 }
  0x89   :  { %v8040_v34 = vcombine.high %v177_v31, %v185_v32  ;;  %v8039_v40 = vcombine.low %v177_v31, %v185_v32 }
  0x8a   :  { %3381 = vmatpush1.bf16.msra.mxu0 %v7909_v35  ;;  %3467 = vmatpush1.bf16.msra.mxu1 %v7911_v36  ;;  %v192_v35 = vld [vmem:[%s13188_s1 + $0x510] sm:$0xff] }
  0x8b   :  { %3382 = vmatprep.subr.bf16.mxu0 %v7926_v37  ;;  %3468 = vmatprep.subr.bf16.mxu1 %v7928_v38  ;;  %v200_v36 = vld [vmem:[%s13188_s1 + $0x550] sm:$0xff]  ;;  %v193_v37 = vld [vmem:[%s13188_s1 + $0x518] sm:$0xff] }
  0x8c   :  { %v201_v38 = vld [vmem:[%s13188_s1 + $0x558] sm:$0xff]  ;;  %v8054_v41 = vcombine.high %v192_v35, %v200_v36  ;;  %v8053_v47 = vcombine.low %v192_v35, %v200_v36 }
  0x8d   :  { %v8056_v42 = vcombine.high %v193_v37, %v201_v38  ;;  %v8055_v48 = vcombine.low %v193_v37, %v201_v38 }
  0x8e   :  { %3383 = vmatpush1.bf16.msra.mxu0 %v7925_v43  ;;  %3469 = vmatpush1.bf16.msra.mxu1 %v7927_v44  ;;  %v208_v43 = vld [vmem:[%s13188_s1 + $0x590] sm:$0xff] }
  0x8f   :  { %3384 = vmatprep.subr.bf16.mxu0 %v7942_v45  ;;  %3470 = vmatprep.subr.bf16.mxu1 %v7944_v46  ;;  %v216_v44 = vld [vmem:[%s13188_s1 + $0x5d0] sm:$0xff]  ;;  %v209_v45 = vld [vmem:[%s13188_s1 + $0x598] sm:$0xff] }
  0x90   :  { %v217_v46 = vld [vmem:[%s13188_s1 + $0x5d8] sm:$0xff]  ;;  %v8070_v49 = vcombine.high %v208_v43, %v216_v44  ;;  %v8069_v57 = vcombine.low %v208_v43, %v216_v44 }
  0x91   :  { %v8072_v50 = vcombine.high %v209_v45, %v217_v46  ;;  %v8071_v59 = vcombine.low %v209_v45, %v217_v46 }
  0x92   :  { %3385 = vmatpush1.bf16.msra.mxu0 %v7941_v51  ;;  %3471 = vmatpush1.bf16.msra.mxu1 %v7943_v52  ;;  %v224_v51 = vld [vmem:[%s13188_s1 + $0x610] sm:$0xff] }
  0x93   :  { %3386 = vmatprep.subr.bf16.mxu0 %v7958_v55  ;;  %3472 = vmatprep.subr.bf16.mxu1 %v7960_v56  ;;  %v232_v52 = vld [vmem:[%s13188_s1 + $0x650] sm:$0xff]  ;;  %v225_v55 = vld [vmem:[%s13188_s1 + $0x618] sm:$0xff] }
  0x94   :  { %v233_v56 = vld [vmem:[%s13188_s1 + $0x658] sm:$0xff]  ;;  %v8086_v60 = vcombine.high %v224_v51, %v232_v52  ;;  %v8085_v2 = vcombine.low %v224_v51, %v232_v52 }
  0x95   :  { %v8088_v61 = vcombine.high %v225_v55, %v233_v56  ;;  %v8087_v3 = vcombine.low %v225_v55, %v233_v56 }
  0x96   :  { %3387 = vmatpush1.bf16.msra.mxu0 %v7957_v62  ;;  %3473 = vmatpush1.bf16.msra.mxu1 %v7959_v63  ;;  %v240_v62 = vld [vmem:[%s13188_s1 + $0x690] sm:$0xff] }
  0x97   :  { %3388 = vmatprep.subr.bf16.mxu0 %v7974_v0  ;;  %3474 = vmatprep.subr.bf16.mxu1 %v7976_v1  ;;  %v248_v63 = vld [vmem:[%s13188_s1 + $0x6d0] sm:$0xff]  ;;  %v241_v0 = vld [vmem:[%s13188_s1 + $0x698] sm:$0xff] }
  0x98   :  { %v249_v1 = vld [vmem:[%s13188_s1 + $0x6d8] sm:$0xff]  ;;  %v8102_v4 = vcombine.high %v240_v62, %v248_v63  ;;  %v8101_v10 = vcombine.low %v240_v62, %v248_v63 }
  0x99   :  { %v8104_v5 = vcombine.high %v241_v0, %v249_v1  ;;  %v8103_v11 = vcombine.low %v241_v0, %v249_v1 }
  0x9a   :  { %3389 = vmatpush1.bf16.msra.mxu0 %v7973_v6  ;;  %3475 = vmatpush1.bf16.msra.mxu1 %v7975_v7  ;;  %v256_v6 = vld [vmem:[%s13188_s1 + $0x710] sm:$0xff] }
  0x9b   :  { %3390 = vmatprep.subr.bf16.mxu0 %v7990_v8  ;;  %3476 = vmatprep.subr.bf16.mxu1 %v7992_v9  ;;  %v264_v7 = vld [vmem:[%s13188_s1 + $0x750] sm:$0xff]  ;;  %v257_v8 = vld [vmem:[%s13188_s1 + $0x718] sm:$0xff] }
  0x9c   :  { %v265_v9 = vld [vmem:[%s13188_s1 + $0x758] sm:$0xff]  ;;  %v8118_v12 = vcombine.high %v256_v6, %v264_v7  ;;  %v8117_v54 = vcombine.low %v256_v6, %v264_v7 }
  0x9d   :  { %v8120_v13 = vcombine.high %v257_v8, %v265_v9  ;;  %v8119_v20 = vcombine.low %v257_v8, %v265_v9 }
  0x9e   :  { %3391 = vmatpush1.bf16.msra.mxu0 %v7989_v14  ;;  %3477 = vmatpush1.bf16.msra.mxu1 %v7991_v16  ;;  %v272_v14 = vld [vmem:[%s13188_s1 + $0x790] sm:$0xff] }
  0x9f   :  { %3392 = vmatprep.subr.bf16.mxu0 %v8006_v19  ;;  %3478 = vmatprep.subr.bf16.mxu1 %v8008_v53  ;;  %v280_v16 = vld [vmem:[%s13188_s1 + $0x7d0] sm:$0xff]  ;;  %v273_v19 = vld [vmem:[%s13188_s1 + $0x798] sm:$0xff] }
  0xa0   :  { %v281_v53 = vld [vmem:[%s13188_s1 + $0x7d8] sm:$0xff]  ;;  %v8134_v21 = vcombine.high %v272_v14, %v280_v16  ;;  %v8133_v29 = vcombine.low %v272_v14, %v280_v16 }
  0xa1   :  { %v8136_v22 = vcombine.high %v273_v19, %v281_v53  ;;  %v8135_v30 = vcombine.low %v273_v19, %v281_v53 }
  0xa2   :  { %3393 = vmatpush1.bf16.msra.mxu0 %v8005_v24  ;;  %3479 = vmatpush1.bf16.msra.mxu1 %v8007_v25  ;;  %v288_v24 = vld [vmem:[%s13188_s1 + $0x810] sm:$0xff] }
  0xa3   :  { %3394 = vmatprep.subr.bf16.mxu0 %v8022_v27  ;;  %3480 = vmatprep.subr.bf16.mxu1 %v8024_v28  ;;  %v296_v25 = vld [vmem:[%s13188_s1 + $0x850] sm:$0xff]  ;;  %v289_v27 = vld [vmem:[%s13188_s1 + $0x818] sm:$0xff] }
  0xa4   :  { %v297_v28 = vld [vmem:[%s13188_s1 + $0x858] sm:$0xff]  ;;  %v8150_v31 = vcombine.high %v288_v24, %v296_v25  ;;  %v8149_v35 = vcombine.low %v288_v24, %v296_v25 }
  0xa5   :  { %v8152_v32 = vcombine.high %v289_v27, %v297_v28  ;;  %v8151_v36 = vcombine.low %v289_v27, %v297_v28 }
  0xa6   :  { %3395 = vmatpush1.bf16.msra.mxu0 %v8021_v17  ;;  %3481 = vmatpush1.bf16.msra.mxu1 %v8023_v18  ;;  %v304_v17 = vld [vmem:[%s13188_s1 + $0x890] sm:$0xff] }
  0xa7   :  { %3396 = vmatprep.subr.bf16.mxu0 %v8038_v33  ;;  %3482 = vmatprep.subr.bf16.mxu1 %v8040_v34  ;;  %v312_v18 = vld [vmem:[%s13188_s1 + $0x8d0] sm:$0xff]  ;;  %v305_v33 = vld [vmem:[%s13188_s1 + $0x898] sm:$0xff] }
  0xa8   :  { %v313_v34 = vld [vmem:[%s13188_s1 + $0x8d8] sm:$0xff]  ;;  %v8166_v37 = vcombine.high %v304_v17, %v312_v18  ;;  %v8165_v43 = vcombine.low %v304_v17, %v312_v18 }
  0xa9   :  { %v8168_v38 = vcombine.high %v305_v33, %v313_v34  ;;  %v8167_v44 = vcombine.low %v305_v33, %v313_v34 }
  0xaa   :  { %3397 = vmatpush1.bf16.msra.mxu0 %v8037_v39  ;;  %3483 = vmatpush1.bf16.msra.mxu1 %v8039_v40  ;;  %v320_v39 = vld [vmem:[%s13188_s1 + $0x910] sm:$0xff] }
  0xab   :  { %3398 = vmatprep.subr.bf16.mxu0 %v8054_v41  ;;  %3484 = vmatprep.subr.bf16.mxu1 %v8056_v42  ;;  %v328_v40 = vld [vmem:[%s13188_s1 + $0x950] sm:$0xff]  ;;  %v321_v41 = vld [vmem:[%s13188_s1 + $0x918] sm:$0xff] }
  0xac   :  { %v329_v42 = vld [vmem:[%s13188_s1 + $0x958] sm:$0xff]  ;;  %v8182_v45 = vcombine.high %v320_v39, %v328_v40  ;;  %v8181_v51 = vcombine.low %v320_v39, %v328_v40 }
  0xad   :  { %v8184_v46 = vcombine.high %v321_v41, %v329_v42  ;;  %v8183_v52 = vcombine.low %v321_v41, %v329_v42 }
  0xae   :  { %3399 = vmatpush1.bf16.msra.mxu0 %v8053_v47  ;;  %3485 = vmatpush1.bf16.msra.mxu1 %v8055_v48  ;;  %v336_v47 = vld [vmem:[%s13188_s1 + $0x990] sm:$0xff] }
  0xaf   :  { %3400 = vmatprep.subr.bf16.mxu0 %v8070_v49  ;;  %3486 = vmatprep.subr.bf16.mxu1 %v8072_v50  ;;  %v344_v48 = vld [vmem:[%s13188_s1 + $0x9d0] sm:$0xff]  ;;  %v337_v49 = vld [vmem:[%s13188_s1 + $0x998] sm:$0xff] }
  0xb0   :  { %v345_v50 = vld [vmem:[%s13188_s1 + $0x9d8] sm:$0xff]  ;;  %v8198_v55 = vcombine.high %v336_v47, %v344_v48  ;;  %v8197_v62 = vcombine.low %v336_v47, %v344_v48 }
  0xb1   :  { %v8200_v56 = vcombine.high %v337_v49, %v345_v50  ;;  %v8199_v63 = vcombine.low %v337_v49, %v345_v50 }
  0xb2   :  { %3401 = vmatpush1.bf16.msra.mxu0 %v8069_v57  ;;  %3487 = vmatpush1.bf16.msra.mxu1 %v8071_v59  ;;  %v352_v57 = vld [vmem:[%s13188_s1 + $0xa10] sm:$0xff] }
  0xb3   :  { %3402 = vmatprep.subr.bf16.mxu0 %v8086_v60  ;;  %3488 = vmatprep.subr.bf16.mxu1 %v8088_v61  ;;  %v360_v59 = vld [vmem:[%s13188_s1 + $0xa50] sm:$0xff]  ;;  %v353_v60 = vld [vmem:[%s13188_s1 + $0xa18] sm:$0xff] }
  0xb4   :  { %v361_v61 = vld [vmem:[%s13188_s1 + $0xa58] sm:$0xff]  ;;  %v8214_v0 = vcombine.high %v352_v57, %v360_v59  ;;  %v8213_v6 = vcombine.low %v352_v57, %v360_v59 }
  0xb5   :  { %v8216_v1 = vcombine.high %v353_v60, %v361_v61  ;;  %v8215_v7 = vcombine.low %v353_v60, %v361_v61 }
  0xb6   :  { %3403 = vmatpush1.bf16.msra.mxu0 %v8085_v2  ;;  %3489 = vmatpush1.bf16.msra.mxu1 %v8087_v3  ;;  %v368_v2 = vld [vmem:[%s13188_s1 + $0xa90] sm:$0xff] }
  0xb7   :  { %3404 = vmatprep.subr.bf16.mxu0 %v8102_v4  ;;  %3490 = vmatprep.subr.bf16.mxu1 %v8104_v5  ;;  %v376_v3 = vld [vmem:[%s13188_s1 + $0xad0] sm:$0xff]  ;;  %v369_v4 = vld [vmem:[%s13188_s1 + $0xa98] sm:$0xff] }
  0xb8   :  { %v377_v5 = vld [vmem:[%s13188_s1 + $0xad8] sm:$0xff]  ;;  %v8230_v8 = vcombine.high %v368_v2, %v376_v3  ;;  %v8229_v14 = vcombine.low %v368_v2, %v376_v3 }
  0xb9   :  { %v8232_v9 = vcombine.high %v369_v4, %v377_v5  ;;  %v8231_v16 = vcombine.low %v369_v4, %v377_v5 }
  0xba   :  { %3405 = vmatpush1.bf16.msra.mxu0 %v8101_v10  ;;  %3491 = vmatpush1.bf16.msra.mxu1 %v8103_v11  ;;  %v384_v10 = vld [vmem:[%s13188_s1 + $0xb10] sm:$0xff] }
  0xbb   :  { %3406 = vmatprep.subr.bf16.mxu0 %v8118_v12  ;;  %3492 = vmatprep.subr.bf16.mxu1 %v8120_v13  ;;  %v392_v11 = vld [vmem:[%s13188_s1 + $0xb50] sm:$0xff]  ;;  %v385_v12 = vld [vmem:[%s13188_s1 + $0xb18] sm:$0xff] }
  0xbc   :  { %v393_v13 = vld [vmem:[%s13188_s1 + $0xb58] sm:$0xff]  ;;  %v8246_v19 = vcombine.high %v384_v10, %v392_v11  ;;  %v8245_v24 = vcombine.low %v384_v10, %v392_v11 }
  0xbd   :  { %v8248_v53 = vcombine.high %v385_v12, %v393_v13  ;;  %v8247_v25 = vcombine.low %v385_v12, %v393_v13 }
  0xbe   :  { %3407 = vmatpush1.bf16.msra.mxu0 %v8117_v54  ;;  %3493 = vmatpush1.bf16.msra.mxu1 %v8119_v20  ;;  %v400_v54 = vld [vmem:[%s13188_s1 + $0xb90] sm:$0xff] }
  0xbf   :  { %3408 = vmatprep.subr.bf16.mxu0 %v8134_v21  ;;  %3494 = vmatprep.subr.bf16.mxu1 %v8136_v22  ;;  %v408_v20 = vld [vmem:[%s13188_s1 + $0xbd0] sm:$0xff]  ;;  %v401_v21 = vld [vmem:[%s13188_s1 + $0xb98] sm:$0xff] }
  0xc0   :  { %v409_v22 = vld [vmem:[%s13188_s1 + $0xbd8] sm:$0xff]  ;;  %v8262_v27 = vcombine.high %v400_v54, %v408_v20  ;;  %v8261_v17 = vcombine.low %v400_v54, %v408_v20 }
  0xc1   :  { %v8264_v28 = vcombine.high %v401_v21, %v409_v22  ;;  %v8263_v18 = vcombine.low %v401_v21, %v409_v22 }
  0xc2   :  { %3409 = vmatpush1.bf16.msra.mxu0 %v8133_v29  ;;  %3495 = vmatpush1.bf16.msra.mxu1 %v8135_v30  ;;  %v416_v29 = vld [vmem:[%s13188_s1 + $0xc10] sm:$0xff] }
  0xc3   :  { %3421 = vmatprep.subr.bf16.mxu0 %v8150_v31  ;;  %3507 = vmatprep.subr.bf16.mxu1 %v8152_v32  ;;  %v424_v30 = vld [vmem:[%s13188_s1 + $0xc50] sm:$0xff]  ;;  %v417_v31 = vld [vmem:[%s13188_s1 + $0xc18] sm:$0xff] }
  0xc4   :  { %v425_v32 = vld [vmem:[%s13188_s1 + $0xc58] sm:$0xff]  ;;  %v8278_v33 = vcombine.high %v416_v29, %v424_v30  ;;  %v8277_v39 = vcombine.low %v416_v29, %v424_v30 }
  0xc5   :  { %3411 = vmatmul.mubr.bf16.vlgmr.msra.gmra.mrb[4].mxu0 %v10101_v15  ;;  %3497 = vmatmul.mubr.bf16.vlgmr.msra.gmra.mrb[4].mxu1 %v10101_v15  ;;  %v8280_v34 = vcombine.high %v417_v31, %v425_v32  ;;  %v8279_v40 = vcombine.low %v417_v31, %v425_v32 }
  0xc6   :  { %3422 = vmatpush1.bf16.msra.mxu0 %v8149_v35  ;;  %3508 = vmatpush1.bf16.msra.mxu1 %v8151_v36  ;;  %v432_v35 = vld [vmem:[%s13188_s1 + $0xc90] sm:$0xff] }
  0xc7   :  { %3423 = vmatprep.subr.bf16.mxu0 %v8166_v37  ;;  %3509 = vmatprep.subr.bf16.mxu1 %v8168_v38  ;;  %v440_v36 = vld [vmem:[%s13188_s1 + $0xcd0] sm:$0xff]  ;;  %v433_v37 = vld [vmem:[%s13188_s1 + $0xc98] sm:$0xff] }
  0xc8   :  { %3453 = vmatprep.mubr.bf16.mxu0 %v10124_v23  ;;  %3539 = vmatprep.mubr.bf16.mxu1 %v10124_v23  ;;  %v441_v38 = vld [vmem:[%s13188_s1 + $0xcd8] sm:$0xff]  ;;  %v8294_v41 = vcombine.high %v432_v35, %v440_v36  ;;  %v8293_v47 = vcombine.low %v432_v35, %v440_v36 }
  0xc9   :  { %v8296_v42 = vcombine.high %v433_v37, %v441_v38  ;;  %v8295_v48 = vcombine.low %v433_v37, %v441_v38 }
  0xca   :  { %3424 = vmatpush1.bf16.msra.mxu0 %v8165_v43  ;;  %3510 = vmatpush1.bf16.msra.mxu1 %v8167_v44  ;;  %v448_v43 = vld [vmem:[%s13188_s1 + $0xd10] sm:$0xff] }
  0xcb   :  { %3425 = vmatprep.subr.bf16.mxu0 %v8182_v45  ;;  %3511 = vmatprep.subr.bf16.mxu1 %v8184_v46  ;;  %v456_v44 = vld [vmem:[%s13188_s1 + $0xd50] sm:$0xff]  ;;  %v449_v45 = vld [vmem:[%s13188_s1 + $0xd18] sm:$0xff] }
  0xcc   :  { %v457_v46 = vld [vmem:[%s13188_s1 + $0xd58] sm:$0xff]  ;;  %v8310_v49 = vcombine.high %v448_v43, %v456_v44  ;;  %v8309_v57 = vcombine.low %v448_v43, %v456_v44 }
  0xcd   :  { %v8312_v50 = vcombine.high %v449_v45, %v457_v46  ;;  %v8311_v59 = vcombine.low %v449_v45, %v457_v46 }
  0xce   :  { %3426 = vmatpush1.bf16.msra.mxu0 %v8181_v51  ;;  %3512 = vmatpush1.bf16.msra.mxu1 %v8183_v52  ;;  %v464_v51 = vld [vmem:[%s13188_s1 + $0xd90] sm:$0xff] }
  0xcf   :  { %3427 = vmatprep.subr.bf16.mxu0 %v8198_v55  ;;  %3513 = vmatprep.subr.bf16.mxu1 %v8200_v56  ;;  %v472_v52 = vld [vmem:[%s13188_s1 + $0xdd0] sm:$0xff]  ;;  %v465_v55 = vld [vmem:[%s13188_s1 + $0xd98] sm:$0xff] }
  0xd0   :  { %v473_v56 = vld [vmem:[%s13188_s1 + $0xdd8] sm:$0xff]  ;;  %v8326_v60 = vcombine.high %v464_v51, %v472_v52  ;;  %v8325_v2 = vcombine.low %v464_v51, %v472_v52 }
  0xd1   :  { %v8328_v61 = vcombine.high %v465_v55, %v473_v56  ;;  %v8327_v3 = vcombine.low %v465_v55, %v473_v56 }
  0xd2   :  { %3428 = vmatpush1.bf16.msra.mxu0 %v8197_v62  ;;  %3514 = vmatpush1.bf16.msra.mxu1 %v8199_v63  ;;  %v480_v62 = vld [vmem:[%s13188_s1 + $0xe10] sm:$0xff] }
  0xd3   :  { %3429 = vmatprep.subr.bf16.mxu0 %v8214_v0  ;;  %3515 = vmatprep.subr.bf16.mxu1 %v8216_v1  ;;  %v488_v63 = vld [vmem:[%s13188_s1 + $0xe50] sm:$0xff]  ;;  %v481_v0 = vld [vmem:[%s13188_s1 + $0xe18] sm:$0xff] }
  0xd4   :  { %v489_v1 = vld [vmem:[%s13188_s1 + $0xe58] sm:$0xff]  ;;  %v8342_v4 = vcombine.high %v480_v62, %v488_v63  ;;  %v8341_v10 = vcombine.low %v480_v62, %v488_v63 }
  0xd5   :  { %v8344_v5 = vcombine.high %v481_v0, %v489_v1  ;;  %v8343_v11 = vcombine.low %v481_v0, %v489_v1 }
  0xd6   :  { %3430 = vmatpush1.bf16.msra.mxu0 %v8213_v6  ;;  %3516 = vmatpush1.bf16.msra.mxu1 %v8215_v7  ;;  %v496_v6 = vld [vmem:[%s13188_s1 + $0xe90] sm:$0xff] }
  0xd7   :  { %3431 = vmatprep.subr.bf16.mxu0 %v8230_v8  ;;  %3517 = vmatprep.subr.bf16.mxu1 %v8232_v9  ;;  %v504_v7 = vld [vmem:[%s13188_s1 + $0xed0] sm:$0xff]  ;;  %v497_v8 = vld [vmem:[%s13188_s1 + $0xe98] sm:$0xff] }
  0xd8   :  { %v505_v9 = vld [vmem:[%s13188_s1 + $0xed8] sm:$0xff]  ;;  %v8358_v12 = vcombine.high %v496_v6, %v504_v7  ;;  %v8357_v54 = vcombine.low %v496_v6, %v504_v7 }
  0xd9   :  { %v8360_v13 = vcombine.high %v497_v8, %v505_v9  ;;  %v8359_v20 = vcombine.low %v497_v8, %v505_v9 }
  0xda   :  { %3432 = vmatpush1.bf16.msra.mxu0 %v8229_v14  ;;  %3518 = vmatpush1.bf16.msra.mxu1 %v8231_v16  ;;  %v512_v14 = vld [vmem:[%s13188_s1 + $0xf10] sm:$0xff] }
  0xdb   :  { %3433 = vmatprep.subr.bf16.mxu0 %v8246_v19  ;;  %3519 = vmatprep.subr.bf16.mxu1 %v8248_v53  ;;  %v520_v16 = vld [vmem:[%s13188_s1 + $0xf50] sm:$0xff]  ;;  %v513_v19 = vld [vmem:[%s13188_s1 + $0xf18] sm:$0xff] }
  0xdc   :  { %v521_v53 = vld [vmem:[%s13188_s1 + $0xf58] sm:$0xff]  ;;  %v8374_v21 = vcombine.high %v512_v14, %v520_v16  ;;  %v8373_v29 = vcombine.low %v512_v14, %v520_v16 }
  0xdd   :  { %v8376_v22 = vcombine.high %v513_v19, %v521_v53  ;;  %v8375_v30 = vcombine.low %v513_v19, %v521_v53 }
  0xde   :  { %3434 = vmatpush1.bf16.msra.mxu0 %v8245_v24  ;;  %3520 = vmatpush1.bf16.msra.mxu1 %v8247_v25  ;;  %v528_v24 = vld [vmem:[%s13188_s1 + $0xf90] sm:$0xff] }
  0xdf   :  { %3435 = vmatprep.subr.bf16.mxu0 %v8262_v27  ;;  %3521 = vmatprep.subr.bf16.mxu1 %v8264_v28  ;;  %v536_v25 = vld [vmem:[%s13188_s1 + $0xfd0] sm:$0xff]  ;;  %v529_v27 = vld [vmem:[%s13188_s1 + $0xf98] sm:$0xff] }
  0xe0   :  { %v537_v28 = vld [vmem:[%s13188_s1 + $0xfd8] sm:$0xff]  ;;  %v8390_v31 = vcombine.high %v528_v24, %v536_v25  ;;  %v8389_v35 = vcombine.low %v528_v24, %v536_v25 }
  0xe1   :  { %v8392_v32 = vcombine.high %v529_v27, %v537_v28  ;;  %v8391_v36 = vcombine.low %v529_v27, %v537_v28 }
  0xe2   :  { %3436 = vmatpush1.bf16.msra.mxu0 %v8261_v17  ;;  %3522 = vmatpush1.bf16.msra.mxu1 %v8263_v18  ;;  %v34_v17 = vld [vmem:[%s13188_s1 + $0x20] sm:$0xff] }
  0xe3   :  { %3437 = vmatprep.subr.bf16.mxu0 %v8278_v33  ;;  %3523 = vmatprep.subr.bf16.mxu1 %v8280_v34  ;;  %v42_v18 = vld [vmem:[%s13188_s1 + $0x60] sm:$0xff]  ;;  %v35_v33 = vld [vmem:[%s13188_s1 + $0x28] sm:$0xff] }
  0xe4   :  { %v43_v34 = vld [vmem:[%s13188_s1 + $0x68] sm:$0xff]  ;;  %v7898_v37 = vcombine.high %v34_v17, %v42_v18  ;;  %v7897_v43 = vcombine.low %v34_v17, %v42_v18 }
  0xe5   :  { %v7900_v38 = vcombine.high %v35_v33, %v43_v34  ;;  %v7899_v44 = vcombine.low %v35_v33, %v43_v34 }
  0xe6   :  { %3438 = vmatpush1.bf16.msra.mxu0 %v8277_v39  ;;  %3524 = vmatpush1.bf16.msra.mxu1 %v8279_v40  ;;  %v50_v39 = vld [vmem:[%s13188_s1 + $0xa0] sm:$0xff] }
  0xe7   :  { %3439 = vmatprep.subr.bf16.mxu0 %v8294_v41  ;;  %3525 = vmatprep.subr.bf16.mxu1 %v8296_v42  ;;  %v58_v40 = vld [vmem:[%s13188_s1 + $0xe0] sm:$0xff]  ;;  %v51_v41 = vld [vmem:[%s13188_s1 + $0xa8] sm:$0xff] }
  0xe8   :  { %v59_v42 = vld [vmem:[%s13188_s1 + $0xe8] sm:$0xff]  ;;  %v7914_v45 = vcombine.high %v50_v39, %v58_v40  ;;  %v7913_v51 = vcombine.low %v50_v39, %v58_v40 }
  0xe9   :  { %v7916_v46 = vcombine.high %v51_v41, %v59_v42  ;;  %v7915_v52 = vcombine.low %v51_v41, %v59_v42 }
  0xea   :  { %3440 = vmatpush1.bf16.msra.mxu0 %v8293_v47  ;;  %3526 = vmatpush1.bf16.msra.mxu1 %v8295_v48  ;;  %v66_v47 = vld [vmem:[%s13188_s1 + $0x120] sm:$0xff] }
  0xeb   :  { %3441 = vmatprep.subr.bf16.mxu0 %v8310_v49  ;;  %3527 = vmatprep.subr.bf16.mxu1 %v8312_v50  ;;  %v74_v48 = vld [vmem:[%s13188_s1 + $0x160] sm:$0xff]  ;;  %v67_v49 = vld [vmem:[%s13188_s1 + $0x128] sm:$0xff] }
  0xec   :  { %v75_v50 = vld [vmem:[%s13188_s1 + $0x168] sm:$0xff]  ;;  %v7930_v55 = vcombine.high %v66_v47, %v74_v48  ;;  %v7929_v62 = vcombine.low %v66_v47, %v74_v48 }
  0xed   :  { %v7932_v56 = vcombine.high %v67_v49, %v75_v50  ;;  %v7931_v63 = vcombine.low %v67_v49, %v75_v50 }
  0xee   :  { %3442 = vmatpush1.bf16.msra.mxu0 %v8309_v57  ;;  %3528 = vmatpush1.bf16.msra.mxu1 %v8311_v59  ;;  %v82_v57 = vld [vmem:[%s13188_s1 + $0x1a0] sm:$0xff] }
  0xef   :  { %3443 = vmatprep.subr.bf16.mxu0 %v8326_v60  ;;  %3529 = vmatprep.subr.bf16.mxu1 %v8328_v61  ;;  %v90_v59 = vld [vmem:[%s13188_s1 + $0x1e0] sm:$0xff]  ;;  %v83_v60 = vld [vmem:[%s13188_s1 + $0x1a8] sm:$0xff] }
  0xf0   :  { %v91_v61 = vld [vmem:[%s13188_s1 + $0x1e8] sm:$0xff]  ;;  %v7946_v0 = vcombine.high %v82_v57, %v90_v59  ;;  %v7945_v6 = vcombine.low %v82_v57, %v90_v59 }
  0xf1   :  { %v7948_v1 = vcombine.high %v83_v60, %v91_v61  ;;  %v7947_v7 = vcombine.low %v83_v60, %v91_v61 }
  0xf2   :  { %3444 = vmatpush1.bf16.msra.mxu0 %v8325_v2  ;;  %3530 = vmatpush1.bf16.msra.mxu1 %v8327_v3  ;;  %v98_v2 = vld [vmem:[%s13188_s1 + $0x220] sm:$0xff] }
  0xf3   :  { %3445 = vmatprep.subr.bf16.mxu0 %v8342_v4  ;;  %3531 = vmatprep.subr.bf16.mxu1 %v8344_v5  ;;  %v106_v3 = vld [vmem:[%s13188_s1 + $0x260] sm:$0xff]  ;;  %v99_v4 = vld [vmem:[%s13188_s1 + $0x228] sm:$0xff] }
  0xf4   :  { %v107_v5 = vld [vmem:[%s13188_s1 + $0x268] sm:$0xff]  ;;  %v7962_v8 = vcombine.high %v98_v2, %v106_v3  ;;  %v7961_v14 = vcombine.low %v98_v2, %v106_v3 }
  0xf5   :  { %v7964_v9 = vcombine.high %v99_v4, %v107_v5  ;;  %v7963_v16 = vcombine.low %v99_v4, %v107_v5 }
  0xf6   :  { %3446 = vmatpush1.bf16.msra.mxu0 %v8341_v10  ;;  %3532 = vmatpush1.bf16.msra.mxu1 %v8343_v11  ;;  %v114_v10 = vld [vmem:[%s13188_s1 + $0x2a0] sm:$0xff] }
  0xf7   :  { %3447 = vmatprep.subr.bf16.mxu0 %v8358_v12  ;;  %3533 = vmatprep.subr.bf16.mxu1 %v8360_v13  ;;  %v122_v11 = vld [vmem:[%s13188_s1 + $0x2e0] sm:$0xff]  ;;  %v115_v12 = vld [vmem:[%s13188_s1 + $0x2a8] sm:$0xff] }
  0xf8   :  { %v123_v13 = vld [vmem:[%s13188_s1 + $0x2e8] sm:$0xff]  ;;  %v7978_v19 = vcombine.high %v114_v10, %v122_v11  ;;  %v7977_v24 = vcombine.low %v114_v10, %v122_v11 }
  0xf9   :  { %v7980_v53 = vcombine.high %v115_v12, %v123_v13  ;;  %v7979_v25 = vcombine.low %v115_v12, %v123_v13 }
  0xfa   :  { %3448 = vmatpush1.bf16.msra.mxu0 %v8357_v54  ;;  %3534 = vmatpush1.bf16.msra.mxu1 %v8359_v20  ;;  %v130_v54 = vld [vmem:[%s13188_s1 + $0x320] sm:$0xff] }
  0xfb   :  { %3449 = vmatprep.subr.bf16.mxu0 %v8374_v21  ;;  %3535 = vmatprep.subr.bf16.mxu1 %v8376_v22  ;;  %v138_v20 = vld [vmem:[%s13188_s1 + $0x360] sm:$0xff]  ;;  %v131_v21 = vld [vmem:[%s13188_s1 + $0x328] sm:$0xff] }
  0xfc   :  { %v139_v22 = vld [vmem:[%s13188_s1 + $0x368] sm:$0xff]  ;;  %v7994_v27 = vcombine.high %v130_v54, %v138_v20  ;;  %v7993_v17 = vcombine.low %v130_v54, %v138_v20 }
  0xfd   :  { %v7996_v28 = vcombine.high %v131_v21, %v139_v22  ;;  %v7995_v18 = vcombine.low %v131_v21, %v139_v22 }
  0xfe   :  { %3450 = vmatpush1.bf16.msra.mxu0 %v8373_v29  ;;  %3536 = vmatpush1.bf16.msra.mxu1 %v8375_v30  ;;  %v146_v29 = vld [vmem:[%s13188_s1 + $0x3a0] sm:$0xff] }
  0xff   :  { %3451 = vmatprep.subr.bf16.mxu0 %v8390_v31  ;;  %3537 = vmatprep.subr.bf16.mxu1 %v8392_v32  ;;  %v154_v30 = vld [vmem:[%s13188_s1 + $0x3e0] sm:$0xff]  ;;  %v147_v31 = vld [vmem:[%s13188_s1 + $0x3a8] sm:$0xff] }
 0x100   :  { %v155_v32 = vld [vmem:[%s13188_s1 + $0x3e8] sm:$0xff]  ;;  %v8010_v33 = vcombine.high %v146_v29, %v154_v30  ;;  %v8009_v39 = vcombine.low %v146_v29, %v154_v30 }
 0x101   :  { %v8012_v34 = vcombine.high %v147_v31, %v155_v32  ;;  %v8011_v40 = vcombine.low %v147_v31, %v155_v32 }
 0x102   :  { %3452 = vmatpush1.bf16.msra.mxu0 %v8389_v35  ;;  %3538 = vmatpush1.bf16.msra.mxu1 %v8391_v36  ;;  %v162_v35 = vld [vmem:[%s13188_s1 + $0x420] sm:$0xff] }
 0x103   :  { %3550 = vmatprep.subr.bf16.mxu0 %v7898_v37  ;;  %3636 = vmatprep.subr.bf16.mxu1 %v7900_v38  ;;  %v170_v36 = vld [vmem:[%s13188_s1 + $0x460] sm:$0xff]  ;;  %v163_v37 = vld [vmem:[%s13188_s1 + $0x428] sm:$0xff] }
 0x104   :  { %v171_v38 = vld [vmem:[%s13188_s1 + $0x468] sm:$0xff]  ;;  %v8026_v41 = vcombine.high %v162_v35, %v170_v36  ;;  %v8025_v47 = vcombine.low %v162_v35, %v170_v36 }
 0x105   :  { %3454 = vmatmul.mubr.bf16.vlgmr.msra.gmra.mrb[4].mxu0 %v10312_v26  ;;  %3540 = vmatmul.mubr.bf16.vlgmr.msra.gmra.mrb[4].mxu1 %v10312_v26  ;;  %v8028_v42 = vcombine.high %v163_v37, %v171_v38  ;;  %v8027_v48 = vcombine.low %v163_v37, %v171_v38 }
 0x106   :  { %3551 = vmatpush1.bf16.msra.mxu0 %v7897_v43  ;;  %3637 = vmatpush1.bf16.msra.mxu1 %v7899_v44  ;;  %v178_v43 = vld [vmem:[%s13188_s1 + $0x4a0] sm:$0xff] }
 0x107   :  { %3552 = vmatprep.subr.bf16.mxu0 %v7914_v45  ;;  %3638 = vmatprep.subr.bf16.mxu1 %v7916_v46  ;;  %v186_v44 = vld [vmem:[%s13188_s1 + $0x4e0] sm:$0xff]  ;;  %v179_v45 = vld [vmem:[%s13188_s1 + $0x4a8] sm:$0xff] }
 0x108   :  { %3582 = vmatprep.mubr.bf16.mxu0 %v9972_v58  ;;  %3668 = vmatprep.mubr.bf16.mxu1 %v9972_v58  ;;  %v187_v46 = vld [vmem:[%s13188_s1 + $0x4e8] sm:$0xff]  ;;  %v8042_v49 = vcombine.high %v178_v43, %v186_v44  ;;  %v8041_v57 = vcombine.low %v178_v43, %v186_v44 }
 0x109   :  { %v8044_v50 = vcombine.high %v179_v45, %v187_v46  ;;  %v8043_v59 = vcombine.low %v179_v45, %v187_v46 }
 0x10a   :  { %3553 = vmatpush1.bf16.msra.mxu0 %v7913_v51  ;;  %3639 = vmatpush1.bf16.msra.mxu1 %v7915_v52  ;;  %v194_v51 = vld [vmem:[%s13188_s1 + $0x520] sm:$0xff] }
 0x10b   :  { %3554 = vmatprep.subr.bf16.mxu0 %v7930_v55  ;;  %3640 = vmatprep.subr.bf16.mxu1 %v7932_v56  ;;  %v202_v52 = vld [vmem:[%s13188_s1 + $0x560] sm:$0xff]  ;;  %v195_v55 = vld [vmem:[%s13188_s1 + $0x528] sm:$0xff] }
 0x10c   :  { %v203_v56 = vld [vmem:[%s13188_s1 + $0x568] sm:$0xff]  ;;  %v8058_v60 = vcombine.high %v194_v51, %v202_v52  ;;  %v8057_v2 = vcombine.low %v194_v51, %v202_v52 }
 0x10d   :  { %v8060_v61 = vcombine.high %v195_v55, %v203_v56  ;;  %v8059_v3 = vcombine.low %v195_v55, %v203_v56 }
 0x10e   :  { %3555 = vmatpush1.bf16.msra.mxu0 %v7929_v62  ;;  %3641 = vmatpush1.bf16.msra.mxu1 %v7931_v63  ;;  %v210_v62 = vld [vmem:[%s13188_s1 + $0x5a0] sm:$0xff] }
 0x10f   :  { %3556 = vmatprep.subr.bf16.mxu0 %v7946_v0  ;;  %3642 = vmatprep.subr.bf16.mxu1 %v7948_v1  ;;  %v218_v63 = vld [vmem:[%s13188_s1 + $0x5e0] sm:$0xff]  ;;  %v211_v0 = vld [vmem:[%s13188_s1 + $0x5a8] sm:$0xff] }
 0x110   :  { %v219_v1 = vld [vmem:[%s13188_s1 + $0x5e8] sm:$0xff]  ;;  %v8074_v4 = vcombine.high %v210_v62, %v218_v63  ;;  %v8073_v10 = vcombine.low %v210_v62, %v218_v63 }
 0x111   :  { %v8076_v5 = vcombine.high %v211_v0, %v219_v1  ;;  %v8075_v11 = vcombine.low %v211_v0, %v219_v1 }
 0x112   :  { %3557 = vmatpush1.bf16.msra.mxu0 %v7945_v6  ;;  %3643 = vmatpush1.bf16.msra.mxu1 %v7947_v7  ;;  %v226_v6 = vld [vmem:[%s13188_s1 + $0x620] sm:$0xff] }
 0x113   :  { %3558 = vmatprep.subr.bf16.mxu0 %v7962_v8  ;;  %3644 = vmatprep.subr.bf16.mxu1 %v7964_v9  ;;  %v234_v7 = vld [vmem:[%s13188_s1 + $0x660] sm:$0xff]  ;;  %v227_v8 = vld [vmem:[%s13188_s1 + $0x628] sm:$0xff] }
 0x114   :  { %v235_v9 = vld [vmem:[%s13188_s1 + $0x668] sm:$0xff]  ;;  %v8090_v12 = vcombine.high %v226_v6, %v234_v7  ;;  %v8089_v54 = vcombine.low %v226_v6, %v234_v7  ;;  %v546_v6 = vlaneseq }
 0x115   :  { %v8092_v13 = vcombine.high %v227_v8, %v235_v9  ;;  %v8091_v20 = vcombine.low %v227_v8, %v235_v9 }
 0x116   :  { %3559 = vmatpush1.bf16.msra.mxu0 %v7961_v14  ;;  %3645 = vmatpush1.bf16.msra.mxu1 %v7963_v16  ;;  %v242_v14 = vld [vmem:[%s13188_s1 + $0x6a0] sm:$0xff] }
 0x117   :  { %3560 = vmatprep.subr.bf16.mxu0 %v7978_v19  ;;  %3646 = vmatprep.subr.bf16.mxu1 %v7980_v53  ;;  %v250_v16 = vld [vmem:[%s13188_s1 + $0x6e0] sm:$0xff]  ;;  %v243_v19 = vld [vmem:[%s13188_s1 + $0x6a8] sm:$0xff] }
 0x118   :  { %v251_v53 = vld [vmem:[%s13188_s1 + $0x6e8] sm:$0xff]  ;;  %v8106_v21 = vcombine.high %v242_v14, %v250_v16  ;;  %v8105_v29 = vcombine.low %v242_v14, %v250_v16  ;;  %v10948_v16 = vshrl.u32 %v546_v6, 7 }
 0x119   :  { %v8108_v22 = vcombine.high %v243_v19, %v251_v53  ;;  %v8107_v30 = vcombine.low %v243_v19, %v251_v53  ;;  %v363_v14 = vld [vmem:[%s13188_s1 + $0xa68] sm:$0xff] }
 0x11a   :  { %3561 = vmatpush1.bf16.msra.mxu0 %v7977_v24  ;;  %3647 = vmatpush1.bf16.msra.mxu1 %v7979_v25  ;;  %v258_v24 = vld [vmem:[%s13188_s1 + $0x720] sm:$0xff] }
 0x11b   :  { %3562 = vmatprep.subr.bf16.mxu0 %v7994_v27  ;;  %3648 = vmatprep.subr.bf16.mxu1 %v7996_v28  ;;  %v266_v25 = vld [vmem:[%s13188_s1 + $0x760] sm:$0xff]  ;;  %v259_v27 = vld [vmem:[%s13188_s1 + $0x728] sm:$0xff] }
 0x11c   :  { %v267_v28 = vld [vmem:[%s13188_s1 + $0x768] sm:$0xff]  ;;  %v8122_v31 = vcombine.high %v258_v24, %v266_v25  ;;  %v8121_v35 = vcombine.low %v258_v24, %v266_v25  ;;  %v10957_v24 = vsub.s32 0, %v10948_v16 }
 0x11d   :  { %v8124_v32 = vcombine.high %v259_v27, %v267_v28  ;;  %v8123_v36 = vcombine.low %v259_v27, %v267_v28  ;;  %v371_v25 = vld [vmem:[%s13188_s1 + $0xaa8] sm:$0xff] }
 0x11e   :  { %3563 = vmatpush1.bf16.msra.mxu0 %v7993_v17  ;;  %3649 = vmatpush1.bf16.msra.mxu1 %v7995_v18  ;;  %v274_v17 = vld [vmem:[%s13188_s1 + $0x7a0] sm:$0xff]  ;;  %v379_v27 = vld [vmem:[%s13188_s1 + $0xae8] sm:$0xff] }
 0x11f   :  { %3564 = vmatprep.subr.bf16.mxu0 %v8010_v33  ;;  %3650 = vmatprep.subr.bf16.mxu1 %v8012_v34  ;;  %v282_v18 = vld [vmem:[%s13188_s1 + $0x7e0] sm:$0xff]  ;;  %v275_v33 = vld [vmem:[%s13188_s1 + $0x7a8] sm:$0xff] }
 0x120   :  { %v283_v34 = vld [vmem:[%s13188_s1 + $0x7e8] sm:$0xff]  ;;  %v8138_v37 = vcombine.high %v274_v17, %v282_v18  ;;  %v8137_v43 = vcombine.low %v274_v17, %v282_v18  ;;  %v10975_v17 = vsub.s32 3, %v10948_v16 }
 0x121   :  { %v8140_v38 = vcombine.high %v275_v33, %v283_v34  ;;  %v8139_v44 = vcombine.low %v275_v33, %v283_v34  ;;  %v8236_v33 = vcombine.high %v371_v25, %v379_v27  ;;  %v386_v34 = vld [vmem:[%s13188_s1 + $0xb20] sm:$0xff] }
 0x122   :  { %3565 = vmatpush1.bf16.msra.mxu0 %v8009_v39  ;;  %3651 = vmatpush1.bf16.msra.mxu1 %v8011_v40  ;;  %v290_v39 = vld [vmem:[%s13188_s1 + $0x820] sm:$0xff] }
 0x123   :  { %3566 = vmatprep.subr.bf16.mxu0 %v8026_v41  ;;  %3652 = vmatprep.subr.bf16.mxu1 %v8028_v42  ;;  %v298_v40 = vld [vmem:[%s13188_s1 + $0x860] sm:$0xff]  ;;  %v291_v41 = vld [vmem:[%s13188_s1 + $0x828] sm:$0xff] }
 0x124   :  { %v299_v42 = vld [vmem:[%s13188_s1 + $0x868] sm:$0xff]  ;;  %v8154_v45 = vcombine.high %v290_v39, %v298_v40  ;;  %v8153_v51 = vcombine.low %v290_v39, %v298_v40 }
 0x125   :  { %v8156_v46 = vcombine.high %v291_v41, %v299_v42  ;;  %v8155_v52 = vcombine.low %v291_v41, %v299_v42 }
 0x126   :  { %3567 = vmatpush1.bf16.msra.mxu0 %v8025_v47  ;;  %3653 = vmatpush1.bf16.msra.mxu1 %v8027_v48  ;;  %v306_v47 = vld [vmem:[%s13188_s1 + $0x8a0] sm:$0xff] }
 0x127   :  { %3568 = vmatprep.subr.bf16.mxu0 %v8042_v49  ;;  %3654 = vmatprep.subr.bf16.mxu1 %v8044_v50  ;;  %v314_v48 = vld [vmem:[%s13188_s1 + $0x8e0] sm:$0xff]  ;;  %v307_v49 = vld [vmem:[%s13188_s1 + $0x8a8] sm:$0xff] }
 0x128   :  { %v315_v50 = vld [vmem:[%s13188_s1 + $0x8e8] sm:$0xff]  ;;  %v8170_v55 = vcombine.high %v306_v47, %v314_v48  ;;  %v8169_v62 = vcombine.low %v306_v47, %v314_v48  ;;  %v402_v47 = vld [vmem:[%s13188_s1 + $0xba0] sm:$0xff] }
 0x129   :  { %v8172_v56 = vcombine.high %v307_v49, %v315_v50  ;;  %v8171_v63 = vcombine.low %v307_v49, %v315_v50  ;;  %v410_v48 = vld [vmem:[%s13188_s1 + $0xbe0] sm:$0xff] }
 0x12a   :  { %3569 = vmatpush1.bf16.msra.mxu0 %v8041_v57  ;;  %3655 = vmatpush1.bf16.msra.mxu1 %v8043_v59  ;;  %v322_v57 = vld [vmem:[%s13188_s1 + $0x920] sm:$0xff] }
 0x12b   :  { %3570 = vmatprep.subr.bf16.mxu0 %v8058_v60  ;;  %3656 = vmatprep.subr.bf16.mxu1 %v8060_v61  ;;  %v330_v59 = vld [vmem:[%s13188_s1 + $0x960] sm:$0xff]  ;;  %v323_v60 = vld [vmem:[%s13188_s1 + $0x928] sm:$0xff] }
 0x12c   :  { %v331_v61 = vld [vmem:[%s13188_s1 + $0x968] sm:$0xff]  ;;  %v8186_v0 = vcombine.high %v322_v57, %v330_v59  ;;  %v8185_v7 = vcombine.low %v322_v57, %v330_v59 }
 0x12d   :  { %v8188_v1 = vcombine.high %v323_v60, %v331_v61  ;;  %v8187_v8 = vcombine.low %v323_v60, %v331_v61 }
 0x12e   :  { %3571 = vmatpush1.bf16.msra.mxu0 %v8057_v2  ;;  %3657 = vmatpush1.bf16.msra.mxu1 %v8059_v3  ;;  %v338_v2 = vld [vmem:[%s13188_s1 + $0x9a0] sm:$0xff] }
 0x12f   :  { %3572 = vmatprep.subr.bf16.mxu0 %v8074_v4  ;;  %3658 = vmatprep.subr.bf16.mxu1 %v8076_v5  ;;  %v346_v3 = vld [vmem:[%s13188_s1 + $0x9e0] sm:$0xff]  ;;  %v339_v4 = vld [vmem:[%s13188_s1 + $0x9a8] sm:$0xff] }
 0x130   :  { %v347_v5 = vld [vmem:[%s13188_s1 + $0x9e8] sm:$0xff]  ;;  %v8202_v9 = vcombine.high %v338_v2, %v346_v3  ;;  %v8201_v19 = vcombine.low %v338_v2, %v346_v3  ;;  %v8266_v3 = vcombine.high %v402_v47, %v410_v48 }
 0x131   :  { %v8203_v53 = vcombine.low %v339_v4, %v347_v5 }
 0x132   :  { %3573 = vmatpush1.bf16.msra.mxu0 %v8073_v10  ;;  %3659 = vmatpush1.bf16.msra.mxu1 %v8075_v11  ;;  %v8204_v10 = vcombine.high %v339_v4, %v347_v5  ;;  %v354_v11 = vld [vmem:[%s13188_s1 + $0xa20] sm:$0xff] }
 0x133   :  { %3574 = vmatprep.subr.bf16.mxu0 %v8090_v12  ;;  %3660 = vmatprep.subr.bf16.mxu1 %v8092_v13  ;;  %v362_v12 = vld [vmem:[%s13188_s1 + $0xa60] sm:$0xff]  ;;  %v355_v13 = vld [vmem:[%s13188_s1 + $0xa28] sm:$0xff] }
 0x134   :  { %v8217_v28 = vcombine.low %v354_v11, %v362_v12 }
 0x136   :  { %3575 = vmatpush1.bf16.msra.mxu0 %v8089_v54  ;;  %3661 = vmatpush1.bf16.msra.mxu1 %v8091_v20  ;;  %v8218_v54 = vcombine.high %v354_v11, %v362_v12  ;;  %v8220_v20 = vcombine.high %v355_v13, %v363_v14 }
 0x137   :  { %3576 = vmatprep.subr.bf16.mxu0 %v8106_v21  ;;  %3662 = vmatprep.subr.bf16.mxu1 %v8108_v22  ;;  %v370_v21 = vld [vmem:[%s13188_s1 + $0xaa0] sm:$0xff] }
 0x138   :  { %v378_v22 = vld [vmem:[%s13188_s1 + $0xae0] sm:$0xff] }
 0x139   :  { %v8234_v18 = vcombine.high %v370_v21, %v378_v22  ;;  %v8233_v41 = vcombine.low %v370_v21, %v378_v22 }
 0x13a   :  { %3577 = vmatpush1.bf16.msra.mxu0 %v8105_v29  ;;  %3663 = vmatpush1.bf16.msra.mxu1 %v8107_v30  ;;  %v542_v29 = vld [vmem:[%s13190_s2] sm:$0xff]  ;;  %v10969_v30 = vsub.s32 2, %v10948_v16 }
 0x13b   :  { %3578 = vmatprep.subr.bf16.mxu0 %v8122_v31  ;;  %3664 = vmatprep.subr.bf16.mxu1 %v8124_v32  ;;  %v10972_v31 = vsub.s32 1, %v10948_v16  ;;  %v8219_v32 = vcombine.low %v355_v13, %v363_v14  ;;  %v561_v42 = vrot.slane %v542_v29, %v10975_v17 }
 0x13c   :  { %v557_v39 = vrot.slane %v542_v29, %v10969_v30 }
 0x13d   :  { %v553_v40 = vrot.slane %v542_v29, %v10972_v31 }
 0x13e   :  { %3579 = vmatpush1.bf16.msra.mxu0 %v8121_v35  ;;  %3665 = vmatpush1.bf16.msra.mxu1 %v8123_v36  ;;  %v394_v35 = vld [vmem:[%s13188_s1 + $0xb60] sm:$0xff]  ;;  %v549_v36 = vrot.slane %v542_v29, %v10957_v24 }
 0x13f   :  { %3580 = vmatprep.subr.bf16.mxu0 %v8138_v37  ;;  %3666 = vmatprep.subr.bf16.mxu1 %v8140_v38  ;;  %v387_v37 = vld [vmem:[%s13188_s1 + $0xb28] sm:$0xff]  ;;  %v8249_v61 = vcombine.low %v386_v34, %v394_v35 }
 0x140   :  { %v395_v38 = vld [vmem:[%s13188_s1 + $0xb68] sm:$0xff] }
 0x142   :  { %3581 = vmatpush1.bf16.msra.mxu0 %v8137_v43  ;;  %3667 = vmatpush1.bf16.msra.mxu1 %v8139_v44  ;;  %v8235_v43 = vcombine.low %v371_v25, %v379_v27  ;;  %v8250_v44 = vcombine.high %v386_v34, %v394_v35  ;;  %v434_v34 = vld [vmem:[%s13188_s1 + $0xca0] sm:$0xff] }
 0x143   :  { %3593 = vmatprep.subr.bf16.mxu0 %v8154_v45  ;;  %3679 = vmatprep.subr.bf16.mxu1 %v8156_v46  ;;  %v8252_v46 = vcombine.high %v387_v37, %v395_v38  ;;  %v442_v35 = vld [vmem:[%s13188_s1 + $0xce0] sm:$0xff] }
 0x145   :  { %3583 = vmatmul.mubr.bf16.vlgmr.msra.gmra.mrb[8].mxu0 %v10101_v15  ;;  %3669 = vmatmul.mubr.bf16.vlgmr.msra.gmra.mrb[8].mxu1 %v10101_v15 }
 0x146   :  { %3594 = vmatpush1.bf16.msra.mxu0 %v8153_v51  ;;  %3680 = vmatpush1.bf16.msra.mxu1 %v8155_v52  ;;  %v403_v52 = vld [vmem:[%s13188_s1 + $0xba8] sm:$0xff] }
 0x147   :  { %3595 = vmatprep.subr.bf16.mxu0 %v8170_v55  ;;  %3681 = vmatprep.subr.bf16.mxu1 %v8172_v56  ;;  %v411_v55 = vld [vmem:[%s13188_s1 + $0xbe8] sm:$0xff] }
 0x148   :  { %3625 = vmatprep.mubr.bf16.mxu0 %v10124_v23  ;;  %3711 = vmatprep.mubr.bf16.mxu1 %v10124_v23  ;;  %v8267_v14 = vcombine.low %v403_v52, %v411_v55 }
 0x14a   :  { %3596 = vmatpush1.bf16.msra.mxu0 %v8169_v62  ;;  %3682 = vmatpush1.bf16.msra.mxu1 %v8171_v63  ;;  %v8251_v62 = vcombine.low %v387_v37, %v395_v38  ;;  %v435_v37 = vld [vmem:[%s13188_s1 + $0xca8] sm:$0xff] }
 0x14b   :  { %3597 = vmatprep.subr.bf16.mxu0 %v8186_v0  ;;  %3683 = vmatprep.subr.bf16.mxu1 %v8188_v1  ;;  %v443_v38 = vld [vmem:[%s13188_s1 + $0xce8] sm:$0xff] }
 0x14e   :  { %3598 = vmatpush1.bf16.msra.mxu0 %v8185_v7  ;;  %3684 = vmatpush1.bf16.msra.mxu1 %v8187_v8  ;;  %v8265_v7 = vcombine.low %v402_v47, %v410_v48  ;;  %v8268_v8 = vcombine.high %v403_v52, %v411_v55  ;;  %v8297_v47 = vcombine.low %v434_v34, %v442_v35  ;;  %v474_v52 = vld [vmem:[%s13188_s1 + $0xde0] sm:$0xff]  ;;  %v467_v55 = vld [vmem:[%s13188_s1 + $0xda8] sm:$0xff] }
 0x14f   :  { %3599 = vmatprep.subr.bf16.mxu0 %v8202_v9  ;;  %3685 = vmatprep.subr.bf16.mxu1 %v8204_v10  ;;  %v418_v9 = vld [vmem:[%s13188_s1 + $0xc20] sm:$0xff]  ;;  %v8299_v48 = vcombine.low %v435_v37, %v443_v38 }
 0x150   :  { %v426_v10 = vld [vmem:[%s13188_s1 + $0xc60] sm:$0xff] }
 0x151   :  { %v8282_v29 = vcombine.high %v418_v9, %v426_v10 }
 0x152   :  { %3600 = vmatpush1.bf16.msra.mxu0 %v8201_v19  ;;  %3686 = vmatpush1.bf16.msra.mxu1 %v8203_v53  ;;  %v419_v19 = vld [vmem:[%s13188_s1 + $0xc28] sm:$0xff] }
 0x153   :  { %3601 = vmatprep.subr.bf16.mxu0 %v8218_v54  ;;  %3687 = vmatprep.subr.bf16.mxu1 %v8220_v20  ;;  %v427_v53 = vld [vmem:[%s13188_s1 + $0xc68] sm:$0xff] }
 0x156   :  { %3602 = vmatpush1.bf16.msra.mxu0 %v8217_v28  ;;  %3688 = vmatpush1.bf16.msra.mxu1 %v8219_v32 }
 0x157   :  { %3603 = vmatprep.subr.bf16.mxu0 %v8234_v18  ;;  %3689 = vmatprep.subr.bf16.mxu1 %v8236_v33  ;;  %v8284_v33 = vcombine.high %v419_v19, %v427_v53 }
 0x158   :  { %v3283_v45 = vpop.f32.mrb[0].mxu0  ;;  %v3369_v50 = vpop.f32.mrb[0].mxu1 }
 0x159   :  { %v8921_v49 = vadd.f32 %v3283_v45, %v549_v36  ;;  %v3285_v51 = vpop.f32.mrb[1].mxu0  ;;  %v8925_v56 = vadd.f32 %v3369_v50, %v557_v39  ;;  %v3371_v59 = vpop.f32.mrb[1].mxu1  ;;  %v451_v45 = vld [vmem:[%s13188_s1 + $0xd28] sm:$0xff] }
 0x15a   :  { %v8922_v57 = vadd.f32 %v3285_v51, %v553_v40  ;;  %v3287_v60 = vpop.f32.mrb[2].mxu0  ;;  %3604 = vmatpush1.bf16.msra.mxu0 %v8233_v41  ;;  %v8926_v63 = vadd.f32 %v3371_v59, %v561_v42  ;;  %v3373_v1 = vpop.f32.mrb[2].mxu1  ;;  %3690 = vmatpush1.bf16.msra.mxu1 %v8235_v43  ;;  %v8298_v41 = vcombine.high %v434_v34, %v442_v35  ;;  %v450_v43 = vld [vmem:[%s13188_s1 + $0xd20] sm:$0xff]  ;;  %v539_v34 = vld [vmem:[%s13188_s1 + $0xfe8] sm:$0xff] }
 0x15b   :  { %v8923_v0 = vadd.f32 %v3287_v60, %v549_v36  ;;  %v3289_v2 = vpop.f32.mrb[3].mxu0  ;;  %3605 = vmatprep.subr.bf16.mxu0 %v8250_v44  ;;  %v8927_v4 = vadd.f32 %v3373_v1, %v557_v39  ;;  %v3375_v6 = vpop.f32.mrb[3].mxu1  ;;  %3691 = vmatprep.subr.bf16.mxu1 %v8252_v46  ;;  %v3894_v11 = vmax.f32 %v8921_v49, 0.0  ;;  %v3896_v54 = vmax.f32 %v8925_v56, 0.0  ;;  %v458_v44 = vld [vmem:[%s13188_s1 + $0xd60] sm:$0xff]  ;;  %v459_v46 = vld [vmem:[%s13188_s1 + $0xd68] sm:$0xff] }
 0x15c   :  { %v8924_v5 = vadd.f32 %v3289_v2, %v553_v40  ;;  %v8928_v13 = vadd.f32 %v3375_v6, %v561_v42  ;;  %v3895_v20 = vmax.f32 %v8922_v57, 0.0  ;;  %v3897_v25 = vmax.f32 %v8926_v63, 0.0  ;;  %v466_v51 = vld [vmem:[%s13188_s1 + $0xda0] sm:$0xff]  ;;  %v475_v56 = vld [vmem:[%s13188_s1 + $0xde8] sm:$0xff] }
 0x15d   :  { %v3910_v12 = vmax.f32 %v8923_v0, 0.0  ;;  %v3912_v21 = vmax.f32 %v8927_v4, 0.0  ;;  %v8281_v39 = vcombine.low %v418_v9, %v426_v10  ;;  %v8283_v40 = vcombine.low %v419_v19, %v427_v53  ;;  %v490_v63 = vld [vmem:[%s13188_s1 + $0xe60] sm:$0xff]  ;;  %v483_v0 = vld [vmem:[%s13188_s1 + $0xe28] sm:$0xff] }
 0x15e   :  { %v3911_v22 = vmax.f32 %v8924_v5, 0.0  ;;  %3606 = vmatpush1.bf16.msra.mxu0 %v8249_v61  ;;  %v3913_v28 = vmax.f32 %v8928_v13, 0.0  ;;  %3692 = vmatpush1.bf16.msra.mxu1 %v8251_v62  ;;  %v8300_v42 = vcombine.high %v435_v37, %v443_v38  ;;  %v8314_v49 = vcombine.high %v450_v43, %v458_v44  ;;  %v482_v62 = vld [vmem:[%s13188_s1 + $0xe20] sm:$0xff]  ;;  %v491_v1 = vld [vmem:[%s13188_s1 + $0xe68] sm:$0xff] }
 0x15f   :  { %v11017_v27 = vpack.c.bf16 %v3910_v12, %v3894_v11  ;;  %3607 = vmatprep.subr.bf16.mxu0 %v8266_v3  ;;  %v11019_v32 = vpack.c.bf16 %v3912_v21, %v3896_v54  ;;  %3693 = vmatprep.subr.bf16.mxu1 %v8268_v8  ;;  %v8316_v50 = vcombine.high %v451_v45, %v459_v46  ;;  %v498_v6 = vld [vmem:[%s13188_s1 + $0xea0] sm:$0xff]  ;;  %v499_v8 = vld [vmem:[%s13188_s1 + $0xea8] sm:$0xff] }
 0x160   :  { %v11021_v18 = vpack.c.bf16 %v3911_v22, %v3895_v20  ;;  %v11029_v36 = vpack.c.bf16 %v3913_v28, %v3897_v25  ;;  %v8313_v57 = vcombine.low %v450_v43, %v458_v44  ;;  %v8315_v59 = vcombine.low %v451_v45, %v459_v46  ;;  %v507_v9 = vld [vmem:[%s13188_s1 + $0xee8] sm:$0xff]  ;;  %v522_v19 = vld [vmem:[%s13188_s1 + $0xf60] sm:$0xff]  ;;  %v45_v43 = vld [vmem:[%s13188_s1 + $0x78] sm:$0xff] }
 0x161   :  { %v8330_v60 = vcombine.high %v466_v51, %v474_v52  ;;  %v8332_v61 = vcombine.high %v467_v55, %v475_v56  ;;  %v8329_v2 = vcombine.low %v466_v51, %v474_v52  ;;  %v8331_v3 = vcombine.low %v467_v55, %v475_v56  ;;  %v515_v53 = vld [vmem:[%s13188_s1 + $0xf28] sm:$0xff]  ;;  %v530_v28 = vld [vmem:[%s13188_s1 + $0xfa0] sm:$0xff]  ;;  %v61_v51 = vld [vmem:[%s13188_s1 + $0xf8] sm:$0xff] }
 0x162   :  { %3608 = vmatpush1.bf16.msra.mxu0 %v8265_v7  ;;  %3694 = vmatpush1.bf16.msra.mxu1 %v8267_v14  ;;  %v8346_v4 = vcombine.high %v482_v62, %v490_v63  ;;  %v8348_v5 = vcombine.high %v483_v0, %v491_v1  ;;  %v506_v7 = vld [vmem:[%s13188_s1 + $0xee0] sm:$0xff]  ;;  %v8345_v10 = vcombine.low %v482_v62, %v490_v63  ;;  %v523_v54 = vld [vmem:[%s13188_s1 + $0xf68] sm:$0xff]  ;;  %v77_v62 = vld [vmem:[%s13188_s1 + $0x178] sm:$0xff] }
 0x163   :  { %3609 = vmatprep.subr.bf16.mxu0 %v8282_v29  ;;  %3695 = vmatprep.subr.bf16.mxu1 %v8284_v33  ;;  %v8347_v11 = vcombine.low %v483_v0, %v491_v1  ;;  %v8362_v12 = vcombine.high %v498_v6, %v506_v7  ;;  %v8364_v13 = vcombine.high %v499_v8, %v507_v9  ;;  %v514_v14 = vld [vmem:[%s13188_s1 + $0xf20] sm:$0xff]  ;;  %v531_v33 = vld [vmem:[%s13188_s1 + $0xfa8] sm:$0xff] }
 0x164   :  { %v8361_v20 = vcombine.low %v498_v6, %v506_v7  ;;  %v8363_v21 = vcombine.low %v499_v8, %v507_v9  ;;  %v8378_v22 = vcombine.high %v514_v14, %v522_v19  ;;  %v8380_v25 = vcombine.high %v515_v53, %v523_v54  ;;  %v538_v29 = vld [vmem:[%s13188_s1 + $0xfe0] sm:$0xff]  ;;  %v93_v6 = vld [vmem:[%s13188_s1 + $0x1f8] sm:$0xff] }
 0x165   :  { %v8377_v35 = vcombine.low %v514_v14, %v522_v19  ;;  %v8379_v37 = vcombine.low %v515_v53, %v523_v54  ;;  %v8394_v38 = vcombine.high %v530_v28, %v538_v29  ;;  %v8393_v44 = vcombine.low %v530_v28, %v538_v29  ;;  %v116_v54 = vld [vmem:[%s13188_s1 + $0x2b0] sm:$0xff] }
 0x166   :  { %3610 = vmatpush1.bf16.msra.mxu0 %v8281_v39  ;;  %3696 = vmatpush1.bf16.msra.mxu1 %v8283_v40  ;;  %v8396_v39 = vcombine.high %v531_v33, %v539_v34  ;;  %v36_v40 = vld [vmem:[%s13188_s1 + $0x30] sm:$0xff]  ;;  %v8395_v45 = vcombine.low %v531_v33, %v539_v34 }
 0x167   :  { %3611 = vmatprep.subr.bf16.mxu0 %v8298_v41  ;;  %3697 = vmatprep.subr.bf16.mxu1 %v8300_v42  ;;  %v44_v41 = vld [vmem:[%s13188_s1 + $0x70] sm:$0xff]  ;;  %v37_v42 = vld [vmem:[%s13188_s1 + $0x38] sm:$0xff] }
 0x168   :  { %v7902_v46 = vcombine.high %v36_v40, %v44_v41  ;;  %v7901_v52 = vcombine.low %v36_v40, %v44_v41  ;;  %v7903_v55 = vcombine.low %v37_v42, %v45_v43  ;;  %v132_v34 = vld [vmem:[%s13188_s1 + $0x330] sm:$0xff] }
 0x16a   :  { %3612 = vmatpush1.bf16.msra.mxu0 %v8297_v47  ;;  %3698 = vmatpush1.bf16.msra.mxu1 %v8299_v48  ;;  %v7904_v47 = vcombine.high %v37_v42, %v45_v43  ;;  %v52_v48 = vld [vmem:[%s13188_s1 + $0xb0] sm:$0xff] }
 0x16b   :  { %3613 = vmatprep.subr.bf16.mxu0 %v8314_v49  ;;  %3699 = vmatprep.subr.bf16.mxu1 %v8316_v50  ;;  %v60_v49 = vld [vmem:[%s13188_s1 + $0xf0] sm:$0xff]  ;;  %v53_v50 = vld [vmem:[%s13188_s1 + $0xb8] sm:$0xff] }
 0x16c   :  { %v7918_v56 = vcombine.high %v52_v48, %v60_v49  ;;  %v7917_v63 = vcombine.low %v52_v48, %v60_v49  ;;  %v7919_v0 = vcombine.low %v53_v50, %v61_v51  ;;  %v148_v43 = vld [vmem:[%s13188_s1 + $0x3b0] sm:$0xff] }
 0x16e   :  { %3614 = vmatpush1.bf16.msra.mxu0 %v8313_v57  ;;  %3700 = vmatpush1.bf16.msra.mxu1 %v8315_v59  ;;  %v68_v57 = vld [vmem:[%s13188_s1 + $0x130] sm:$0xff] }
 0x16f   :  { %3615 = vmatprep.subr.bf16.mxu0 %v8330_v60  ;;  %3701 = vmatprep.subr.bf16.mxu1 %v8332_v61  ;;  %v76_v59 = vld [vmem:[%s13188_s1 + $0x170] sm:$0xff]  ;;  %v7920_v60 = vcombine.high %v53_v50, %v61_v51  ;;  %v69_v61 = vld [vmem:[%s13188_s1 + $0x138] sm:$0xff] }
 0x170   :  { %v7934_v1 = vcombine.high %v68_v57, %v76_v59  ;;  %v7933_v7 = vcombine.low %v68_v57, %v76_v59  ;;  %v7935_v8 = vcombine.low %v69_v61, %v77_v62  ;;  %v164_v51 = vld [vmem:[%s13188_s1 + $0x430] sm:$0xff]  ;;  %v173_v57 = vld [vmem:[%s13188_s1 + $0x478] sm:$0xff] }
 0x172   :  { %3616 = vmatpush1.bf16.msra.mxu0 %v8329_v2  ;;  %3702 = vmatpush1.bf16.msra.mxu1 %v8331_v3  ;;  %v7936_v2 = vcombine.high %v69_v61, %v77_v62  ;;  %v84_v3 = vld [vmem:[%s13188_s1 + $0x1b0] sm:$0xff] }
 0x173   :  { %3617 = vmatprep.subr.bf16.mxu0 %v8346_v4  ;;  %3703 = vmatprep.subr.bf16.mxu1 %v8348_v5  ;;  %v92_v4 = vld [vmem:[%s13188_s1 + $0x1f0] sm:$0xff]  ;;  %v85_v5 = vld [vmem:[%s13188_s1 + $0x1b8] sm:$0xff] }
 0x174   :  { %v7950_v9 = vcombine.high %v84_v3, %v92_v4  ;;  %v7949_v14 = vcombine.low %v84_v3, %v92_v4  ;;  %v7951_v19 = vcombine.low %v85_v5, %v93_v6  ;;  %v180_v62 = vld [vmem:[%s13188_s1 + $0x4b0] sm:$0xff] }
 0x176   :  { %3618 = vmatpush1.bf16.msra.mxu0 %v8345_v10  ;;  %3704 = vmatpush1.bf16.msra.mxu1 %v8347_v11  ;;  %v100_v10 = vld [vmem:[%s13188_s1 + $0x230] sm:$0xff] }
 0x177   :  { %3619 = vmatprep.subr.bf16.mxu0 %v8362_v12  ;;  %3705 = vmatprep.subr.bf16.mxu1 %v8364_v13  ;;  %v108_v11 = vld [vmem:[%s13188_s1 + $0x270] sm:$0xff]  ;;  %v101_v12 = vld [vmem:[%s13188_s1 + $0x238] sm:$0xff] }
 0x178   :  { %v109_v13 = vld [vmem:[%s13188_s1 + $0x278] sm:$0xff]  ;;  %v7966_v53 = vcombine.high %v100_v10, %v108_v11  ;;  %v7965_v28 = vcombine.low %v100_v10, %v108_v11 }
 0x179   :  { %v7967_v29 = vcombine.low %v101_v12, %v109_v13  ;;  %v205_v10 = vld [vmem:[%s13188_s1 + $0x578] sm:$0xff] }
 0x17a   :  { %3620 = vmatpush1.bf16.msra.mxu0 %v8361_v20  ;;  %3706 = vmatpush1.bf16.msra.mxu1 %v8363_v21  ;;  %v124_v20 = vld [vmem:[%s13188_s1 + $0x2f0] sm:$0xff]  ;;  %v117_v21 = vld [vmem:[%s13188_s1 + $0x2b8] sm:$0xff] }
 0x17b   :  { %3621 = vmatprep.subr.bf16.mxu0 %v8378_v22  ;;  %3707 = vmatprep.subr.bf16.mxu1 %v8380_v25  ;;  %v7968_v22 = vcombine.high %v101_v12, %v109_v13  ;;  %v125_v25 = vld [vmem:[%s13188_s1 + $0x2f8] sm:$0xff]  ;;  %v7982_v33 = vcombine.high %v116_v54, %v124_v20  ;;  %v7981_v40 = vcombine.low %v116_v54, %v124_v20  ;;  %v212_v13 = vld [vmem:[%s13188_s1 + $0x5b0] sm:$0xff] }
 0x17c   :  { %v7983_v41 = vcombine.low %v117_v21, %v125_v25  ;;  %v221_v54 = vld [vmem:[%s13188_s1 + $0x5f8] sm:$0xff] }
 0x17e   :  { %3622 = vmatpush1.bf16.msra.mxu0 %v8377_v35  ;;  %3708 = vmatpush1.bf16.msra.mxu1 %v8379_v37  ;;  %v140_v35 = vld [vmem:[%s13188_s1 + $0x370] sm:$0xff]  ;;  %v133_v37 = vld [vmem:[%s13188_s1 + $0x338] sm:$0xff] }
 0x17f   :  { %3623 = vmatprep.subr.bf16.mxu0 %v8394_v38  ;;  %3709 = vmatprep.subr.bf16.mxu1 %v8396_v39  ;;  %v7984_v38 = vcombine.high %v117_v21, %v125_v25  ;;  %v141_v39 = vld [vmem:[%s13188_s1 + $0x378] sm:$0xff]  ;;  %v7998_v42 = vcombine.high %v132_v34, %v140_v35  ;;  %v7997_v48 = vcombine.low %v132_v34, %v140_v35  ;;  %v228_v25 = vld [vmem:[%s13188_s1 + $0x630] sm:$0xff] }
 0x180   :  { %v7999_v49 = vcombine.low %v133_v37, %v141_v39  ;;  %v237_v34 = vld [vmem:[%s13188_s1 + $0x678] sm:$0xff] }
 0x182   :  { %3624 = vmatpush1.bf16.msra.mxu0 %v8393_v44  ;;  %3710 = vmatpush1.bf16.msra.mxu1 %v8395_v45  ;;  %v156_v44 = vld [vmem:[%s13188_s1 + $0x3f0] sm:$0xff]  ;;  %v149_v45 = vld [vmem:[%s13188_s1 + $0x3b8] sm:$0xff] }
 0x183   :  { %3722 = vmatprep.subr.bf16.mxu0 %v7902_v46  ;;  %3808 = vmatprep.subr.bf16.mxu1 %v7904_v47  ;;  %v8000_v46 = vcombine.high %v133_v37, %v141_v39  ;;  %v157_v47 = vld [vmem:[%s13188_s1 + $0x3f8] sm:$0xff]  ;;  %v8014_v50 = vcombine.high %v148_v43, %v156_v44  ;;  %v8013_v59 = vcombine.low %v148_v43, %v156_v44  ;;  %v244_v39 = vld [vmem:[%s13188_s1 + $0x6b0] sm:$0xff] }
 0x184   :  { %v253_v43 = vld [vmem:[%s13188_s1 + $0x6f8] sm:$0xff] }
 0x185   :  { %3626 = vmatmul.mubr.bf16.vlgmr.msra.gmra.mrb[8].mxu0 %v10312_v26  ;;  %3712 = vmatmul.mubr.bf16.vlgmr.msra.gmra.mrb[8].mxu1 %v10312_v26 }
 0x186   :  { %3723 = vmatpush1.bf16.msra.mxu0 %v7901_v52  ;;  %3809 = vmatpush1.bf16.msra.mxu1 %v7903_v55  ;;  %v172_v52 = vld [vmem:[%s13188_s1 + $0x470] sm:$0xff]  ;;  %v165_v55 = vld [vmem:[%s13188_s1 + $0x438] sm:$0xff] }
 0x187   :  { %3724 = vmatprep.subr.bf16.mxu0 %v7918_v56  ;;  %3810 = vmatprep.subr.bf16.mxu1 %v7920_v60  ;;  %v8016_v56 = vcombine.high %v149_v45, %v157_v47  ;;  %v8015_v60 = vcombine.low %v149_v45, %v157_v47  ;;  %v8030_v61 = vcombine.high %v164_v51, %v172_v52  ;;  %v260_v47 = vld [vmem:[%s13188_s1 + $0x730] sm:$0xff] }
 0x188   :  { %3754 = vmatprep.mubr.bf16.mxu0 %v9972_v58  ;;  %3840 = vmatprep.mubr.bf16.mxu1 %v9972_v58  ;;  %v7952_v58 = vcombine.high %v85_v5, %v93_v6  ;;  %v8029_v3 = vcombine.low %v164_v51, %v172_v52  ;;  %v8031_v4 = vcombine.low %v165_v55, %v173_v57  ;;  %v196_v6 = vld [vmem:[%s13188_s1 + $0x530] sm:$0xff]  ;;  %v269_v51 = vld [vmem:[%s13188_s1 + $0x778] sm:$0xff] }
 0x18a   :  { %3725 = vmatpush1.bf16.msra.mxu0 %v7917_v63  ;;  %3811 = vmatpush1.bf16.msra.mxu1 %v7919_v0  ;;  %v188_v63 = vld [vmem:[%s13188_s1 + $0x4f0] sm:$0xff]  ;;  %v181_v0 = vld [vmem:[%s13188_s1 + $0x4b8] sm:$0xff] }
 0x18b   :  { %3726 = vmatprep.subr.bf16.mxu0 %v7934_v1  ;;  %3812 = vmatprep.subr.bf16.mxu1 %v7936_v2  ;;  %v8032_v1 = vcombine.high %v165_v55, %v173_v57  ;;  %v189_v2 = vld [vmem:[%s13188_s1 + $0x4f8] sm:$0xff]  ;;  %v8046_v5 = vcombine.high %v180_v62, %v188_v63  ;;  %v8045_v11 = vcombine.low %v180_v62, %v188_v63  ;;  %v276_v57 = vld [vmem:[%s13188_s1 + $0x7b0] sm:$0xff] }
 0x18c   :  { %v8047_v12 = vcombine.low %v181_v0, %v189_v2  ;;  %v285_v62 = vld [vmem:[%s13188_s1 + $0x7f8] sm:$0xff] }
 0x18e   :  { %3727 = vmatpush1.bf16.msra.mxu0 %v7933_v7  ;;  %3813 = vmatpush1.bf16.msra.mxu1 %v7935_v8  ;;  %v204_v7 = vld [vmem:[%s13188_s1 + $0x570] sm:$0xff]  ;;  %v197_v8 = vld [vmem:[%s13188_s1 + $0x538] sm:$0xff] }
 0x18f   :  { %3728 = vmatprep.subr.bf16.mxu0 %v7950_v9  ;;  %3814 = vmatprep.subr.bf16.mxu1 %v7952_v58  ;;  %v8048_v9 = vcombine.high %v181_v0, %v189_v2  ;;  %v8062_v58 = vcombine.high %v196_v6, %v204_v7  ;;  %v8061_v20 = vcombine.low %v196_v6, %v204_v7  ;;  %v292_v2 = vld [vmem:[%s13188_s1 + $0x830] sm:$0xff]  ;;  %v301_v6 = vld [vmem:[%s13188_s1 + $0x878] sm:$0xff] }
 0x190   :  { %v8063_v21 = vcombine.low %v197_v8, %v205_v10 }
 0x192   :  { %3729 = vmatpush1.bf16.msra.mxu0 %v7949_v14  ;;  %3815 = vmatpush1.bf16.msra.mxu1 %v7951_v19  ;;  %v220_v14 = vld [vmem:[%s13188_s1 + $0x5f0] sm:$0xff]  ;;  %v213_v19 = vld [vmem:[%s13188_s1 + $0x5b8] sm:$0xff] }
 0x193   :  { %3730 = vmatprep.subr.bf16.mxu0 %v7966_v53  ;;  %3816 = vmatprep.subr.bf16.mxu1 %v7968_v22  ;;  %v8064_v53 = vcombine.high %v197_v8, %v205_v10  ;;  %v8078_v22 = vcombine.high %v212_v13, %v220_v14  ;;  %v8077_v35 = vcombine.low %v212_v13, %v220_v14  ;;  %v308_v10 = vld [vmem:[%s13188_s1 + $0x8b0] sm:$0xff]  ;;  %v317_v13 = vld [vmem:[%s13188_s1 + $0x8f8] sm:$0xff] }
 0x194   :  { %v8079_v37 = vcombine.low %v213_v19, %v221_v54 }
 0x196   :  { %3731 = vmatpush1.bf16.msra.mxu0 %v7965_v28  ;;  %3817 = vmatpush1.bf16.msra.mxu1 %v7967_v29  ;;  %v236_v28 = vld [vmem:[%s13188_s1 + $0x670] sm:$0xff]  ;;  %v229_v29 = vld [vmem:[%s13188_s1 + $0x638] sm:$0xff] }
 0x197   :  { %3732 = vmatprep.subr.bf16.mxu0 %v7982_v33  ;;  %3818 = vmatprep.subr.bf16.mxu1 %v7984_v38  ;;  %v8080_v33 = vcombine.high %v213_v19, %v221_v54  ;;  %v8094_v38 = vcombine.high %v228_v25, %v236_v28  ;;  %v8093_v44 = vcombine.low %v228_v25, %v236_v28  ;;  %v324_v19 = vld [vmem:[%s13188_s1 + $0x930] sm:$0xff]  ;;  %v333_v25 = vld [vmem:[%s13188_s1 + $0x978] sm:$0xff] }
 0x198   :  { %v8095_v45 = vcombine.low %v229_v29, %v237_v34 }
 0x19a   :  { %3733 = vmatpush1.bf16.msra.mxu0 %v7981_v40  ;;  %3819 = vmatpush1.bf16.msra.mxu1 %v7983_v41  ;;  %v252_v40 = vld [vmem:[%s13188_s1 + $0x6f0] sm:$0xff]  ;;  %v245_v41 = vld [vmem:[%s13188_s1 + $0x6b8] sm:$0xff] }
 0x19b   :  { %3734 = vmatprep.subr.bf16.mxu0 %v7998_v42  ;;  %3820 = vmatprep.subr.bf16.mxu1 %v8000_v46  ;;  %v8096_v42 = vcombine.high %v229_v29, %v237_v34  ;;  %v8110_v46 = vcombine.high %v244_v39, %v252_v40  ;;  %v8109_v52 = vcombine.low %v244_v39, %v252_v40 }
 0x19c   :  { %v8111_v55 = vcombine.low %v245_v41, %v253_v43 }
 0x19e   :  { %3735 = vmatpush1.bf16.msra.mxu0 %v7997_v48  ;;  %3821 = vmatpush1.bf16.msra.mxu1 %v7999_v49  ;;  %v268_v48 = vld [vmem:[%s13188_s1 + $0x770] sm:$0xff]  ;;  %v261_v49 = vld [vmem:[%s13188_s1 + $0x738] sm:$0xff] }
 0x19f   :  { %3736 = vmatprep.subr.bf16.mxu0 %v8014_v50  ;;  %3822 = vmatprep.subr.bf16.mxu1 %v8016_v56  ;;  %v8112_v50 = vcombine.high %v245_v41, %v253_v43  ;;  %v8126_v56 = vcombine.high %v260_v47, %v268_v48  ;;  %v8125_v63 = vcombine.low %v260_v47, %v268_v48  ;;  %v364_v43 = vld [vmem:[%s13188_s1 + $0xa70] sm:$0xff] }
 0x1a0   :  { %v8127_v0 = vcombine.low %v261_v49, %v269_v51 }
 0x1a2   :  { %3737 = vmatpush1.bf16.msra.mxu0 %v8013_v59  ;;  %3823 = vmatpush1.bf16.msra.mxu1 %v8015_v60  ;;  %v284_v59 = vld [vmem:[%s13188_s1 + $0x7f0] sm:$0xff]  ;;  %v277_v60 = vld [vmem:[%s13188_s1 + $0x7b8] sm:$0xff] }
 0x1a3   :  { %3738 = vmatprep.subr.bf16.mxu0 %v8030_v61  ;;  %3824 = vmatprep.subr.bf16.mxu1 %v8032_v1  ;;  %v8128_v61 = vcombine.high %v261_v49, %v269_v51  ;;  %v8142_v1 = vcombine.high %v276_v57, %v284_v59  ;;  %v8141_v7 = vcombine.low %v276_v57, %v284_v59  ;;  %v372_v49 = vld [vmem:[%s13188_s1 + $0xab0] sm:$0xff]  ;;  %v373_v51 = vld [vmem:[%s13188_s1 + $0xab8] sm:$0xff]  ;;  %v572_v59 = vsub.s32 6, %v10948_v16 }
 0x1a4   :  { %v8143_v8 = vcombine.low %v277_v60, %v285_v62 }
 0x1a6   :  { %3739 = vmatpush1.bf16.msra.mxu0 %v8029_v3  ;;  %3825 = vmatpush1.bf16.msra.mxu1 %v8031_v4  ;;  %v300_v3 = vld [vmem:[%s13188_s1 + $0x870] sm:$0xff]  ;;  %v293_v4 = vld [vmem:[%s13188_s1 + $0x838] sm:$0xff] }
 0x1a7   :  { %3740 = vmatprep.subr.bf16.mxu0 %v8046_v5  ;;  %3826 = vmatprep.subr.bf16.mxu1 %v8048_v9  ;;  %v8144_v5 = vcombine.high %v277_v60, %v285_v62  ;;  %v8158_v9 = vcombine.high %v292_v2, %v300_v3  ;;  %v8157_v14 = vcombine.low %v292_v2, %v300_v3  ;;  %v568_v60 = vsub.s32 5, %v10948_v16  ;;  %v11394_v2 = vld [vmem:[%s13188_s1 + $0xb38] sm:$0xff] }
 0x1a8   :  { %v8159_v54 = vcombine.low %v293_v4, %v301_v6  ;;  %v576_v62 = vsub.s32 7, %v10948_v16 }
 0x1aa   :  { %3741 = vmatpush1.bf16.msra.mxu0 %v8045_v11  ;;  %3827 = vmatpush1.bf16.msra.mxu1 %v8047_v12  ;;  %v316_v11 = vld [vmem:[%s13188_s1 + $0x8f0] sm:$0xff]  ;;  %v309_v12 = vld [vmem:[%s13188_s1 + $0x8b8] sm:$0xff] }
 0x1ab   :  { %3742 = vmatprep.subr.bf16.mxu0 %v8062_v58  ;;  %3828 = vmatprep.subr.bf16.mxu1 %v8064_v53  ;;  %v8160_v58 = vcombine.high %v293_v4, %v301_v6  ;;  %v332_v53 = vld [vmem:[%s13188_s1 + $0x970] sm:$0xff]  ;;  %v8173_v28 = vcombine.low %v308_v10, %v316_v11  ;;  %v8175_v29 = vcombine.low %v309_v12, %v317_v13  ;;  %v397_v4 = vld [vmem:[%s13188_s1 + $0xb78] sm:$0xff] }
 0x1ac   :  { %v8189_v39 = vcombine.low %v324_v19, %v332_v53 }
 0x1ae   :  { %3743 = vmatpush1.bf16.msra.mxu0 %v8061_v20  ;;  %3829 = vmatpush1.bf16.msra.mxu1 %v8063_v21  ;;  %v8174_v20 = vcombine.high %v308_v10, %v316_v11  ;;  %v8176_v21 = vcombine.high %v309_v12, %v317_v13  ;;  %v11411_v10 = vld [vmem:[%s13188_s1 + $0xbb0] sm:$0xff] }
 0x1af   :  { %3744 = vmatprep.subr.bf16.mxu0 %v8078_v22  ;;  %3830 = vmatprep.subr.bf16.mxu1 %v8080_v33  ;;  %v325_v22 = vld [vmem:[%s13188_s1 + $0x938] sm:$0xff]  ;;  %v8190_v33 = vcombine.high %v324_v19, %v332_v53  ;;  %v412_v13 = vld [vmem:[%s13188_s1 + $0xbf0] sm:$0xff]  ;;  %v8256_v19 = vcombine.high %v11394_v2, %v397_v4 }
 0x1b0   :  { %v8192_v34 = vcombine.high %v325_v22, %v333_v25  ;;  %v8191_v40 = vcombine.low %v325_v22, %v333_v25  ;;  %v413_v22 = vld [vmem:[%s13188_s1 + $0xbf8] sm:$0xff] }
 0x1b2   :  { %3745 = vmatpush1.bf16.msra.mxu0 %v8077_v35  ;;  %3831 = vmatpush1.bf16.msra.mxu1 %v8079_v37  ;;  %v340_v35 = vld [vmem:[%s13188_s1 + $0x9b0] sm:$0xff] }
 0x1b3   :  { %3746 = vmatprep.subr.bf16.mxu0 %v8094_v38  ;;  %3832 = vmatprep.subr.bf16.mxu1 %v8096_v42  ;;  %v348_v37 = vld [vmem:[%s13188_s1 + $0x9f0] sm:$0xff]  ;;  %v341_v38 = vld [vmem:[%s13188_s1 + $0x9b8] sm:$0xff] }
 0x1b4   :  { %v8206_v41 = vcombine.high %v340_v35, %v348_v37  ;;  %v356_v42 = vld [vmem:[%s13188_s1 + $0xa30] sm:$0xff] }
 0x1b5   :  { %v8222_v48 = vcombine.high %v356_v42, %v364_v43  ;;  %v8221_v57 = vcombine.low %v356_v42, %v364_v43  ;;  %v8270_v42 = vcombine.high %v11411_v10, %v412_v13 }
 0x1b6   :  { %3747 = vmatpush1.bf16.msra.mxu0 %v8093_v44  ;;  %3833 = vmatpush1.bf16.msra.mxu1 %v8095_v45  ;;  %v357_v44 = vld [vmem:[%s13188_s1 + $0xa38] sm:$0xff] }
 0x1b7   :  { %3748 = vmatprep.subr.bf16.mxu0 %v8110_v46  ;;  %3834 = vmatprep.subr.bf16.mxu1 %v8112_v50  ;;  %v365_v45 = vld [vmem:[%s13188_s1 + $0xa78] sm:$0xff]  ;;  %v8205_v46 = vcombine.low %v340_v35, %v348_v37  ;;  %v380_v50 = vld [vmem:[%s13188_s1 + $0xaf0] sm:$0xff]  ;;  %v8255_v35 = vcombine.low %v11394_v2, %v397_v4 }
 0x1b8   :  { %v420_v37 = vld [vmem:[%s13188_s1 + $0xc30] sm:$0xff] }
 0x1ba   :  { %3749 = vmatpush1.bf16.msra.mxu0 %v8109_v52  ;;  %3835 = vmatpush1.bf16.msra.mxu1 %v8111_v55  ;;  %v8224_v52 = vcombine.high %v357_v44, %v365_v45  ;;  %v381_v55 = vld [vmem:[%s13188_s1 + $0xaf8] sm:$0xff] }
 0x1bb   :  { %3750 = vmatprep.subr.bf16.mxu0 %v8126_v56  ;;  %3836 = vmatprep.subr.bf16.mxu1 %v8128_v61  ;;  %v564_v56 = vsub.s32 4, %v10948_v16  ;;  %v8223_v61 = vcombine.low %v357_v44, %v365_v45  ;;  %v8240_v3 = vcombine.high %v373_v51, %v381_v55  ;;  %v8239_v12 = vcombine.low %v373_v51, %v381_v55  ;;  %v421_v51 = vld [vmem:[%s13188_s1 + $0xc38] sm:$0xff] }
 0x1bc   :  { %v8269_v45 = vcombine.low %v11411_v10, %v412_v13  ;;  %v437_v10 = vld [vmem:[%s13188_s1 + $0xcb8] sm:$0xff] }
 0x1be   :  { %3751 = vmatpush1.bf16.msra.mxu0 %v8125_v63  ;;  %3837 = vmatpush1.bf16.msra.mxu1 %v8127_v0  ;;  %v8238_v63 = vcombine.high %v372_v49, %v380_v50  ;;  %v388_v0 = vld [vmem:[%s13188_s1 + $0xb30] sm:$0xff] }
 0x1bf   :  { %3752 = vmatprep.subr.bf16.mxu0 %v8142_v1  ;;  %3838 = vmatprep.subr.bf16.mxu1 %v8144_v5  ;;  %v396_v1 = vld [vmem:[%s13188_s1 + $0xb70] sm:$0xff]  ;;  %v9825_v5 = vld [vmem:[%s13190_s2] sm:$0xff] }
 0x1c0   :  { %v565_v6 = vrot.slane %v9825_v5, %v564_v56  ;;  %v577_v11 = vrot.slane %v9825_v5, %v576_v62 }
 0x1c2   :  { %3753 = vmatpush1.bf16.msra.mxu0 %v8141_v7  ;;  %3839 = vmatpush1.bf16.msra.mxu1 %v8143_v8  ;;  %v573_v7 = vrot.slane %v9825_v5, %v572_v59  ;;  %v569_v8 = vrot.slane %v9825_v5, %v568_v60 }
 0x1c3   :  { %3765 = vmatprep.subr.bf16.mxu0 %v8158_v9  ;;  %3851 = vmatprep.subr.bf16.mxu1 %v8160_v58  ;;  %v8237_v9 = vcombine.low %v372_v49, %v380_v50  ;;  %v8254_v58 = vcombine.high %v388_v0, %v396_v1 }
 0x1c5   :  { %3755 = vmatmul.mubr.bf16.vlgmr.msra.gmra.mrb[12].mxu0 %v10101_v15  ;;  %3841 = vmatmul.mubr.bf16.vlgmr.msra.gmra.mrb[12].mxu1 %v10101_v15  ;;  %v349_v15 = vld [vmem:[%s13188_s1 + $0x9f8] sm:$0xff] }
 0x1c6   :  { %3766 = vmatpush1.bf16.msra.mxu0 %v8157_v14  ;;  %3852 = vmatpush1.bf16.msra.mxu1 %v8159_v54  ;;  %v8207_v47 = vcombine.low %v341_v38, %v349_v15 }
 0x1c7   :  { %3767 = vmatprep.subr.bf16.mxu0 %v8174_v20  ;;  %3853 = vmatprep.subr.bf16.mxu1 %v8176_v21  ;;  %v405_v21 = vld [vmem:[%s13188_s1 + $0xbb8] sm:$0xff] }
 0x1c8   :  { %3797 = vmatprep.mubr.bf16.mxu0 %v10124_v23  ;;  %3883 = vmatprep.mubr.bf16.mxu1 %v10124_v23  ;;  %v8208_v23 = vcombine.high %v341_v38, %v349_v15  ;;  %v428_v38 = vld [vmem:[%s13188_s1 + $0xc70] sm:$0xff]  ;;  %v8271_v50 = vcombine.low %v405_v21, %v413_v22 }
 0x1c9   :  { %v8286_v5 = vcombine.high %v420_v37, %v428_v38 }
 0x1ca   :  { %3768 = vmatpush1.bf16.msra.mxu0 %v8173_v28  ;;  %3854 = vmatpush1.bf16.msra.mxu1 %v8175_v29 }
 0x1cb   :  { %3769 = vmatprep.subr.bf16.mxu0 %v8190_v33  ;;  %3855 = vmatprep.subr.bf16.mxu1 %v8192_v34  ;;  %v8253_v34 = vcombine.low %v388_v0, %v396_v1  ;;  %v436_v0 = vld [vmem:[%s13188_s1 + $0xcb0] sm:$0xff] }
 0x1cc   :  { %v444_v1 = vld [vmem:[%s13188_s1 + $0xcf0] sm:$0xff] }
 0x1cd   :  { %v8302_v13 = vcombine.high %v436_v0, %v444_v1 }
 0x1ce   :  { %3770 = vmatpush1.bf16.msra.mxu0 %v8189_v39  ;;  %3856 = vmatpush1.bf16.msra.mxu1 %v8191_v40 }
 0x1cf   :  { %3771 = vmatprep.subr.bf16.mxu0 %v8206_v41  ;;  %3857 = vmatprep.subr.bf16.mxu1 %v8208_v23 }
 0x1d2   :  { %3772 = vmatpush1.bf16.msra.mxu0 %v8205_v46  ;;  %3858 = vmatpush1.bf16.msra.mxu1 %v8207_v47  ;;  %v8272_v46 = vcombine.high %v405_v21, %v413_v22  ;;  %v8301_v21 = vcombine.low %v436_v0, %v444_v1  ;;  %v525_v1 = vld [vmem:[%s13188_s1 + $0xf78] sm:$0xff] }
 0x1d3   :  { %3773 = vmatprep.subr.bf16.mxu0 %v8222_v48  ;;  %3859 = vmatprep.subr.bf16.mxu1 %v8224_v52  ;;  %v429_v52 = vld [vmem:[%s13188_s1 + $0xc78] sm:$0xff] }
 0x1d6   :  { %3774 = vmatpush1.bf16.msra.mxu0 %v8221_v57  ;;  %3860 = vmatpush1.bf16.msra.mxu1 %v8223_v61 }
 0x1d7   :  { %3775 = vmatprep.subr.bf16.mxu0 %v8238_v63  ;;  %3861 = vmatprep.subr.bf16.mxu1 %v8240_v3 }
 0x1d8   :  { %v3455_v14 = vpop.f32.mrb[4].mxu0  ;;  %v3541_v54 = vpop.f32.mrb[4].mxu1 }
 0x1d9   :  { %v8929_v53 = vadd.f32 %v3455_v14, %v565_v6  ;;  %v3457_v20 = vpop.f32.mrb[5].mxu0  ;;  %v8933_v25 = vadd.f32 %v3541_v54, %v573_v7  ;;  %v3543_v29 = vpop.f32.mrb[5].mxu1  ;;  %v452_v14 = vld [vmem:[%s13188_s1 + $0xd30] sm:$0xff] }
 0x1da   :  { %v8930_v28 = vadd.f32 %v3457_v20, %v569_v8  ;;  %v3459_v33 = vpop.f32.mrb[6].mxu0  ;;  %3776 = vmatpush1.bf16.msra.mxu0 %v8237_v9  ;;  %v8934_v15 = vadd.f32 %v3543_v29, %v577_v11  ;;  %v3545_v40 = vpop.f32.mrb[6].mxu1  ;;  %3862 = vmatpush1.bf16.msra.mxu1 %v8239_v12  ;;  %v8285_v12 = vcombine.low %v420_v37, %v428_v38  ;;  %v461_v20 = vld [vmem:[%s13188_s1 + $0xd78] sm:$0xff]  ;;  %v476_v29 = vld [vmem:[%s13188_s1 + $0xdf0] sm:$0xff] }
 0x1db   :  { %v8931_v39 = vadd.f32 %v3459_v33, %v565_v6  ;;  %v3461_v41 = vpop.f32.mrb[7].mxu0  ;;  %3777 = vmatprep.subr.bf16.mxu0 %v8254_v58  ;;  %v8935_v43 = vadd.f32 %v3545_v40, %v573_v7  ;;  %v3547_v23 = vpop.f32.mrb[7].mxu1  ;;  %3863 = vmatprep.subr.bf16.mxu1 %v8256_v19  ;;  %v3898_v47 = vmax.f32 %v8929_v53, 0.0  ;;  %v3900_v55 = vmax.f32 %v8933_v25, 0.0  ;;  %v460_v19 = vld [vmem:[%s13188_s1 + $0xd70] sm:$0xff]  ;;  %v453_v53 = vld [vmem:[%s13188_s1 + $0xd38] sm:$0xff] }
 0x1dc   :  { %v8932_v44 = vadd.f32 %v3461_v41, %v569_v8  ;;  %v8936_v49 = vadd.f32 %v3547_v23, %v577_v11  ;;  %v3899_v57 = vmax.f32 %v8930_v28, 0.0  ;;  %v3901_v2 = vmax.f32 %v8934_v15, 0.0  ;;  %v445_v11 = vld [vmem:[%s13188_s1 + $0xcf8] sm:$0xff]  ;;  %v468_v28 = vld [vmem:[%s13188_s1 + $0xdb0] sm:$0xff] }
 0x1dd   :  { %v3914_v48 = vmax.f32 %v8931_v39, 0.0  ;;  %v3916_v61 = vmax.f32 %v8935_v43, 0.0  ;;  %v8288_v8 = vcombine.high %v421_v51, %v429_v52  ;;  %v8287_v58 = vcombine.low %v421_v51, %v429_v52  ;;  %v469_v33 = vld [vmem:[%s13188_s1 + $0xdb8] sm:$0xff]  ;;  %v484_v39 = vld [vmem:[%s13188_s1 + $0xe30] sm:$0xff] }
 0x1de   :  { %v3915_v63 = vmax.f32 %v8932_v44, 0.0  ;;  %3778 = vmatpush1.bf16.msra.mxu0 %v8253_v34  ;;  %v3917_v4 = vmax.f32 %v8936_v49, 0.0  ;;  %3864 = vmatpush1.bf16.msra.mxu1 %v8255_v35  ;;  %v8304_v54 = vcombine.high %v437_v10, %v445_v11  ;;  %v8303_v22 = vcombine.low %v437_v10, %v445_v11  ;;  %v477_v35 = vld [vmem:[%s13188_s1 + $0xdf8] sm:$0xff]  ;;  %v492_v40 = vld [vmem:[%s13188_s1 + $0xe70] sm:$0xff] }
 0x1df   :  { %v11446_v3 = vpack.c.bf16 %v3914_v48, %v3898_v47  ;;  %3779 = vmatprep.subr.bf16.mxu0 %v8270_v42  ;;  %v11448_v6 = vpack.c.bf16 %v3916_v61, %v3900_v55  ;;  %3865 = vmatprep.subr.bf16.mxu1 %v8272_v46  ;;  %v8318_v25 = vcombine.high %v452_v14, %v460_v19  ;;  %v485_v41 = vld [vmem:[%s13188_s1 + $0xe38] sm:$0xff]  ;;  %v500_v46 = vld [vmem:[%s13188_s1 + $0xeb0] sm:$0xff] }
 0x1e0   :  { %v11450_v7 = vpack.c.bf16 %v3915_v63, %v3899_v57  ;;  %v11452_v9 = vpack.c.bf16 %v3917_v4, %v3901_v2  ;;  %v8320_v34 = vcombine.high %v453_v53, %v461_v20  ;;  %v8317_v37 = vcombine.low %v452_v14, %v460_v19  ;;  %v493_v43 = vld [vmem:[%s13188_s1 + $0xe78] sm:$0xff]  ;;  %v508_v47 = vld [vmem:[%s13188_s1 + $0xef0] sm:$0xff] }
 0x1e1   :  { %v8319_v38 = vcombine.low %v453_v53, %v461_v20  ;;  %v8334_v15 = vcombine.high %v468_v28, %v476_v29  ;;  %v8336_v42 = vcombine.high %v469_v33, %v477_v35  ;;  %v8333_v44 = vcombine.low %v468_v28, %v476_v29  ;;  %v501_v48 = vld [vmem:[%s13188_s1 + $0xeb8] sm:$0xff]  ;;  %v516_v57 = vld [vmem:[%s13188_s1 + $0xf30] sm:$0xff] }
 0x1e2   :  { %3780 = vmatpush1.bf16.msra.mxu0 %v8269_v45  ;;  %3866 = vmatpush1.bf16.msra.mxu1 %v8271_v50  ;;  %v8335_v23 = vcombine.low %v469_v33, %v477_v35  ;;  %v8350_v45 = vcombine.high %v484_v39, %v492_v40  ;;  %v8352_v49 = vcombine.high %v485_v41, %v493_v43  ;;  %v509_v50 = vld [vmem:[%s13188_s1 + $0xef8] sm:$0xff]  ;;  %v524_v61 = vld [vmem:[%s13188_s1 + $0xf70] sm:$0xff] }
 0x1e3   :  { %3781 = vmatprep.subr.bf16.mxu0 %v8286_v5  ;;  %3867 = vmatprep.subr.bf16.mxu1 %v8288_v8  ;;  %v8349_v51 = vcombine.low %v484_v39, %v492_v40  ;;  %v8351_v52 = vcombine.low %v485_v41, %v493_v43  ;;  %v8366_v55 = vcombine.high %v500_v46, %v508_v47  ;;  %v517_v63 = vld [vmem:[%s13188_s1 + $0xf38] sm:$0xff]  ;;  %v532_v8 = vld [vmem:[%s13188_s1 + $0xfb0] sm:$0xff] }
 0x1e4   :  { %v8368_v0 = vcombine.high %v501_v48, %v509_v50  ;;  %v8365_v2 = vcombine.low %v500_v46, %v508_v47  ;;  %v8367_v4 = vcombine.low %v501_v48, %v509_v50  ;;  %v8382_v5 = vcombine.high %v516_v57, %v524_v61  ;;  %v540_v10 = vld [vmem:[%s13188_s1 + $0xff0] sm:$0xff]  ;;  %v533_v11 = vld [vmem:[%s13188_s1 + $0xfb8] sm:$0xff] }
 0x1e5   :  { %v8383_v14 = vcombine.low %v517_v63, %v525_v1  ;;  %v8398_v19 = vcombine.high %v532_v8, %v540_v10  ;;  %v9056_v28 = vld [vmem:[%s13191_s3 + $0x8] ss:$16 sps:$4 sm:$0xff]   ;;  %v9061_v29 = vld [vmem:[%s13191_s3 + $0x24] ss:$16 sps:$4 sm:$0xff]   ;;  %v9059_v33 = vld [vmem:[%s13191_s3 + $0x20] ss:$16 sps:$4 sm:$0xff]  }
 0x1e6   :  { %3782 = vmatpush1.bf16.msra.mxu0 %v8285_v12  ;;  %3868 = vmatpush1.bf16.msra.mxu1 %v8287_v58  ;;  %v8384_v12 = vcombine.high %v517_v63, %v525_v1  ;;  %v541_v58 = vld [vmem:[%s13188_s1 + $0xff8] sm:$0xff]  ;;  %v9071_v39 = vld [vmem:[%s13191_s3 + $0x60] ss:$16 sps:$4 sm:$0xff]  }
 0x1e7   :  { %3783 = vmatprep.subr.bf16.mxu0 %v8302_v13  ;;  %3869 = vmatprep.subr.bf16.mxu1 %v8304_v54  ;;  %v8381_v13 = vcombine.low %v516_v57, %v524_v61  ;;  %v8400_v53 = vcombine.high %v533_v11, %v541_v58  ;;  %v8397_v54 = vcombine.low %v532_v8, %v540_v10  ;;  %v9064_v35 = vld [vmem:[%s13191_s3 + $0x2c] ss:$16 sps:$4 sm:$0xff]   ;;  %v9074_v41 = vld [vmem:[%s13191_s3 + $0x68] ss:$16 sps:$4 sm:$0xff]   ;;  %v9077_v43 = vld [vmem:[%s13191_s3 + $0x80] ss:$16 sps:$4 sm:$0xff]  }
 0x1e8   :  { %v8399_v20 = vcombine.low %v533_v11, %v541_v58  ;;  %v9076_v40 = vld [vmem:[%s13191_s3 + $0x6c] ss:$16 sps:$4 sm:$0xff]   ;;  %v9083_v46 = vld [vmem:[%s13191_s3 + $0xa0] ss:$16 sps:$4 sm:$0xff]   ;;  %v9086_v48 = vld [vmem:[%s13191_s3 + $0xa8] ss:$16 sps:$4 sm:$0xff]  }
 0x1e9   :  { %v9088_v47 = vld [vmem:[%s13191_s3 + $0xac] ss:$16 sps:$4 sm:$0xff]   ;;  %v9089_v50 = vld [vmem:[%s13191_s3 + $0xc0] ss:$16 sps:$4 sm:$0xff]   ;;  %v9098_v63 = vld [vmem:[%s13191_s3 + $0xe8] ss:$16 sps:$4 sm:$0xff]  }
 0x1ea   :  { %3784 = vmatpush1.bf16.msra.mxu0 %v8301_v21  ;;  %3870 = vmatpush1.bf16.msra.mxu1 %v8303_v22  ;;  %v9055_v21 = vld [vmem:[%s13191_s3 + $0x4] ss:$16 sps:$4 sm:$0xff]   ;;  %v9053_v22 = vld [vmem:[%s13191_s3] ss:$16 sps:$4 sm:$0xff]   ;;  %v9100_v61 = vld [vmem:[%s13191_s3 + $0xec] ss:$16 sps:$4 sm:$0xff]  }
 0x1eb   :  { %3785 = vmatprep.subr.bf16.mxu0 %v8318_v25  ;;  %3871 = vmatprep.subr.bf16.mxu1 %v8320_v34  ;;  %v9058_v25 = vld [vmem:[%s13191_s3 + $0xc] ss:$16 sps:$4 sm:$0xff]   ;;  %v9062_v34 = vld [vmem:[%s13191_s3 + $0x28] ss:$16 sps:$4 sm:$0xff]   ;;  %v9095_v57 = vld [vmem:[%s13191_s3 + $0xe0] ss:$16 sps:$4 sm:$0xff]  }
 0x1ec   :  { %v9101_v1 = vld [vmem:[%s13191_s3 + $0x100] ss:$16 sps:$4 sm:$0xff]   ;;  %v9112_v10 = vld [vmem:[%s13191_s3 + $0x12c] ss:$16 sps:$4 sm:$0xff]   ;;  %v9110_v11 = vld [vmem:[%s13191_s3 + $0x128] ss:$16 sps:$4 sm:$0xff]  }
 0x1ed   :  { %v9107_v8 = vld [vmem:[%s13191_s3 + $0x120] ss:$16 sps:$4 sm:$0xff]  }
 0x1ee   :  { %3786 = vmatpush1.bf16.msra.mxu0 %v8317_v37  ;;  %3872 = vmatpush1.bf16.msra.mxu1 %v8319_v38  ;;  %v9067_v37 = vld [vmem:[%s13191_s3 + $0x44] ss:$16 sps:$4 sm:$0xff]   ;;  %v9070_v38 = vld [vmem:[%s13191_s3 + $0x4c] ss:$16 sps:$4 sm:$0xff]   ;;  %v9113_v58 = vld [vmem:[%s13191_s3 + $0x140] ss:$16 sps:$4 sm:$0xff]  }
 0x1ef   :  { %3787 = vmatprep.subr.bf16.mxu0 %v8334_v15  ;;  %3873 = vmatprep.subr.bf16.mxu1 %v8336_v42  ;;  %v9068_v15 = vld [vmem:[%s13191_s3 + $0x48] ss:$16 sps:$4 sm:$0xff]   ;;  %v9079_v42 = vld [vmem:[%s13191_s3 + $0x84] ss:$16 sps:$4 sm:$0xff]  }
 0x1f2   :  { %3788 = vmatpush1.bf16.msra.mxu0 %v8333_v44  ;;  %3874 = vmatpush1.bf16.msra.mxu1 %v8335_v23  ;;  %v9082_v44 = vld [vmem:[%s13191_s3 + $0x8c] ss:$16 sps:$4 sm:$0xff]   ;;  %v9080_v23 = vld [vmem:[%s13191_s3 + $0x88] ss:$16 sps:$4 sm:$0xff]  }
 0x1f3   :  { %3789 = vmatprep.subr.bf16.mxu0 %v8350_v45  ;;  %3875 = vmatprep.subr.bf16.mxu1 %v8352_v49  ;;  %v9085_v45 = vld [vmem:[%s13191_s3 + $0xa4] ss:$16 sps:$4 sm:$0xff]  }
 0x1f4   :  { %v9091_v49 = vld [vmem:[%s13191_s3 + $0xc4] ss:$16 sps:$4 sm:$0xff]  }
 0x1f6   :  { %3790 = vmatpush1.bf16.msra.mxu0 %v8349_v51  ;;  %3876 = vmatpush1.bf16.msra.mxu1 %v8351_v52  ;;  %v9094_v51 = vld [vmem:[%s13191_s3 + $0xcc] ss:$16 sps:$4 sm:$0xff]   ;;  %v9092_v52 = vld [vmem:[%s13191_s3 + $0xc8] ss:$16 sps:$4 sm:$0xff]  }
 0x1f7   :  { %3791 = vmatprep.subr.bf16.mxu0 %v8366_v55  ;;  %3877 = vmatprep.subr.bf16.mxu1 %v8368_v0  ;;  %v9097_v55 = vld [vmem:[%s13191_s3 + $0xe4] ss:$16 sps:$4 sm:$0xff]  }
 0x1f8   :  { %v9103_v0 = vld [vmem:[%s13191_s3 + $0x104] ss:$16 sps:$4 sm:$0xff]  }
 0x1fa   :  { %3792 = vmatpush1.bf16.msra.mxu0 %v8365_v2  ;;  %3878 = vmatpush1.bf16.msra.mxu1 %v8367_v4  ;;  %v9106_v2 = vld [vmem:[%s13191_s3 + $0x10c] ss:$16 sps:$4 sm:$0xff]   ;;  %v9104_v4 = vld [vmem:[%s13191_s3 + $0x108] ss:$16 sps:$4 sm:$0xff]  }
 0x1fb   :  { %3793 = vmatprep.subr.bf16.mxu0 %v8382_v5  ;;  %3879 = vmatprep.subr.bf16.mxu1 %v8384_v12  ;;  %v9109_v5 = vld [vmem:[%s13191_s3 + $0x124] ss:$16 sps:$4 sm:$0xff]  }
 0x1fc   :  { %v9115_v12 = vld [vmem:[%s13191_s3 + $0x144] ss:$16 sps:$4 sm:$0xff]  }
 0x1fe   :  { %3794 = vmatpush1.bf16.msra.mxu0 %v8381_v13  ;;  %3880 = vmatpush1.bf16.msra.mxu1 %v8383_v14  ;;  %v9118_v13 = vld [vmem:[%s13191_s3 + $0x14c] ss:$16 sps:$4 sm:$0xff]   ;;  %v9116_v14 = vld [vmem:[%s13191_s3 + $0x148] ss:$16 sps:$4 sm:$0xff]  }
 0x1ff   :  { %3795 = vmatprep.subr.bf16.mxu0 %v8398_v19  ;;  %3881 = vmatprep.subr.bf16.mxu1 %v8400_v53  ;;  %v9121_v19 = vld [vmem:[%s13191_s3 + $0x164] ss:$16 sps:$4 sm:$0xff]   ;;  %v9119_v53 = vld [vmem:[%s13191_s3 + $0x160] ss:$16 sps:$4 sm:$0xff]  }
 0x202   :  { %3796 = vmatpush1.bf16.msra.mxu0 %v8397_v54  ;;  %3882 = vmatpush1.bf16.msra.mxu1 %v8399_v20  ;;  %v9124_v54 = vld [vmem:[%s13191_s3 + $0x16c] ss:$16 sps:$4 sm:$0xff]   ;;  %v9122_v20 = vld [vmem:[%s13191_s3 + $0x168] ss:$16 sps:$4 sm:$0xff]  }
 0x203   :  { %7036 = vmatprep.subr.bf16.mxu0 %v9055_v21  ;;  %7380 = vmatprep.subr.bf16.mxu1 %v9058_v25  ;;  %v9127_v21 = vld [vmem:[%s13191_s3 + $0x184] ss:$16 sps:$4 sm:$0xff]   ;;  %v9130_v25 = vld [vmem:[%s13191_s3 + $0x18c] ss:$16 sps:$4 sm:$0xff]  }
 0x205   :  { %3798 = vmatmul.mubr.bf16.vlgmr.msra.gmra.mrb[12].mxu0 %v10312_v26  ;;  %3884 = vmatmul.mubr.bf16.vlgmr.msra.gmra.mrb[12].mxu1 %v10312_v26  ;;  %v9065_v26 = vld [vmem:[%s13191_s3 + $0x40] ss:$16 sps:$4 sm:$0xff]  }
 0x206   :  { %7037 = vmatpush1.bf16.msra.mxu0 %v9053_v22  ;;  %7068 = vmatprep.mubr.bf16.mxu0 %v11021_v18  ;;  %v9125_v22 = vld [vmem:[%s13191_s3 + $0x180] ss:$16 sps:$4 sm:$0xff]  }
 0x207   :  { %7381 = vmatpush1.bf16.msra.mxu1 %v9056_v28  ;;  %7412 = vmatprep.mubr.bf16.mxu1 %v11021_v18  ;;  %v9073_v18 = vld [vmem:[%s13191_s3 + $0x64] ss:$16 sps:$4 sm:$0xff]   ;;  %v9128_v28 = vld [vmem:[%s13191_s3 + $0x188] ss:$16 sps:$4 sm:$0xff]  }
 0x208   :  { %7038 = vmatprep.subr.bf16.mxu0 %v9061_v29  ;;  %7382 = vmatprep.subr.bf16.mxu1 %v9064_v35  ;;  %v9133_v29 = vld [vmem:[%s13191_s3 + $0x1a4] ss:$16 sps:$4 sm:$0xff]   ;;  %v9134_v35 = vld [vmem:[%s13191_s3 + $0x1a8] ss:$16 sps:$4 sm:$0xff]  }
 0x20a   :  { %7039 = vmatpush1.bf16.msra.mxu0 %v9059_v33  ;;  %v9131_v33 = vld [vmem:[%s13191_s3 + $0x1a0] ss:$16 sps:$4 sm:$0xff]  }
 0x20b   :  { %7383 = vmatpush1.bf16.msra.mxu1 %v9062_v34  ;;  %7040 = vmatprep.subr.bf16.mxu0 %v9067_v37  ;;  %v9136_v34 = vld [vmem:[%s13191_s3 + $0x1ac] ss:$16 sps:$4 sm:$0xff]   ;;  %v9139_v37 = vld [vmem:[%s13191_s3 + $0x1c4] ss:$16 sps:$4 sm:$0xff]  }
 0x20c   :  { %7384 = vmatprep.subr.bf16.mxu1 %v9070_v38  ;;  %v9137_v38 = vld [vmem:[%s13191_s3 + $0x1c0] ss:$16 sps:$4 sm:$0xff]  }
 0x20e   :  { %7041 = vmatpush1.bf16.msra.mxu0 %v9065_v26  ;;  %v9142_v26 = vld [vmem:[%s13191_s3 + $0x1cc] ss:$16 sps:$4 sm:$0xff]  }
 0x20f   :  { %7385 = vmatpush1.bf16.msra.mxu1 %v9068_v15  ;;  %7042 = vmatprep.subr.bf16.mxu0 %v9073_v18  ;;  %v9140_v15 = vld [vmem:[%s13191_s3 + $0x1c8] ss:$16 sps:$4 sm:$0xff]   ;;  %v9145_v18 = vld [vmem:[%s13191_s3 + $0x1e4] ss:$16 sps:$4 sm:$0xff]  }
 0x210   :  { %7386 = vmatprep.subr.bf16.mxu1 %v9076_v40  ;;  %v9148_v40 = vld [vmem:[%s13191_s3 + $0x1ec] ss:$16 sps:$4 sm:$0xff]  }
 0x212   :  { %7043 = vmatpush1.bf16.msra.mxu0 %v9071_v39  ;;  %v9143_v39 = vld [vmem:[%s13191_s3 + $0x1e0] ss:$16 sps:$4 sm:$0xff]  }
 0x213   :  { %7387 = vmatpush1.bf16.msra.mxu1 %v9074_v41  ;;  %7044 = vmatprep.subr.bf16.mxu0 %v9079_v42  ;;  %v9146_v41 = vld [vmem:[%s13191_s3 + $0x1e8] ss:$16 sps:$4 sm:$0xff]   ;;  %v9151_v42 = vld [vmem:[%s13191_s3 + $0x204] ss:$16 sps:$4 sm:$0xff]  }
 0x214   :  { %7388 = vmatprep.subr.bf16.mxu1 %v9082_v44  ;;  %v9154_v44 = vld [vmem:[%s13191_s3 + $0x20c] ss:$16 sps:$4 sm:$0xff]  }
 0x216   :  { %7045 = vmatpush1.bf16.msra.mxu0 %v9077_v43  ;;  %v9149_v43 = vld [vmem:[%s13191_s3 + $0x200] ss:$16 sps:$4 sm:$0xff]  }
 0x217   :  { %7389 = vmatpush1.bf16.msra.mxu1 %v9080_v23  ;;  %7046 = vmatprep.subr.bf16.mxu0 %v9085_v45  ;;  %v9152_v23 = vld [vmem:[%s13191_s3 + $0x208] ss:$16 sps:$4 sm:$0xff]   ;;  %v9157_v45 = vld [vmem:[%s13191_s3 + $0x224] ss:$16 sps:$4 sm:$0xff]  }
 0x218   :  { %7390 = vmatprep.subr.bf16.mxu1 %v9088_v47  ;;  %v9158_v47 = vld [vmem:[%s13191_s3 + $0x228] ss:$16 sps:$4 sm:$0xff]  }
 0x21a   :  { %7047 = vmatpush1.bf16.msra.mxu0 %v9083_v46  ;;  %v9155_v46 = vld [vmem:[%s13191_s3 + $0x220] ss:$16 sps:$4 sm:$0xff]  }
 0x21b   :  { %7391 = vmatpush1.bf16.msra.mxu1 %v9086_v48  ;;  %7048 = vmatprep.subr.bf16.mxu0 %v9091_v49  ;;  %v9160_v48 = vld [vmem:[%s13191_s3 + $0x22c] ss:$16 sps:$4 sm:$0xff]   ;;  %v9163_v49 = vld [vmem:[%s13191_s3 + $0x244] ss:$16 sps:$4 sm:$0xff]  }
 0x21c   :  { %7392 = vmatprep.subr.bf16.mxu1 %v9094_v51  ;;  %v9164_v51 = vld [vmem:[%s13191_s3 + $0x248] ss:$16 sps:$4 sm:$0xff]  }
 0x21e   :  { %7049 = vmatpush1.bf16.msra.mxu0 %v9089_v50  ;;  %v9166_v50 = vld [vmem:[%s13191_s3 + $0x24c] ss:$16 sps:$4 sm:$0xff]  }
 0x21f   :  { %7393 = vmatpush1.bf16.msra.mxu1 %v9092_v52  ;;  %7050 = vmatprep.subr.bf16.mxu0 %v9097_v55  ;;  %v9167_v52 = vld [vmem:[%s13191_s3 + $0x260] ss:$16 sps:$4 sm:$0xff]   ;;  %v9172_v55 = vld [vmem:[%s13191_s3 + $0x26c] ss:$16 sps:$4 sm:$0xff]  }
 0x220   :  { %7394 = vmatprep.subr.bf16.mxu1 %v9100_v61  ;;  %v9175_v61 = vld [vmem:[%s13191_s3 + $0x284] ss:$16 sps:$4 sm:$0xff]  }
 0x222   :  { %7051 = vmatpush1.bf16.msra.mxu0 %v9095_v57  ;;  %v9170_v57 = vld [vmem:[%s13191_s3 + $0x268] ss:$16 sps:$4 sm:$0xff]  }
 0x223   :  { %7395 = vmatpush1.bf16.msra.mxu1 %v9098_v63  ;;  %7052 = vmatprep.subr.bf16.mxu0 %v9103_v0  ;;  %v9178_v63 = vld [vmem:[%s13191_s3 + $0x28c] ss:$16 sps:$4 sm:$0xff]   ;;  %v9173_v0 = vld [vmem:[%s13191_s3 + $0x280] ss:$16 sps:$4 sm:$0xff]  }
 0x224   :  { %7396 = vmatprep.subr.bf16.mxu1 %v9106_v2  ;;  %v9176_v2 = vld [vmem:[%s13191_s3 + $0x288] ss:$16 sps:$4 sm:$0xff]  }
 0x226   :  { %7053 = vmatpush1.bf16.msra.mxu0 %v9101_v1  ;;  %v11792_v1 = vld [vmem:[%s13190_s2 + $0x8] sm:$0xff] }
 0x227   :  { %7397 = vmatpush1.bf16.msra.mxu1 %v9104_v4  ;;  %7054 = vmatprep.subr.bf16.mxu0 %v9109_v5  ;;  %v9181_v4 = vld [vmem:[%s13191_s3 + $0x2a4] ss:$16 sps:$4 sm:$0xff]   ;;  %v9184_v5 = vld [vmem:[%s13191_s3 + $0x2ac] ss:$16 sps:$4 sm:$0xff]  }
 0x228   :  { %7398 = vmatprep.subr.bf16.mxu1 %v9112_v10  ;;  %v581_v10 = vrot.slane %v11792_v1, %v10957_v24 }
 0x22a   :  { %7055 = vmatpush1.bf16.msra.mxu0 %v9107_v8  ;;  %v9179_v8 = vld [vmem:[%s13191_s3 + $0x2a0] ss:$16 sps:$4 sm:$0xff]  }
 0x22b   :  { %7399 = vmatpush1.bf16.msra.mxu1 %v9110_v11  ;;  %7056 = vmatprep.subr.bf16.mxu0 %v9115_v12  ;;  %v9182_v11 = vld [vmem:[%s13191_s3 + $0x2a8] ss:$16 sps:$4 sm:$0xff]   ;;  %v9187_v12 = vld [vmem:[%s13191_s3 + $0x2c4] ss:$16 sps:$4 sm:$0xff]  }
 0x22c   :  { %7400 = vmatprep.subr.bf16.mxu1 %v9118_v13  ;;  %v585_v13 = vrot.slane %v11792_v1, %v10972_v31 }
 0x22e   :  { %7057 = vmatpush1.bf16.msra.mxu0 %v9113_v58  ;;  %v589_v58 = vrot.slane %v11792_v1, %v10969_v30 }
 0x22f   :  { %7401 = vmatpush1.bf16.msra.mxu1 %v9116_v14  ;;  %7058 = vmatprep.subr.bf16.mxu0 %v9121_v19  ;;  %v9190_v14 = vld [vmem:[%s13191_s3 + $0x2cc] ss:$16 sps:$4 sm:$0xff]   ;;  %v593_v19 = vrot.slane %v11792_v1, %v10975_v17 }
 0x230   :  { %7402 = vmatprep.subr.bf16.mxu1 %v9124_v54 }
 0x232   :  { %7059 = vmatpush1.bf16.msra.mxu0 %v9119_v53 }
 0x233   :  { %7403 = vmatpush1.bf16.msra.mxu1 %v9122_v20  ;;  %7060 = vmatprep.subr.bf16.mxu0 %v9127_v21 }
 0x234   :  { %7404 = vmatprep.subr.bf16.mxu1 %v9130_v25  ;;  %v9188_v25 = vld [vmem:[%s13191_s3 + $0x2c8] ss:$16 sps:$4 sm:$0xff]  }
 0x236   :  { %7061 = vmatpush1.bf16.msra.mxu0 %v9125_v22  ;;  %v9185_v22 = vld [vmem:[%s13191_s3 + $0x2c0] ss:$16 sps:$4 sm:$0xff]  }
 0x237   :  { %7405 = vmatpush1.bf16.msra.mxu1 %v9128_v28  ;;  %7062 = vmatprep.subr.bf16.mxu0 %v9133_v29 }
 0x238   :  { %7406 = vmatprep.subr.bf16.mxu1 %v9136_v34 }
 0x23a   :  { %7063 = vmatpush1.bf16.msra.mxu0 %v9131_v33 }
 0x23b   :  { %7407 = vmatpush1.bf16.msra.mxu1 %v9134_v35  ;;  %7064 = vmatprep.subr.bf16.mxu0 %v9139_v37  ;;  %v9193_v35 = vld [vmem:[%s13191_s3 + $0x2e4] ss:$16 sps:$4 sm:$0xff]   ;;  %v9196_v37 = vld [vmem:[%s13191_s3 + $0x2ec] ss:$16 sps:$4 sm:$0xff]  }
 0x23c   :  { %7408 = vmatprep.subr.bf16.mxu1 %v9142_v26 }
 0x23e   :  { %7065 = vmatpush1.bf16.msra.mxu0 %v9137_v38 }
 0x23f   :  { %7409 = vmatpush1.bf16.msra.mxu1 %v9140_v15  ;;  %7066 = vmatprep.subr.bf16.mxu0 %v9145_v18 }
 0x240   :  { %7410 = vmatprep.subr.bf16.mxu1 %v9148_v40 }
 0x242   :  { %7067 = vmatpush1.bf16.msra.mxu0 %v9143_v39 }
 0x243   :  { %7411 = vmatpush1.bf16.msra.mxu1 %v9146_v41  ;;  %7079 = vmatprep.subr.bf16.mxu0 %v9151_v42  ;;  %v9191_v42 = vld [vmem:[%s13191_s3 + $0x2e0] ss:$16 sps:$4 sm:$0xff]  }
 0x244   :  { %7423 = vmatprep.subr.bf16.mxu1 %v9154_v44 }
 0x245   :  { %7069 = vmatmul.mubr.bf16.vlgmr.msra.gmra.mrb[16].mxu0 %v11017_v27 }
 0x246   :  { %7413 = vmatmul.mubr.bf16.vlgmr.msra.gmra.mrb[16].mxu1 %v11017_v27  ;;  %7080 = vmatpush1.bf16.msra.mxu0 %v9149_v43  ;;  %v9161_v27 = vld [vmem:[%s13191_s3 + $0x240] ss:$16 sps:$4 sm:$0xff]  }
 0x247   :  { %7111 = vmatprep.mubr.bf16.mxu0 %v11029_v36  ;;  %7424 = vmatpush1.bf16.msra.mxu1 %v9152_v23 }
 0x248   :  { %7455 = vmatprep.mubr.bf16.mxu1 %v11029_v36  ;;  %7081 = vmatprep.subr.bf16.mxu0 %v9157_v45  ;;  %v9169_v36 = vld [vmem:[%s13191_s3 + $0x264] ss:$16 sps:$4 sm:$0xff]   ;;  %v9194_v45 = vld [vmem:[%s13191_s3 + $0x2e8] ss:$16 sps:$4 sm:$0xff]  }
 0x249   :  { %7425 = vmatprep.subr.bf16.mxu1 %v9160_v48 }
 0x24a   :  { %7082 = vmatpush1.bf16.msra.mxu0 %v9155_v46  ;;  %v9199_v46 = vld [vmem:[%s13191_s3 + $0x304] ss:$16 sps:$4 sm:$0xff]  }
 0x24b   :  { %7426 = vmatpush1.bf16.msra.mxu1 %v9158_v47  ;;  %7083 = vmatprep.subr.bf16.mxu0 %v9163_v49 }
 0x24c   :  { %7427 = vmatprep.subr.bf16.mxu1 %v9166_v50 }
 0x24e   :  { %7084 = vmatpush1.bf16.msra.mxu0 %v9161_v27  ;;  %v9202_v27 = vld [vmem:[%s13191_s3 + $0x30c] ss:$16 sps:$4 sm:$0xff]  }
 0x24f   :  { %7428 = vmatpush1.bf16.msra.mxu1 %v9164_v51  ;;  %7085 = vmatprep.subr.bf16.mxu0 %v9169_v36 }
 0x250   :  { %7429 = vmatprep.subr.bf16.mxu1 %v9172_v55 }
 0x252   :  { %7086 = vmatpush1.bf16.msra.mxu0 %v9167_v52 }
 0x253   :  { %7430 = vmatpush1.bf16.msra.mxu1 %v9170_v57  ;;  %7087 = vmatprep.subr.bf16.mxu0 %v9175_v61 }
 0x254   :  { %7431 = vmatprep.subr.bf16.mxu1 %v9178_v63  ;;  %v9197_v63 = vld [vmem:[%s13191_s3 + $0x300] ss:$16 sps:$4 sm:$0xff]  }
 0x256   :  { %7088 = vmatpush1.bf16.msra.mxu0 %v9173_v0  ;;  %v9200_v0 = vld [vmem:[%s13191_s3 + $0x308] ss:$16 sps:$4 sm:$0xff]  }
 0x257   :  { %7432 = vmatpush1.bf16.msra.mxu1 %v9176_v2  ;;  %7089 = vmatprep.subr.bf16.mxu0 %v9181_v4  ;;  %v9205_v2 = vld [vmem:[%s13191_s3 + $0x324] ss:$16 sps:$4 sm:$0xff]   ;;  %v9203_v4 = vld [vmem:[%s13191_s3 + $0x320] ss:$16 sps:$4 sm:$0xff]  }
 0x258   :  { %v3627_v53 = vpop.f32.mrb[8].mxu0  ;;  %7433 = vmatprep.subr.bf16.mxu1 %v9184_v5  ;;  %v3713_v20 = vpop.f32.mrb[8].mxu1  ;;  %v9208_v5 = vld [vmem:[%s13191_s3 + $0x32c] ss:$16 sps:$4 sm:$0xff]  }
 0x259   :  { %v8937_v54 = vadd.f32 %v3627_v53, %v581_v10  ;;  %v3629_v21 = vpop.f32.mrb[9].mxu0  ;;  %v8941_v28 = vadd.f32 %v3713_v20, %v589_v58  ;;  %v3715_v33 = vpop.f32.mrb[9].mxu1  ;;  %v9218_v53 = vld [vmem:[%s13191_s3 + $0x368] ss:$16 sps:$4 sm:$0xff]   ;;  %v9221_v20 = vld [vmem:[%s13191_s3 + $0x380] ss:$16 sps:$4 sm:$0xff]  }
 0x25a   :  { %v8938_v29 = vadd.f32 %v3629_v21, %v585_v13  ;;  %v3631_v34 = vpop.f32.mrb[10].mxu0  ;;  %7090 = vmatpush1.bf16.msra.mxu0 %v9179_v8  ;;  %v8942_v38 = vadd.f32 %v3715_v33, %v593_v19  ;;  %v3717_v15 = vpop.f32.mrb[10].mxu1  ;;  %v9206_v8 = vld [vmem:[%s13191_s3 + $0x328] ss:$16 sps:$4 sm:$0xff]   ;;  %v9226_v21 = vld [vmem:[%s13191_s3 + $0x38c] ss:$16 sps:$4 sm:$0xff]  }
 0x25b   :  { %v8939_v26 = vadd.f32 %v3631_v34, %v581_v10  ;;  %7434 = vmatpush1.bf16.msra.mxu1 %v9182_v11  ;;  %v3633_v18 = vpop.f32.mrb[11].mxu0  ;;  %7091 = vmatprep.subr.bf16.mxu0 %v9187_v12  ;;  %v8943_v39 = vadd.f32 %v3717_v15, %v589_v58  ;;  %v3719_v41 = vpop.f32.mrb[11].mxu1  ;;  %v3902_v43 = vmax.f32 %v8937_v54, 0.0  ;;  %v3904_v47 = vmax.f32 %v8941_v28, 0.0  ;;  %v9211_v10 = vld [vmem:[%s13191_s3 + $0x344] ss:$16 sps:$4 sm:$0xff]  }
 0x25c   :  { %v8940_v40 = vadd.f32 %v3633_v18, %v585_v13  ;;  %7435 = vmatprep.subr.bf16.mxu1 %v9190_v14  ;;  %v8944_v23 = vadd.f32 %v3719_v41, %v593_v19  ;;  %v3903_v48 = vmax.f32 %v8938_v29, 0.0  ;;  %v3905_v51 = vmax.f32 %v8942_v38, 0.0  ;;  %v9209_v11 = vld [vmem:[%s13191_s3 + $0x340] ss:$16 sps:$4 sm:$0xff]   ;;  %v9214_v12 = vld [vmem:[%s13191_s3 + $0x34c] ss:$16 sps:$4 sm:$0xff]  }
 0x25d   :  { %v3918_v44 = vmax.f32 %v8939_v26, 0.0  ;;  %v3920_v49 = vmax.f32 %v8943_v39, 0.0  ;;  %v9212_v58 = vld [vmem:[%s13191_s3 + $0x348] ss:$16 sps:$4 sm:$0xff]   ;;  %v9217_v13 = vld [vmem:[%s13191_s3 + $0x364] ss:$16 sps:$4 sm:$0xff]  }
 0x25e   :  { %v3919_v50 = vmax.f32 %v8940_v40, 0.0  ;;  %7092 = vmatpush1.bf16.msra.mxu0 %v9185_v22  ;;  %v3921_v52 = vmax.f32 %v8944_v23, 0.0  ;;  %v9215_v14 = vld [vmem:[%s13191_s3 + $0x360] ss:$16 sps:$4 sm:$0xff]   ;;  %v9220_v19 = vld [vmem:[%s13191_s3 + $0x36c] ss:$16 sps:$4 sm:$0xff]  }
 0x25f   :  { %v11847_v36 = vpack.c.bf16 %v3918_v44, %v3902_v43  ;;  %7436 = vmatpush1.bf16.msra.mxu1 %v9188_v25  ;;  %7093 = vmatprep.subr.bf16.mxu0 %v9193_v35  ;;  %v11849_v55 = vpack.c.bf16 %v3920_v49, %v3904_v47  ;;  %v9223_v54 = vld [vmem:[%s13191_s3 + $0x384] ss:$16 sps:$4 sm:$0xff]   ;;  %v9224_v22 = vld [vmem:[%s13191_s3 + $0x388] ss:$16 sps:$4 sm:$0xff]   ;;  %v9227_v28 = vld [vmem:[%s13191_s3 + $0x3a0] ss:$16 sps:$4 sm:$0xff]  }
 0x260   :  { %v11851_v57 = vpack.c.bf16 %v3919_v50, %v3903_v48  ;;  %7437 = vmatprep.subr.bf16.mxu1 %v9196_v37  ;;  %v11853_v61 = vpack.c.bf16 %v3921_v52, %v3905_v51  ;;  %v9229_v25 = vld [vmem:[%s13191_s3 + $0x3a4] ss:$16 sps:$4 sm:$0xff]   ;;  %v9232_v29 = vld [vmem:[%s13191_s3 + $0x3ac] ss:$16 sps:$4 sm:$0xff]   ;;  %v9230_v33 = vld [vmem:[%s13191_s3 + $0x3a8] ss:$16 sps:$4 sm:$0xff]  }
 0x261   :  { %v9235_v34 = vld [vmem:[%s13191_s3 + $0x3c4] ss:$16 sps:$4 sm:$0xff]   ;;  %v9233_v35 = vld [vmem:[%s13191_s3 + $0x3c0] ss:$16 sps:$4 sm:$0xff]   ;;  %v9238_v37 = vld [vmem:[%s13191_s3 + $0x3cc] ss:$16 sps:$4 sm:$0xff]  }
 0x262   :  { %7094 = vmatpush1.bf16.msra.mxu0 %v9191_v42  ;;  %v9236_v38 = vld [vmem:[%s13191_s3 + $0x3c8] ss:$16 sps:$4 sm:$0xff]   ;;  %v9241_v26 = vld [vmem:[%s13191_s3 + $0x3e4] ss:$16 sps:$4 sm:$0xff]   ;;  %v9239_v15 = vld [vmem:[%s13191_s3 + $0x3e0] ss:$16 sps:$4 sm:$0xff]  }
 0x263   :  { %7438 = vmatpush1.bf16.msra.mxu1 %v9194_v45  ;;  %7095 = vmatprep.subr.bf16.mxu0 %v9199_v46  ;;  %v9244_v18 = vld [vmem:[%s13191_s3 + $0x3ec] ss:$16 sps:$4 sm:$0xff]   ;;  %v9242_v39 = vld [vmem:[%s13191_s3 + $0x3e8] ss:$16 sps:$4 sm:$0xff]   ;;  %v9247_v40 = vld [vmem:[%s13191_s3 + $0x404] ss:$16 sps:$4 sm:$0xff]  }
 0x264   :  { %7439 = vmatprep.subr.bf16.mxu1 %v9202_v27  ;;  %v9245_v41 = vld [vmem:[%s13191_s3 + $0x400] ss:$16 sps:$4 sm:$0xff]   ;;  %v9250_v42 = vld [vmem:[%s13191_s3 + $0x40c] ss:$16 sps:$4 sm:$0xff]   ;;  %v9248_v43 = vld [vmem:[%s13191_s3 + $0x408] ss:$16 sps:$4 sm:$0xff]  }
 0x265   :  { %v9253_v44 = vld [vmem:[%s13191_s3 + $0x424] ss:$16 sps:$4 sm:$0xff]   ;;  %v9251_v23 = vld [vmem:[%s13191_s3 + $0x420] ss:$16 sps:$4 sm:$0xff]   ;;  %v9254_v45 = vld [vmem:[%s13191_s3 + $0x428] ss:$16 sps:$4 sm:$0xff]  }
 0x266   :  { %7096 = vmatpush1.bf16.msra.mxu0 %v9197_v63  ;;  %v9256_v46 = vld [vmem:[%s13191_s3 + $0x42c] ss:$16 sps:$4 sm:$0xff]   ;;  %v9259_v47 = vld [vmem:[%s13191_s3 + $0x444] ss:$16 sps:$4 sm:$0xff]   ;;  %v9260_v49 = vld [vmem:[%s13191_s3 + $0x448] ss:$16 sps:$4 sm:$0xff]  }
 0x267   :  { %7440 = vmatpush1.bf16.msra.mxu1 %v9200_v0  ;;  %7097 = vmatprep.subr.bf16.mxu0 %v9205_v2  ;;  %v9262_v48 = vld [vmem:[%s13191_s3 + $0x44c] ss:$16 sps:$4 sm:$0xff]   ;;  %v9263_v27 = vld [vmem:[%s13191_s3 + $0x460] ss:$16 sps:$4 sm:$0xff]   ;;  %v9266_v51 = vld [vmem:[%s13191_s3 + $0x468] ss:$16 sps:$4 sm:$0xff]  }
 0x268   :  { %7441 = vmatprep.subr.bf16.mxu1 %v9208_v5  ;;  %v9268_v50 = vld [vmem:[%s13191_s3 + $0x46c] ss:$16 sps:$4 sm:$0xff]   ;;  %v9271_v52 = vld [vmem:[%s13191_s3 + $0x484] ss:$16 sps:$4 sm:$0xff]   ;;  %v9269_v0 = vld [vmem:[%s13191_s3 + $0x480] ss:$16 sps:$4 sm:$0xff]  }
 0x269   :  { %v9274_v63 = vld [vmem:[%s13191_s3 + $0x48c] ss:$16 sps:$4 sm:$0xff]   ;;  %v9272_v2 = vld [vmem:[%s13191_s3 + $0x488] ss:$16 sps:$4 sm:$0xff]  }
 0x26a   :  { %7098 = vmatpush1.bf16.msra.mxu0 %v9203_v4  ;;  %v9277_v4 = vld [vmem:[%s13191_s3 + $0x4a4] ss:$16 sps:$4 sm:$0xff]   ;;  %v9280_v5 = vld [vmem:[%s13191_s3 + $0x4ac] ss:$16 sps:$4 sm:$0xff]  }
 0x26b   :  { %7442 = vmatpush1.bf16.msra.mxu1 %v9206_v8  ;;  %7099 = vmatprep.subr.bf16.mxu0 %v9211_v10  ;;  %v9275_v8 = vld [vmem:[%s13191_s3 + $0x4a0] ss:$16 sps:$4 sm:$0xff]   ;;  %v9278_v10 = vld [vmem:[%s13191_s3 + $0x4a8] ss:$16 sps:$4 sm:$0xff]  }
 0x26c   :  { %7443 = vmatprep.subr.bf16.mxu1 %v9214_v12  ;;  %v9286_v12 = vld [vmem:[%s13191_s3 + $0x4cc] ss:$16 sps:$4 sm:$0xff]  }
 0x26e   :  { %7100 = vmatpush1.bf16.msra.mxu0 %v9209_v11  ;;  %v9283_v11 = vld [vmem:[%s13191_s3 + $0x4c4] ss:$16 sps:$4 sm:$0xff]  }
 0x26f   :  { %7444 = vmatpush1.bf16.msra.mxu1 %v9212_v58  ;;  %7101 = vmatprep.subr.bf16.mxu0 %v9217_v13  ;;  %v9281_v58 = vld [vmem:[%s13191_s3 + $0x4c0] ss:$16 sps:$4 sm:$0xff]   ;;  %v9284_v13 = vld [vmem:[%s13191_s3 + $0x4c8] ss:$16 sps:$4 sm:$0xff]  }
 0x270   :  { %7445 = vmatprep.subr.bf16.mxu1 %v9220_v19  ;;  %v9292_v19 = vld [vmem:[%s13191_s3 + $0x4ec] ss:$16 sps:$4 sm:$0xff]  }
 0x272   :  { %7102 = vmatpush1.bf16.msra.mxu0 %v9215_v14  ;;  %v9289_v14 = vld [vmem:[%s13191_s3 + $0x4e4] ss:$16 sps:$4 sm:$0xff]  }
 0x273   :  { %7446 = vmatpush1.bf16.msra.mxu1 %v9218_v53  ;;  %7103 = vmatprep.subr.bf16.mxu0 %v9223_v54  ;;  %v9287_v53 = vld [vmem:[%s13191_s3 + $0x4e0] ss:$16 sps:$4 sm:$0xff]   ;;  %v9290_v54 = vld [vmem:[%s13191_s3 + $0x4e8] ss:$16 sps:$4 sm:$0xff]  }
 0x274   :  { %7447 = vmatprep.subr.bf16.mxu1 %v9226_v21  ;;  %v9298_v21 = vld [vmem:[%s13191_s3 + $0x50c] ss:$16 sps:$4 sm:$0xff]  }
 0x276   :  { %7104 = vmatpush1.bf16.msra.mxu0 %v9221_v20  ;;  %v9295_v20 = vld [vmem:[%s13191_s3 + $0x504] ss:$16 sps:$4 sm:$0xff]  }
 0x277   :  { %7448 = vmatpush1.bf16.msra.mxu1 %v9224_v22  ;;  %7105 = vmatprep.subr.bf16.mxu0 %v9229_v25  ;;  %v9293_v22 = vld [vmem:[%s13191_s3 + $0x500] ss:$16 sps:$4 sm:$0xff]   ;;  %v9296_v25 = vld [vmem:[%s13191_s3 + $0x508] ss:$16 sps:$4 sm:$0xff]  }
 0x278   :  { %7449 = vmatprep.subr.bf16.mxu1 %v9232_v29  ;;  %v9304_v29 = vld [vmem:[%s13191_s3 + $0x52c] ss:$16 sps:$4 sm:$0xff]  }
 0x27a   :  { %7106 = vmatpush1.bf16.msra.mxu0 %v9227_v28  ;;  %v9301_v28 = vld [vmem:[%s13191_s3 + $0x524] ss:$16 sps:$4 sm:$0xff]  }
 0x27b   :  { %7450 = vmatpush1.bf16.msra.mxu1 %v9230_v33  ;;  %7107 = vmatprep.subr.bf16.mxu0 %v9235_v34  ;;  %v9299_v33 = vld [vmem:[%s13191_s3 + $0x520] ss:$16 sps:$4 sm:$0xff]   ;;  %v9302_v34 = vld [vmem:[%s13191_s3 + $0x528] ss:$16 sps:$4 sm:$0xff]  }
 0x27c   :  { %7451 = vmatprep.subr.bf16.mxu1 %v9238_v37  ;;  %v9310_v37 = vld [vmem:[%s13191_s3 + $0x54c] ss:$16 sps:$4 sm:$0xff]  }
 0x27e   :  { %7108 = vmatpush1.bf16.msra.mxu0 %v9233_v35  ;;  %v9307_v35 = vld [vmem:[%s13191_s3 + $0x544] ss:$16 sps:$4 sm:$0xff]  }
 0x27f   :  { %7452 = vmatpush1.bf16.msra.mxu1 %v9236_v38  ;;  %7109 = vmatprep.subr.bf16.mxu0 %v9241_v26  ;;  %v9305_v38 = vld [vmem:[%s13191_s3 + $0x540] ss:$16 sps:$4 sm:$0xff]   ;;  %v9308_v26 = vld [vmem:[%s13191_s3 + $0x548] ss:$16 sps:$4 sm:$0xff]  }
 0x280   :  { %7453 = vmatprep.subr.bf16.mxu1 %v9244_v18  ;;  %v9316_v18 = vld [vmem:[%s13191_s3 + $0x56c] ss:$16 sps:$4 sm:$0xff]  }
 0x282   :  { %7110 = vmatpush1.bf16.msra.mxu0 %v9239_v15  ;;  %v9313_v15 = vld [vmem:[%s13191_s3 + $0x564] ss:$16 sps:$4 sm:$0xff]  }
 0x283   :  { %7454 = vmatpush1.bf16.msra.mxu1 %v9242_v39  ;;  %7122 = vmatprep.subr.bf16.mxu0 %v9247_v40  ;;  %v9311_v39 = vld [vmem:[%s13191_s3 + $0x560] ss:$16 sps:$4 sm:$0xff]   ;;  %v9314_v40 = vld [vmem:[%s13191_s3 + $0x568] ss:$16 sps:$4 sm:$0xff]  }
 0x284   :  { %7466 = vmatprep.subr.bf16.mxu1 %v9250_v42  ;;  %v9322_v42 = vld [vmem:[%s13191_s3 + $0x58c] ss:$16 sps:$4 sm:$0xff]  }
 0x285   :  { %7112 = vmatmul.mubr.bf16.vlgmr.msra.gmra.mrb[16].mxu0 %v11019_v32 }
 0x286   :  { %7456 = vmatmul.mubr.bf16.vlgmr.msra.gmra.mrb[16].mxu1 %v11019_v32  ;;  %7123 = vmatpush1.bf16.msra.mxu0 %v9245_v41  ;;  %v9257_v32 = vld [vmem:[%s13191_s3 + $0x440] ss:$16 sps:$4 sm:$0xff]   ;;  %v9319_v41 = vld [vmem:[%s13191_s3 + $0x584] ss:$16 sps:$4 sm:$0xff]  }
 0x287   :  { %7154 = vmatprep.mubr.bf16.mxu0 %v11450_v7  ;;  %7467 = vmatpush1.bf16.msra.mxu1 %v9248_v43  ;;  %v9317_v43 = vld [vmem:[%s13191_s3 + $0x580] ss:$16 sps:$4 sm:$0xff]  }
 0x288   :  { %7498 = vmatprep.mubr.bf16.mxu1 %v11450_v7  ;;  %7124 = vmatprep.subr.bf16.mxu0 %v9253_v44  ;;  %v9265_v7 = vld [vmem:[%s13191_s3 + $0x464] ss:$16 sps:$4 sm:$0xff]   ;;  %v9320_v44 = vld [vmem:[%s13191_s3 + $0x588] ss:$16 sps:$4 sm:$0xff]  }
 0x289   :  { %7468 = vmatprep.subr.bf16.mxu1 %v9256_v46  ;;  %v9323_v46 = vld [vmem:[%s13191_s3 + $0x5a0] ss:$16 sps:$4 sm:$0xff]  }
 0x28a   :  { %7125 = vmatpush1.bf16.msra.mxu0 %v9251_v23  ;;  %v9325_v23 = vld [vmem:[%s13191_s3 + $0x5a4] ss:$16 sps:$4 sm:$0xff]  }
 0x28b   :  { %7469 = vmatpush1.bf16.msra.mxu1 %v9254_v45  ;;  %7126 = vmatprep.subr.bf16.mxu0 %v9259_v47  ;;  %v9328_v45 = vld [vmem:[%s13191_s3 + $0x5ac] ss:$16 sps:$4 sm:$0xff]   ;;  %v9326_v47 = vld [vmem:[%s13191_s3 + $0x5a8] ss:$16 sps:$4 sm:$0xff]  }
 0x28c   :  { %7470 = vmatprep.subr.bf16.mxu1 %v9262_v48  ;;  %v9331_v48 = vld [vmem:[%s13191_s3 + $0x5c4] ss:$16 sps:$4 sm:$0xff]  }
 0x28e   :  { %7127 = vmatpush1.bf16.msra.mxu0 %v9257_v32  ;;  %v9334_v32 = vld [vmem:[%s13191_s3 + $0x5cc] ss:$16 sps:$4 sm:$0xff]  }
 0x28f   :  { %7471 = vmatpush1.bf16.msra.mxu1 %v9260_v49  ;;  %7128 = vmatprep.subr.bf16.mxu0 %v9265_v7  ;;  %v9329_v49 = vld [vmem:[%s13191_s3 + $0x5c0] ss:$16 sps:$4 sm:$0xff]   ;;  %v9332_v7 = vld [vmem:[%s13191_s3 + $0x5c8] ss:$16 sps:$4 sm:$0xff]  }
 0x290   :  { %7472 = vmatprep.subr.bf16.mxu1 %v9268_v50  ;;  %v9337_v50 = vld [vmem:[%s13191_s3 + $0x5e4] ss:$16 sps:$4 sm:$0xff]  }
 0x292   :  { %7129 = vmatpush1.bf16.msra.mxu0 %v9263_v27  ;;  %v9340_v27 = vld [vmem:[%s13191_s3 + $0x5ec] ss:$16 sps:$4 sm:$0xff]  }
 0x293   :  { %7473 = vmatpush1.bf16.msra.mxu1 %v9266_v51  ;;  %7130 = vmatprep.subr.bf16.mxu0 %v9271_v52  ;;  %v9335_v51 = vld [vmem:[%s13191_s3 + $0x5e0] ss:$16 sps:$4 sm:$0xff]   ;;  %v9338_v52 = vld [vmem:[%s13191_s3 + $0x5e8] ss:$16 sps:$4 sm:$0xff]  }
 0x294   :  { %7474 = vmatprep.subr.bf16.mxu1 %v9274_v63  ;;  %v9343_v63 = vld [vmem:[%s13191_s3 + $0x604] ss:$16 sps:$4 sm:$0xff]  }
 0x296   :  { %7131 = vmatpush1.bf16.msra.mxu0 %v9269_v0  ;;  %v9346_v0 = vld [vmem:[%s13191_s3 + $0x60c] ss:$16 sps:$4 sm:$0xff]  }
 0x297   :  { %7475 = vmatpush1.bf16.msra.mxu1 %v9272_v2  ;;  %7132 = vmatprep.subr.bf16.mxu0 %v9277_v4  ;;  %v9341_v2 = vld [vmem:[%s13191_s3 + $0x600] ss:$16 sps:$4 sm:$0xff]   ;;  %v9344_v4 = vld [vmem:[%s13191_s3 + $0x608] ss:$16 sps:$4 sm:$0xff]  }
 0x298   :  { %7476 = vmatprep.subr.bf16.mxu1 %v9280_v5  ;;  %v9349_v5 = vld [vmem:[%s13191_s3 + $0x624] ss:$16 sps:$4 sm:$0xff]  }
 0x29a   :  { %7133 = vmatpush1.bf16.msra.mxu0 %v9275_v8  ;;  %v9352_v8 = vld [vmem:[%s13191_s3 + $0x62c] ss:$16 sps:$4 sm:$0xff]  }
 0x29b   :  { %7477 = vmatpush1.bf16.msra.mxu1 %v9278_v10  ;;  %7134 = vmatprep.subr.bf16.mxu0 %v9283_v11  ;;  %v9347_v10 = vld [vmem:[%s13191_s3 + $0x620] ss:$16 sps:$4 sm:$0xff]   ;;  %v9350_v11 = vld [vmem:[%s13191_s3 + $0x628] ss:$16 sps:$4 sm:$0xff]  }
 0x29c   :  { %7478 = vmatprep.subr.bf16.mxu1 %v9286_v12  ;;  %v9355_v12 = vld [vmem:[%s13191_s3 + $0x644] ss:$16 sps:$4 sm:$0xff]  }
 0x29e   :  { %7135 = vmatpush1.bf16.msra.mxu0 %v9281_v58  ;;  %v9353_v58 = vld [vmem:[%s13191_s3 + $0x640] ss:$16 sps:$4 sm:$0xff]  }
 0x29f   :  { %7479 = vmatpush1.bf16.msra.mxu1 %v9284_v13  ;;  %7136 = vmatprep.subr.bf16.mxu0 %v9289_v14  ;;  %v9356_v13 = vld [vmem:[%s13191_s3 + $0x648] ss:$16 sps:$4 sm:$0xff]   ;;  %v9364_v14 = vld [vmem:[%s13191_s3 + $0x66c] ss:$16 sps:$4 sm:$0xff]  }
 0x2a0   :  { %7480 = vmatprep.subr.bf16.mxu1 %v9292_v19  ;;  %v9359_v19 = vld [vmem:[%s13191_s3 + $0x660] ss:$16 sps:$4 sm:$0xff]  }
 0x2a2   :  { %7137 = vmatpush1.bf16.msra.mxu0 %v9287_v53  ;;  %v9362_v53 = vld [vmem:[%s13191_s3 + $0x668] ss:$16 sps:$4 sm:$0xff]  }
 0x2a3   :  { %7481 = vmatpush1.bf16.msra.mxu1 %v9290_v54  ;;  %7138 = vmatprep.subr.bf16.mxu0 %v9295_v20  ;;  %v9367_v54 = vld [vmem:[%s13191_s3 + $0x684] ss:$16 sps:$4 sm:$0xff]   ;;  %v9370_v20 = vld [vmem:[%s13191_s3 + $0x68c] ss:$16 sps:$4 sm:$0xff]  }
 0x2a4   :  { %7482 = vmatprep.subr.bf16.mxu1 %v9298_v21  ;;  %v9365_v21 = vld [vmem:[%s13191_s3 + $0x680] ss:$16 sps:$4 sm:$0xff]  }
 0x2a6   :  { %7139 = vmatpush1.bf16.msra.mxu0 %v9293_v22  ;;  %v9368_v22 = vld [vmem:[%s13191_s3 + $0x688] ss:$16 sps:$4 sm:$0xff]  }
 0x2a7   :  { %7483 = vmatpush1.bf16.msra.mxu1 %v9296_v25  ;;  %7140 = vmatprep.subr.bf16.mxu0 %v9301_v28  ;;  %v9373_v25 = vld [vmem:[%s13191_s3 + $0x6a4] ss:$16 sps:$4 sm:$0xff]   ;;  %v9376_v28 = vld [vmem:[%s13191_s3 + $0x6ac] ss:$16 sps:$4 sm:$0xff]  }
 0x2a8   :  { %7484 = vmatprep.subr.bf16.mxu1 %v9304_v29  ;;  %v597_v29 = vrot.slane %v11792_v1, %v564_v56  ;;  %v9374_v56 = vld [vmem:[%s13191_s3 + $0x6a8] ss:$16 sps:$4 sm:$0xff]  }
 0x2aa   :  { %7141 = vmatpush1.bf16.msra.mxu0 %v9299_v33  ;;  %v605_v33 = vrot.slane %v11792_v1, %v572_v59  ;;  %v9379_v59 = vld [vmem:[%s13191_s3 + $0x6c4] ss:$16 sps:$4 sm:$0xff]  }
 0x2ab   :  { %7485 = vmatpush1.bf16.msra.mxu1 %v9302_v34  ;;  %7142 = vmatprep.subr.bf16.mxu0 %v9307_v35  ;;  %v601_v34 = vrot.slane %v11792_v1, %v568_v60  ;;  %v9371_v35 = vld [vmem:[%s13191_s3 + $0x6a0] ss:$16 sps:$4 sm:$0xff]   ;;  %v9382_v60 = vld [vmem:[%s13191_s3 + $0x6cc] ss:$16 sps:$4 sm:$0xff]  }
 0x2ac   :  { %7486 = vmatprep.subr.bf16.mxu1 %v9310_v37  ;;  %v609_v37 = vrot.slane %v11792_v1, %v576_v62 }
 0x2ae   :  { %7143 = vmatpush1.bf16.msra.mxu0 %v9305_v38 }
 0x2af   :  { %7487 = vmatpush1.bf16.msra.mxu1 %v9308_v26  ;;  %7144 = vmatprep.subr.bf16.mxu0 %v9313_v15 }
 0x2b0   :  { %7488 = vmatprep.subr.bf16.mxu1 %v9316_v18 }
 0x2b2   :  { %7145 = vmatpush1.bf16.msra.mxu0 %v9311_v39 }
 0x2b3   :  { %7489 = vmatpush1.bf16.msra.mxu1 %v9314_v40  ;;  %7146 = vmatprep.subr.bf16.mxu0 %v9319_v41  ;;  %v9377_v40 = vld [vmem:[%s13191_s3 + $0x6c0] ss:$16 sps:$4 sm:$0xff]  }
 0x2b4   :  { %7490 = vmatprep.subr.bf16.mxu1 %v9322_v42 }
 0x2b6   :  { %7147 = vmatpush1.bf16.msra.mxu0 %v9317_v43 }
 0x2b7   :  { %7491 = vmatpush1.bf16.msra.mxu1 %v9320_v44  ;;  %7148 = vmatprep.subr.bf16.mxu0 %v9325_v23  ;;  %v9380_v23 = vld [vmem:[%s13191_s3 + $0x6c8] ss:$16 sps:$4 sm:$0xff]  }
 0x2b8   :  { %7492 = vmatprep.subr.bf16.mxu1 %v9328_v45  ;;  %v9385_v45 = vld [vmem:[%s13191_s3 + $0x6e4] ss:$16 sps:$4 sm:$0xff]  }
 0x2ba   :  { %7149 = vmatpush1.bf16.msra.mxu0 %v9323_v46 }
 0x2bb   :  { %7493 = vmatpush1.bf16.msra.mxu1 %v9326_v47  ;;  %7150 = vmatprep.subr.bf16.mxu0 %v9331_v48 }
 0x2bc   :  { %7494 = vmatprep.subr.bf16.mxu1 %v9334_v32  ;;  %v9388_v32 = vld [vmem:[%s13191_s3 + $0x6ec] ss:$16 sps:$4 sm:$0xff]  }
 0x2be   :  { %7151 = vmatpush1.bf16.msra.mxu0 %v9329_v49 }
 0x2bf   :  { %7495 = vmatpush1.bf16.msra.mxu1 %v9332_v7  ;;  %7152 = vmatprep.subr.bf16.mxu0 %v9337_v50 }
 0x2c0   :  { %7496 = vmatprep.subr.bf16.mxu1 %v9340_v27 }
 0x2c2   :  { %7153 = vmatpush1.bf16.msra.mxu0 %v9335_v51 }
 0x2c3   :  { %7497 = vmatpush1.bf16.msra.mxu1 %v9338_v52  ;;  %7165 = vmatprep.subr.bf16.mxu0 %v9343_v63 }
 0x2c4   :  { %7509 = vmatprep.subr.bf16.mxu1 %v9346_v0  ;;  %v9383_v0 = vld [vmem:[%s13191_s3 + $0x6e0] ss:$16 sps:$4 sm:$0xff]  }
 0x2c5   :  { %7155 = vmatmul.mubr.bf16.vlgmr.msra.gmra.mrb[16].mxu0 %v11446_v3 }
 0x2c6   :  { %7499 = vmatmul.mubr.bf16.vlgmr.msra.gmra.mrb[16].mxu1 %v11446_v3  ;;  %7166 = vmatpush1.bf16.msra.mxu0 %v9341_v2  ;;  %v9358_v3 = vld [vmem:[%s13191_s3 + $0x64c] ss:$16 sps:$4 sm:$0xff]  }
 0x2c7   :  { %7197 = vmatprep.mubr.bf16.mxu0 %v11452_v9  ;;  %7510 = vmatpush1.bf16.msra.mxu1 %v9344_v4 }
 0x2c8   :  { %7541 = vmatprep.mubr.bf16.mxu1 %v11452_v9  ;;  %7167 = vmatprep.subr.bf16.mxu0 %v9349_v5  ;;  %v9361_v9 = vld [vmem:[%s13191_s3 + $0x664] ss:$16 sps:$4 sm:$0xff]  }
 0x2c9   :  { %7511 = vmatprep.subr.bf16.mxu1 %v9352_v8  ;;  %v9386_v8 = vld [vmem:[%s13191_s3 + $0x6e8] ss:$16 sps:$4 sm:$0xff]  }
 0x2ca   :  { %7168 = vmatpush1.bf16.msra.mxu0 %v9347_v10  ;;  %v9391_v10 = vld [vmem:[%s13191_s3 + $0x704] ss:$16 sps:$4 sm:$0xff]  }
 0x2cb   :  { %7512 = vmatpush1.bf16.msra.mxu1 %v9350_v11  ;;  %7169 = vmatprep.subr.bf16.mxu0 %v9355_v12 }
 0x2cc   :  { %7513 = vmatprep.subr.bf16.mxu1 %v9358_v3  ;;  %v9394_v3 = vld [vmem:[%s13191_s3 + $0x70c] ss:$16 sps:$4 sm:$0xff]  }
 0x2ce   :  { %7170 = vmatpush1.bf16.msra.mxu0 %v9353_v58 }
 0x2cf   :  { %7514 = vmatpush1.bf16.msra.mxu1 %v9356_v13  ;;  %7171 = vmatprep.subr.bf16.mxu0 %v9361_v9  ;;  %v9389_v13 = vld [vmem:[%s13191_s3 + $0x700] ss:$16 sps:$4 sm:$0xff]   ;;  %v9392_v9 = vld [vmem:[%s13191_s3 + $0x708] ss:$16 sps:$4 sm:$0xff]  }
 0x2d0   :  { %7515 = vmatprep.subr.bf16.mxu1 %v9364_v14  ;;  %v9397_v14 = vld [vmem:[%s13191_s3 + $0x724] ss:$16 sps:$4 sm:$0xff]  }
 0x2d2   :  { %7172 = vmatpush1.bf16.msra.mxu0 %v9359_v19  ;;  %v9400_v19 = vld [vmem:[%s13191_s3 + $0x72c] ss:$16 sps:$4 sm:$0xff]  }
 0x2d3   :  { %7516 = vmatpush1.bf16.msra.mxu1 %v9362_v53  ;;  %7173 = vmatprep.subr.bf16.mxu0 %v9367_v54  ;;  %v9395_v53 = vld [vmem:[%s13191_s3 + $0x720] ss:$16 sps:$4 sm:$0xff]   ;;  %v9398_v54 = vld [vmem:[%s13191_s3 + $0x728] ss:$16 sps:$4 sm:$0xff]  }
 0x2d4   :  { %7517 = vmatprep.subr.bf16.mxu1 %v9370_v20  ;;  %v9403_v20 = vld [vmem:[%s13191_s3 + $0x744] ss:$16 sps:$4 sm:$0xff]  }
 0x2d6   :  { %7174 = vmatpush1.bf16.msra.mxu0 %v9365_v21  ;;  %v9406_v21 = vld [vmem:[%s13191_s3 + $0x74c] ss:$16 sps:$4 sm:$0xff]  }
 0x2d7   :  { %7518 = vmatpush1.bf16.msra.mxu1 %v9368_v22  ;;  %7175 = vmatprep.subr.bf16.mxu0 %v9373_v25  ;;  %v9401_v22 = vld [vmem:[%s13191_s3 + $0x740] ss:$16 sps:$4 sm:$0xff]   ;;  %v9404_v25 = vld [vmem:[%s13191_s3 + $0x748] ss:$16 sps:$4 sm:$0xff]  }
 0x2d8   :  { %v3799_v38 = vpop.f32.mrb[12].mxu0  ;;  %7519 = vmatprep.subr.bf16.mxu1 %v9376_v28  ;;  %v3885_v15 = vpop.f32.mrb[12].mxu1  ;;  %v9409_v28 = vld [vmem:[%s13191_s3 + $0x764] ss:$16 sps:$4 sm:$0xff]  }
 0x2d9   :  { %v8945_v26 = vadd.f32 %v3799_v38, %v597_v29  ;;  %v3801_v16 = vpop.f32.mrb[13].mxu0  ;;  %v8949_v18 = vadd.f32 %v3885_v15, %v605_v33  ;;  %v3887_v1 = vpop.f32.mrb[13].mxu1  ;;  %v9421_v38 = vld [vmem:[%s13191_s3 + $0x7a4] ss:$16 sps:$4 sm:$0xff]   ;;  %v9422_v15 = vld [vmem:[%s13191_s3 + $0x7a8] ss:$16 sps:$4 sm:$0xff]  }
 0x2da   :  { %v8946_v62 = vadd.f32 %v3801_v16, %v601_v34  ;;  %v3803_v39 = vpop.f32.mrb[14].mxu0  ;;  %7176 = vmatpush1.bf16.msra.mxu0 %v9371_v35  ;;  %v8950_v41 = vadd.f32 %v3887_v1, %v609_v37  ;;  %v3889_v43 = vpop.f32.mrb[14].mxu1  ;;  %v9415_v35 = vld [vmem:[%s13191_s3 + $0x784] ss:$16 sps:$4 sm:$0xff]   ;;  %v9428_v1 = vld [vmem:[%s13191_s3 + $0x7c8] ss:$16 sps:$4 sm:$0xff]  }
 0x2db   :  { %v8947_v42 = vadd.f32 %v3803_v39, %v597_v29  ;;  %7520 = vmatpush1.bf16.msra.mxu1 %v9374_v56  ;;  %v3805_v44 = vpop.f32.mrb[15].mxu0  ;;  %7177 = vmatprep.subr.bf16.mxu0 %v9379_v59  ;;  %v8951_v46 = vadd.f32 %v3889_v43, %v605_v33  ;;  %v3891_v48 = vpop.f32.mrb[15].mxu1  ;;  %v3906_v49 = vmax.f32 %v8945_v26, 0.0  ;;  %v3908_v27 = vmax.f32 %v8949_v18, 0.0  ;;  %v9412_v29 = vld [vmem:[%s13191_s3 + $0x76c] ss:$16 sps:$4 sm:$0xff]  }
 0x2dc   :  { %v8948_v47 = vadd.f32 %v3805_v44, %v601_v34  ;;  %7521 = vmatprep.subr.bf16.mxu1 %v9382_v60  ;;  %v8952_v50 = vadd.f32 %v3891_v48, %v609_v37  ;;  %v3907_v51 = vmax.f32 %v8946_v62, 0.0  ;;  %v3909_v2 = vmax.f32 %v8950_v41, 0.0  ;;  %v9407_v33 = vld [vmem:[%s13191_s3 + $0x760] ss:$16 sps:$4 sm:$0xff]   ;;  %v9410_v34 = vld [vmem:[%s13191_s3 + $0x768] ss:$16 sps:$4 sm:$0xff]  }
 0x2dd   :  { %v3922_v7 = vmax.f32 %v8947_v42, 0.0  ;;  %v3924_v52 = vmax.f32 %v8951_v46, 0.0  ;;  %v9418_v37 = vld [vmem:[%s13191_s3 + $0x78c] ss:$16 sps:$4 sm:$0xff]   ;;  %v9413_v56 = vld [vmem:[%s13191_s3 + $0x780] ss:$16 sps:$4 sm:$0xff]  }
 0x2de   :  { %v3923_v63 = vmax.f32 %v8948_v47, 0.0  ;;  %7178 = vmatpush1.bf16.msra.mxu0 %v9377_v40  ;;  %v3925_v5 = vmax.f32 %v8952_v50, 0.0  ;;  %v9416_v59 = vld [vmem:[%s13191_s3 + $0x788] ss:$16 sps:$4 sm:$0xff]   ;;  %v9424_v60 = vld [vmem:[%s13191_s3 + $0x7ac] ss:$16 sps:$4 sm:$0xff]  }
 0x2df   :  { %v12250_v4 = vpack.c.bf16 %v3922_v7, %v3906_v49  ;;  %7522 = vmatpush1.bf16.msra.mxu1 %v9380_v23  ;;  %7179 = vmatprep.subr.bf16.mxu0 %v9385_v45  ;;  %v12258_v11 = vpack.c.bf16 %v3924_v52, %v3908_v27  ;;  %v9419_v26 = vld [vmem:[%s13191_s3 + $0x7a0] ss:$16 sps:$4 sm:$0xff]   ;;  %v9427_v16 = vld [vmem:[%s13191_s3 + $0x7c4] ss:$16 sps:$4 sm:$0xff]   ;;  %v9430_v18 = vld [vmem:[%s13191_s3 + $0x7cc] ss:$16 sps:$4 sm:$0xff]  }
 0x2e0   :  { %v12260_v12 = vpack.c.bf16 %v3923_v63, %v3907_v51  ;;  %7523 = vmatprep.subr.bf16.mxu1 %v9388_v32  ;;  %v12265_v58 = vpack.c.bf16 %v3925_v5, %v3909_v2  ;;  %v9425_v62 = vld [vmem:[%s13191_s3 + $0x7c0] ss:$16 sps:$4 sm:$0xff]   ;;  %v9433_v39 = vld [vmem:[%s13191_s3 + $0x7e4] ss:$16 sps:$4 sm:$0xff]   ;;  %v9436_v40 = vld [vmem:[%s13191_s3 + $0x7ec] ss:$16 sps:$4 sm:$0xff]  }
 0x2e1   :  { %v9431_v41 = vld [vmem:[%s13191_s3 + $0x7e0] ss:$16 sps:$4 sm:$0xff]   ;;  %v9434_v42 = vld [vmem:[%s13191_s3 + $0x7e8] ss:$16 sps:$4 sm:$0xff]   ;;  %v9439_v43 = vld [vmem:[%s13191_s3 + $0x804] ss:$16 sps:$4 sm:$0xff]  }
 0x2e2   :  { %7180 = vmatpush1.bf16.msra.mxu0 %v9383_v0  ;;  %v9442_v44 = vld [vmem:[%s13191_s3 + $0x80c] ss:$16 sps:$4 sm:$0xff]   ;;  %v9437_v23 = vld [vmem:[%s13191_s3 + $0x800] ss:$16 sps:$4 sm:$0xff]   ;;  %v9440_v45 = vld [vmem:[%s13191_s3 + $0x808] ss:$16 sps:$4 sm:$0xff]  }
 0x2e3   :  { %7524 = vmatpush1.bf16.msra.mxu1 %v9386_v8  ;;  %7181 = vmatprep.subr.bf16.mxu0 %v9391_v10  ;;  %v9445_v46 = vld [vmem:[%s13191_s3 + $0x824] ss:$16 sps:$4 sm:$0xff]   ;;  %v9448_v47 = vld [vmem:[%s13191_s3 + $0x82c] ss:$16 sps:$4 sm:$0xff]   ;;  %v9443_v48 = vld [vmem:[%s13191_s3 + $0x820] ss:$16 sps:$4 sm:$0xff]  }
 0x2e4   :  { %7525 = vmatprep.subr.bf16.mxu1 %v9394_v3  ;;  %v9446_v32 = vld [vmem:[%s13191_s3 + $0x828] ss:$16 sps:$4 sm:$0xff]   ;;  %v9451_v49 = vld [vmem:[%s13191_s3 + $0x844] ss:$16 sps:$4 sm:$0xff]   ;;  %v9449_v7 = vld [vmem:[%s13191_s3 + $0x840] ss:$16 sps:$4 sm:$0xff]  }
 0x2e5   :  { %v9452_v50 = vld [vmem:[%s13191_s3 + $0x848] ss:$16 sps:$4 sm:$0xff]   ;;  %v9460_v27 = vld [vmem:[%s13191_s3 + $0x86c] ss:$16 sps:$4 sm:$0xff]   ;;  %v9455_v51 = vld [vmem:[%s13191_s3 + $0x860] ss:$16 sps:$4 sm:$0xff]  }
 0x2e6   :  { %7182 = vmatpush1.bf16.msra.mxu0 %v9389_v13  ;;  %v9458_v52 = vld [vmem:[%s13191_s3 + $0x868] ss:$16 sps:$4 sm:$0xff]   ;;  %v9463_v63 = vld [vmem:[%s13191_s3 + $0x884] ss:$16 sps:$4 sm:$0xff]   ;;  %v9466_v0 = vld [vmem:[%s13191_s3 + $0x88c] ss:$16 sps:$4 sm:$0xff]  }
 0x2e7   :  { %7526 = vmatpush1.bf16.msra.mxu1 %v9392_v9  ;;  %7183 = vmatprep.subr.bf16.mxu0 %v9397_v14  ;;  %v9461_v2 = vld [vmem:[%s13191_s3 + $0x880] ss:$16 sps:$4 sm:$0xff]   ;;  %v9464_v5 = vld [vmem:[%s13191_s3 + $0x888] ss:$16 sps:$4 sm:$0xff]   ;;  %v9469_v8 = vld [vmem:[%s13191_s3 + $0x8a4] ss:$16 sps:$4 sm:$0xff]  }
 0x2e8   :  { %7527 = vmatprep.subr.bf16.mxu1 %v9400_v19  ;;  %v9472_v10 = vld [vmem:[%s13191_s3 + $0x8ac] ss:$16 sps:$4 sm:$0xff]   ;;  %v9467_v3 = vld [vmem:[%s13191_s3 + $0x8a0] ss:$16 sps:$4 sm:$0xff]   ;;  %v9470_v13 = vld [vmem:[%s13191_s3 + $0x8a8] ss:$16 sps:$4 sm:$0xff]  }
 0x2e9   :  { %v9475_v9 = vld [vmem:[%s13191_s3 + $0x8c4] ss:$16 sps:$4 sm:$0xff]   ;;  %v9478_v14 = vld [vmem:[%s13191_s3 + $0x8cc] ss:$16 sps:$4 sm:$0xff]   ;;  %v9473_v19 = vld [vmem:[%s13191_s3 + $0x8c0] ss:$16 sps:$4 sm:$0xff]  }
 0x2ea   :  { %7184 = vmatpush1.bf16.msra.mxu0 %v9395_v53  ;;  %v9476_v53 = vld [vmem:[%s13191_s3 + $0x8c8] ss:$16 sps:$4 sm:$0xff]  }
 0x2eb   :  { %7528 = vmatpush1.bf16.msra.mxu1 %v9398_v54  ;;  %7185 = vmatprep.subr.bf16.mxu0 %v9403_v20  ;;  %v9481_v54 = vld [vmem:[%s13191_s3 + $0x8e4] ss:$16 sps:$4 sm:$0xff]   ;;  %v9484_v20 = vld [vmem:[%s13191_s3 + $0x8ec] ss:$16 sps:$4 sm:$0xff]  }
 0x2ec   :  { %7529 = vmatprep.subr.bf16.mxu1 %v9406_v21  ;;  %v9479_v21 = vld [vmem:[%s13191_s3 + $0x8e0] ss:$16 sps:$4 sm:$0xff]  }
 0x2ee   :  { %7186 = vmatpush1.bf16.msra.mxu0 %v9401_v22  ;;  %v9482_v22 = vld [vmem:[%s13191_s3 + $0x8e8] ss:$16 sps:$4 sm:$0xff]  }
 0x2ef   :  { %7530 = vmatpush1.bf16.msra.mxu1 %v9404_v25  ;;  %7187 = vmatprep.subr.bf16.mxu0 %v9409_v28  ;;  %v9487_v25 = vld [vmem:[%s13191_s3 + $0x904] ss:$16 sps:$4 sm:$0xff]   ;;  %v9490_v28 = vld [vmem:[%s13191_s3 + $0x90c] ss:$16 sps:$4 sm:$0xff]  }
 0x2f0   :  { %7531 = vmatprep.subr.bf16.mxu1 %v9412_v29  ;;  %v9485_v29 = vld [vmem:[%s13191_s3 + $0x900] ss:$16 sps:$4 sm:$0xff]  }
 0x2f2   :  { %7188 = vmatpush1.bf16.msra.mxu0 %v9407_v33  ;;  %v9488_v33 = vld [vmem:[%s13191_s3 + $0x908] ss:$16 sps:$4 sm:$0xff]  }
 0x2f3   :  { %7532 = vmatpush1.bf16.msra.mxu1 %v9410_v34  ;;  %7189 = vmatprep.subr.bf16.mxu0 %v9415_v35  ;;  %v9493_v34 = vld [vmem:[%s13191_s3 + $0x924] ss:$16 sps:$4 sm:$0xff]   ;;  %v9496_v35 = vld [vmem:[%s13191_s3 + $0x92c] ss:$16 sps:$4 sm:$0xff]  }
 0x2f4   :  { %7533 = vmatprep.subr.bf16.mxu1 %v9418_v37  ;;  %v9491_v37 = vld [vmem:[%s13191_s3 + $0x920] ss:$16 sps:$4 sm:$0xff]  }
 0x2f6   :  { %7190 = vmatpush1.bf16.msra.mxu0 %v9413_v56  ;;  %v9494_v56 = vld [vmem:[%s13191_s3 + $0x928] ss:$16 sps:$4 sm:$0xff]  }
 0x2f7   :  { %7534 = vmatpush1.bf16.msra.mxu1 %v9416_v59  ;;  %7191 = vmatprep.subr.bf16.mxu0 %v9421_v38  ;;  %v9499_v59 = vld [vmem:[%s13191_s3 + $0x944] ss:$16 sps:$4 sm:$0xff]   ;;  %v9502_v38 = vld [vmem:[%s13191_s3 + $0x94c] ss:$16 sps:$4 sm:$0xff]  }
 0x2f8   :  { %7535 = vmatprep.subr.bf16.mxu1 %v9424_v60  ;;  %v9497_v60 = vld [vmem:[%s13191_s3 + $0x940] ss:$16 sps:$4 sm:$0xff]  }
 0x2fa   :  { %7192 = vmatpush1.bf16.msra.mxu0 %v9419_v26  ;;  %v9500_v26 = vld [vmem:[%s13191_s3 + $0x948] ss:$16 sps:$4 sm:$0xff]  }
 0x2fb   :  { %7536 = vmatpush1.bf16.msra.mxu1 %v9422_v15  ;;  %7193 = vmatprep.subr.bf16.mxu0 %v9427_v16  ;;  %v9505_v15 = vld [vmem:[%s13191_s3 + $0x964] ss:$16 sps:$4 sm:$0xff]   ;;  %v9508_v16 = vld [vmem:[%s13191_s3 + $0x96c] ss:$16 sps:$4 sm:$0xff]  }
 0x2fc   :  { %7537 = vmatprep.subr.bf16.mxu1 %v9430_v18  ;;  %v9503_v18 = vld [vmem:[%s13191_s3 + $0x960] ss:$16 sps:$4 sm:$0xff]  }
 0x2fe   :  { %7194 = vmatpush1.bf16.msra.mxu0 %v9425_v62  ;;  %v9506_v62 = vld [vmem:[%s13191_s3 + $0x968] ss:$16 sps:$4 sm:$0xff]  }
 0x2ff   :  { %7538 = vmatpush1.bf16.msra.mxu1 %v9428_v1  ;;  %7195 = vmatprep.subr.bf16.mxu0 %v9433_v39  ;;  %v9511_v1 = vld [vmem:[%s13191_s3 + $0x984] ss:$16 sps:$4 sm:$0xff]   ;;  %v9514_v39 = vld [vmem:[%s13191_s3 + $0x98c] ss:$16 sps:$4 sm:$0xff]  }
 0x300   :  { %7539 = vmatprep.subr.bf16.mxu1 %v9436_v40  ;;  %v9509_v40 = vld [vmem:[%s13191_s3 + $0x980] ss:$16 sps:$4 sm:$0xff]  }
 0x302   :  { %7196 = vmatpush1.bf16.msra.mxu0 %v9431_v41  ;;  %v9512_v41 = vld [vmem:[%s13191_s3 + $0x988] ss:$16 sps:$4 sm:$0xff]  }
 0x303   :  { %7540 = vmatpush1.bf16.msra.mxu1 %v9434_v42  ;;  %7208 = vmatprep.subr.bf16.mxu0 %v9439_v43  ;;  %v9517_v42 = vld [vmem:[%s13191_s3 + $0x9a4] ss:$16 sps:$4 sm:$0xff]   ;;  %v9520_v43 = vld [vmem:[%s13191_s3 + $0x9ac] ss:$16 sps:$4 sm:$0xff]  }
 0x304   :  { %7552 = vmatprep.subr.bf16.mxu1 %v9442_v44  ;;  %v9515_v44 = vld [vmem:[%s13191_s3 + $0x9a0] ss:$16 sps:$4 sm:$0xff]  }
 0x305   :  { %7198 = vmatmul.mubr.bf16.vlgmr.msra.gmra.mrb[16].mxu0 %v11448_v6 }
 0x306   :  { %7542 = vmatmul.mubr.bf16.vlgmr.msra.gmra.mrb[16].mxu1 %v11448_v6  ;;  %7209 = vmatpush1.bf16.msra.mxu0 %v9437_v23  ;;  %v9454_v6 = vld [vmem:[%s13191_s3 + $0x84c] ss:$16 sps:$4 sm:$0xff]   ;;  %v9518_v23 = vld [vmem:[%s13191_s3 + $0x9a8] ss:$16 sps:$4 sm:$0xff]  }
 0x307   :  { %7240 = vmatprep.mubr.bf16.mxu0 %v11851_v57  ;;  %7553 = vmatpush1.bf16.msra.mxu1 %v9440_v45  ;;  %v9523_v45 = vld [vmem:[%s13191_s3 + $0x9c4] ss:$16 sps:$4 sm:$0xff]  }
 0x308   :  { %7584 = vmatprep.mubr.bf16.mxu1 %v11851_v57  ;;  %7210 = vmatprep.subr.bf16.mxu0 %v9445_v46  ;;  %v9457_v57 = vld [vmem:[%s13191_s3 + $0x864] ss:$16 sps:$4 sm:$0xff]   ;;  %v9526_v46 = vld [vmem:[%s13191_s3 + $0x9cc] ss:$16 sps:$4 sm:$0xff]  }
 0x309   :  { %7554 = vmatprep.subr.bf16.mxu1 %v9448_v47  ;;  %v9521_v47 = vld [vmem:[%s13191_s3 + $0x9c0] ss:$16 sps:$4 sm:$0xff]  }
 0x30a   :  { %7211 = vmatpush1.bf16.msra.mxu0 %v9443_v48  ;;  %v9524_v48 = vld [vmem:[%s13191_s3 + $0x9c8] ss:$16 sps:$4 sm:$0xff]  }
 0x30b   :  { %7555 = vmatpush1.bf16.msra.mxu1 %v9446_v32  ;;  %7212 = vmatprep.subr.bf16.mxu0 %v9451_v49  ;;  %v9529_v32 = vld [vmem:[%s13191_s3 + $0x9e4] ss:$16 sps:$4 sm:$0xff]   ;;  %v9532_v49 = vld [vmem:[%s13191_s3 + $0x9ec] ss:$16 sps:$4 sm:$0xff]  }
 0x30c   :  { %7556 = vmatprep.subr.bf16.mxu1 %v9454_v6  ;;  %v9527_v6 = vld [vmem:[%s13191_s3 + $0x9e0] ss:$16 sps:$4 sm:$0xff]  }
 0x30e   :  { %7213 = vmatpush1.bf16.msra.mxu0 %v9449_v7  ;;  %v9530_v7 = vld [vmem:[%s13191_s3 + $0x9e8] ss:$16 sps:$4 sm:$0xff]  }
 0x30f   :  { %7557 = vmatpush1.bf16.msra.mxu1 %v9452_v50  ;;  %7214 = vmatprep.subr.bf16.mxu0 %v9457_v57  ;;  %v9535_v50 = vld [vmem:[%s13191_s3 + $0xa04] ss:$16 sps:$4 sm:$0xff]   ;;  %v9538_v57 = vld [vmem:[%s13191_s3 + $0xa0c] ss:$16 sps:$4 sm:$0xff]  }
 0x310   :  { %7558 = vmatprep.subr.bf16.mxu1 %v9460_v27  ;;  %v9533_v27 = vld [vmem:[%s13191_s3 + $0xa00] ss:$16 sps:$4 sm:$0xff]  }
 0x312   :  { %7215 = vmatpush1.bf16.msra.mxu0 %v9455_v51  ;;  %v9536_v51 = vld [vmem:[%s13191_s3 + $0xa08] ss:$16 sps:$4 sm:$0xff]  }
 0x313   :  { %7559 = vmatpush1.bf16.msra.mxu1 %v9458_v52  ;;  %7216 = vmatprep.subr.bf16.mxu0 %v9463_v63  ;;  %v9541_v52 = vld [vmem:[%s13191_s3 + $0xa24] ss:$16 sps:$4 sm:$0xff]   ;;  %v9544_v63 = vld [vmem:[%s13191_s3 + $0xa2c] ss:$16 sps:$4 sm:$0xff]  }
 0x314   :  { %7560 = vmatprep.subr.bf16.mxu1 %v9466_v0  ;;  %v9539_v0 = vld [vmem:[%s13191_s3 + $0xa20] ss:$16 sps:$4 sm:$0xff]  }
 0x316   :  { %7217 = vmatpush1.bf16.msra.mxu0 %v9461_v2  ;;  %v9542_v2 = vld [vmem:[%s13191_s3 + $0xa28] ss:$16 sps:$4 sm:$0xff]  }
 0x317   :  { %7561 = vmatpush1.bf16.msra.mxu1 %v9464_v5  ;;  %7218 = vmatprep.subr.bf16.mxu0 %v9469_v8  ;;  %v9547_v5 = vld [vmem:[%s13191_s3 + $0xa44] ss:$16 sps:$4 sm:$0xff]   ;;  %v9545_v8 = vld [vmem:[%s13191_s3 + $0xa40] ss:$16 sps:$4 sm:$0xff]  }
 0x318   :  { %7562 = vmatprep.subr.bf16.mxu1 %v9472_v10  ;;  %v9548_v10 = vld [vmem:[%s13191_s3 + $0xa48] ss:$16 sps:$4 sm:$0xff]  }
 0x31a   :  { %7219 = vmatpush1.bf16.msra.mxu0 %v9467_v3  ;;  %v9556_v3 = vld [vmem:[%s13191_s3 + $0xa6c] ss:$16 sps:$4 sm:$0xff]  }
 0x31b   :  { %7563 = vmatpush1.bf16.msra.mxu1 %v9470_v13  ;;  %7220 = vmatprep.subr.bf16.mxu0 %v9475_v9  ;;  %v9551_v13 = vld [vmem:[%s13191_s3 + $0xa60] ss:$16 sps:$4 sm:$0xff]   ;;  %v9554_v9 = vld [vmem:[%s13191_s3 + $0xa68] ss:$16 sps:$4 sm:$0xff]  }
 0x31c   :  { %7564 = vmatprep.subr.bf16.mxu1 %v9478_v14  ;;  %v9559_v14 = vld [vmem:[%s13191_s3 + $0xa84] ss:$16 sps:$4 sm:$0xff]  }
 0x31e   :  { %7221 = vmatpush1.bf16.msra.mxu0 %v9473_v19  ;;  %v9562_v19 = vld [vmem:[%s13191_s3 + $0xa8c] ss:$16 sps:$4 sm:$0xff]  }
 0x31f   :  { %7565 = vmatpush1.bf16.msra.mxu1 %v9476_v53  ;;  %7222 = vmatprep.subr.bf16.mxu0 %v9481_v54  ;;  %v9557_v53 = vld [vmem:[%s13191_s3 + $0xa80] ss:$16 sps:$4 sm:$0xff]   ;;  %v9560_v54 = vld [vmem:[%s13191_s3 + $0xa88] ss:$16 sps:$4 sm:$0xff]  }
 0x320   :  { %7566 = vmatprep.subr.bf16.mxu1 %v9484_v20  ;;  %v9565_v20 = vld [vmem:[%s13191_s3 + $0xaa4] ss:$16 sps:$4 sm:$0xff]  }
 0x322   :  { %7223 = vmatpush1.bf16.msra.mxu0 %v9479_v21  ;;  %v9568_v21 = vld [vmem:[%s13191_s3 + $0xaac] ss:$16 sps:$4 sm:$0xff]  }
 0x323   :  { %7567 = vmatpush1.bf16.msra.mxu1 %v9482_v22  ;;  %7224 = vmatprep.subr.bf16.mxu0 %v9487_v25  ;;  %v9563_v22 = vld [vmem:[%s13191_s3 + $0xaa0] ss:$16 sps:$4 sm:$0xff]   ;;  %v9566_v25 = vld [vmem:[%s13191_s3 + $0xaa8] ss:$16 sps:$4 sm:$0xff]  }
 0x324   :  { %7568 = vmatprep.subr.bf16.mxu1 %v9490_v28  ;;  %v9571_v28 = vld [vmem:[%s13191_s3 + $0xac4] ss:$16 sps:$4 sm:$0xff]  }
 0x326   :  { %7225 = vmatpush1.bf16.msra.mxu0 %v9485_v29  ;;  %v9574_v29 = vld [vmem:[%s13191_s3 + $0xacc] ss:$16 sps:$4 sm:$0xff]  }
 0x327   :  { %7569 = vmatpush1.bf16.msra.mxu1 %v9488_v33  ;;  %7226 = vmatprep.subr.bf16.mxu0 %v9493_v34  ;;  %v9569_v33 = vld [vmem:[%s13191_s3 + $0xac0] ss:$16 sps:$4 sm:$0xff]   ;;  %v9572_v34 = vld [vmem:[%s13191_s3 + $0xac8] ss:$16 sps:$4 sm:$0xff]  }
 0x328   :  { %7570 = vmatprep.subr.bf16.mxu1 %v9496_v35  ;;  %v9577_v35 = vld [vmem:[%s13191_s3 + $0xae4] ss:$16 sps:$4 sm:$0xff]  }
 0x32a   :  { %7227 = vmatpush1.bf16.msra.mxu0 %v9491_v37  ;;  %v9580_v37 = vld [vmem:[%s13191_s3 + $0xaec] ss:$16 sps:$4 sm:$0xff]  }
 0x32b   :  { %7571 = vmatpush1.bf16.msra.mxu1 %v9494_v56  ;;  %7228 = vmatprep.subr.bf16.mxu0 %v9499_v59  ;;  %v9575_v56 = vld [vmem:[%s13191_s3 + $0xae0] ss:$16 sps:$4 sm:$0xff]   ;;  %v9578_v59 = vld [vmem:[%s13191_s3 + $0xae8] ss:$16 sps:$4 sm:$0xff]  }
 0x32c   :  { %7572 = vmatprep.subr.bf16.mxu1 %v9502_v38  ;;  %v9583_v38 = vld [vmem:[%s13191_s3 + $0xb04] ss:$16 sps:$4 sm:$0xff]  }
 0x32e   :  { %7229 = vmatpush1.bf16.msra.mxu0 %v9497_v60  ;;  %v9586_v60 = vld [vmem:[%s13191_s3 + $0xb0c] ss:$16 sps:$4 sm:$0xff]  }
 0x32f   :  { %7573 = vmatpush1.bf16.msra.mxu1 %v9500_v26  ;;  %7230 = vmatprep.subr.bf16.mxu0 %v9505_v15  ;;  %v9581_v26 = vld [vmem:[%s13191_s3 + $0xb00] ss:$16 sps:$4 sm:$0xff]   ;;  %v9584_v15 = vld [vmem:[%s13191_s3 + $0xb08] ss:$16 sps:$4 sm:$0xff]  }
 0x330   :  { %7574 = vmatprep.subr.bf16.mxu1 %v9508_v16  ;;  %v9589_v16 = vld [vmem:[%s13191_s3 + $0xb24] ss:$16 sps:$4 sm:$0xff]  }
 0x332   :  { %7231 = vmatpush1.bf16.msra.mxu0 %v9503_v18  ;;  %v9592_v18 = vld [vmem:[%s13191_s3 + $0xb2c] ss:$16 sps:$4 sm:$0xff]  }
 0x333   :  { %7575 = vmatpush1.bf16.msra.mxu1 %v9506_v62  ;;  %7232 = vmatprep.subr.bf16.mxu0 %v9511_v1  ;;  %v9587_v62 = vld [vmem:[%s13191_s3 + $0xb20] ss:$16 sps:$4 sm:$0xff]   ;;  %v9590_v1 = vld [vmem:[%s13191_s3 + $0xb28] ss:$16 sps:$4 sm:$0xff]  }
 0x334   :  { %7576 = vmatprep.subr.bf16.mxu1 %v9514_v39  ;;  %v9595_v39 = vld [vmem:[%s13191_s3 + $0xb44] ss:$16 sps:$4 sm:$0xff]  }
 0x336   :  { %7233 = vmatpush1.bf16.msra.mxu0 %v9509_v40  ;;  %v9598_v40 = vld [vmem:[%s13191_s3 + $0xb4c] ss:$16 sps:$4 sm:$0xff]  }
 0x337   :  { %7577 = vmatpush1.bf16.msra.mxu1 %v9512_v41  ;;  %7234 = vmatprep.subr.bf16.mxu0 %v9517_v42  ;;  %v9593_v41 = vld [vmem:[%s13191_s3 + $0xb40] ss:$16 sps:$4 sm:$0xff]   ;;  %v9596_v42 = vld [vmem:[%s13191_s3 + $0xb48] ss:$16 sps:$4 sm:$0xff]  }
 0x338   :  { %7578 = vmatprep.subr.bf16.mxu1 %v9520_v43  ;;  %v9601_v43 = vld [vmem:[%s13191_s3 + $0xb64] ss:$16 sps:$4 sm:$0xff]  }
 0x33a   :  { %7235 = vmatpush1.bf16.msra.mxu0 %v9515_v44  ;;  %v9604_v44 = vld [vmem:[%s13191_s3 + $0xb6c] ss:$16 sps:$4 sm:$0xff]  }
 0x33b   :  { %7579 = vmatpush1.bf16.msra.mxu1 %v9518_v23  ;;  %7236 = vmatprep.subr.bf16.mxu0 %v9523_v45  ;;  %v9599_v23 = vld [vmem:[%s13191_s3 + $0xb60] ss:$16 sps:$4 sm:$0xff]   ;;  %v9602_v45 = vld [vmem:[%s13191_s3 + $0xb68] ss:$16 sps:$4 sm:$0xff]  }
 0x33c   :  { %7580 = vmatprep.subr.bf16.mxu1 %v9526_v46  ;;  %v9607_v46 = vld [vmem:[%s13191_s3 + $0xb84] ss:$16 sps:$4 sm:$0xff]  }
 0x33e   :  { %7237 = vmatpush1.bf16.msra.mxu0 %v9521_v47  ;;  %v9610_v47 = vld [vmem:[%s13191_s3 + $0xb8c] ss:$16 sps:$4 sm:$0xff]  }
 0x33f   :  { %7581 = vmatpush1.bf16.msra.mxu1 %v9524_v48  ;;  %7238 = vmatprep.subr.bf16.mxu0 %v9529_v32  ;;  %v9605_v48 = vld [vmem:[%s13191_s3 + $0xb80] ss:$16 sps:$4 sm:$0xff]   ;;  %v9608_v32 = vld [vmem:[%s13191_s3 + $0xb88] ss:$16 sps:$4 sm:$0xff]  }
 0x340   :  { %7582 = vmatprep.subr.bf16.mxu1 %v9532_v49  ;;  %v9613_v49 = vld [vmem:[%s13191_s3 + $0xba4] ss:$16 sps:$4 sm:$0xff]  }
 0x342   :  { %7239 = vmatpush1.bf16.msra.mxu0 %v9527_v6  ;;  %v9616_v6 = vld [vmem:[%s13191_s3 + $0xbac] ss:$16 sps:$4 sm:$0xff]  }
 0x343   :  { %7583 = vmatpush1.bf16.msra.mxu1 %v9530_v7  ;;  %7251 = vmatprep.subr.bf16.mxu0 %v9535_v50  ;;  %v9611_v7 = vld [vmem:[%s13191_s3 + $0xba0] ss:$16 sps:$4 sm:$0xff]   ;;  %v9614_v50 = vld [vmem:[%s13191_s3 + $0xba8] ss:$16 sps:$4 sm:$0xff]  }
 0x344   :  { %7595 = vmatprep.subr.bf16.mxu1 %v9538_v57  ;;  %v9619_v57 = vld [vmem:[%s13191_s3 + $0xbc4] ss:$16 sps:$4 sm:$0xff]  }
 0x345   :  { %7241 = vmatmul.mubr.bf16.vlgmr.msra.gmra.mrb[16].mxu0 %v11847_v36 }
 0x346   :  { %7585 = vmatmul.mubr.bf16.vlgmr.msra.gmra.mrb[16].mxu1 %v11847_v36  ;;  %7252 = vmatpush1.bf16.msra.mxu0 %v9533_v27  ;;  %v9550_v36 = vld [vmem:[%s13191_s3 + $0xa4c] ss:$16 sps:$4 sm:$0xff]  }
 0x347   :  { %7283 = vmatprep.mubr.bf16.mxu0 %v11853_v61  ;;  %7596 = vmatpush1.bf16.msra.mxu1 %v9536_v51  ;;  %v9622_v27 = vld [vmem:[%s13191_s3 + $0xbcc] ss:$16 sps:$4 sm:$0xff]   ;;  %v9617_v51 = vld [vmem:[%s13191_s3 + $0xbc0] ss:$16 sps:$4 sm:$0xff]  }
 0x348   :  { %7627 = vmatprep.mubr.bf16.mxu1 %v11853_v61  ;;  %7253 = vmatprep.subr.bf16.mxu0 %v9541_v52  ;;  %v9553_v61 = vld [vmem:[%s13191_s3 + $0xa64] ss:$16 sps:$4 sm:$0xff]   ;;  %v9620_v52 = vld [vmem:[%s13191_s3 + $0xbc8] ss:$16 sps:$4 sm:$0xff]  }
 0x349   :  { %7597 = vmatprep.subr.bf16.mxu1 %v9544_v63  ;;  %v9625_v63 = vld [vmem:[%s13191_s3 + $0xbe4] ss:$16 sps:$4 sm:$0xff]  }
 0x34a   :  { %7254 = vmatpush1.bf16.msra.mxu0 %v9539_v0  ;;  %v9628_v0 = vld [vmem:[%s13191_s3 + $0xbec] ss:$16 sps:$4 sm:$0xff]  }
 0x34b   :  { %7598 = vmatpush1.bf16.msra.mxu1 %v9542_v2  ;;  %7255 = vmatprep.subr.bf16.mxu0 %v9547_v5  ;;  %v9623_v2 = vld [vmem:[%s13191_s3 + $0xbe0] ss:$16 sps:$4 sm:$0xff]   ;;  %v9626_v5 = vld [vmem:[%s13191_s3 + $0xbe8] ss:$16 sps:$4 sm:$0xff]  }
 0x34c   :  { %7599 = vmatprep.subr.bf16.mxu1 %v9550_v36  ;;  %v9631_v36 = vld [vmem:[%s13191_s3 + $0xc04] ss:$16 sps:$4 sm:$0xff]  }
 0x34e   :  { %7256 = vmatpush1.bf16.msra.mxu0 %v9545_v8  ;;  %v9634_v8 = vld [vmem:[%s13191_s3 + $0xc0c] ss:$16 sps:$4 sm:$0xff]  }
 0x34f   :  { %7600 = vmatpush1.bf16.msra.mxu1 %v9548_v10  ;;  %7257 = vmatprep.subr.bf16.mxu0 %v9553_v61  ;;  %v9629_v10 = vld [vmem:[%s13191_s3 + $0xc00] ss:$16 sps:$4 sm:$0xff]   ;;  %v9632_v61 = vld [vmem:[%s13191_s3 + $0xc08] ss:$16 sps:$4 sm:$0xff]  }
 0x350   :  { %7601 = vmatprep.subr.bf16.mxu1 %v9556_v3  ;;  %v9637_v3 = vld [vmem:[%s13191_s3 + $0xc24] ss:$16 sps:$4 sm:$0xff]  }
 0x352   :  { %7258 = vmatpush1.bf16.msra.mxu0 %v9551_v13  ;;  %v9640_v13 = vld [vmem:[%s13191_s3 + $0xc2c] ss:$16 sps:$4 sm:$0xff]  }
 0x353   :  { %7602 = vmatpush1.bf16.msra.mxu1 %v9554_v9  ;;  %7259 = vmatprep.subr.bf16.mxu0 %v9559_v14  ;;  %v9635_v9 = vld [vmem:[%s13191_s3 + $0xc20] ss:$16 sps:$4 sm:$0xff]   ;;  %v9638_v14 = vld [vmem:[%s13191_s3 + $0xc28] ss:$16 sps:$4 sm:$0xff]  }
 0x354   :  { %7603 = vmatprep.subr.bf16.mxu1 %v9562_v19  ;;  %v9643_v19 = vld [vmem:[%s13191_s3 + $0xc44] ss:$16 sps:$4 sm:$0xff]  }
 0x356   :  { %7260 = vmatpush1.bf16.msra.mxu0 %v9557_v53  ;;  %v9641_v53 = vld [vmem:[%s13191_s3 + $0xc40] ss:$16 sps:$4 sm:$0xff]  }
 0x357   :  { %7604 = vmatpush1.bf16.msra.mxu1 %v9560_v54  ;;  %7261 = vmatprep.subr.bf16.mxu0 %v9565_v20  ;;  %v9644_v54 = vld [vmem:[%s13191_s3 + $0xc48] ss:$16 sps:$4 sm:$0xff]   ;;  %v9652_v20 = vld [vmem:[%s13191_s3 + $0xc6c] ss:$16 sps:$4 sm:$0xff]  }
 0x358   :  { %7605 = vmatprep.subr.bf16.mxu1 %v9568_v21  ;;  %v9647_v21 = vld [vmem:[%s13191_s3 + $0xc60] ss:$16 sps:$4 sm:$0xff]  }
 0x35a   :  { %7262 = vmatpush1.bf16.msra.mxu0 %v9563_v22  ;;  %v9650_v22 = vld [vmem:[%s13191_s3 + $0xc68] ss:$16 sps:$4 sm:$0xff]  }
 0x35b   :  { %7606 = vmatpush1.bf16.msra.mxu1 %v9566_v25  ;;  %7263 = vmatprep.subr.bf16.mxu0 %v9571_v28  ;;  %v9655_v25 = vld [vmem:[%s13191_s3 + $0xc84] ss:$16 sps:$4 sm:$0xff]   ;;  %v9658_v28 = vld [vmem:[%s13191_s3 + $0xc8c] ss:$16 sps:$4 sm:$0xff]  }
 0x35c   :  { %7607 = vmatprep.subr.bf16.mxu1 %v9574_v29  ;;  %v9653_v29 = vld [vmem:[%s13191_s3 + $0xc80] ss:$16 sps:$4 sm:$0xff]  }
 0x35e   :  { %7264 = vmatpush1.bf16.msra.mxu0 %v9569_v33  ;;  %v9656_v33 = vld [vmem:[%s13191_s3 + $0xc88] ss:$16 sps:$4 sm:$0xff]  }
 0x35f   :  { %7608 = vmatpush1.bf16.msra.mxu1 %v9572_v34  ;;  %7265 = vmatprep.subr.bf16.mxu0 %v9577_v35  ;;  %v9661_v34 = vld [vmem:[%s13191_s3 + $0xca4] ss:$16 sps:$4 sm:$0xff]   ;;  %v9664_v35 = vld [vmem:[%s13191_s3 + $0xcac] ss:$16 sps:$4 sm:$0xff]  }
 0x360   :  { %7609 = vmatprep.subr.bf16.mxu1 %v9580_v37  ;;  %v9659_v37 = vld [vmem:[%s13191_s3 + $0xca0] ss:$16 sps:$4 sm:$0xff]  }
 0x362   :  { %7266 = vmatpush1.bf16.msra.mxu0 %v9575_v56  ;;  %v9662_v56 = vld [vmem:[%s13191_s3 + $0xca8] ss:$16 sps:$4 sm:$0xff]  }
 0x363   :  { %7610 = vmatpush1.bf16.msra.mxu1 %v9578_v59  ;;  %7267 = vmatprep.subr.bf16.mxu0 %v9583_v38  ;;  %v9667_v59 = vld [vmem:[%s13191_s3 + $0xcc4] ss:$16 sps:$4 sm:$0xff]   ;;  %v9670_v38 = vld [vmem:[%s13191_s3 + $0xccc] ss:$16 sps:$4 sm:$0xff]  }
 0x364   :  { %7611 = vmatprep.subr.bf16.mxu1 %v9586_v60  ;;  %v9665_v60 = vld [vmem:[%s13191_s3 + $0xcc0] ss:$16 sps:$4 sm:$0xff]  }
 0x366   :  { %7268 = vmatpush1.bf16.msra.mxu0 %v9581_v26  ;;  %v9668_v26 = vld [vmem:[%s13191_s3 + $0xcc8] ss:$16 sps:$4 sm:$0xff]  }
 0x367   :  { %7612 = vmatpush1.bf16.msra.mxu1 %v9584_v15  ;;  %7269 = vmatprep.subr.bf16.mxu0 %v9589_v16  ;;  %v9673_v15 = vld [vmem:[%s13191_s3 + $0xce4] ss:$16 sps:$4 sm:$0xff]   ;;  %v9676_v16 = vld [vmem:[%s13191_s3 + $0xcec] ss:$16 sps:$4 sm:$0xff]  }
 0x368   :  { %7613 = vmatprep.subr.bf16.mxu1 %v9592_v18  ;;  %v9671_v18 = vld [vmem:[%s13191_s3 + $0xce0] ss:$16 sps:$4 sm:$0xff]  }
 0x36a   :  { %7270 = vmatpush1.bf16.msra.mxu0 %v9587_v62  ;;  %v9674_v62 = vld [vmem:[%s13191_s3 + $0xce8] ss:$16 sps:$4 sm:$0xff]  }
 0x36b   :  { %7614 = vmatpush1.bf16.msra.mxu1 %v9590_v1  ;;  %7271 = vmatprep.subr.bf16.mxu0 %v9595_v39  ;;  %v9679_v1 = vld [vmem:[%s13191_s3 + $0xd04] ss:$16 sps:$4 sm:$0xff]   ;;  %v9682_v39 = vld [vmem:[%s13191_s3 + $0xd0c] ss:$16 sps:$4 sm:$0xff]  }
 0x36c   :  { %7615 = vmatprep.subr.bf16.mxu1 %v9598_v40  ;;  %v9677_v40 = vld [vmem:[%s13191_s3 + $0xd00] ss:$16 sps:$4 sm:$0xff]  }
 0x36e   :  { %7272 = vmatpush1.bf16.msra.mxu0 %v9593_v41  ;;  %v9680_v41 = vld [vmem:[%s13191_s3 + $0xd08] ss:$16 sps:$4 sm:$0xff]  }
 0x36f   :  { %7616 = vmatpush1.bf16.msra.mxu1 %v9596_v42  ;;  %7273 = vmatprep.subr.bf16.mxu0 %v9601_v43  ;;  %v9685_v42 = vld [vmem:[%s13191_s3 + $0xd24] ss:$16 sps:$4 sm:$0xff]   ;;  %v9688_v43 = vld [vmem:[%s13191_s3 + $0xd2c] ss:$16 sps:$4 sm:$0xff]  }
 0x370   :  { %7617 = vmatprep.subr.bf16.mxu1 %v9604_v44  ;;  %v9683_v44 = vld [vmem:[%s13191_s3 + $0xd20] ss:$16 sps:$4 sm:$0xff]  }
 0x372   :  { %7274 = vmatpush1.bf16.msra.mxu0 %v9599_v23  ;;  %v9686_v23 = vld [vmem:[%s13191_s3 + $0xd28] ss:$16 sps:$4 sm:$0xff]  }
 0x373   :  { %7618 = vmatpush1.bf16.msra.mxu1 %v9602_v45  ;;  %7275 = vmatprep.subr.bf16.mxu0 %v9607_v46  ;;  %v9691_v45 = vld [vmem:[%s13191_s3 + $0xd44] ss:$16 sps:$4 sm:$0xff]   ;;  %v9694_v46 = vld [vmem:[%s13191_s3 + $0xd4c] ss:$16 sps:$4 sm:$0xff]  }
 0x374   :  { %7619 = vmatprep.subr.bf16.mxu1 %v9610_v47  ;;  %v9689_v47 = vld [vmem:[%s13191_s3 + $0xd40] ss:$16 sps:$4 sm:$0xff]  }
 0x376   :  { %7276 = vmatpush1.bf16.msra.mxu0 %v9605_v48  ;;  %v9692_v48 = vld [vmem:[%s13191_s3 + $0xd48] ss:$16 sps:$4 sm:$0xff]  }
 0x377   :  { %7620 = vmatpush1.bf16.msra.mxu1 %v9608_v32  ;;  %7277 = vmatprep.subr.bf16.mxu0 %v9613_v49  ;;  %v9697_v32 = vld [vmem:[%s13191_s3 + $0xd64] ss:$16 sps:$4 sm:$0xff]   ;;  %v9700_v49 = vld [vmem:[%s13191_s3 + $0xd6c] ss:$16 sps:$4 sm:$0xff]  }
 0x378   :  { %7621 = vmatprep.subr.bf16.mxu1 %v9616_v6  ;;  %v9695_v6 = vld [vmem:[%s13191_s3 + $0xd60] ss:$16 sps:$4 sm:$0xff]  }
 0x37a   :  { %7278 = vmatpush1.bf16.msra.mxu0 %v9611_v7  ;;  %v9698_v7 = vld [vmem:[%s13191_s3 + $0xd68] ss:$16 sps:$4 sm:$0xff]  }
 0x37b   :  { %7622 = vmatpush1.bf16.msra.mxu1 %v9614_v50  ;;  %7279 = vmatprep.subr.bf16.mxu0 %v9619_v57  ;;  %v9703_v50 = vld [vmem:[%s13191_s3 + $0xd84] ss:$16 sps:$4 sm:$0xff]   ;;  %v9706_v57 = vld [vmem:[%s13191_s3 + $0xd8c] ss:$16 sps:$4 sm:$0xff]  }
 0x37c   :  { %7623 = vmatprep.subr.bf16.mxu1 %v9622_v27  ;;  %v9701_v27 = vld [vmem:[%s13191_s3 + $0xd80] ss:$16 sps:$4 sm:$0xff]  }
 0x37e   :  { %7280 = vmatpush1.bf16.msra.mxu0 %v9617_v51  ;;  %v9704_v51 = vld [vmem:[%s13191_s3 + $0xd88] ss:$16 sps:$4 sm:$0xff]  }
 0x37f   :  { %7624 = vmatpush1.bf16.msra.mxu1 %v9620_v52  ;;  %7281 = vmatprep.subr.bf16.mxu0 %v9625_v63  ;;  %v9709_v52 = vld [vmem:[%s13191_s3 + $0xda4] ss:$16 sps:$4 sm:$0xff]   ;;  %v9712_v63 = vld [vmem:[%s13191_s3 + $0xdac] ss:$16 sps:$4 sm:$0xff]  }
 0x380   :  { %7625 = vmatprep.subr.bf16.mxu1 %v9628_v0  ;;  %v9707_v0 = vld [vmem:[%s13191_s3 + $0xda0] ss:$16 sps:$4 sm:$0xff]  }
 0x382   :  { %7282 = vmatpush1.bf16.msra.mxu0 %v9623_v2  ;;  %v9710_v2 = vld [vmem:[%s13191_s3 + $0xda8] ss:$16 sps:$4 sm:$0xff]  }
 0x383   :  { %7626 = vmatpush1.bf16.msra.mxu1 %v9626_v5  ;;  %7294 = vmatprep.subr.bf16.mxu0 %v9631_v36  ;;  %v9715_v5 = vld [vmem:[%s13191_s3 + $0xdc4] ss:$16 sps:$4 sm:$0xff]   ;;  %v9718_v36 = vld [vmem:[%s13191_s3 + $0xdcc] ss:$16 sps:$4 sm:$0xff]  }
 0x384   :  { %7638 = vmatprep.subr.bf16.mxu1 %v9634_v8  ;;  %v9713_v8 = vld [vmem:[%s13191_s3 + $0xdc0] ss:$16 sps:$4 sm:$0xff]  }
 0x385   :  { %7284 = vmatmul.mubr.bf16.vlgmr.msra.gmra.mrb[16].mxu0 %v11849_v55 }
 0x386   :  { %7628 = vmatmul.mubr.bf16.vlgmr.msra.gmra.mrb[16].mxu1 %v11849_v55  ;;  %7295 = vmatpush1.bf16.msra.mxu0 %v9629_v10  ;;  %v9646_v55 = vld [vmem:[%s13191_s3 + $0xc4c] ss:$16 sps:$4 sm:$0xff]   ;;  %v9716_v10 = vld [vmem:[%s13191_s3 + $0xdc8] ss:$16 sps:$4 sm:$0xff]  }
 0x387   :  { %7326 = vmatprep.mubr.bf16.mxu0 %v12260_v12  ;;  %7639 = vmatpush1.bf16.msra.mxu1 %v9632_v61  ;;  %v9721_v61 = vld [vmem:[%s13191_s3 + $0xde4] ss:$16 sps:$4 sm:$0xff]  }
 0x388   :  { %7670 = vmatprep.mubr.bf16.mxu1 %v12260_v12  ;;  %7296 = vmatprep.subr.bf16.mxu0 %v9637_v3  ;;  %v9649_v12 = vld [vmem:[%s13191_s3 + $0xc64] ss:$16 sps:$4 sm:$0xff]   ;;  %v9724_v3 = vld [vmem:[%s13191_s3 + $0xdec] ss:$16 sps:$4 sm:$0xff]  }
 0x389   :  { %7640 = vmatprep.subr.bf16.mxu1 %v9640_v13  ;;  %v9719_v13 = vld [vmem:[%s13191_s3 + $0xde0] ss:$16 sps:$4 sm:$0xff]  }
 0x38a   :  { %7297 = vmatpush1.bf16.msra.mxu0 %v9635_v9  ;;  %v9722_v9 = vld [vmem:[%s13191_s3 + $0xde8] ss:$16 sps:$4 sm:$0xff]  }
 0x38b   :  { %7641 = vmatpush1.bf16.msra.mxu1 %v9638_v14  ;;  %7298 = vmatprep.subr.bf16.mxu0 %v9643_v19  ;;  %v9727_v14 = vld [vmem:[%s13191_s3 + $0xe04] ss:$16 sps:$4 sm:$0xff]   ;;  %v9730_v19 = vld [vmem:[%s13191_s3 + $0xe0c] ss:$16 sps:$4 sm:$0xff]  }
 0x38c   :  { %7642 = vmatprep.subr.bf16.mxu1 %v9646_v55  ;;  %v9725_v55 = vld [vmem:[%s13191_s3 + $0xe00] ss:$16 sps:$4 sm:$0xff]  }
 0x38e   :  { %7299 = vmatpush1.bf16.msra.mxu0 %v9641_v53  ;;  %v9728_v53 = vld [vmem:[%s13191_s3 + $0xe08] ss:$16 sps:$4 sm:$0xff]  }
 0x38f   :  { %7643 = vmatpush1.bf16.msra.mxu1 %v9644_v54  ;;  %7300 = vmatprep.subr.bf16.mxu0 %v9649_v12  ;;  %v9733_v54 = vld [vmem:[%s13191_s3 + $0xe24] ss:$16 sps:$4 sm:$0xff]   ;;  %v9736_v12 = vld [vmem:[%s13191_s3 + $0xe2c] ss:$16 sps:$4 sm:$0xff]  }
 0x390   :  { %7644 = vmatprep.subr.bf16.mxu1 %v9652_v20  ;;  %v9731_v20 = vld [vmem:[%s13191_s3 + $0xe20] ss:$16 sps:$4 sm:$0xff]  }
 0x392   :  { %7301 = vmatpush1.bf16.msra.mxu0 %v9647_v21  ;;  %v9734_v21 = vld [vmem:[%s13191_s3 + $0xe28] ss:$16 sps:$4 sm:$0xff]  }
 0x393   :  { %7645 = vmatpush1.bf16.msra.mxu1 %v9650_v22  ;;  %7302 = vmatprep.subr.bf16.mxu0 %v9655_v25  ;;  %v9739_v22 = vld [vmem:[%s13191_s3 + $0xe44] ss:$16 sps:$4 sm:$0xff]   ;;  %v9737_v25 = vld [vmem:[%s13191_s3 + $0xe40] ss:$16 sps:$4 sm:$0xff]  }
 0x394   :  { %7646 = vmatprep.subr.bf16.mxu1 %v9658_v28  ;;  %v9740_v28 = vld [vmem:[%s13191_s3 + $0xe48] ss:$16 sps:$4 sm:$0xff]  }
 0x396   :  { %7303 = vmatpush1.bf16.msra.mxu0 %v9653_v29  ;;  %v9748_v29 = vld [vmem:[%s13191_s3 + $0xe6c] ss:$16 sps:$4 sm:$0xff]  }
 0x397   :  { %7647 = vmatpush1.bf16.msra.mxu1 %v9656_v33  ;;  %7304 = vmatprep.subr.bf16.mxu0 %v9661_v34  ;;  %v9743_v33 = vld [vmem:[%s13191_s3 + $0xe60] ss:$16 sps:$4 sm:$0xff]   ;;  %v9746_v34 = vld [vmem:[%s13191_s3 + $0xe68] ss:$16 sps:$4 sm:$0xff]  }
 0x398   :  { %7648 = vmatprep.subr.bf16.mxu1 %v9664_v35  ;;  %v9751_v35 = vld [vmem:[%s13191_s3 + $0xe84] ss:$16 sps:$4 sm:$0xff]  }
 0x39a   :  { %7305 = vmatpush1.bf16.msra.mxu0 %v9659_v37  ;;  %v9754_v37 = vld [vmem:[%s13191_s3 + $0xe8c] ss:$16 sps:$4 sm:$0xff]  }
 0x39b   :  { %7649 = vmatpush1.bf16.msra.mxu1 %v9662_v56  ;;  %7306 = vmatprep.subr.bf16.mxu0 %v9667_v59  ;;  %v9749_v56 = vld [vmem:[%s13191_s3 + $0xe80] ss:$16 sps:$4 sm:$0xff]   ;;  %v9752_v59 = vld [vmem:[%s13191_s3 + $0xe88] ss:$16 sps:$4 sm:$0xff]  }
 0x39c   :  { %7650 = vmatprep.subr.bf16.mxu1 %v9670_v38  ;;  %v9757_v38 = vld [vmem:[%s13191_s3 + $0xea4] ss:$16 sps:$4 sm:$0xff]  }
 0x39e   :  { %7307 = vmatpush1.bf16.msra.mxu0 %v9665_v60  ;;  %v9760_v60 = vld [vmem:[%s13191_s3 + $0xeac] ss:$16 sps:$4 sm:$0xff]  }
 0x39f   :  { %7651 = vmatpush1.bf16.msra.mxu1 %v9668_v26  ;;  %7308 = vmatprep.subr.bf16.mxu0 %v9673_v15  ;;  %v9755_v26 = vld [vmem:[%s13191_s3 + $0xea0] ss:$16 sps:$4 sm:$0xff]   ;;  %v9758_v15 = vld [vmem:[%s13191_s3 + $0xea8] ss:$16 sps:$4 sm:$0xff]  }
 0x3a0   :  { %7652 = vmatprep.subr.bf16.mxu1 %v9676_v16  ;;  %v9763_v16 = vld [vmem:[%s13191_s3 + $0xec4] ss:$16 sps:$4 sm:$0xff]  }
 0x3a2   :  { %7309 = vmatpush1.bf16.msra.mxu0 %v9671_v18  ;;  %v9766_v18 = vld [vmem:[%s13191_s3 + $0xecc] ss:$16 sps:$4 sm:$0xff]  }
 0x3a3   :  { %7653 = vmatpush1.bf16.msra.mxu1 %v9674_v62  ;;  %7310 = vmatprep.subr.bf16.mxu0 %v9679_v1  ;;  %v9761_v62 = vld [vmem:[%s13191_s3 + $0xec0] ss:$16 sps:$4 sm:$0xff]   ;;  %v9764_v1 = vld [vmem:[%s13191_s3 + $0xec8] ss:$16 sps:$4 sm:$0xff]  }
 0x3a4   :  { %7654 = vmatprep.subr.bf16.mxu1 %v9682_v39  ;;  %v9769_v39 = vld [vmem:[%s13191_s3 + $0xee4] ss:$16 sps:$4 sm:$0xff]  }
 0x3a6   :  { %7311 = vmatpush1.bf16.msra.mxu0 %v9677_v40  ;;  %v9772_v40 = vld [vmem:[%s13191_s3 + $0xeec] ss:$16 sps:$4 sm:$0xff]  }
 0x3a7   :  { %7655 = vmatpush1.bf16.msra.mxu1 %v9680_v41  ;;  %7312 = vmatprep.subr.bf16.mxu0 %v9685_v42  ;;  %v9767_v41 = vld [vmem:[%s13191_s3 + $0xee0] ss:$16 sps:$4 sm:$0xff]   ;;  %v9770_v42 = vld [vmem:[%s13191_s3 + $0xee8] ss:$16 sps:$4 sm:$0xff]  }
 0x3a8   :  { %7656 = vmatprep.subr.bf16.mxu1 %v9688_v43  ;;  %v9775_v43 = vld [vmem:[%s13191_s3 + $0xf04] ss:$16 sps:$4 sm:$0xff]  }
 0x3aa   :  { %7313 = vmatpush1.bf16.msra.mxu0 %v9683_v44  ;;  %v9778_v44 = vld [vmem:[%s13191_s3 + $0xf0c] ss:$16 sps:$4 sm:$0xff]  }
 0x3ab   :  { %7657 = vmatpush1.bf16.msra.mxu1 %v9686_v23  ;;  %7314 = vmatprep.subr.bf16.mxu0 %v9691_v45  ;;  %v9773_v23 = vld [vmem:[%s13191_s3 + $0xf00] ss:$16 sps:$4 sm:$0xff]   ;;  %v9776_v45 = vld [vmem:[%s13191_s3 + $0xf08] ss:$16 sps:$4 sm:$0xff]  }
 0x3ac   :  { %7658 = vmatprep.subr.bf16.mxu1 %v9694_v46  ;;  %v9781_v46 = vld [vmem:[%s13191_s3 + $0xf24] ss:$16 sps:$4 sm:$0xff]  }
 0x3ae   :  { %7315 = vmatpush1.bf16.msra.mxu0 %v9689_v47  ;;  %v9784_v47 = vld [vmem:[%s13191_s3 + $0xf2c] ss:$16 sps:$4 sm:$0xff]  }
 0x3af   :  { %7659 = vmatpush1.bf16.msra.mxu1 %v9692_v48  ;;  %7316 = vmatprep.subr.bf16.mxu0 %v9697_v32  ;;  %v9779_v48 = vld [vmem:[%s13191_s3 + $0xf20] ss:$16 sps:$4 sm:$0xff]   ;;  %v9782_v32 = vld [vmem:[%s13191_s3 + $0xf28] ss:$16 sps:$4 sm:$0xff]  }
 0x3b0   :  { %7660 = vmatprep.subr.bf16.mxu1 %v9700_v49  ;;  %v9787_v49 = vld [vmem:[%s13191_s3 + $0xf44] ss:$16 sps:$4 sm:$0xff]  }
 0x3b2   :  { %7317 = vmatpush1.bf16.msra.mxu0 %v9695_v6  ;;  %v9790_v6 = vld [vmem:[%s13191_s3 + $0xf4c] ss:$16 sps:$4 sm:$0xff]  }
 0x3b3   :  { %7661 = vmatpush1.bf16.msra.mxu1 %v9698_v7  ;;  %7318 = vmatprep.subr.bf16.mxu0 %v9703_v50  ;;  %v9785_v7 = vld [vmem:[%s13191_s3 + $0xf40] ss:$16 sps:$4 sm:$0xff]   ;;  %v9788_v50 = vld [vmem:[%s13191_s3 + $0xf48] ss:$16 sps:$4 sm:$0xff]  }
 0x3b4   :  { %7662 = vmatprep.subr.bf16.mxu1 %v9706_v57  ;;  %v9793_v57 = vld [vmem:[%s13191_s3 + $0xf64] ss:$16 sps:$4 sm:$0xff]  }
 0x3b6   :  { %7319 = vmatpush1.bf16.msra.mxu0 %v9701_v27  ;;  %v9796_v27 = vld [vmem:[%s13191_s3 + $0xf6c] ss:$16 sps:$4 sm:$0xff]  }
 0x3b7   :  { %7663 = vmatpush1.bf16.msra.mxu1 %v9704_v51  ;;  %7320 = vmatprep.subr.bf16.mxu0 %v9709_v52  ;;  %v9791_v51 = vld [vmem:[%s13191_s3 + $0xf60] ss:$16 sps:$4 sm:$0xff]   ;;  %v9794_v52 = vld [vmem:[%s13191_s3 + $0xf68] ss:$16 sps:$4 sm:$0xff]  }
 0x3b8   :  { %7664 = vmatprep.subr.bf16.mxu1 %v9712_v63  ;;  %v9799_v63 = vld [vmem:[%s13191_s3 + $0xf84] ss:$16 sps:$4 sm:$0xff]  }
 0x3ba   :  { %7321 = vmatpush1.bf16.msra.mxu0 %v9707_v0  ;;  %v9802_v0 = vld [vmem:[%s13191_s3 + $0xf8c] ss:$16 sps:$4 sm:$0xff]  }
 0x3bb   :  { %7665 = vmatpush1.bf16.msra.mxu1 %v9710_v2  ;;  %7322 = vmatprep.subr.bf16.mxu0 %v9715_v5  ;;  %v9797_v2 = vld [vmem:[%s13191_s3 + $0xf80] ss:$16 sps:$4 sm:$0xff]   ;;  %v9800_v5 = vld [vmem:[%s13191_s3 + $0xf88] ss:$16 sps:$4 sm:$0xff]  }
 0x3bc   :  { %7666 = vmatprep.subr.bf16.mxu1 %v9718_v36  ;;  %v9805_v36 = vld [vmem:[%s13191_s3 + $0xfa4] ss:$16 sps:$4 sm:$0xff]  }
 0x3be   :  { %7323 = vmatpush1.bf16.msra.mxu0 %v9713_v8  ;;  %v9808_v8 = vld [vmem:[%s13191_s3 + $0xfac] ss:$16 sps:$4 sm:$0xff]  }
 0x3bf   :  { %7667 = vmatpush1.bf16.msra.mxu1 %v9716_v10  ;;  %7324 = vmatprep.subr.bf16.mxu0 %v9721_v61  ;;  %v9803_v10 = vld [vmem:[%s13191_s3 + $0xfa0] ss:$16 sps:$4 sm:$0xff]   ;;  %v9806_v61 = vld [vmem:[%s13191_s3 + $0xfa8] ss:$16 sps:$4 sm:$0xff]  }
 0x3c0   :  { %7668 = vmatprep.subr.bf16.mxu1 %v9724_v3  ;;  %v9811_v3 = vld [vmem:[%s13191_s3 + $0xfc4] ss:$16 sps:$4 sm:$0xff]  }
 0x3c2   :  { %7325 = vmatpush1.bf16.msra.mxu0 %v9719_v13  ;;  %v9814_v13 = vld [vmem:[%s13191_s3 + $0xfcc] ss:$16 sps:$4 sm:$0xff]  }
 0x3c3   :  { %7669 = vmatpush1.bf16.msra.mxu1 %v9722_v9  ;;  %7337 = vmatprep.subr.bf16.mxu0 %v9727_v14  ;;  %v9809_v9 = vld [vmem:[%s13191_s3 + $0xfc0] ss:$16 sps:$4 sm:$0xff]   ;;  %v9812_v14 = vld [vmem:[%s13191_s3 + $0xfc8] ss:$16 sps:$4 sm:$0xff]  }
 0x3c4   :  { %7681 = vmatprep.subr.bf16.mxu1 %v9730_v19  ;;  %v9817_v19 = vld [vmem:[%s13191_s3 + $0xfe4] ss:$16 sps:$4 sm:$0xff]  }
 0x3c5   :  { %7327 = vmatmul.mubr.bf16.vlgmr.msra.gmra.mrb[16].mxu0 %v12250_v4 }
 0x3c6   :  { %7671 = vmatmul.mubr.bf16.vlgmr.msra.gmra.mrb[16].mxu1 %v12250_v4  ;;  %7338 = vmatpush1.bf16.msra.mxu0 %v9725_v55  ;;  %v9742_v4 = vld [vmem:[%s13191_s3 + $0xe4c] ss:$16 sps:$4 sm:$0xff]  }
 0x3c7   :  { %7369 = vmatprep.mubr.bf16.mxu0 %v12265_v58  ;;  %7682 = vmatpush1.bf16.msra.mxu1 %v9728_v53  ;;  %v9820_v55 = vld [vmem:[%s13191_s3 + $0xfec] ss:$16 sps:$4 sm:$0xff]   ;;  %v9815_v53 = vld [vmem:[%s13191_s3 + $0xfe0] ss:$16 sps:$4 sm:$0xff]  }
 0x3c8   :  { %7713 = vmatprep.mubr.bf16.mxu1 %v12265_v58  ;;  %7339 = vmatprep.subr.bf16.mxu0 %v9733_v54  ;;  %v9745_v58 = vld [vmem:[%s13191_s3 + $0xe64] ss:$16 sps:$4 sm:$0xff]   ;;  %v9818_v54 = vld [vmem:[%s13191_s3 + $0xfe8] ss:$16 sps:$4 sm:$0xff]  }
 0x3c9   :  { %7683 = vmatprep.subr.bf16.mxu1 %v9736_v12  ;;  %v4454_v12 = vld [vmem:[%s13192_s4] sm:$0xf] }
 0x3ca   :  { %7340 = vmatpush1.bf16.msra.mxu0 %v9731_v20  ;;  %v4459_v20 = vrot.slane %v4454_v12, %v10957_v24 }
 0x3cb   :  { %7684 = vmatpush1.bf16.msra.mxu1 %v9734_v21  ;;  %7341 = vmatprep.subr.bf16.mxu0 %v9739_v22  ;;  %v4467_v21 = vrot.slane %v4454_v12, %v10969_v30  ;;  %v4463_v22 = vrot.slane %v4454_v12, %v10972_v31 }
 0x3cc   :  { %7685 = vmatprep.subr.bf16.mxu1 %v9742_v4  ;;  %v9826_v4 = vld [vmem:[%s13189_s0] sm:$0xff] }
 0x3ce   :  { %7342 = vmatpush1.bf16.msra.mxu0 %v9737_v25  ;;  %v7724_v25 = vunpack.c.l.bf16 %v9826_v4 }
 0x3cf   :  { %7686 = vmatpush1.bf16.msra.mxu1 %v9740_v28  ;;  %7343 = vmatprep.subr.bf16.mxu0 %v9745_v58  ;;  %v7725_v58 = vunpack.c.h.bf16 %v9826_v4 }
 0x3d0   :  { %7687 = vmatprep.subr.bf16.mxu1 %v9748_v29  ;;  %v4471_v29 = vrot.slane %v4454_v12, %v10975_v17 }
 0x3d2   :  { %7344 = vmatpush1.bf16.msra.mxu0 %v9743_v33 }
 0x3d3   :  { %7688 = vmatpush1.bf16.msra.mxu1 %v9746_v34  ;;  %7345 = vmatprep.subr.bf16.mxu0 %v9751_v35  ;;  %v9827_v35 = vld [vmem:[%s13189_s0 + $0x10] sm:$0xff] }
 0x3d4   :  { %7689 = vmatprep.subr.bf16.mxu1 %v9754_v37  ;;  %v7728_v37 = vunpack.c.l.bf16 %v9827_v35 }
 0x3d6   :  { %7346 = vmatpush1.bf16.msra.mxu0 %v9749_v56 }
 0x3d7   :  { %7690 = vmatpush1.bf16.msra.mxu1 %v9752_v59  ;;  %7347 = vmatprep.subr.bf16.mxu0 %v9757_v38  ;;  %v9828_v59 = vld [vmem:[%s13189_s0 + $0x8] sm:$0xff] }
 0x3d8   :  { %7691 = vmatprep.subr.bf16.mxu1 %v9760_v60  ;;  %v7726_v38 = vunpack.c.l.bf16 %v9828_v59 }
 0x3da   :  { %7348 = vmatpush1.bf16.msra.mxu0 %v9755_v26 }
 0x3db   :  { %7692 = vmatpush1.bf16.msra.mxu1 %v9758_v15  ;;  %7349 = vmatprep.subr.bf16.mxu0 %v9763_v16  ;;  %v7729_v16 = vunpack.c.h.bf16 %v9827_v35 }
 0x3dc   :  { %7693 = vmatprep.subr.bf16.mxu1 %v9766_v18 }
 0x3de   :  { %7350 = vmatpush1.bf16.msra.mxu0 %v9761_v62 }
 0x3df   :  { %7694 = vmatpush1.bf16.msra.mxu1 %v9764_v1  ;;  %7351 = vmatprep.subr.bf16.mxu0 %v9769_v39  ;;  %v9829_v39 = vld [vmem:[%s13189_s0 + $0x18] sm:$0xff] }
 0x3e0   :  { %7695 = vmatprep.subr.bf16.mxu1 %v9772_v40  ;;  %v7730_v40 = vunpack.c.l.bf16 %v9829_v39 }
 0x3e2   :  { %7352 = vmatpush1.bf16.msra.mxu0 %v9767_v41 }
 0x3e3   :  { %7696 = vmatpush1.bf16.msra.mxu1 %v9770_v42  ;;  %7353 = vmatprep.subr.bf16.mxu0 %v9775_v43  ;;  %v7727_v42 = vunpack.c.h.bf16 %v9828_v59 }
 0x3e4   :  { %7697 = vmatprep.subr.bf16.mxu1 %v9778_v44 }
 0x3e6   :  { %7354 = vmatpush1.bf16.msra.mxu0 %v9773_v23 }
 0x3e7   :  { %7698 = vmatpush1.bf16.msra.mxu1 %v9776_v45  ;;  %7355 = vmatprep.subr.bf16.mxu0 %v9781_v46 }
 0x3e8   :  { %7699 = vmatprep.subr.bf16.mxu1 %v9784_v47 }
 0x3ea   :  { %7356 = vmatpush1.bf16.msra.mxu0 %v9779_v48 }
 0x3eb   :  { %7700 = vmatpush1.bf16.msra.mxu1 %v9782_v32  ;;  %7357 = vmatprep.subr.bf16.mxu0 %v9787_v49 }
 0x3ec   :  { %7701 = vmatprep.subr.bf16.mxu1 %v9790_v6 }
 0x3ee   :  { %7358 = vmatpush1.bf16.msra.mxu0 %v9785_v7  ;;  %v7731_v7 = vunpack.c.h.bf16 %v9829_v39 }
 0x3ef   :  { %7702 = vmatpush1.bf16.msra.mxu1 %v9788_v50  ;;  %7359 = vmatprep.subr.bf16.mxu0 %v9793_v57 }
 0x3f0   :  { %7703 = vmatprep.subr.bf16.mxu1 %v9796_v27 }
 0x3f2   :  { %7360 = vmatpush1.bf16.msra.mxu0 %v9791_v51 }
 0x3f3   :  { %7704 = vmatpush1.bf16.msra.mxu1 %v9794_v52  ;;  %7361 = vmatprep.subr.bf16.mxu0 %v9799_v63 }
 0x3f4   :  { %7705 = vmatprep.subr.bf16.mxu1 %v9802_v0 }
 0x3f6   :  { %7362 = vmatpush1.bf16.msra.mxu0 %v9797_v2 }
 0x3f7   :  { %7706 = vmatpush1.bf16.msra.mxu1 %v9800_v5  ;;  %7363 = vmatprep.subr.bf16.mxu0 %v9805_v36 }
 0x3f8   :  { %7707 = vmatprep.subr.bf16.mxu1 %v9808_v8 }
 0x3fa   :  { %7364 = vmatpush1.bf16.msra.mxu0 %v9803_v10 }
 0x3fb   :  { %7708 = vmatpush1.bf16.msra.mxu1 %v9806_v61  ;;  %7365 = vmatprep.subr.bf16.mxu0 %v9811_v3 }
 0x3fc   :  { %7709 = vmatprep.subr.bf16.mxu1 %v9814_v13 }
 0x3fe   :  { %7366 = vmatpush1.bf16.msra.mxu0 %v9809_v9 }
 0x3ff   :  { %7710 = vmatpush1.bf16.msra.mxu1 %v9812_v14  ;;  %7367 = vmatprep.subr.bf16.mxu0 %v9817_v19 }
 0x400   :  { %7711 = vmatprep.subr.bf16.mxu1 %v9820_v55 }
 0x402   :  { %7368 = vmatpush1.bf16.msra.mxu0 %v9815_v53 }
 0x403   :  { %7712 = vmatpush1.bf16.msra.mxu1 %v9818_v54 }
 0x405   :  { %7370 = vmatmul.mubr.bf16.vlgmr.msra.gmra.mrb[16].mxu0 %v12258_v11 }
 0x406   :  { %7714 = vmatmul.mubr.bf16.vlgmr.msra.gmra.mrb[16].mxu1 %v12258_v11 }
 0x4d8   :  { %v7371_v28 = vpop.f32.mrb[16].mxu0 }
 0x4d9   :  { %v8953_v11 = vadd.f32 %v7371_v28, %v4459_v20  ;;  %v7715_v33 = vpop.f32.mrb[16].mxu1  ;;  %v7373_v34 = vpop.f32.mrb[17].mxu0 }
 0x4da   :  { %v8957_v56 = vadd.f32 %v7715_v33, %v4467_v21  ;;  %v8954_v60 = vadd.f32 %v7373_v34, %v4463_v22  ;;  %v7717_v26 = vpop.f32.mrb[17].mxu1  ;;  %v7375_v15 = vpop.f32.mrb[18].mxu0 }
 0x4db   :  { %v7732_v18 = vadd.f32 %v8953_v11, %v7724_v25  ;;  %v8955_v62 = vadd.f32 %v7375_v15, %v4459_v20  ;;  %v7719_v1 = vpop.f32.mrb[18].mxu1  ;;  %v7377_v41 = vpop.f32.mrb[19].mxu0  ;;  %v8958_v44 = vadd.f32 %v7717_v26, %v4471_v29  ;;  %v7740_v15 = vld [vmem:[%s13193_s5] sm:$0xf] }
 0x4dc   :  { %v7733_v43 = vadd.f32 %v8954_v60, %v7725_v58  ;;  %v8959_v23 = vadd.f32 %v7719_v1, %v4467_v21  ;;  %v8956_v45 = vadd.f32 %v7377_v41, %v4463_v22  ;;  %v7721_v46 = vpop.f32.mrb[19].mxu1  ;;  %v7734_v48 = vadd.f32 %v8957_v56, %v7726_v38 }
 0x4dd   :  { %v7736_v47 = vadd.f32 %v8955_v62, %v7728_v37  ;;  %v8960_v6 = vadd.f32 %v7721_v46, %v4471_v29  ;;  %v7735_v27 = vadd.f32 %v8958_v44, %v7727_v42  ;;  %v7807_v62 = vrot.slane %v7740_v15, %v10969_v30 }
 0x4de   :  { %v7737_v32 = vadd.f32 %v8956_v45, %v7729_v16  ;;  %v7742_v49 = vadd.f32 %v7733_v43, %v7732_v18  ;;  %v7738_v50 = vadd.f32 %v8959_v23, %v7730_v40  ;;  %v7741_v16 = vld [vmem:[%s13194_s6] sm:$0xf]  ;;  %v7803_v1 = vrot.slane %v7740_v15, %v10972_v31 }
 0x4df   :  { %v7739_v0 = vadd.f32 %v8960_v6, %v7731_v7  ;;  %v7811_v39 = vrot.slane %v7740_v15, %v10975_v17  ;;  %v7828_v41 = vrot.slane %v7741_v16, %v10957_v24  ;;  %v7836_v42 = vrot.slane %v7741_v16, %v10969_v30 }
 0x4e0   :  { %v7747_v57 = vadd.f32 %v7737_v32, %v7736_v47  ;;  %v7743_v51 = vadd.f32 %v7742_v49, %v7734_v48  ;;  %v7840_v44 = vrot.slane %v7741_v16, %v10975_v17 }
 0x4e2   :  { %v7744_v52 = vadd.f32 %v7743_v51, %v7735_v27  ;;  %v7748_v63 = vadd.f32 %v7747_v57, %v7738_v50 }
 0x4e4   :  { %7745 = vadd.xlane.f32.xlu0 %v7744_v52  ;;  %v7749_v2 = vadd.f32 %v7748_v63, %v7739_v0 }
 0x4e8   :  { %7750 = vadd.xlane.f32.xlu0 %v7749_v2 }
 0x571   :  { %v7746_v5 = vpop.xlane.xlu0 %7745 }
 0x572   :  { %v7753_v36 = vmul.f32 0.001953125, %v7746_v5 }
 0x574   :  { %v7755_v8 = vsub.f32 %v7732_v18, %v7753_v36  ;;  %v7756_v10 = vsub.f32 %v7733_v43, %v7753_v36  ;;  %v7757_v61 = vsub.f32 %v7734_v48, %v7753_v36  ;;  %v7758_v13 = vsub.f32 %v7735_v27, %v7753_v36 }
 0x575   :  { %v7751_v3 = vpop.xlane.xlu0 %7750  ;;  %v7799_v18 = vrot.slane %v7740_v15, %v10957_v24  ;;  %v7832_v43 = vrot.slane %v7741_v16, %v10972_v31 }
 0x576   :  { %v7754_v9 = vmul.f32 0.001953125, %v7751_v3  ;;  %v7763_v14 = vmul.f32 %v7755_v8, %v7755_v8  ;;  %v7764_v19 = vmul.f32 %v7756_v10, %v7756_v10  ;;  %v7765_v55 = vmul.f32 %v7757_v61, %v7757_v61 }
 0x577   :  { %v7766_v21 = vmul.f32 %v7758_v13, %v7758_v13 }
 0x578   :  { %v7759_v53 = vsub.f32 %v7736_v47, %v7754_v9  ;;  %v7760_v54 = vsub.f32 %v7737_v32, %v7754_v9  ;;  %v7771_v12 = vadd.f32 %v7764_v19, %v7763_v14  ;;  %v7761_v20 = vsub.f32 %v7738_v50, %v7754_v9 }
 0x579   :  { %v7762_v4 = vsub.f32 %v7739_v0, %v7754_v9 }
 0x57a   :  { %v7772_v22 = vadd.f32 %v7771_v12, %v7765_v55  ;;  %v7767_v25 = vmul.f32 %v7759_v53, %v7759_v53  ;;  %v7768_v28 = vmul.f32 %v7760_v54, %v7760_v54  ;;  %v7769_v29 = vmul.f32 %v7761_v20, %v7761_v20 }
 0x57b   :  { %v7770_v33 = vmul.f32 %v7762_v4, %v7762_v4 }
 0x57c   :  { %v7773_v58 = vadd.f32 %v7772_v22, %v7766_v21  ;;  %v7776_v11 = vadd.f32 %v7768_v28, %v7767_v25 }
 0x57e   :  { %7774 = vadd.xlane.f32.xlu1 %v7773_v58  ;;  %v7777_v34 = vadd.f32 %v7776_v11, %v7769_v29 }
 0x580   :  { %v7778_v35 = vadd.f32 %v7777_v34, %v7770_v33 }
 0x582   :  { %7779 = vadd.xlane.f32.xlu1 %v7778_v35 }
 0x60b   :  { %v7775_v37 = vpop.xlane.xlu1 %7774 }
 0x60c   :  { %v7781_v56 = vmul.f32 0.001953125, %v7775_v37 }
 0x60e   :  { %v7783_v59 = vadd.f32 1e-05, %v7781_v56 }
 0x60f   :  { %v7780_v38 = vpop.xlane.xlu1 %7779 }
 0x610   :  { %9821 = vrsqrt.f32 %v7783_v59  ;;  %v7782_v60 = vmul.f32 0.001953125, %v7780_v38 }
 0x612   :  { %v7784_v26 = vadd.f32 1e-05, %v7782_v60 }
 0x614   :  { %9823 = vrsqrt.f32 %v7784_v26 }
 0x61a   :  { %v9822_v40 = vpop.eup %9821 }
 0x61b   :  { %v7787_v23 = vmul.f32 %v9822_v40, %v7755_v8  ;;  %v7788_v45 = vmul.f32 %v9822_v40, %v7756_v10  ;;  %v7789_v46 = vmul.f32 %v9822_v40, %v7757_v61  ;;  %v7790_v47 = vmul.f32 %v9822_v40, %v7758_v13 }
 0x61d   :  { %v7816_v48 = vmul.f32 %v7799_v18, %v7787_v23  ;;  %v7817_v32 = vmul.f32 %v7803_v1, %v7788_v45  ;;  %v7818_v49 = vmul.f32 %v7807_v62, %v7789_v46  ;;  %v7819_v6 = vmul.f32 %v7811_v39, %v7790_v47 }
 0x61e   :  { %v9824_v7 = vpop.eup %9823 }
 0x61f   :  { %v7845_v50 = vadd.f32 %v7828_v41, %v7816_v48  ;;  %v7846_v57 = vadd.f32 %v7832_v43, %v7817_v32  ;;  %v7847_v27 = vadd.f32 %v7836_v42, %v7818_v49  ;;  %v7848_v51 = vadd.f32 %v7840_v44, %v7819_v6 }
 0x620   :  { %v7791_v24 = vmul.f32 %v9824_v7, %v7759_v53  ;;  %v7792_v52 = vmul.f32 %v9824_v7, %v7760_v54  ;;  %v7793_v30 = vmul.f32 %v9824_v7, %v7761_v20  ;;  %v7794_v63 = vmul.f32 %v9824_v7, %v7762_v4 }
 0x621   :  { %v8917_v31 = vpack.c.bf16 %v7846_v57, %v7845_v50  ;;  %v8918_v0 = vpack.c.bf16 %v7848_v51, %v7847_v27 }
 0x622   :  { %v7820_v17 = vmul.f32 %v7799_v18, %v7791_v24  ;;  %v7821_v2 = vmul.f32 %v7803_v1, %v7792_v52  ;;  %v7822_v5 = vmul.f32 %v7807_v62, %v7793_v30  ;;  %v7823_v36 = vmul.f32 %v7811_v39, %v7794_v63 }
 0x623   :  { %7877 = vst [vmem:[%s13195_s7] sm:$0xff] %v8917_v31  ;;  %7878 = vst [vmem:[%s13195_s7 + $0x8] sm:$0xff] %v8918_v0 }
 0x624   :  { %v7849_v8 = vadd.f32 %v7828_v41, %v7820_v17  ;;  %v7850_v10 = vadd.f32 %v7832_v43, %v7821_v2  ;;  %v7851_v61 = vadd.f32 %v7836_v42, %v7822_v5  ;;  %v7852_v3 = vadd.f32 %v7840_v44, %v7823_v36 }
 0x626   :  { %v8919_v13 = vpack.c.bf16 %v7850_v10, %v7849_v8  ;;  %v8920_v9 = vpack.c.bf16 %v7852_v3, %v7851_v61 }
 0x628   :  { %7879 = vst [vmem:[%s13195_s7 + $0x10] sm:$0xff] %v8919_v13  ;;  %7880 = vst [vmem:[%s13195_s7 + $0x18] sm:$0xff] %v8920_v9 }

// kernel: transformer_forward.5
= control target key start
LH: loop header
LB: loop body
LE: loop exit
PB: predicated region body
PF: predicated region fallthrough
CT: control target
= control target key end

     0   :  { %s2095_s12 = smov 0   ;;  %s2097_s13 = smov 0   ;;  %s2595_s0 = inlined_call_operand.vmem [shape: bf16[16,512], index: 0, kind: input, shape index: {}]   ;;  %s2596_s1 = inlined_call_operand.vmem [shape: bf16[512,2048], index: 1, kind: input, shape index: {}]   ;;  %s2597_s2 = inlined_call_operand.vmem [shape: f32[1,2048], index: 2, kind: input, shape index: {}]   ;;  %s2598_s3 = inlined_call_operand.vmem [shape: f32[16,2048], index: 3, kind: output, shape index: {}]  }
   0x1   :  { %s2099_s14 = smov 0   ;;  %s2101_s15 = smov 0  }
   0x2   :  { %s2103_s16 = smov 0  }
   0x3 LB: > { %s22_s17 = sadd.s32 1, %s2069_s15  ;;  %s1630_s18 = sadd.s32 4294967295, %s2073_s16   ;;  %s2073_s16 = sphi %s2103_s16, %s13_s16   ;;  %s2069_s15 = sphi %s2101_s15, %s2603_s15   ;;  %s2065_s14 = sphi %s2099_s14, %s2602_s14   ;;  %s2061_s13 = sphi %s2097_s13, %s2601_s13   ;;  %s2057_s12 = sphi %s2095_s12, %s2600_s12  }
   0x4   : > { %p23_p0 = scmp.ge.s32.totalorder %s22_s17, 4  ;;  %p65_p1 = scmp.ne.s32.totalorder %s2061_s13, %s2057_s12 }
   0x5   : > { %p66_p2 = scmp.eq.s32.totalorder %s2073_s16, 0  ;;  %p123_p4 = scmp.eq.s32.totalorder %s1630_s18, 3 }
   0x6   : > { %s2605_s17 = smov (%p23_p0, %s22_s17), 0  ;;  %s58_s20 = sadd.s32 1, %s2061_s13 }
   0x7   : > { %p67_p3 = por %p66_p2, %p65_p1  ;;  %s55_s19 = ssub.s32 %s2069_s15, %s2605_s17 }
   0x8   : > { %p56_p5 = scmp.eq.s32.totalorder %s55_s19, 0  ;;  %p2130_p6 = por %p123_p4, %p65_p1 }
   0x9   : > { %p1634_p7 = scmp.ge.s32.totalorder %s2073_s16, 4 }
   0xa   : > { %s2135_s22 = scalar_select %p56_p5, %s2061_s13, %s58_s20  }
   0xb   : > { %155 = sbr.rel (%p1634_p7) target bundleno = 86 (0x56), region = 20 }
  0x12   : > { %158 = sbr.rel (!%p67_p3) target bundleno = 86 (0x56), region = 24  ;;  %s160_s23 = sand.u32 (%p67_p3), 1, %s2061_s13  }
  0x13   : > { %s1779_s24 = sshll.u32 (%p67_p3), %s2069_s15, 4  ;;  %s1635_s25 = sshll.u32 (%p67_p3), %s160_s23, 10 }
  0x14   : > { %s2143_s28 = scalar_lea.vmem (%p67_p3), %s2596_s1, %s1779_s24  ;;  %s2148_s29 = scalar_lea.vmem (%p67_p3), [#allocation2], %s1635_s25 }
  0x15   : > { %v178_v0 = vld [vmem:[%s2143_s28] sm:$0xff] (%p67_p3)  ;;  %v180_v1 = vld [vmem:[%s2143_s28 + $0x8] sm:$0xff] (%p67_p3) }
  0x16   : > { %v182_v2 = vld [vmem:[%s2143_s28 + $0x40] sm:$0xff] (%p67_p3)  ;;  %179 = vst [vmem:[%s2148_s29] sm:$0xff] (%p67_p3), %v178_v0  ;;  %181 = vst [vmem:[%s2148_s29 + $0x8] sm:$0xff] (%p67_p3), %v180_v1  ;;  %v184_v3 = vld [vmem:[%s2143_s28 + $0x48] sm:$0xff] (%p67_p3) }
  0x17   : > { %183 = vst [vmem:[%s2148_s29 + $0x10] sm:$0xff] (%p67_p3), %v182_v2  ;;  %v186_v4 = vld [vmem:[%s2143_s28 + $0x80] sm:$0xff] (%p67_p3)  ;;  %v188_v5 = vld [vmem:[%s2143_s28 + $0x88] sm:$0xff] (%p67_p3)  ;;  %185 = vst [vmem:[%s2148_s29 + $0x18] sm:$0xff] (%p67_p3), %v184_v3 }
  0x18   : > { %187 = vst [vmem:[%s2148_s29 + $0x20] sm:$0xff] (%p67_p3), %v186_v4  ;;  %189 = vst [vmem:[%s2148_s29 + $0x28] sm:$0xff] (%p67_p3), %v188_v5  ;;  %v190_v6 = vld [vmem:[%s2143_s28 + $0xc0] sm:$0xff] (%p67_p3)  ;;  %v192_v7 = vld [vmem:[%s2143_s28 + $0xc8] sm:$0xff] (%p67_p3) }
  0x19   : > { %v194_v8 = vld [vmem:[%s2143_s28 + $0x100] sm:$0xff]  ;;  %191 = vst [vmem:[%s2148_s29 + $0x30] sm:$0xff] %v190_v6  ;;  %193 = vst [vmem:[%s2148_s29 + $0x38] sm:$0xff] %v192_v7  ;;  %v196_v9 = vld [vmem:[%s2143_s28 + $0x108] sm:$0xff] }
  0x1a   : > { %195 = vst [vmem:[%s2148_s29 + $0x40] sm:$0xff] %v194_v8  ;;  %v198_v10 = vld [vmem:[%s2143_s28 + $0x140] sm:$0xff]  ;;  %v200_v11 = vld [vmem:[%s2143_s28 + $0x148] sm:$0xff]  ;;  %197 = vst [vmem:[%s2148_s29 + $0x48] sm:$0xff] %v196_v9 }
  0x1b   : > { %199 = vst [vmem:[%s2148_s29 + $0x50] sm:$0xff] %v198_v10  ;;  %201 = vst [vmem:[%s2148_s29 + $0x58] sm:$0xff] %v200_v11  ;;  %v202_v12 = vld [vmem:[%s2143_s28 + $0x180] sm:$0xff]  ;;  %v204_v13 = vld [vmem:[%s2143_s28 + $0x188] sm:$0xff] }
  0x1c   : > { %v206_v14 = vld [vmem:[%s2143_s28 + $0x1c0] sm:$0xff]  ;;  %203 = vst [vmem:[%s2148_s29 + $0x60] sm:$0xff] %v202_v12  ;;  %205 = vst [vmem:[%s2148_s29 + $0x68] sm:$0xff] %v204_v13  ;;  %v208_v15 = vld [vmem:[%s2143_s28 + $0x1c8] sm:$0xff] }
  0x1d   : > { %207 = vst [vmem:[%s2148_s29 + $0x70] sm:$0xff] %v206_v14  ;;  %v210_v16 = vld [vmem:[%s2143_s28 + $0x200] sm:$0xff]  ;;  %v212_v17 = vld [vmem:[%s2143_s28 + $0x208] sm:$0xff]  ;;  %209 = vst [vmem:[%s2148_s29 + $0x78] sm:$0xff] %v208_v15 }
  0x1e   : > { %211 = vst [vmem:[%s2148_s29 + $0x80] sm:$0xff] %v210_v16  ;;  %213 = vst [vmem:[%s2148_s29 + $0x88] sm:$0xff] %v212_v17  ;;  %v214_v18 = vld [vmem:[%s2143_s28 + $0x240] sm:$0xff]  ;;  %v216_v19 = vld [vmem:[%s2143_s28 + $0x248] sm:$0xff] }
  0x1f   : > { %v218_v20 = vld [vmem:[%s2143_s28 + $0x280] sm:$0xff]  ;;  %215 = vst [vmem:[%s2148_s29 + $0x90] sm:$0xff] %v214_v18  ;;  %217 = vst [vmem:[%s2148_s29 + $0x98] sm:$0xff] %v216_v19  ;;  %v220_v21 = vld [vmem:[%s2143_s28 + $0x288] sm:$0xff] }
  0x20   : > { %219 = vst [vmem:[%s2148_s29 + $0xa0] sm:$0xff] %v218_v20  ;;  %v222_v22 = vld [vmem:[%s2143_s28 + $0x2c0] sm:$0xff]  ;;  %v224_v23 = vld [vmem:[%s2143_s28 + $0x2c8] sm:$0xff]  ;;  %221 = vst [vmem:[%s2148_s29 + $0xa8] sm:$0xff] %v220_v21 }
  0x21   : > { %223 = vst [vmem:[%s2148_s29 + $0xb0] sm:$0xff] %v222_v22  ;;  %225 = vst [vmem:[%s2148_s29 + $0xb8] sm:$0xff] %v224_v23  ;;  %v226_v24 = vld [vmem:[%s2143_s28 + $0x300] sm:$0xff]  ;;  %v228_v25 = vld [vmem:[%s2143_s28 + $0x308] sm:$0xff] }
  0x22   : > { %v230_v26 = vld [vmem:[%s2143_s28 + $0x340] sm:$0xff]  ;;  %227 = vst [vmem:[%s2148_s29 + $0xc0] sm:$0xff] %v226_v24  ;;  %229 = vst [vmem:[%s2148_s29 + $0xc8] sm:$0xff] %v228_v25  ;;  %v232_v27 = vld [vmem:[%s2143_s28 + $0x348] sm:$0xff] }
  0x23   : > { %231 = vst [vmem:[%s2148_s29 + $0xd0] sm:$0xff] %v230_v26  ;;  %v234_v28 = vld [vmem:[%s2143_s28 + $0x380] sm:$0xff]  ;;  %v236_v29 = vld [vmem:[%s2143_s28 + $0x388] sm:$0xff]  ;;  %233 = vst [vmem:[%s2148_s29 + $0xd8] sm:$0xff] %v232_v27 }
  0x24   : > { %235 = vst [vmem:[%s2148_s29 + $0xe0] sm:$0xff] %v234_v28  ;;  %237 = vst [vmem:[%s2148_s29 + $0xe8] sm:$0xff] %v236_v29  ;;  %v238_v30 = vld [vmem:[%s2143_s28 + $0x3c0] sm:$0xff]  ;;  %v240_v31 = vld [vmem:[%s2143_s28 + $0x3c8] sm:$0xff] }
  0x25   : > { %v242_v32 = vld [vmem:[%s2143_s28 + $0x400] sm:$0xff]  ;;  %239 = vst [vmem:[%s2148_s29 + $0xf0] sm:$0xff] %v238_v30  ;;  %241 = vst [vmem:[%s2148_s29 + $0xf8] sm:$0xff] %v240_v31  ;;  %v244_v33 = vld [vmem:[%s2143_s28 + $0x408] sm:$0xff] }
  0x26   : > { %243 = vst [vmem:[%s2148_s29 + $0x100] sm:$0xff] %v242_v32  ;;  %v246_v34 = vld [vmem:[%s2143_s28 + $0x440] sm:$0xff]  ;;  %v248_v35 = vld [vmem:[%s2143_s28 + $0x448] sm:$0xff]  ;;  %245 = vst [vmem:[%s2148_s29 + $0x108] sm:$0xff] %v244_v33 }
  0x27   : > { %247 = vst [vmem:[%s2148_s29 + $0x110] sm:$0xff] %v246_v34  ;;  %249 = vst [vmem:[%s2148_s29 + $0x118] sm:$0xff] %v248_v35  ;;  %v250_v36 = vld [vmem:[%s2143_s28 + $0x480] sm:$0xff]  ;;  %v252_v37 = vld [vmem:[%s2143_s28 + $0x488] sm:$0xff] }
  0x28   : > { %v254_v38 = vld [vmem:[%s2143_s28 + $0x4c0] sm:$0xff]  ;;  %251 = vst [vmem:[%s2148_s29 + $0x120] sm:$0xff] %v250_v36  ;;  %253 = vst [vmem:[%s2148_s29 + $0x128] sm:$0xff] %v252_v37  ;;  %v256_v39 = vld [vmem:[%s2143_s28 + $0x4c8] sm:$0xff] }
  0x29   : > { %255 = vst [vmem:[%s2148_s29 + $0x130] sm:$0xff] %v254_v38  ;;  %v258_v40 = vld [vmem:[%s2143_s28 + $0x500] sm:$0xff]  ;;  %v260_v41 = vld [vmem:[%s2143_s28 + $0x508] sm:$0xff]  ;;  %257 = vst [vmem:[%s2148_s29 + $0x138] sm:$0xff] %v256_v39 }
  0x2a   : > { %259 = vst [vmem:[%s2148_s29 + $0x140] sm:$0xff] %v258_v40  ;;  %261 = vst [vmem:[%s2148_s29 + $0x148] sm:$0xff] %v260_v41  ;;  %v262_v42 = vld [vmem:[%s2143_s28 + $0x540] sm:$0xff]  ;;  %v264_v43 = vld [vmem:[%s2143_s28 + $0x548] sm:$0xff] }
  0x2b   : > { %v266_v44 = vld [vmem:[%s2143_s28 + $0x580] sm:$0xff]  ;;  %263 = vst [vmem:[%s2148_s29 + $0x150] sm:$0xff] %v262_v42  ;;  %265 = vst [vmem:[%s2148_s29 + $0x158] sm:$0xff] %v264_v43  ;;  %v268_v45 = vld [vmem:[%s2143_s28 + $0x588] sm:$0xff] }
  0x2c   : > { %267 = vst [vmem:[%s2148_s29 + $0x160] sm:$0xff] %v266_v44  ;;  %v270_v46 = vld [vmem:[%s2143_s28 + $0x5c0] sm:$0xff]  ;;  %v272_v47 = vld [vmem:[%s2143_s28 + $0x5c8] sm:$0xff]  ;;  %269 = vst [vmem:[%s2148_s29 + $0x168] sm:$0xff] %v268_v45 }
  0x2d   : > { %271 = vst [vmem:[%s2148_s29 + $0x170] sm:$0xff] %v270_v46  ;;  %273 = vst [vmem:[%s2148_s29 + $0x178] sm:$0xff] %v272_v47  ;;  %v274_v48 = vld [vmem:[%s2143_s28 + $0x600] sm:$0xff]  ;;  %v276_v49 = vld [vmem:[%s2143_s28 + $0x608] sm:$0xff] }
  0x2e   : > { %v278_v50 = vld [vmem:[%s2143_s28 + $0x640] sm:$0xff]  ;;  %275 = vst [vmem:[%s2148_s29 + $0x180] sm:$0xff] %v274_v48  ;;  %277 = vst [vmem:[%s2148_s29 + $0x188] sm:$0xff] %v276_v49  ;;  %v280_v51 = vld [vmem:[%s2143_s28 + $0x648] sm:$0xff] }
  0x2f   : > { %279 = vst [vmem:[%s2148_s29 + $0x190] sm:$0xff] %v278_v50  ;;  %v282_v52 = vld [vmem:[%s2143_s28 + $0x680] sm:$0xff]  ;;  %v284_v53 = vld [vmem:[%s2143_s28 + $0x688] sm:$0xff]  ;;  %281 = vst [vmem:[%s2148_s29 + $0x198] sm:$0xff] %v280_v51 }
  0x30   : > { %283 = vst [vmem:[%s2148_s29 + $0x1a0] sm:$0xff] %v282_v52  ;;  %285 = vst [vmem:[%s2148_s29 + $0x1a8] sm:$0xff] %v284_v53  ;;  %v286_v54 = vld [vmem:[%s2143_s28 + $0x6c0] sm:$0xff]  ;;  %v288_v55 = vld [vmem:[%s2143_s28 + $0x6c8] sm:$0xff] }
  0x31   : > { %v290_v56 = vld [vmem:[%s2143_s28 + $0x700] sm:$0xff]  ;;  %287 = vst [vmem:[%s2148_s29 + $0x1b0] sm:$0xff] %v286_v54  ;;  %289 = vst [vmem:[%s2148_s29 + $0x1b8] sm:$0xff] %v288_v55  ;;  %v292_v57 = vld [vmem:[%s2143_s28 + $0x708] sm:$0xff] }
  0x32   : > { %291 = vst [vmem:[%s2148_s29 + $0x1c0] sm:$0xff] %v290_v56  ;;  %v294_v58 = vld [vmem:[%s2143_s28 + $0x740] sm:$0xff]  ;;  %v296_v59 = vld [vmem:[%s2143_s28 + $0x748] sm:$0xff]  ;;  %293 = vst [vmem:[%s2148_s29 + $0x1c8] sm:$0xff] %v292_v57 }
  0x33   : > { %295 = vst [vmem:[%s2148_s29 + $0x1d0] sm:$0xff] %v294_v58  ;;  %297 = vst [vmem:[%s2148_s29 + $0x1d8] sm:$0xff] %v296_v59  ;;  %v298_v60 = vld [vmem:[%s2143_s28 + $0x780] sm:$0xff]  ;;  %v300_v61 = vld [vmem:[%s2143_s28 + $0x788] sm:$0xff] }
  0x34   : > { %v302_v62 = vld [vmem:[%s2143_s28 + $0x7c0] sm:$0xff]  ;;  %299 = vst [vmem:[%s2148_s29 + $0x1e0] sm:$0xff] %v298_v60  ;;  %301 = vst [vmem:[%s2148_s29 + $0x1e8] sm:$0xff] %v300_v61  ;;  %v304_v63 = vld [vmem:[%s2143_s28 + $0x7c8] sm:$0xff] }
  0x35   : > { %303 = vst [vmem:[%s2148_s29 + $0x1f0] sm:$0xff] %v302_v62  ;;  %v306_v0 = vld [vmem:[%s2143_s28 + $0x800] sm:$0xff]  ;;  %v308_v1 = vld [vmem:[%s2143_s28 + $0x808] sm:$0xff]  ;;  %305 = vst [vmem:[%s2148_s29 + $0x1f8] sm:$0xff] %v304_v63 }
  0x36   : > { %307 = vst [vmem:[%s2148_s29 + $0x200] sm:$0xff] %v306_v0  ;;  %309 = vst [vmem:[%s2148_s29 + $0x208] sm:$0xff] %v308_v1  ;;  %v310_v2 = vld [vmem:[%s2143_s28 + $0x840] sm:$0xff]  ;;  %v312_v3 = vld [vmem:[%s2143_s28 + $0x848] sm:$0xff] }
  0x37   : > { %v314_v4 = vld [vmem:[%s2143_s28 + $0x880] sm:$0xff]  ;;  %311 = vst [vmem:[%s2148_s29 + $0x210] sm:$0xff] %v310_v2  ;;  %313 = vst [vmem:[%s2148_s29 + $0x218] sm:$0xff] %v312_v3  ;;  %v316_v5 = vld [vmem:[%s2143_s28 + $0x888] sm:$0xff] }
  0x38   : > { %315 = vst [vmem:[%s2148_s29 + $0x220] sm:$0xff] %v314_v4  ;;  %v318_v6 = vld [vmem:[%s2143_s28 + $0x8c0] sm:$0xff]  ;;  %v320_v7 = vld [vmem:[%s2143_s28 + $0x8c8] sm:$0xff]  ;;  %317 = vst [vmem:[%s2148_s29 + $0x228] sm:$0xff] %v316_v5 }
  0x39   : > { %319 = vst [vmem:[%s2148_s29 + $0x230] sm:$0xff] %v318_v6  ;;  %321 = vst [vmem:[%s2148_s29 + $0x238] sm:$0xff] %v320_v7  ;;  %v322_v8 = vld [vmem:[%s2143_s28 + $0x900] sm:$0xff]  ;;  %v324_v9 = vld [vmem:[%s2143_s28 + $0x908] sm:$0xff] }
  0x3a   : > { %v326_v10 = vld [vmem:[%s2143_s28 + $0x940] sm:$0xff]  ;;  %323 = vst [vmem:[%s2148_s29 + $0x240] sm:$0xff] %v322_v8  ;;  %325 = vst [vmem:[%s2148_s29 + $0x248] sm:$0xff] %v324_v9  ;;  %v328_v11 = vld [vmem:[%s2143_s28 + $0x948] sm:$0xff] }
  0x3b   : > { %327 = vst [vmem:[%s2148_s29 + $0x250] sm:$0xff] %v326_v10  ;;  %v330_v12 = vld [vmem:[%s2143_s28 + $0x980] sm:$0xff]  ;;  %v332_v13 = vld [vmem:[%s2143_s28 + $0x988] sm:$0xff]  ;;  %329 = vst [vmem:[%s2148_s29 + $0x258] sm:$0xff] %v328_v11 }
  0x3c   : > { %331 = vst [vmem:[%s2148_s29 + $0x260] sm:$0xff] %v330_v12  ;;  %333 = vst [vmem:[%s2148_s29 + $0x268] sm:$0xff] %v332_v13  ;;  %v334_v14 = vld [vmem:[%s2143_s28 + $0x9c0] sm:$0xff]  ;;  %v336_v15 = vld [vmem:[%s2143_s28 + $0x9c8] sm:$0xff] }
  0x3d   : > { %v338_v16 = vld [vmem:[%s2143_s28 + $0xa00] sm:$0xff]  ;;  %335 = vst [vmem:[%s2148_s29 + $0x270] sm:$0xff] %v334_v14  ;;  %337 = vst [vmem:[%s2148_s29 + $0x278] sm:$0xff] %v336_v15  ;;  %v340_v17 = vld [vmem:[%s2143_s28 + $0xa08] sm:$0xff] }
  0x3e   : > { %339 = vst [vmem:[%s2148_s29 + $0x280] sm:$0xff] %v338_v16  ;;  %v342_v18 = vld [vmem:[%s2143_s28 + $0xa40] sm:$0xff]  ;;  %v344_v19 = vld [vmem:[%s2143_s28 + $0xa48] sm:$0xff]  ;;  %341 = vst [vmem:[%s2148_s29 + $0x288] sm:$0xff] %v340_v17 }
  0x3f   : > { %343 = vst [vmem:[%s2148_s29 + $0x290] sm:$0xff] %v342_v18  ;;  %345 = vst [vmem:[%s2148_s29 + $0x298] sm:$0xff] %v344_v19  ;;  %v346_v20 = vld [vmem:[%s2143_s28 + $0xa80] sm:$0xff]  ;;  %v348_v21 = vld [vmem:[%s2143_s28 + $0xa88] sm:$0xff] }
  0x40   : > { %v350_v22 = vld [vmem:[%s2143_s28 + $0xac0] sm:$0xff]  ;;  %347 = vst [vmem:[%s2148_s29 + $0x2a0] sm:$0xff] %v346_v20  ;;  %349 = vst [vmem:[%s2148_s29 + $0x2a8] sm:$0xff] %v348_v21  ;;  %v352_v23 = vld [vmem:[%s2143_s28 + $0xac8] sm:$0xff] }
  0x41   : > { %351 = vst [vmem:[%s2148_s29 + $0x2b0] sm:$0xff] %v350_v22  ;;  %v354_v24 = vld [vmem:[%s2143_s28 + $0xb00] sm:$0xff]  ;;  %v356_v25 = vld [vmem:[%s2143_s28 + $0xb08] sm:$0xff]  ;;  %353 = vst [vmem:[%s2148_s29 + $0x2b8] sm:$0xff] %v352_v23 }
  0x42   : > { %355 = vst [vmem:[%s2148_s29 + $0x2c0] sm:$0xff] %v354_v24  ;;  %357 = vst [vmem:[%s2148_s29 + $0x2c8] sm:$0xff] %v356_v25  ;;  %v358_v26 = vld [vmem:[%s2143_s28 + $0xb40] sm:$0xff]  ;;  %v360_v27 = vld [vmem:[%s2143_s28 + $0xb48] sm:$0xff] }
  0x43   : > { %v362_v28 = vld [vmem:[%s2143_s28 + $0xb80] sm:$0xff]  ;;  %359 = vst [vmem:[%s2148_s29 + $0x2d0] sm:$0xff] %v358_v26  ;;  %361 = vst [vmem:[%s2148_s29 + $0x2d8] sm:$0xff] %v360_v27  ;;  %v364_v29 = vld [vmem:[%s2143_s28 + $0xb88] sm:$0xff] }
  0x44   : > { %363 = vst [vmem:[%s2148_s29 + $0x2e0] sm:$0xff] %v362_v28  ;;  %v366_v30 = vld [vmem:[%s2143_s28 + $0xbc0] sm:$0xff]  ;;  %v368_v31 = vld [vmem:[%s2143_s28 + $0xbc8] sm:$0xff]  ;;  %365 = vst [vmem:[%s2148_s29 + $0x2e8] sm:$0xff] %v364_v29 }
  0x45   : > { %367 = vst [vmem:[%s2148_s29 + $0x2f0] sm:$0xff] %v366_v30  ;;  %369 = vst [vmem:[%s2148_s29 + $0x2f8] sm:$0xff] %v368_v31  ;;  %v370_v32 = vld [vmem:[%s2143_s28 + $0xc00] sm:$0xff]  ;;  %v372_v33 = vld [vmem:[%s2143_s28 + $0xc08] sm:$0xff] }
  0x46   : > { %v374_v34 = vld [vmem:[%s2143_s28 + $0xc40] sm:$0xff]  ;;  %371 = vst [vmem:[%s2148_s29 + $0x300] sm:$0xff] %v370_v32  ;;  %373 = vst [vmem:[%s2148_s29 + $0x308] sm:$0xff] %v372_v33  ;;  %v376_v35 = vld [vmem:[%s2143_s28 + $0xc48] sm:$0xff] }
  0x47   : > { %375 = vst [vmem:[%s2148_s29 + $0x310] sm:$0xff] %v374_v34  ;;  %v378_v36 = vld [vmem:[%s2143_s28 + $0xc80] sm:$0xff]  ;;  %v380_v37 = vld [vmem:[%s2143_s28 + $0xc88] sm:$0xff]  ;;  %377 = vst [vmem:[%s2148_s29 + $0x318] sm:$0xff] %v376_v35 }
  0x48   : > { %379 = vst [vmem:[%s2148_s29 + $0x320] sm:$0xff] %v378_v36  ;;  %381 = vst [vmem:[%s2148_s29 + $0x328] sm:$0xff] %v380_v37  ;;  %v382_v38 = vld [vmem:[%s2143_s28 + $0xcc0] sm:$0xff]  ;;  %v384_v39 = vld [vmem:[%s2143_s28 + $0xcc8] sm:$0xff] }
  0x49   : > { %v386_v40 = vld [vmem:[%s2143_s28 + $0xd00] sm:$0xff]  ;;  %383 = vst [vmem:[%s2148_s29 + $0x330] sm:$0xff] %v382_v38  ;;  %385 = vst [vmem:[%s2148_s29 + $0x338] sm:$0xff] %v384_v39  ;;  %v388_v41 = vld [vmem:[%s2143_s28 + $0xd08] sm:$0xff] }
  0x4a   : > { %387 = vst [vmem:[%s2148_s29 + $0x340] sm:$0xff] %v386_v40  ;;  %v390_v42 = vld [vmem:[%s2143_s28 + $0xd40] sm:$0xff]  ;;  %v392_v43 = vld [vmem:[%s2143_s28 + $0xd48] sm:$0xff]  ;;  %389 = vst [vmem:[%s2148_s29 + $0x348] sm:$0xff] %v388_v41 }
  0x4b   : > { %391 = vst [vmem:[%s2148_s29 + $0x350] sm:$0xff] %v390_v42  ;;  %393 = vst [vmem:[%s2148_s29 + $0x358] sm:$0xff] %v392_v43  ;;  %v394_v44 = vld [vmem:[%s2143_s28 + $0xd80] sm:$0xff]  ;;  %v396_v45 = vld [vmem:[%s2143_s28 + $0xd88] sm:$0xff] }
  0x4c   : > { %v398_v46 = vld [vmem:[%s2143_s28 + $0xdc0] sm:$0xff]  ;;  %395 = vst [vmem:[%s2148_s29 + $0x360] sm:$0xff] %v394_v44  ;;  %397 = vst [vmem:[%s2148_s29 + $0x368] sm:$0xff] %v396_v45  ;;  %v400_v47 = vld [vmem:[%s2143_s28 + $0xdc8] sm:$0xff] }
  0x4d   : > { %399 = vst [vmem:[%s2148_s29 + $0x370] sm:$0xff] %v398_v46  ;;  %v402_v48 = vld [vmem:[%s2143_s28 + $0xe00] sm:$0xff]  ;;  %v404_v49 = vld [vmem:[%s2143_s28 + $0xe08] sm:$0xff]  ;;  %401 = vst [vmem:[%s2148_s29 + $0x378] sm:$0xff] %v400_v47 }
  0x4e   : > { %403 = vst [vmem:[%s2148_s29 + $0x380] sm:$0xff] %v402_v48  ;;  %405 = vst [vmem:[%s2148_s29 + $0x388] sm:$0xff] %v404_v49  ;;  %v406_v50 = vld [vmem:[%s2143_s28 + $0xe40] sm:$0xff]  ;;  %v408_v51 = vld [vmem:[%s2143_s28 + $0xe48] sm:$0xff] }
  0x4f   : > { %v410_v52 = vld [vmem:[%s2143_s28 + $0xe80] sm:$0xff]  ;;  %407 = vst [vmem:[%s2148_s29 + $0x390] sm:$0xff] %v406_v50  ;;  %409 = vst [vmem:[%s2148_s29 + $0x398] sm:$0xff] %v408_v51  ;;  %v412_v53 = vld [vmem:[%s2143_s28 + $0xe88] sm:$0xff] }
  0x50   : > { %411 = vst [vmem:[%s2148_s29 + $0x3a0] sm:$0xff] %v410_v52  ;;  %v414_v54 = vld [vmem:[%s2143_s28 + $0xec0] sm:$0xff]  ;;  %v416_v55 = vld [vmem:[%s2143_s28 + $0xec8] sm:$0xff]  ;;  %413 = vst [vmem:[%s2148_s29 + $0x3a8] sm:$0xff] %v412_v53 }
  0x51   : > { %415 = vst [vmem:[%s2148_s29 + $0x3b0] sm:$0xff] %v414_v54  ;;  %417 = vst [vmem:[%s2148_s29 + $0x3b8] sm:$0xff] %v416_v55  ;;  %v418_v56 = vld [vmem:[%s2143_s28 + $0xf00] sm:$0xff]  ;;  %v420_v57 = vld [vmem:[%s2143_s28 + $0xf08] sm:$0xff] }
  0x52   : > { %v422_v58 = vld [vmem:[%s2143_s28 + $0xf40] sm:$0xff]  ;;  %419 = vst [vmem:[%s2148_s29 + $0x3c0] sm:$0xff] %v418_v56  ;;  %421 = vst [vmem:[%s2148_s29 + $0x3c8] sm:$0xff] %v420_v57  ;;  %v424_v59 = vld [vmem:[%s2143_s28 + $0xf48] sm:$0xff] }
  0x53   : > { %423 = vst [vmem:[%s2148_s29 + $0x3d0] sm:$0xff] %v422_v58  ;;  %v426_v60 = vld [vmem:[%s2143_s28 + $0xf80] sm:$0xff]  ;;  %v428_v61 = vld [vmem:[%s2143_s28 + $0xf88] sm:$0xff]  ;;  %425 = vst [vmem:[%s2148_s29 + $0x3d8] sm:$0xff] %v424_v59 }
  0x54   : > { %427 = vst [vmem:[%s2148_s29 + $0x3e0] sm:$0xff] %v426_v60  ;;  %429 = vst [vmem:[%s2148_s29 + $0x3e8] sm:$0xff] %v428_v61  ;;  %v430_v62 = vld [vmem:[%s2143_s28 + $0xfc0] sm:$0xff]  ;;  %v432_v63 = vld [vmem:[%s2143_s28 + $0xfc8] sm:$0xff] }
  0x55   : > { %431 = vst [vmem:[%s2148_s29 + $0x3f0] sm:$0xff] %v430_v62  ;;  %433 = vst [vmem:[%s2148_s29 + $0x3f8] sm:$0xff] %v432_v63 }
  0x56 PF: > { %p1638_p8 = scmp.ge.s32.totalorder %s2073_s16, 1  ;;  %p446_p9 = scmp.lt.s32.totalorder %s2073_s16, 5 }
  0x58   : > { %p447_p10 = pnand %p1638_p8, %p446_p9 }
  0x59   : > { %s453_s30 = sand.u32 (!%p447_p10), 1, %s2057_s12   ;;  %v1935_v0 = vld [vmem:[%s2595_s0 + $0x4] ss:$16 sps:$4 sm:$0xff] (!%p447_p10)   ;;  %s1641_s20 = sshll.u32 (!%p447_p10), %s2065_s14, 2 }
  0x5a   : > { %450 = sbr.rel (%p447_p10) target bundleno = 447 (0x1bf), region = 51  ;;  %s1639_s4 = sshll.u32 (!%p447_p10), %s453_s30, 10  ;;  %1346 = vmatprep.mubr.bf16.mxu0 (!%p447_p10), %v1935_v0  ;;  %1432 = vmatprep.mubr.bf16.mxu1 (!%p447_p10), %v1935_v0 }
  0x5b   : > { %s2411_s7 = scalar_lea.vmem (!%p447_p10), [#allocation2], %s1639_s4  ;;  %p494_p11 = scmp.lt.s32.totalorder (!%p447_p10), %s1641_s20, 15 }
  0x5c   : > { %v1837_v1 = vld [vmem:[%s2411_s7 + $0x4] ss:$16 sps:$4 sm:$0xff] (!%p447_p10)   ;;  %v1839_v2 = vld [vmem:[%s2411_s7 + $0xc] ss:$16 sps:$4 sm:$0xff] (!%p447_p10)   ;;  %v1841_v3 = vld [vmem:[%s2411_s7] ss:$16 sps:$4 sm:$0xff] (!%p447_p10)  }
  0x5d   : > { %1314 = vmatprep.subr.bf16.mxu0 (!%p447_p10), %v1837_v1  ;;  %v1842_v4 = vld [vmem:[%s2411_s7 + $0x8] ss:$16 sps:$4 sm:$0xff] (!%p447_p10)   ;;  %1400 = vmatprep.subr.bf16.mxu1 (!%p447_p10), %v1839_v2  ;;  %v1843_v5 = vld [vmem:[%s2411_s7 + $0x24] ss:$16 sps:$4 sm:$0xff] (!%p447_p10)   ;;  %v1845_v6 = vld [vmem:[%s2411_s7 + $0x2c] ss:$16 sps:$4 sm:$0xff] (!%p447_p10)  }
  0x5e   : > { %1315 = vmatpush1.bf16.msra.mxu0 (!%p447_p10), %v1841_v3  ;;  %1401 = vmatpush1.bf16.msra.mxu1 (!%p447_p10), %v1842_v4  ;;  %v1847_v7 = vld [vmem:[%s2411_s7 + $0x20] ss:$16 sps:$4 sm:$0xff] (!%p447_p10)   ;;  %v1848_v8 = vld [vmem:[%s2411_s7 + $0x28] ss:$16 sps:$4 sm:$0xff] (!%p447_p10)   ;;  %v1849_v9 = vld [vmem:[%s2411_s7 + $0x44] ss:$16 sps:$4 sm:$0xff] (!%p447_p10)  }
  0x5f   : > { %1316 = vmatprep.subr.bf16.mxu0 (!%p447_p10), %v1843_v5  ;;  %1402 = vmatprep.subr.bf16.mxu1 (!%p447_p10), %v1845_v6  ;;  %v1851_v10 = vld [vmem:[%s2411_s7 + $0x4c] ss:$16 sps:$4 sm:$0xff] (!%p447_p10)   ;;  %v1853_v11 = vld [vmem:[%s2411_s7 + $0x40] ss:$16 sps:$4 sm:$0xff] (!%p447_p10)   ;;  %v1854_v12 = vld [vmem:[%s2411_s7 + $0x48] ss:$16 sps:$4 sm:$0xff] (!%p447_p10)  }
  0x60   : > { %v1855_v13 = vld [vmem:[%s2411_s7 + $0x64] ss:$16 sps:$4 sm:$0xff] (!%p447_p10)   ;;  %v1857_v14 = vld [vmem:[%s2411_s7 + $0x6c] ss:$16 sps:$4 sm:$0xff] (!%p447_p10)   ;;  %v1859_v15 = vld [vmem:[%s2411_s7 + $0x60] ss:$16 sps:$4 sm:$0xff] (!%p447_p10)  }
  0x61   : > { %v1860_v16 = vld [vmem:[%s2411_s7 + $0x68] ss:$16 sps:$4 sm:$0xff]   ;;  %v1861_v17 = vld [vmem:[%s2411_s7 + $0x84] ss:$16 sps:$4 sm:$0xff]   ;;  %v1863_v18 = vld [vmem:[%s2411_s7 + $0x8c] ss:$16 sps:$4 sm:$0xff]  }
  0x62   : > { %1317 = vmatpush1.bf16.msra.mxu0 %v1847_v7  ;;  %1403 = vmatpush1.bf16.msra.mxu1 %v1848_v8  ;;  %v1865_v19 = vld [vmem:[%s2411_s7 + $0x80] ss:$16 sps:$4 sm:$0xff]   ;;  %v1866_v20 = vld [vmem:[%s2411_s7 + $0x88] ss:$16 sps:$4 sm:$0xff]   ;;  %v1867_v21 = vld [vmem:[%s2411_s7 + $0xa4] ss:$16 sps:$4 sm:$0xff]  }
  0x63   : > { %1318 = vmatprep.subr.bf16.mxu0 %v1849_v9  ;;  %1404 = vmatprep.subr.bf16.mxu1 %v1851_v10  ;;  %v1869_v22 = vld [vmem:[%s2411_s7 + $0xac] ss:$16 sps:$4 sm:$0xff]   ;;  %v1871_v23 = vld [vmem:[%s2411_s7 + $0xa0] ss:$16 sps:$4 sm:$0xff]   ;;  %v1872_v24 = vld [vmem:[%s2411_s7 + $0xa8] ss:$16 sps:$4 sm:$0xff]  }
  0x64   : > { %v1873_v25 = vld [vmem:[%s2411_s7 + $0xc4] ss:$16 sps:$4 sm:$0xff]   ;;  %v1875_v26 = vld [vmem:[%s2411_s7 + $0xcc] ss:$16 sps:$4 sm:$0xff]   ;;  %v1877_v27 = vld [vmem:[%s2411_s7 + $0xc0] ss:$16 sps:$4 sm:$0xff]  }
  0x65   : > { %v1878_v28 = vld [vmem:[%s2411_s7 + $0xc8] ss:$16 sps:$4 sm:$0xff]   ;;  %v1879_v29 = vld [vmem:[%s2411_s7 + $0xe4] ss:$16 sps:$4 sm:$0xff]   ;;  %v1881_v30 = vld [vmem:[%s2411_s7 + $0xec] ss:$16 sps:$4 sm:$0xff]  }
  0x66   : > { %1319 = vmatpush1.bf16.msra.mxu0 %v1853_v11  ;;  %1405 = vmatpush1.bf16.msra.mxu1 %v1854_v12  ;;  %v1883_v31 = vld [vmem:[%s2411_s7 + $0xe0] ss:$16 sps:$4 sm:$0xff]   ;;  %v1884_v32 = vld [vmem:[%s2411_s7 + $0xe8] ss:$16 sps:$4 sm:$0xff]   ;;  %v1885_v33 = vld [vmem:[%s2411_s7 + $0x104] ss:$16 sps:$4 sm:$0xff]  }
  0x67   : > { %1320 = vmatprep.subr.bf16.mxu0 %v1855_v13  ;;  %1406 = vmatprep.subr.bf16.mxu1 %v1857_v14  ;;  %v1887_v34 = vld [vmem:[%s2411_s7 + $0x10c] ss:$16 sps:$4 sm:$0xff]   ;;  %v1889_v35 = vld [vmem:[%s2411_s7 + $0x100] ss:$16 sps:$4 sm:$0xff]   ;;  %v1890_v36 = vld [vmem:[%s2411_s7 + $0x108] ss:$16 sps:$4 sm:$0xff]  }
  0x68   : > { %v1891_v37 = vld [vmem:[%s2411_s7 + $0x124] ss:$16 sps:$4 sm:$0xff]   ;;  %v1893_v38 = vld [vmem:[%s2411_s7 + $0x12c] ss:$16 sps:$4 sm:$0xff]   ;;  %v1895_v39 = vld [vmem:[%s2411_s7 + $0x120] ss:$16 sps:$4 sm:$0xff]  }
  0x69   : > { %v1896_v40 = vld [vmem:[%s2411_s7 + $0x128] ss:$16 sps:$4 sm:$0xff]   ;;  %v1897_v41 = vld [vmem:[%s2411_s7 + $0x144] ss:$16 sps:$4 sm:$0xff]   ;;  %v1899_v42 = vld [vmem:[%s2411_s7 + $0x14c] ss:$16 sps:$4 sm:$0xff]  }
  0x6a   : > { %1321 = vmatpush1.bf16.msra.mxu0 %v1859_v15  ;;  %1407 = vmatpush1.bf16.msra.mxu1 %v1860_v16  ;;  %v1901_v43 = vld [vmem:[%s2411_s7 + $0x140] ss:$16 sps:$4 sm:$0xff]   ;;  %v1902_v44 = vld [vmem:[%s2411_s7 + $0x148] ss:$16 sps:$4 sm:$0xff]   ;;  %v1903_v45 = vld [vmem:[%s2411_s7 + $0x164] ss:$16 sps:$4 sm:$0xff]  }
  0x6b   : > { %1322 = vmatprep.subr.bf16.mxu0 %v1861_v17  ;;  %1408 = vmatprep.subr.bf16.mxu1 %v1863_v18  ;;  %v1905_v46 = vld [vmem:[%s2411_s7 + $0x16c] ss:$16 sps:$4 sm:$0xff]   ;;  %v1907_v47 = vld [vmem:[%s2411_s7 + $0x160] ss:$16 sps:$4 sm:$0xff]   ;;  %v1908_v48 = vld [vmem:[%s2411_s7 + $0x168] ss:$16 sps:$4 sm:$0xff]  }
  0x6c   : > { %v1909_v49 = vld [vmem:[%s2411_s7 + $0x184] ss:$16 sps:$4 sm:$0xff]   ;;  %v1911_v50 = vld [vmem:[%s2411_s7 + $0x18c] ss:$16 sps:$4 sm:$0xff]   ;;  %v1913_v51 = vld [vmem:[%s2411_s7 + $0x180] ss:$16 sps:$4 sm:$0xff]  }
  0x6d   : > { %v1914_v52 = vld [vmem:[%s2411_s7 + $0x188] ss:$16 sps:$4 sm:$0xff]   ;;  %v1915_v53 = vld [vmem:[%s2411_s7 + $0x1a4] ss:$16 sps:$4 sm:$0xff]   ;;  %v1917_v54 = vld [vmem:[%s2411_s7 + $0x1ac] ss:$16 sps:$4 sm:$0xff]  }
  0x6e   : > { %1323 = vmatpush1.bf16.msra.mxu0 %v1865_v19  ;;  %1409 = vmatpush1.bf16.msra.mxu1 %v1866_v20  ;;  %v1919_v55 = vld [vmem:[%s2411_s7 + $0x1a0] ss:$16 sps:$4 sm:$0xff]   ;;  %v1920_v56 = vld [vmem:[%s2411_s7 + $0x1a8] ss:$16 sps:$4 sm:$0xff]   ;;  %v1921_v57 = vld [vmem:[%s2411_s7 + $0x1c4] ss:$16 sps:$4 sm:$0xff]  }
  0x6f   : > { %1324 = vmatprep.subr.bf16.mxu0 %v1867_v21  ;;  %1410 = vmatprep.subr.bf16.mxu1 %v1869_v22  ;;  %v1923_v58 = vld [vmem:[%s2411_s7 + $0x1cc] ss:$16 sps:$4 sm:$0xff]   ;;  %v1925_v59 = vld [vmem:[%s2411_s7 + $0x1c0] ss:$16 sps:$4 sm:$0xff]   ;;  %v1926_v60 = vld [vmem:[%s2411_s7 + $0x1c8] ss:$16 sps:$4 sm:$0xff]  }
  0x70   : > { %v1927_v61 = vld [vmem:[%s2411_s7 + $0x1e4] ss:$16 sps:$4 sm:$0xff]   ;;  %v1929_v62 = vld [vmem:[%s2411_s7 + $0x1ec] ss:$16 sps:$4 sm:$0xff]   ;;  %v1931_v63 = vld [vmem:[%s2411_s7 + $0x1e0] ss:$16 sps:$4 sm:$0xff]  }
  0x71   : > { %v1932_v0 = vld [vmem:[%s2411_s7 + $0x1e8] ss:$16 sps:$4 sm:$0xff]   ;;  %v1938_v1 = vld [vmem:[%s2411_s7 + $0x204] ss:$16 sps:$4 sm:$0xff]   ;;  %v1941_v2 = vld [vmem:[%s2411_s7 + $0x20c] ss:$16 sps:$4 sm:$0xff]  }
  0x72   : > { %1325 = vmatpush1.bf16.msra.mxu0 %v1871_v23  ;;  %1411 = vmatpush1.bf16.msra.mxu1 %v1872_v24  ;;  %v1933_v3 = vld [vmem:[%s2595_s0] ss:$16 sps:$4 sm:$0xff]   ;;  %v1939_v5 = vld [vmem:[%s2411_s7 + $0x208] ss:$16 sps:$4 sm:$0xff]   ;;  %v1944_v6 = vld [vmem:[%s2411_s7 + $0x224] ss:$16 sps:$4 sm:$0xff]  }
  0x73   : > { %1326 = vmatprep.subr.bf16.mxu0 %v1873_v25  ;;  %1412 = vmatprep.subr.bf16.mxu1 %v1875_v26  ;;  %v1936_v4 = vld [vmem:[%s2411_s7 + $0x200] ss:$16 sps:$4 sm:$0xff]   ;;  %v1947_v7 = vld [vmem:[%s2411_s7 + $0x22c] ss:$16 sps:$4 sm:$0xff]   ;;  %v1945_v9 = vld [vmem:[%s2411_s7 + $0x228] ss:$16 sps:$4 sm:$0xff]  }
  0x74   : > { %v1942_v8 = vld [vmem:[%s2411_s7 + $0x220] ss:$16 sps:$4 sm:$0xff]   ;;  %v1950_v10 = vld [vmem:[%s2411_s7 + $0x244] ss:$16 sps:$4 sm:$0xff]   ;;  %v1953_v11 = vld [vmem:[%s2411_s7 + $0x24c] ss:$16 sps:$4 sm:$0xff]  }
  0x75   : > { %v1948_v12 = vld [vmem:[%s2411_s7 + $0x240] ss:$16 sps:$4 sm:$0xff]   ;;  %v1951_v13 = vld [vmem:[%s2411_s7 + $0x248] ss:$16 sps:$4 sm:$0xff]   ;;  %v1956_v14 = vld [vmem:[%s2411_s7 + $0x264] ss:$16 sps:$4 sm:$0xff]  }
  0x76   : > { %1327 = vmatpush1.bf16.msra.mxu0 %v1877_v27  ;;  %1413 = vmatpush1.bf16.msra.mxu1 %v1878_v28  ;;  %v1959_v15 = vld [vmem:[%s2411_s7 + $0x26c] ss:$16 sps:$4 sm:$0xff]   ;;  %v1954_v16 = vld [vmem:[%s2411_s7 + $0x260] ss:$16 sps:$4 sm:$0xff]   ;;  %v1957_v17 = vld [vmem:[%s2411_s7 + $0x268] ss:$16 sps:$4 sm:$0xff]  }
  0x77   : > { %1328 = vmatprep.subr.bf16.mxu0 %v1879_v29  ;;  %1414 = vmatprep.subr.bf16.mxu1 %v1881_v30  ;;  %v1962_v18 = vld [vmem:[%s2411_s7 + $0x284] ss:$16 sps:$4 sm:$0xff]   ;;  %v1965_v19 = vld [vmem:[%s2411_s7 + $0x28c] ss:$16 sps:$4 sm:$0xff]   ;;  %v1960_v20 = vld [vmem:[%s2411_s7 + $0x280] ss:$16 sps:$4 sm:$0xff]  }
  0x78   : > { %v1963_v21 = vld [vmem:[%s2411_s7 + $0x288] ss:$16 sps:$4 sm:$0xff]   ;;  %v1968_v22 = vld [vmem:[%s2411_s7 + $0x2a4] ss:$16 sps:$4 sm:$0xff]   ;;  %v1971_v23 = vld [vmem:[%s2411_s7 + $0x2ac] ss:$16 sps:$4 sm:$0xff]  }
  0x79   : > { %v1966_v24 = vld [vmem:[%s2411_s7 + $0x2a0] ss:$16 sps:$4 sm:$0xff]   ;;  %v1969_v25 = vld [vmem:[%s2411_s7 + $0x2a8] ss:$16 sps:$4 sm:$0xff]   ;;  %v1974_v26 = vld [vmem:[%s2411_s7 + $0x2c4] ss:$16 sps:$4 sm:$0xff]  }
  0x7a   : > { %1329 = vmatpush1.bf16.msra.mxu0 %v1883_v31  ;;  %1415 = vmatpush1.bf16.msra.mxu1 %v1884_v32  ;;  %v1977_v27 = vld [vmem:[%s2411_s7 + $0x2cc] ss:$16 sps:$4 sm:$0xff]   ;;  %v1972_v29 = vld [vmem:[%s2411_s7 + $0x2c0] ss:$16 sps:$4 sm:$0xff]   ;;  %v1975_v30 = vld [vmem:[%s2411_s7 + $0x2c8] ss:$16 sps:$4 sm:$0xff]  }
  0x7b   : > { %1330 = vmatprep.subr.bf16.mxu0 %v1885_v33  ;;  %1416 = vmatprep.subr.bf16.mxu1 %v1887_v34  ;;  %v2034_v28 = vld [vmem:[%s2595_s0 + $0xc] ss:$16 sps:$4 sm:$0xff]   ;;  %v1980_v31 = vld [vmem:[%s2411_s7 + $0x2e4] ss:$16 sps:$4 sm:$0xff]   ;;  %v1978_v33 = vld [vmem:[%s2411_s7 + $0x2e0] ss:$16 sps:$4 sm:$0xff]  }
  0x7c   : > { %v1983_v32 = vld [vmem:[%s2411_s7 + $0x2ec] ss:$16 sps:$4 sm:$0xff]   ;;  %v1981_v34 = vld [vmem:[%s2411_s7 + $0x2e8] ss:$16 sps:$4 sm:$0xff]   ;;  %s2607_s20 = smov (!%p494_p11, %s1641_s20), 15  ;;  %s1640_s26 = sshll.u32 %s453_s30, 6 }
  0x7d   : > { %s496_s25 = scalar_lea.vmem %s2597_s2, %s2607_s20  ;;  %s2556_s27 = scalar_lea.vmem [#allocation3], %s1640_s26 }
  0x7e   : > { %1331 = vmatpush1.bf16.msra.mxu0 %v1889_v35  ;;  %1417 = vmatpush1.bf16.msra.mxu1 %v1890_v36  ;;  %v1986_v35 = vld [vmem:[%s2411_s7 + $0x304] ss:$16 sps:$4 sm:$0xff]   ;;  %v1989_v36 = vld [vmem:[%s2411_s7 + $0x30c] ss:$16 sps:$4 sm:$0xff]   ;;  %s1780_s12 = sshll.u32 (%p2130_p6), %s2065_s14, 5 }
  0x7f   : > { %1332 = vmatprep.subr.bf16.mxu0 %v1891_v37  ;;  %1418 = vmatprep.subr.bf16.mxu1 %v1893_v38  ;;  %v1984_v37 = vld [vmem:[%s2411_s7 + $0x300] ss:$16 sps:$4 sm:$0xff]   ;;  %v1987_v38 = vld [vmem:[%s2411_s7 + $0x308] ss:$16 sps:$4 sm:$0xff]   ;;  %s1506_s30 = scalar_lea.vmem (%p2130_p6), %s2598_s3, %s1780_s12 }
  0x82   : > { %1333 = vmatpush1.bf16.msra.mxu0 %v1895_v39  ;;  %1419 = vmatpush1.bf16.msra.mxu1 %v1896_v40  ;;  %v1992_v39 = vld [vmem:[%s2411_s7 + $0x324] ss:$16 sps:$4 sm:$0xff]   ;;  %v1995_v40 = vld [vmem:[%s2411_s7 + $0x32c] ss:$16 sps:$4 sm:$0xff]  }
  0x83   : > { %1334 = vmatprep.subr.bf16.mxu0 %v1897_v41  ;;  %1420 = vmatprep.subr.bf16.mxu1 %v1899_v42  ;;  %v1990_v41 = vld [vmem:[%s2411_s7 + $0x320] ss:$16 sps:$4 sm:$0xff]   ;;  %v1993_v42 = vld [vmem:[%s2411_s7 + $0x328] ss:$16 sps:$4 sm:$0xff]  }
  0x86   : > { %1335 = vmatpush1.bf16.msra.mxu0 %v1901_v43  ;;  %1421 = vmatpush1.bf16.msra.mxu1 %v1902_v44  ;;  %v1998_v43 = vld [vmem:[%s2411_s7 + $0x344] ss:$16 sps:$4 sm:$0xff]   ;;  %v2001_v44 = vld [vmem:[%s2411_s7 + $0x34c] ss:$16 sps:$4 sm:$0xff]  }
  0x87   : > { %1336 = vmatprep.subr.bf16.mxu0 %v1903_v45  ;;  %1422 = vmatprep.subr.bf16.mxu1 %v1905_v46  ;;  %v1996_v45 = vld [vmem:[%s2411_s7 + $0x340] ss:$16 sps:$4 sm:$0xff]   ;;  %v1999_v46 = vld [vmem:[%s2411_s7 + $0x348] ss:$16 sps:$4 sm:$0xff]  }
  0x8a   : > { %1337 = vmatpush1.bf16.msra.mxu0 %v1907_v47  ;;  %1423 = vmatpush1.bf16.msra.mxu1 %v1908_v48  ;;  %v2004_v47 = vld [vmem:[%s2411_s7 + $0x364] ss:$16 sps:$4 sm:$0xff]   ;;  %v2007_v48 = vld [vmem:[%s2411_s7 + $0x36c] ss:$16 sps:$4 sm:$0xff]  }
  0x8b   : > { %1338 = vmatprep.subr.bf16.mxu0 %v1909_v49  ;;  %1424 = vmatprep.subr.bf16.mxu1 %v1911_v50  ;;  %v2002_v49 = vld [vmem:[%s2411_s7 + $0x360] ss:$16 sps:$4 sm:$0xff]   ;;  %v2005_v50 = vld [vmem:[%s2411_s7 + $0x368] ss:$16 sps:$4 sm:$0xff]  }
  0x8e   : > { %1339 = vmatpush1.bf16.msra.mxu0 %v1913_v51  ;;  %1425 = vmatpush1.bf16.msra.mxu1 %v1914_v52  ;;  %v2010_v51 = vld [vmem:[%s2411_s7 + $0x384] ss:$16 sps:$4 sm:$0xff]   ;;  %v2013_v52 = vld [vmem:[%s2411_s7 + $0x38c] ss:$16 sps:$4 sm:$0xff]  }
  0x8f   : > { %1340 = vmatprep.subr.bf16.mxu0 %v1915_v53  ;;  %1426 = vmatprep.subr.bf16.mxu1 %v1917_v54  ;;  %v2008_v53 = vld [vmem:[%s2411_s7 + $0x380] ss:$16 sps:$4 sm:$0xff]   ;;  %v2011_v54 = vld [vmem:[%s2411_s7 + $0x388] ss:$16 sps:$4 sm:$0xff]  }
  0x92   : > { %1341 = vmatpush1.bf16.msra.mxu0 %v1919_v55  ;;  %1427 = vmatpush1.bf16.msra.mxu1 %v1920_v56  ;;  %v2016_v55 = vld [vmem:[%s2411_s7 + $0x3a4] ss:$16 sps:$4 sm:$0xff]   ;;  %v2019_v56 = vld [vmem:[%s2411_s7 + $0x3ac] ss:$16 sps:$4 sm:$0xff]  }
  0x93   : > { %1342 = vmatprep.subr.bf16.mxu0 %v1921_v57  ;;  %1428 = vmatprep.subr.bf16.mxu1 %v1923_v58  ;;  %v2014_v57 = vld [vmem:[%s2411_s7 + $0x3a0] ss:$16 sps:$4 sm:$0xff]   ;;  %v2017_v58 = vld [vmem:[%s2411_s7 + $0x3a8] ss:$16 sps:$4 sm:$0xff]  }
  0x96   : > { %1343 = vmatpush1.bf16.msra.mxu0 %v1925_v59  ;;  %1429 = vmatpush1.bf16.msra.mxu1 %v1926_v60  ;;  %v2022_v59 = vld [vmem:[%s2411_s7 + $0x3c4] ss:$16 sps:$4 sm:$0xff]   ;;  %v2025_v60 = vld [vmem:[%s2411_s7 + $0x3cc] ss:$16 sps:$4 sm:$0xff]  }
  0x97   : > { %1344 = vmatprep.subr.bf16.mxu0 %v1927_v61  ;;  %1430 = vmatprep.subr.bf16.mxu1 %v1929_v62  ;;  %v2020_v61 = vld [vmem:[%s2411_s7 + $0x3c0] ss:$16 sps:$4 sm:$0xff]   ;;  %v2023_v62 = vld [vmem:[%s2411_s7 + $0x3c8] ss:$16 sps:$4 sm:$0xff]  }
  0x9a   : > { %1345 = vmatpush1.bf16.msra.mxu0 %v1931_v63  ;;  %1431 = vmatpush1.bf16.msra.mxu1 %v1932_v0  ;;  %v2028_v63 = vld [vmem:[%s2411_s7 + $0x3e4] ss:$16 sps:$4 sm:$0xff]   ;;  %v2031_v0 = vld [vmem:[%s2411_s7 + $0x3ec] ss:$16 sps:$4 sm:$0xff]  }
  0x9b   : > { %1357 = vmatprep.subr.bf16.mxu0 %v1938_v1  ;;  %1443 = vmatprep.subr.bf16.mxu1 %v1941_v2  ;;  %v2026_v1 = vld [vmem:[%s2411_s7 + $0x3e0] ss:$16 sps:$4 sm:$0xff]   ;;  %v2029_v2 = vld [vmem:[%s2411_s7 + $0x3e8] ss:$16 sps:$4 sm:$0xff]  }
  0x9d   : > { %1347 = vmatmul.mubr.bf16.vlgmr.msra.gmra.mrb[0].mxu0 %v1933_v3  ;;  %1433 = vmatmul.mubr.bf16.vlgmr.msra.gmra.mrb[0].mxu1 %v1933_v3  ;;  %v2032_v3 = vld [vmem:[%s2595_s0 + $0x8] ss:$16 sps:$4 sm:$0xff]  }
  0x9e   : > { %1358 = vmatpush1.bf16.msra.mxu0 %v1936_v4  ;;  %1444 = vmatpush1.bf16.msra.mxu1 %v1939_v5  ;;  %v634_v4 = vlaneseq }
  0x9f   : > { %1359 = vmatprep.subr.bf16.mxu0 %v1944_v6  ;;  %1445 = vmatprep.subr.bf16.mxu1 %v1947_v7 }
  0xa0   : > { %1389 = vmatprep.mubr.bf16.mxu0 %v2034_v28  ;;  %1475 = vmatprep.mubr.bf16.mxu1 %v2034_v28  ;;  %v635_v5 = vshrl.u32 %v634_v4, 7 }
  0xa2   : > { %1360 = vmatpush1.bf16.msra.mxu0 %v1942_v8  ;;  %1446 = vmatpush1.bf16.msra.mxu1 %v1945_v9  ;;  %v636_v6 = vsub.s32 0, %v635_v5  ;;  %v644_v7 = vsub.s32 2, %v635_v5  ;;  %v632_v8 = vld [vmem:[%s496_s25] sm:$0xf]  ;;  %v640_v9 = vsub.s32 1, %v635_v5 }
  0xa3   : > { %1361 = vmatprep.subr.bf16.mxu0 %v1950_v10  ;;  %1447 = vmatprep.subr.bf16.mxu1 %v1953_v11  ;;  %v648_v10 = vsub.s32 3, %v635_v5 }
  0xa4   : > { %v637_v11 = vrot.slane %v632_v8, %v636_v6 }
  0xa6   : > { %1362 = vmatpush1.bf16.msra.mxu0 %v1948_v12  ;;  %1448 = vmatpush1.bf16.msra.mxu1 %v1951_v13  ;;  %v645_v12 = vrot.slane %v632_v8, %v644_v7  ;;  %v641_v13 = vrot.slane %v632_v8, %v640_v9 }
  0xa7   : > { %1363 = vmatprep.subr.bf16.mxu0 %v1956_v14  ;;  %1449 = vmatprep.subr.bf16.mxu1 %v1959_v15  ;;  %v649_v14 = vrot.slane %v632_v8, %v648_v10 }
  0xaa   : > { %1364 = vmatpush1.bf16.msra.mxu0 %v1954_v16  ;;  %1450 = vmatpush1.bf16.msra.mxu1 %v1957_v17 }
  0xab   : > { %1365 = vmatprep.subr.bf16.mxu0 %v1962_v18  ;;  %1451 = vmatprep.subr.bf16.mxu1 %v1965_v19 }
  0xae   : > { %1366 = vmatpush1.bf16.msra.mxu0 %v1960_v20  ;;  %1452 = vmatpush1.bf16.msra.mxu1 %v1963_v21 }
  0xaf   : > { %1367 = vmatprep.subr.bf16.mxu0 %v1968_v22  ;;  %1453 = vmatprep.subr.bf16.mxu1 %v1971_v23 }
  0xb2   : > { %1368 = vmatpush1.bf16.msra.mxu0 %v1966_v24  ;;  %1454 = vmatpush1.bf16.msra.mxu1 %v1969_v25 }
  0xb3   : > { %1369 = vmatprep.subr.bf16.mxu0 %v1974_v26  ;;  %1455 = vmatprep.subr.bf16.mxu1 %v1977_v27 }
  0xb6   : > { %1370 = vmatpush1.bf16.msra.mxu0 %v1972_v29  ;;  %1456 = vmatpush1.bf16.msra.mxu1 %v1975_v30 }
  0xb7   : > { %1371 = vmatprep.subr.bf16.mxu0 %v1980_v31  ;;  %1457 = vmatprep.subr.bf16.mxu1 %v1983_v32 }
  0xba   : > { %1372 = vmatpush1.bf16.msra.mxu0 %v1978_v33  ;;  %1458 = vmatpush1.bf16.msra.mxu1 %v1981_v34 }
  0xbb   : > { %1373 = vmatprep.subr.bf16.mxu0 %v1986_v35  ;;  %1459 = vmatprep.subr.bf16.mxu1 %v1989_v36 }
  0xbe   : > { %1374 = vmatpush1.bf16.msra.mxu0 %v1984_v37  ;;  %1460 = vmatpush1.bf16.msra.mxu1 %v1987_v38 }
  0xbf   : > { %1375 = vmatprep.subr.bf16.mxu0 %v1992_v39  ;;  %1461 = vmatprep.subr.bf16.mxu1 %v1995_v40 }
  0xc2   : > { %1376 = vmatpush1.bf16.msra.mxu0 %v1990_v41  ;;  %1462 = vmatpush1.bf16.msra.mxu1 %v1993_v42 }
  0xc3   : > { %1377 = vmatprep.subr.bf16.mxu0 %v1998_v43  ;;  %1463 = vmatprep.subr.bf16.mxu1 %v2001_v44 }
  0xc6   : > { %1378 = vmatpush1.bf16.msra.mxu0 %v1996_v45  ;;  %1464 = vmatpush1.bf16.msra.mxu1 %v1999_v46 }
  0xc7   : > { %1379 = vmatprep.subr.bf16.mxu0 %v2004_v47  ;;  %1465 = vmatprep.subr.bf16.mxu1 %v2007_v48 }
  0xca   : > { %1380 = vmatpush1.bf16.msra.mxu0 %v2002_v49  ;;  %1466 = vmatpush1.bf16.msra.mxu1 %v2005_v50 }
  0xcb   : > { %1381 = vmatprep.subr.bf16.mxu0 %v2010_v51  ;;  %1467 = vmatprep.subr.bf16.mxu1 %v2013_v52 }
  0xce   : > { %1382 = vmatpush1.bf16.msra.mxu0 %v2008_v53  ;;  %1468 = vmatpush1.bf16.msra.mxu1 %v2011_v54 }
  0xcf   : > { %1383 = vmatprep.subr.bf16.mxu0 %v2016_v55  ;;  %1469 = vmatprep.subr.bf16.mxu1 %v2019_v56 }
  0xd2   : > { %1384 = vmatpush1.bf16.msra.mxu0 %v2014_v57  ;;  %1470 = vmatpush1.bf16.msra.mxu1 %v2017_v58 }
  0xd3   : > { %1385 = vmatprep.subr.bf16.mxu0 %v2022_v59  ;;  %1471 = vmatprep.subr.bf16.mxu1 %v2025_v60 }
  0xd6   : > { %1386 = vmatpush1.bf16.msra.mxu0 %v2020_v61  ;;  %1472 = vmatpush1.bf16.msra.mxu1 %v2023_v62 }
  0xd7   : > { %1387 = vmatprep.subr.bf16.mxu0 %v2028_v63  ;;  %1473 = vmatprep.subr.bf16.mxu1 %v2031_v0 }
  0xda   : > { %1388 = vmatpush1.bf16.msra.mxu0 %v2026_v1  ;;  %1474 = vmatpush1.bf16.msra.mxu1 %v2029_v2 }
  0xdd   : > { %1390 = vmatmul.mubr.bf16.vlgmr.msra.gmra.mrb[0].mxu0 %v2032_v3  ;;  %1476 = vmatmul.mubr.bf16.vlgmr.msra.gmra.mrb[0].mxu1 %v2032_v3 }
 0x1b0   : > { %v1391_v15 = vpop.f32.mrb[0].mxu0  ;;  %v1477_v16 = vpop.f32.mrb[0].mxu1  ;;  %1500 = sbr.rel (!%p2130_p6) target bundleno = 447 (0x1bf), region = 59 }
 0x1b1   : > { %v1781_v17 = vadd.f32 %v1391_v15, %v637_v11  ;;  %v1785_v18 = vadd.f32 %v1477_v16, %v645_v12  ;;  %v1393_v19 = vpop.f32.mrb[1].mxu0  ;;  %v1479_v20 = vpop.f32.mrb[1].mxu1 }
 0x1b2   : > { %v1782_v21 = vadd.f32 %v1393_v19, %v641_v13  ;;  %v1786_v22 = vadd.f32 %v1479_v20, %v649_v14  ;;  %v1395_v23 = vpop.f32.mrb[2].mxu0  ;;  %v1481_v24 = vpop.f32.mrb[2].mxu1 }
 0x1b3   : > { %1486 = vst [vmem:[%s2556_s27] sm:$0xff] %v1781_v17  ;;  %1488 = vst [vmem:[%s2556_s27 + $0x10] sm:$0xff] %v1785_v18  ;;  %v1783_v25 = vadd.f32 %v1395_v23, %v637_v11  ;;  %v1787_v26 = vadd.f32 %v1481_v24, %v645_v12  ;;  %v1397_v27 = vpop.f32.mrb[3].mxu0  ;;  %v1483_v28 = vpop.f32.mrb[3].mxu1 }
 0x1b4   : > { %1487 = vst [vmem:[%s2556_s27 + $0x8] sm:$0xff] %v1782_v21  ;;  %1489 = vst [vmem:[%s2556_s27 + $0x18] sm:$0xff] %v1786_v22  ;;  %v1784_v29 = vadd.f32 %v1397_v27, %v641_v13  ;;  %v1788_v30 = vadd.f32 %v1483_v28, %v649_v14 }
 0x1b5   : > { %1490 = vst [vmem:[%s2556_s27 + $0x20] sm:$0xff] %v1783_v25  ;;  %1492 = vst [vmem:[%s2556_s27 + $0x30] sm:$0xff] %v1787_v26 }
 0x1b6   : > { %1491 = vst [vmem:[%s2556_s27 + $0x28] sm:$0xff] %v1784_v29  ;;  %1493 = vst [vmem:[%s2556_s27 + $0x38] sm:$0xff] %v1788_v30 }
 0x1ba   : > { %v1519_v31 = vld [vmem:[%s2556_s27] sm:$0xff]  ;;  %v1523_v33 = vld [vmem:[%s2556_s27 + $0x10] sm:$0xff] }
 0x1bb   : > { %v1521_v32 = vld [vmem:[%s2556_s27 + $0x8] sm:$0xff]  ;;  %v1525_v34 = vld [vmem:[%s2556_s27 + $0x18] sm:$0xff]  ;;  %1520 = vst [vmem:[%s1506_s30] sm:$0xff] %v1519_v31  ;;  %1524 = vst [vmem:[%s1506_s30 + $0x10] sm:$0xff] %v1523_v33 }
 0x1bc   : > { %v1527_v35 = vld [vmem:[%s2556_s27 + $0x20] sm:$0xff]  ;;  %1522 = vst [vmem:[%s1506_s30 + $0x8] sm:$0xff] %v1521_v32  ;;  %1526 = vst [vmem:[%s1506_s30 + $0x18] sm:$0xff] %v1525_v34  ;;  %v1531_v37 = vld [vmem:[%s2556_s27 + $0x30] sm:$0xff] }
 0x1bd   : > { %v1529_v36 = vld [vmem:[%s2556_s27 + $0x28] sm:$0xff]  ;;  %1528 = vst [vmem:[%s1506_s30 + $0x80] sm:$0xff] %v1527_v35  ;;  %v1533_v38 = vld [vmem:[%s2556_s27 + $0x38] sm:$0xff]  ;;  %1532 = vst [vmem:[%s1506_s30 + $0x90] sm:$0xff] %v1531_v37 }
 0x1be   : > { %1530 = vst [vmem:[%s1506_s30 + $0x88] sm:$0xff] %v1529_v36  ;;  %1534 = vst [vmem:[%s1506_s30 + $0x98] sm:$0xff] %v1533_v38 }
 0x1bf PF: > { %s13_s16 = sadd.s32 1, %s2073_s16   ;;  %s2600_s12 = smov %s2061_s13 }
 0x1c0   : > { %p10_p12 = scmp.ge.s32.totalorder %s13_s16, 6   ;;  %s2601_s13 = smov %s2135_s22 }
 0x1c1   : > { %s2602_s14 = smov %s2069_s15  ;;  %s2603_s15 = smov %s2605_s17 }
 0x1c2   :  { %12 = sbr.rel (!%p10_p12) target bundleno = 3 (0x3), region = 119 }

</bundles_post_ra>
